<compile_context>
chip_gen: v6e
topology: v6e:2x2x1
jax: 0.10.0
libtpu: 0.0.40
codegen_flags: <defaults>
</compile_context>

<pallas_src>
import jax
import jax.numpy as jnp
from jax.experimental import pallas as pl
from jax.experimental.pallas import tpu as pltpu

HIDDEN = 1000          # hard-coded in the PyTorch module
HIDDEN_P = 1024        # padded hidden size (multiple of 256)
NOUT_P = 128           # padded output size (lane-dense stores)
TB_MAX = 256           # max batch-tile rows per grid step
BN_EPS = 1e-5


def _classify_kernel(x_ref, w1_ref, b1_ref, w2_ref, b2_ref, w3_ref, b3_ref, o_ref):
    """grid = (head, batch_block): full 3-layer MLP head on one batch tile."""
    h1 = jnp.dot(x_ref[...], w1_ref[...], preferred_element_type=jnp.float32)
    h1 = jnp.maximum(h1 + b1_ref[...], 0.0)                       # Linear+BN+ReLU
    h2 = jnp.dot(h1.astype(jnp.bfloat16), w2_ref[...],
                 preferred_element_type=jnp.float32)
    h2 = jnp.maximum(h2 + b2_ref[...], 0.0)                       # Linear+BN+ReLU
    o_ref[...] = (jnp.dot(h2.astype(jnp.bfloat16), w3_ref[...],
                          preferred_element_type=jnp.float32)
                  + b3_ref[...])                                  # final Linear


def _round_up(n, m):
    return ((n + m - 1) // m) * m


def _head_axis_semantics():
    """CORE_PARALLEL only on 2-TensorCore chips (v7x); PARALLEL elsewhere."""
    try:
        kind = jax.devices()[0].device_kind.lower()
    except Exception:
        kind = ""
    return pltpu.CORE_PARALLEL if "v7" in kind else pltpu.PARALLEL


def classify_forward(x, params, n_gender=2, n_age=5):
    """Equivalent of Classify_.forward (eval mode). One fused pallas_call."""
    B, IN = x.shape
    tb = min(TB_MAX, _round_up(B, 8))
    Bp = _round_up(B, tb)
    nb = Bp // tb

    x_bf = x.astype(jnp.bfloat16)
    if Bp != B:
        x_bf = jnp.pad(x_bf, ((0, Bp - B), (0, 0)))

    flops = 2 * 2 * Bp * (IN * HIDDEN_P + HIDDEN_P * HIDDEN_P + HIDDEN_P * NOUT_P)
    bytes_accessed = (int(x_bf.size) * 2
                      + sum(int(v.size) * int(v.dtype.itemsize)
                            for v in params.values())
                      + 2 * Bp * NOUT_P * 4)
    cost = pl.CostEstimate(flops=flops, transcendentals=0,
                           bytes_accessed=bytes_accessed)

    def run(head_sem):
        grid_spec = pltpu.PrefetchScalarGridSpec(
            num_scalar_prefetch=0,
            grid=(2, nb),                                                   # (head, batch)
            in_specs=[
                pl.BlockSpec((tb, IN), lambda h, b: (b, 0)),                # x tile
                pl.BlockSpec((None, IN, HIDDEN_P), lambda h, b: (h, 0, 0)),       # w1
                pl.BlockSpec((None, 1, HIDDEN_P), lambda h, b: (h, 0, 0)),        # b1
                pl.BlockSpec((None, HIDDEN_P, HIDDEN_P), lambda h, b: (h, 0, 0)), # w2
                pl.BlockSpec((None, 1, HIDDEN_P), lambda h, b: (h, 0, 0)),        # b2
                pl.BlockSpec((None, HIDDEN_P, NOUT_P), lambda h, b: (h, 0, 0)),   # w3
                pl.BlockSpec((None, 1, NOUT_P), lambda h, b: (h, 0, 0)),          # b3
            ],
            out_specs=pl.BlockSpec((None, tb, NOUT_P), lambda h, b: (h, b, 0)),
        )
        return pl.pallas_call(
            _classify_kernel,
            out_shape=jax.ShapeDtypeStruct((2, Bp, NOUT_P), jnp.float32),
            grid_spec=grid_spec,
            cost_estimate=cost,
            compiler_params=pltpu.CompilerParams(
                dimension_semantics=(head_sem, pltpu.ARBITRARY)),
        )(x_bf, params["w1"], params["b1"], params["w2"], params["b2"],
          params["w3"], params["b3"])

    try:
        out = run(_head_axis_semantics())
    except Exception:
        # Safety net: if this toolchain/chip rejects CORE_PARALLEL, fall back
        # to a plain sequential head loop (identical semantics).
        out = run(pltpu.ARBITRARY)

    return {"gender": out[0, :B, :n_gender], "age": out[1, :B, :n_age]}


# ----------------------- deterministic parameter init -----------------------

def _init_linear(key, fan_in, fan_out):
    bound = 1.0 / jnp.sqrt(float(fan_in))
    kw, kb = jax.random.split(key)
    w = jax.random.uniform(kw, (fan_in, fan_out), jnp.float32, -bound, bound)
    b = jax.random.uniform(kb, (1, fan_out), jnp.float32, -bound, bound)
    return w, b


def _init_bn(key, n):
    kg, kb, km, kv = jax.random.split(key, 4)
    gamma = 1.0 + 0.1 * jax.random.normal(kg, (1, n), jnp.float32)
    beta = 0.1 * jax.random.normal(kb, (1, n), jnp.float32)
    mean = 0.1 * jax.random.normal(km, (1, n), jnp.float32)
    var = jnp.abs(1.0 + 0.1 * jax.random.normal(kv, (1, n), jnp.float32))
    return dict(gamma=gamma, beta=beta, mean=mean, var=var)


def init_head(key, input_size, hidden, n_out):
    """Raw (unfolded) parameters of one PyTorch head, with trained-like BN stats."""
    k1, k2, k3, k4, k5 = jax.random.split(key, 5)
    w1, b1 = _init_linear(k1, input_size, hidden)
    w2, b2 = _init_linear(k2, hidden, hidden)
    w3, b3 = _init_linear(k3, hidden, n_out)
    return dict(w1=w1, b1=b1, w2=w2, b2=b2, w3=w3, b3=b3,
                bn1=_init_bn(k4, hidden), bn2=_init_bn(k5, hidden))


def fold_and_pad(p, n_out):
    """Fold eval-mode BN into the Linears, zero-pad, cast weights to bf16."""
    s1 = p["bn1"]["gamma"] / jnp.sqrt(p["bn1"]["var"] + BN_EPS)
    t1 = p["bn1"]["beta"] - p["bn1"]["mean"] * s1
    s2 = p["bn2"]["gamma"] / jnp.sqrt(p["bn2"]["var"] + BN_EPS)
    t2 = p["bn2"]["beta"] - p["bn2"]["mean"] * s2
    w1 = p["w1"] * s1
    b1 = p["b1"] * s1 + t1
    w2 = p["w2"] * s2
    b2 = p["b2"] * s2 + t2
    w3, b3 = p["w3"], p["b3"]

    ph = HIDDEN_P - HIDDEN
    pn = NOUT_P - n_out
    w1 = jnp.pad(w1, ((0, 0), (0, ph)))
    b1 = jnp.pad(b1, ((0, 0), (0, ph)))
    w2 = jnp.pad(w2, ((0, ph), (0, ph)))
    b2 = jnp.pad(b2, ((0, 0), (0, ph)))
    w3 = jnp.pad(w3, ((0, ph), (0, pn)))
    b3 = jnp.pad(b3, ((0, 0), (0, pn)))
    return dict(w1=w1.astype(jnp.bfloat16), b1=b1,
                w2=w2.astype(jnp.bfloat16), b2=b2,
                w3=w3.astype(jnp.bfloat16), b3=b3)


def stack_heads(pg, pa):
    """Stack gender/age params along a leading head axis of size 2."""
    return {k: jnp.stack([pg[k], pa[k]], axis=0) for k in pg}


# ----------------------------- references ------------------------------------

def _head_ref_folded(x, sp, h):
    """Same folded/padded bf16 math as the kernel (tight plumbing check)."""
    xb = x.astype(jnp.bfloat16)
    a = jnp.dot(xb, sp["w1"][h], preferred_element_type=jnp.float32) + sp["b1"][h]
    a = jnp.maximum(a, 0.0)
    a = jnp.dot(a.astype(jnp.bfloat16), sp["w2"][h],
                preferred_element_type=jnp.float32) + sp["b2"][h]
    a = jnp.maximum(a, 0.0)
    return jnp.dot(a.astype(jnp.bfloat16), sp["w3"][h],
                   preferred_element_type=jnp.float32) + sp["b3"][h]


def _head_ref_f32(x, p):
    """Un-fused full-f32 reference of the original PyTorch head (eval mode)."""
    hi = jax.lax.Precision.HIGHEST

    def bn(a, s):
        return (a - s["mean"]) * (s["gamma"] / jnp.sqrt(s["var"] + BN_EPS)) + s["beta"]

    a = jnp.dot(x, p["w1"], precision=hi) + p["b1"]
    a = jnp.maximum(bn(a, p["bn1"]), 0.0)      # Dropout(p=0.3) is identity in eval
    a = jnp.dot(a, p["w2"], precision=hi) + p["b2"]
    a = jnp.maximum(bn(a, p["bn2"]), 0.0)
    return jnp.dot(a, p["w3"], precision=hi) + p["b3"]


if __name__ == "__main__":
    B = 8              # batch (sublane-aligned)
    INPUT_SIZE = 256   # Classify_ default is 2048; kept small for the example
    N_GENDER = 2
    N_AGE = 5

    root = jax.random.PRNGKey(0)
    kx, kg, ka = jax.random.split(root, 3)

    x = jax.random.normal(kx, (B, INPUT_SIZE), jnp.float32)
    raw_gender = init_head(kg, INPUT_SIZE, HIDDEN, N_GENDER)
    raw_age = init_head(ka, INPUT_SIZE, HIDDEN, N_AGE)
    stacked = stack_heads(fold_and_pad(raw_gender, N_GENDER),
                          fold_and_pad(raw_age, N_AGE))

    out = classify_forward(x, stacked, N_GENDER, N_AGE)
    out = jax.tree_util.tree_map(jax.block_until_ready, out)
    assert out["gender"].shape == (B, N_GENDER)
    assert out["age"].shape == (B, N_AGE)

    # 1) Tight plumbing check: identical folded/padded bf16 math as the kernel.
    ref_g_bf = _head_ref_folded(x, stacked, 0)[:, :N_GENDER]
    ref_a_bf = _head_ref_folded(x, stacked, 1)[:, :N_AGE]
    assert jnp.allclose(out["gender"], ref_g_bf, atol=5e-3, rtol=5e-3)
    assert jnp.allclose(out["age"], ref_a_bf, atol=5e-3, rtol=5e-3)

    # 2) Fidelity check vs the un-fused f32 PyTorch-equivalent reference
    #    (bounds BN-fold + bf16 rounding error).
    ref_g_f32 = _head_ref_f32(x, raw_gender)
    ref_a_f32 = _head_ref_f32(x, raw_age)
    assert jnp.allclose(out["gender"], ref_g_f32, atol=3e-2, rtol=3e-2)
    assert jnp.allclose(out["age"], ref_a_f32, atol=3e-2, rtol=3e-2)

    print("KERNEL_OK")
</pallas_src>

<mosaic_0001>
module attributes {stable_mosaic.version = 11 : i64} {
  func.func @_classify_kernel(%arg0: i32, %arg1: i32, %arg2: memref<8x256xbf16, #tpu.memory_space<vmem>>, %arg3: memref<1x256x1024xbf16, #tpu.memory_space<vmem>>, %arg4: memref<1x1x1024xf32, #tpu.memory_space<vmem>>, %arg5: memref<1x1024x1024xbf16, #tpu.memory_space<vmem>>, %arg6: memref<1x1x1024xf32, #tpu.memory_space<vmem>>, %arg7: memref<1x1024x128xbf16, #tpu.memory_space<vmem>>, %arg8: memref<1x1x128xf32, #tpu.memory_space<vmem>>, %arg9: memref<1x8x128xf32, #tpu.memory_space<vmem>>) attributes {dimension_semantics = [#tpu.dimension_semantics<parallel>, #tpu.dimension_semantics<arbitrary>], iteration_bounds = array<i64: 2, 1>, scalar_prefetch = 0 : i64, scratch_operands = 0 : i64, tpu.core_type = #tpu.core_type<tc>, window_params = [{transform_indices = @transform_0, window_bounds = array<i64: 8, 256>}, {transform_indices = @transform_1, window_bounds = array<i64: 1, 256, 1024>}, {transform_indices = @transform_2, window_bounds = array<i64: 1, 1, 1024>}, {transform_indices = @transform_3, window_bounds = array<i64: 1, 1024, 1024>}, {transform_indices = @transform_4, window_bounds = array<i64: 1, 1, 1024>}, {transform_indices = @transform_5, window_bounds = array<i64: 1, 1024, 128>}, {transform_indices = @transform_6, window_bounds = array<i64: 1, 1, 128>}, {transform_indices = @transform_7, window_bounds = array<i64: 1, 8, 128>}]} {
    %c0 = arith.constant 0 : index
    %c0_0 = arith.constant 0 : index
    %0 = vector.load %arg2[%c0, %c0_0] : memref<8x256xbf16, #tpu.memory_space<vmem>>, vector<8x256xbf16>
    %c0_1 = arith.constant 0 : index
    %c0_2 = arith.constant 0 : index
    %c0_3 = arith.constant 0 : index
    %1 = vector.load %arg3[%c0_1, %c0_2, %c0_3] : memref<1x256x1024xbf16, #tpu.memory_space<vmem>>, vector<1x256x1024xbf16>
    %2 = vector.shape_cast %1 : vector<1x256x1024xbf16> to vector<256x1024xbf16>
    %cst = arith.constant dense<0.000000e+00> : vector<8x1024xf32>
    %3 = tpu.matmul %0, %2, %cst {dimension_numbers = #tpu.dot_dimension_numbers<[1], [0], [0], [1], [0, 0, 1, 1], [], []>} : vector<8x256xbf16>, vector<256x1024xbf16>, vector<8x1024xf32> -> vector<8x1024xf32>
    %c0_4 = arith.constant 0 : index
    %c0_5 = arith.constant 0 : index
    %c0_6 = arith.constant 0 : index
    %4 = vector.load %arg4[%c0_4, %c0_5, %c0_6] : memref<1x1x1024xf32, #tpu.memory_space<vmem>>, vector<1x1x1024xf32>
    %5 = vector.shape_cast %4 : vector<1x1x1024xf32> to vector<1x1024xf32>
    %6 = vector.broadcast %5 : vector<1x1024xf32> to vector<8x1024xf32>
    %7 = arith.addf %3, %6 : vector<8x1024xf32>
    %cst_7 = arith.constant 0.000000e+00 : f32
    %8 = vector.broadcast %cst_7 : f32 to vector<8x1024xf32>
    %9 = arith.maximumf %7, %8 : vector<8x1024xf32>
    %10 = arith.truncf %9 : vector<8x1024xf32> to vector<8x1024xbf16>
    %c0_8 = arith.constant 0 : index
    %c0_9 = arith.constant 0 : index
    %c0_10 = arith.constant 0 : index
    %11 = vector.load %arg5[%c0_8, %c0_9, %c0_10] : memref<1x1024x1024xbf16, #tpu.memory_space<vmem>>, vector<1x1024x1024xbf16>
    %12 = vector.shape_cast %11 : vector<1x1024x1024xbf16> to vector<1024x1024xbf16>
    %cst_11 = arith.constant dense<0.000000e+00> : vector<8x1024xf32>
    %13 = tpu.matmul %10, %12, %cst_11 {dimension_numbers = #tpu.dot_dimension_numbers<[1], [0], [0], [1], [0, 0, 1, 1], [], []>} : vector<8x1024xbf16>, vector<1024x1024xbf16>, vector<8x1024xf32> -> vector<8x1024xf32>
    %c0_12 = arith.constant 0 : index
    %c0_13 = arith.constant 0 : index
    %c0_14 = arith.constant 0 : index
    %14 = vector.load %arg6[%c0_12, %c0_13, %c0_14] : memref<1x1x1024xf32, #tpu.memory_space<vmem>>, vector<1x1x1024xf32>
    %15 = vector.shape_cast %14 : vector<1x1x1024xf32> to vector<1x1024xf32>
    %16 = vector.broadcast %15 : vector<1x1024xf32> to vector<8x1024xf32>
    %17 = arith.addf %13, %16 : vector<8x1024xf32>
    %cst_15 = arith.constant 0.000000e+00 : f32
    %18 = vector.broadcast %cst_15 : f32 to vector<8x1024xf32>
    %19 = arith.maximumf %17, %18 : vector<8x1024xf32>
    %20 = arith.truncf %19 : vector<8x1024xf32> to vector<8x1024xbf16>
    %c0_16 = arith.constant 0 : index
    %c0_17 = arith.constant 0 : index
    %c0_18 = arith.constant 0 : index
    %21 = vector.load %arg7[%c0_16, %c0_17, %c0_18] : memref<1x1024x128xbf16, #tpu.memory_space<vmem>>, vector<1x1024x128xbf16>
    %22 = vector.shape_cast %21 : vector<1x1024x128xbf16> to vector<1024x128xbf16>
    %cst_19 = arith.constant dense<0.000000e+00> : vector<8x128xf32>
    %23 = tpu.matmul %20, %22, %cst_19 {dimension_numbers = #tpu.dot_dimension_numbers<[1], [0], [0], [1], [0, 0, 1, 1], [], []>} : vector<8x1024xbf16>, vector<1024x128xbf16>, vector<8x128xf32> -> vector<8x128xf32>
    %c0_20 = arith.constant 0 : index
    %c0_21 = arith.constant 0 : index
    %c0_22 = arith.constant 0 : index
    %24 = vector.load %arg8[%c0_20, %c0_21, %c0_22] : memref<1x1x128xf32, #tpu.memory_space<vmem>>, vector<1x1x128xf32>
    %25 = vector.shape_cast %24 : vector<1x1x128xf32> to vector<1x128xf32>
    %26 = vector.broadcast %25 : vector<1x128xf32> to vector<8x128xf32>
    %27 = arith.addf %23, %26 : vector<8x128xf32>
    %c0_23 = arith.constant 0 : index
    %c0_24 = arith.constant 0 : index
    %c0_25 = arith.constant 0 : index
    %28 = vector.load %arg9[%c0_23, %c0_24, %c0_25] : memref<1x8x128xf32, #tpu.memory_space<vmem>>, vector<1x8x128xf32>
    %29 = vector.shape_cast %28 : vector<1x8x128xf32> to vector<8x128xf32>
    %30 = vector.shape_cast %27 : vector<8x128xf32> to vector<1x8x128xf32>
    tpu.vector_store %arg9[%c0_23, %c0_24, %c0_25], %30 {strides = array<i32>} : memref<1x8x128xf32, #tpu.memory_space<vmem>>, vector<1x8x128xf32>,
    return
  }
  func.func @transform_0(%arg0: i32, %arg1: i32) -> (i32, i32) {
    %c0_i32 = arith.constant 0 : i32
    %c0_i32_0 = arith.constant 0 : i32
    return %arg1, %c0_i32 : i32, i32
  }
  func.func @transform_1(%arg0: i32, %arg1: i32) -> (i32, i32, i32) {
    %c0_i32 = arith.constant 0 : i32
    %c0_i32_0 = arith.constant 0 : i32
    %c0_i32_1 = arith.constant 0 : i32
    return %arg0, %c0_i32, %c0_i32_0 : i32, i32, i32
  }
  func.func @transform_2(%arg0: i32, %arg1: i32) -> (i32, i32, i32) {
    %c0_i32 = arith.constant 0 : i32
    %c0_i32_0 = arith.constant 0 : i32
    %c0_i32_1 = arith.constant 0 : i32
    return %arg0, %c0_i32, %c0_i32_0 : i32, i32, i32
  }
  func.func @transform_3(%arg0: i32, %arg1: i32) -> (i32, i32, i32) {
    %c0_i32 = arith.constant 0 : i32
    %c0_i32_0 = arith.constant 0 : i32
    %c0_i32_1 = arith.constant 0 : i32
    return %arg0, %c0_i32, %c0_i32_0 : i32, i32, i32
  }
  func.func @transform_4(%arg0: i32, %arg1: i32) -> (i32, i32, i32) {
    %c0_i32 = arith.constant 0 : i32
    %c0_i32_0 = arith.constant 0 : i32
    %c0_i32_1 = arith.constant 0 : i32
    return %arg0, %c0_i32, %c0_i32_0 : i32, i32, i32
  }
  func.func @transform_5(%arg0: i32, %arg1: i32) -> (i32, i32, i32) {
    %c0_i32 = arith.constant 0 : i32
    %c0_i32_0 = arith.constant 0 : i32
    %c0_i32_1 = arith.constant 0 : i32
    return %arg0, %c0_i32, %c0_i32_0 : i32, i32, i32
  }
  func.func @transform_6(%arg0: i32, %arg1: i32) -> (i32, i32, i32) {
    %c0_i32 = arith.constant 0 : i32
    %c0_i32_0 = arith.constant 0 : i32
    %c0_i32_1 = arith.constant 0 : i32
    return %arg0, %c0_i32, %c0_i32_0 : i32, i32, i32
  }
  func.func @transform_7(%arg0: i32, %arg1: i32) -> (i32, i32, i32) {
    %c0_i32 = arith.constant 0 : i32
    %c0_i32_0 = arith.constant 0 : i32
    return %arg0, %arg1, %c0_i32 : i32, i32, i32
  }
}

module attributes {stable_mosaic.version = 11 : i64} {
  func.func @_classify_kernel(%arg0: i32, %arg1: i32, %arg2: memref<8x256xbf16, #tpu.memory_space<vmem>>, %arg3: memref<1x256x1024xbf16, #tpu.memory_space<vmem>>, %arg4: memref<1x1x1024xf32, #tpu.memory_space<vmem>>, %arg5: memref<1x1024x1024xbf16, #tpu.memory_space<vmem>>, %arg6: memref<1x1x1024xf32, #tpu.memory_space<vmem>>, %arg7: memref<1x1024x128xbf16, #tpu.memory_space<vmem>>, %arg8: memref<1x1x128xf32, #tpu.memory_space<vmem>>, %arg9: memref<1x8x128xf32, #tpu.memory_space<vmem>>) attributes {dimension_semantics = [#tpu.dimension_semantics<arbitrary>, #tpu.dimension_semantics<arbitrary>], iteration_bounds = array<i64: 2, 1>, scalar_prefetch = 0 : i64, scratch_operands = 0 : i64, tpu.core_type = #tpu.core_type<tc>, window_params = [{transform_indices = @transform_0, window_bounds = array<i64: 8, 256>}, {transform_indices = @transform_1, window_bounds = array<i64: 1, 256, 1024>}, {transform_indices = @transform_2, window_bounds = array<i64: 1, 1, 1024>}, {transform_indices = @transform_3, window_bounds = array<i64: 1, 1024, 1024>}, {transform_indices = @transform_4, window_bounds = array<i64: 1, 1, 1024>}, {transform_indices = @transform_5, window_bounds = array<i64: 1, 1024, 128>}, {transform_indices = @transform_6, window_bounds = array<i64: 1, 1, 128>}, {transform_indices = @transform_7, window_bounds = array<i64: 1, 8, 128>}]} {
    %c0 = arith.constant 0 : index
    %c0_0 = arith.constant 0 : index
    %0 = vector.load %arg2[%c0, %c0_0] : memref<8x256xbf16, #tpu.memory_space<vmem>>, vector<8x256xbf16>
    %c0_1 = arith.constant 0 : index
    %c0_2 = arith.constant 0 : index
    %c0_3 = arith.constant 0 : index
    %1 = vector.load %arg3[%c0_1, %c0_2, %c0_3] : memref<1x256x1024xbf16, #tpu.memory_space<vmem>>, vector<1x256x1024xbf16>
    %2 = vector.shape_cast %1 : vector<1x256x1024xbf16> to vector<256x1024xbf16>
    %cst = arith.constant dense<0.000000e+00> : vector<8x1024xf32>
    %3 = tpu.matmul %0, %2, %cst {dimension_numbers = #tpu.dot_dimension_numbers<[1], [0], [0], [1], [0, 0, 1, 1], [], []>} : vector<8x256xbf16>, vector<256x1024xbf16>, vector<8x1024xf32> -> vector<8x1024xf32>
    %c0_4 = arith.constant 0 : index
    %c0_5 = arith.constant 0 : index
    %c0_6 = arith.constant 0 : index
    %4 = vector.load %arg4[%c0_4, %c0_5, %c0_6] : memref<1x1x1024xf32, #tpu.memory_space<vmem>>, vector<1x1x1024xf32>
    %5 = vector.shape_cast %4 : vector<1x1x1024xf32> to vector<1x1024xf32>
    %6 = vector.broadcast %5 : vector<1x1024xf32> to vector<8x1024xf32>
    %7 = arith.addf %3, %6 : vector<8x1024xf32>
    %cst_7 = arith.constant 0.000000e+00 : f32
    %8 = vector.broadcast %cst_7 : f32 to vector<8x1024xf32>
    %9 = arith.maximumf %7, %8 : vector<8x1024xf32>
    %10 = arith.truncf %9 : vector<8x1024xf32> to vector<8x1024xbf16>
    %c0_8 = arith.constant 0 : index
    %c0_9 = arith.constant 0 : index
    %c0_10 = arith.constant 0 : index
    %11 = vector.load %arg5[%c0_8, %c0_9, %c0_10] : memref<1x1024x1024xbf16, #tpu.memory_space<vmem>>, vector<1x1024x1024xbf16>
    %12 = vector.shape_cast %11 : vector<1x1024x1024xbf16> to vector<1024x1024xbf16>
    %cst_11 = arith.constant dense<0.000000e+00> : vector<8x1024xf32>
    %13 = tpu.matmul %10, %12, %cst_11 {dimension_numbers = #tpu.dot_dimension_numbers<[1], [0], [0], [1], [0, 0, 1, 1], [], []>} : vector<8x1024xbf16>, vector<1024x1024xbf16>, vector<8x1024xf32> -> vector<8x1024xf32>
    %c0_12 = arith.constant 0 : index
    %c0_13 = arith.constant 0 : index
    %c0_14 = arith.constant 0 : index
    %14 = vector.load %arg6[%c0_12, %c0_13, %c0_14] : memref<1x1x1024xf32, #tpu.memory_space<vmem>>, vector<1x1x1024xf32>
    %15 = vector.shape_cast %14 : vector<1x1x1024xf32> to vector<1x1024xf32>
    %16 = vector.broadcast %15 : vector<1x1024xf32> to vector<8x1024xf32>
    %17 = arith.addf %13, %16 : vector<8x1024xf32>
    %cst_15 = arith.constant 0.000000e+00 : f32
    %18 = vector.broadcast %cst_15 : f32 to vector<8x1024xf32>
    %19 = arith.maximumf %17, %18 : vector<8x1024xf32>
    %20 = arith.truncf %19 : vector<8x1024xf32> to vector<8x1024xbf16>
    %c0_16 = arith.constant 0 : index
    %c0_17 = arith.constant 0 : index
    %c0_18 = arith.constant 0 : index
    %21 = vector.load %arg7[%c0_16, %c0_17, %c0_18] : memref<1x1024x128xbf16, #tpu.memory_space<vmem>>, vector<1x1024x128xbf16>
    %22 = vector.shape_cast %21 : vector<1x1024x128xbf16> to vector<1024x128xbf16>
    %cst_19 = arith.constant dense<0.000000e+00> : vector<8x128xf32>
    %23 = tpu.matmul %20, %22, %cst_19 {dimension_numbers = #tpu.dot_dimension_numbers<[1], [0], [0], [1], [0, 0, 1, 1], [], []>} : vector<8x1024xbf16>, vector<1024x128xbf16>, vector<8x128xf32> -> vector<8x128xf32>
    %c0_20 = arith.constant 0 : index
    %c0_21 = arith.constant 0 : index
    %c0_22 = arith.constant 0 : index
    %24 = vector.load %arg8[%c0_20, %c0_21, %c0_22] : memref<1x1x128xf32, #tpu.memory_space<vmem>>, vector<1x1x128xf32>
    %25 = vector.shape_cast %24 : vector<1x1x128xf32> to vector<1x128xf32>
    %26 = vector.broadcast %25 : vector<1x128xf32> to vector<8x128xf32>
    %27 = arith.addf %23, %26 : vector<8x128xf32>
    %c0_23 = arith.constant 0 : index
    %c0_24 = arith.constant 0 : index
    %c0_25 = arith.constant 0 : index
    %28 = vector.load %arg9[%c0_23, %c0_24, %c0_25] : memref<1x8x128xf32, #tpu.memory_space<vmem>>, vector<1x8x128xf32>
    %29 = vector.shape_cast %28 : vector<1x8x128xf32> to vector<8x128xf32>
    %30 = vector.shape_cast %27 : vector<8x128xf32> to vector<1x8x128xf32>
    tpu.vector_store %arg9[%c0_23, %c0_24, %c0_25], %30 {strides = array<i32>} : memref<1x8x128xf32, #tpu.memory_space<vmem>>, vector<1x8x128xf32>,
    return
  }
  func.func @transform_0(%arg0: i32, %arg1: i32) -> (i32, i32) {
    %c0_i32 = arith.constant 0 : i32
    %c0_i32_0 = arith.constant 0 : i32
    return %arg1, %c0_i32 : i32, i32
  }
  func.func @transform_1(%arg0: i32, %arg1: i32) -> (i32, i32, i32) {
    %c0_i32 = arith.constant 0 : i32
    %c0_i32_0 = arith.constant 0 : i32
    %c0_i32_1 = arith.constant 0 : i32
    return %arg0, %c0_i32, %c0_i32_0 : i32, i32, i32
  }
  func.func @transform_2(%arg0: i32, %arg1: i32) -> (i32, i32, i32) {
    %c0_i32 = arith.constant 0 : i32
    %c0_i32_0 = arith.constant 0 : i32
    %c0_i32_1 = arith.constant 0 : i32
    return %arg0, %c0_i32, %c0_i32_0 : i32, i32, i32
  }
  func.func @transform_3(%arg0: i32, %arg1: i32) -> (i32, i32, i32) {
    %c0_i32 = arith.constant 0 : i32
    %c0_i32_0 = arith.constant 0 : i32
    %c0_i32_1 = arith.constant 0 : i32
    return %arg0, %c0_i32, %c0_i32_0 : i32, i32, i32
  }
  func.func @transform_4(%arg0: i32, %arg1: i32) -> (i32, i32, i32) {
    %c0_i32 = arith.constant 0 : i32
    %c0_i32_0 = arith.constant 0 : i32
    %c0_i32_1 = arith.constant 0 : i32
    return %arg0, %c0_i32, %c0_i32_0 : i32, i32, i32
  }
  func.func @transform_5(%arg0: i32, %arg1: i32) -> (i32, i32, i32) {
    %c0_i32 = arith.constant 0 : i32
    %c0_i32_0 = arith.constant 0 : i32
    %c0_i32_1 = arith.constant 0 : i32
    return %arg0, %c0_i32, %c0_i32_0 : i32, i32, i32
  }
  func.func @transform_6(%arg0: i32, %arg1: i32) -> (i32, i32, i32) {
    %c0_i32 = arith.constant 0 : i32
    %c0_i32_0 = arith.constant 0 : i32
    %c0_i32_1 = arith.constant 0 : i32
    return %arg0, %c0_i32, %c0_i32_0 : i32, i32, i32
  }
  func.func @transform_7(%arg0: i32, %arg1: i32) -> (i32, i32, i32) {
    %c0_i32 = arith.constant 0 : i32
    %c0_i32_0 = arith.constant 0 : i32
    return %arg0, %arg1, %c0_i32 : i32, i32, i32
  }
}

</mosaic_0001>

<bundles_post_ra>
// kernel: tpu_custom_call.1
= control target key start
LH: loop header
LB: loop body
LE: loop exit
PB: predicated region body
PF: predicated region fallthrough
CT: control target
= control target key end

     0   :  { %s8693_s0 = inlined_call_operand.hbm [shape: bf16[8,256], index: 0, kind: input, shape index: {}]   ;;  %s8694_s1 = inlined_call_operand.hbm [shape: bf16[2,256,1024], index: 1, kind: input, shape index: {}]   ;;  %s8695_s2 = inlined_call_operand.hbm [shape: f32[2,1,1024], index: 2, kind: input, shape index: {}]   ;;  %s8696_s3 = inlined_call_operand.hbm [shape: bf16[2,1024,1024], index: 3, kind: input, shape index: {}]   ;;  %s8697_s4 = inlined_call_operand.hbm [shape: f32[2,1,1024], index: 4, kind: input, shape index: {}]   ;;  %s8698_s5 = inlined_call_operand.hbm [shape: bf16[2,1024,128], index: 5, kind: input, shape index: {}]   ;;  %s8699_s6 = inlined_call_operand.hbm [shape: f32[2,1,128], index: 6, kind: input, shape index: {}]   ;;  %s8700_s7 = inlined_call_operand.hbm [shape: f32[2,8,128], index: 7, kind: output, shape index: {}]  }
   0x1   :  { %8711 = sst [smem:[#allocation23_spill]] %s8693_s0 }
   0x2   :  { %8712 = sst [smem:[#allocation24_spill]] %s8694_s1 }
   0x3   :  { %8713 = sst [smem:[#allocation25_spill]] %s8695_s2 }
   0x4   :  { %8714 = sst [smem:[#allocation26_spill]] %s8699_s6 }
   0x5   :  { %8715 = sst [smem:[#allocation27_spill]] %s8700_s7 }
   0x6   :  { %12 = vsyncpa [#allocation3], 0 }
   0x7   :  { %13 = vsyncpa [#allocation6], 0 }
   0x8   :  { %15 = vsyncpa [#allocation6 + $0x1], 0 }
   0x9   :  { %16 = vsyncpa [#allocation9], 0 }
   0xa   :  { %18 = vsyncpa [#allocation9 + $0x1], 0 }
   0xb   :  { %19 = vsyncpa [#allocation12], 0 }
   0xc   :  { %21 = vsyncpa [#allocation12 + $0x1], 0 }
   0xd   :  { %22 = vsyncpa [#allocation4], 0 }
   0xe   :  { %24 = vsyncpa [#allocation4 + $0x1], 0  ;;  %s7531_s24 = smov 0   ;;  %s7533_s25 = smov 0  }
   0xf   :  { %s7535_s26 = smov 0   ;;  %s7537_s27 = smov 0  }
  0x10   :  { %s7539_s28 = smov 0   ;;  %s7541_s29 = smov 0  }
  0x11 LB: > { %8716 = sst [smem:[#allocation20_spill]] %s7469_s27  ;;  %s42_s30 = sadd.s32 1, %s7473_s28  ;;  %s7477_s29 = sphi %s7541_s29, %s30_s29   ;;  %s7473_s28 = sphi %s7539_s28, %s8749_s28   ;;  %s7469_s27 = sphi %s7537_s27, %s8748_s27   ;;  %s7465_s26 = sphi %s7535_s26, %s8747_s26   ;;  %s7461_s25 = sphi %s7533_s25, %s8746_s25   ;;  %s7457_s24 = sphi %s7531_s24, %s8745_s24  }
  0x12   : > { %s75_s8 = sadd.s32 1, %s7465_s26  ;;  %p44_p0 = scmp.ge.s32.totalorder %s42_s30, 2 }
  0x13   : > { %p82_p1 = scmp.ne.s32.totalorder %s7465_s26, %s7461_s25  ;;  %p83_p2 = scmp.eq.s32.totalorder %s7477_s29, 0 }
  0x14   : > { %s8751_s30 = smov (%p44_p0, %s42_s30), 0  ;;  %p7068_p5 = scmp.lt.s32.totalorder %s7477_s29, 2 }
  0x15   : > { %8717 = sst [smem:[#allocation21_spill]] %s8751_s30  ;;  %p84_p4 = por %p83_p2, %p82_p1 }
  0x16   : > { %s72_s9 = ssub.s32 %s7473_s28, %s8751_s30  ;;  %s7576_s10 = sand.u32 1, %s7477_s29  }
  0x17   : > { %p73_p6 = scmp.eq.s32.totalorder %s72_s9, 0  ;;  %s7579_s11 = sand.u32 1, %s7465_s26  }
  0x18   : > { %s6929_s12 = sshll.u32 %s7473_s28, 14  ;;  %s6194_s14 = sshll.u32 %s7579_s11, 10 }
  0x19   : > { %s7583_s13 = scalar_select %p73_p6, %s7465_s26, %s75_s8  }
  0x1a   : > { %s8719_s1 = sld [smem:[#allocation24_spill]]  ;;  %p7589_p7 = pnand %p7068_p5, %p84_p4 }
  0x1b   : > { %8718 = sst [smem:[#allocation22_spill]] %s7583_s13  ;;  %s288_s19 = scalar_lea.vmem [#allocation5], %s6194_s14 }
  0x1c   : > { %s295_s20 = sshll.u32 %s288_s19, 4  ;;  %s8703_s21 = scalar_lea.sflag [#allocation6], %s7576_s10  ;;  %s296_s20 = int_to_ptr.vmem [resolvable:$true] %s295_s20 }
  0x1d   : > { %p7596_p8 = pneg %p7589_p7  ;;  %s7204_s23 = scalar_lea.vmem %s296_s20, 16384 }
  0x1e   : > { %p7205_p9 = scmp.ne.s32.totalorder %s296_s20, %s7204_s23  ;;  %s7479_s8 = smov [#allocation5]  }
  0x1f   : > { %s7209_s9 = sshll.u32 %s7479_s8, 4  ;;  %s7210_s9 = int_to_ptr.vmem [resolvable:$false] %s7209_s9 }
  0x20   : > { %s294_s17 = scalar_lea.hbm %s8719_s1, %s6929_s12  ;;  %p7207_p10 = pnand %p7205_p9, %p7596_p8 }
  0x21   : > { %s7211_s12 = scalar_lea.vmem %s7210_s9, 32768  ;;  %p7212_p12 = scmp.lt.s32.totalorder %s296_s20, %s7210_s9 }
  0x22   : > { %p7208_p11 = pneg %p7207_p10  ;;  %p7213_p13 = scmp.lt.s32.totalorder %s7211_s12, %s7204_s23 }
  0x24   : > { %p7214_p0 = por %p7213_p13, %p7212_p12 }
  0x26   : > { %p7215_p2 = pnand %p7214_p0, %p7208_p11 }
  0x28   : > { %7218 = shalt.err (!%p7215_p2)
}
  0x29   : > { %s7480_s14 = smov 512   ;;  %s7481_s15 = smov 32  }
  0x2a   : > { %7047 = dma.hbm_to_vmem [thread:$0]  (!%p7589_p7), %s294_s17, 16384, %s296_s20, %s8703_s21, %s7480_s14, %s7480_s14, %s7481_s15  }
  0x2b   : > { %s6200_s16 = sshll.u32 %s7579_s11, 12  ;;  %s6931_s19 = sshll.u32 %s7473_s28, 16 }
  0x2c   : > { %s334_s23 = scalar_lea.hbm %s8696_s3, %s6931_s19  ;;  %s328_s12 = scalar_lea.vmem [#allocation8], %s6200_s16 }
  0x2d   : > { %s335_s1 = sshll.u32 %s328_s12, 4  ;;  %s6206_s30 = sshll.u32 %s7579_s11, 9  ;;  %s336_s1 = int_to_ptr.vmem [resolvable:$true] %s335_s1 }
  0x2e   : > { %s8705_s13 = scalar_lea.sflag [#allocation9], %s7576_s10  ;;  %s7232_s7 = scalar_lea.vmem %s336_s1, 65536 }
  0x2f   : > { %p7233_p4 = scmp.ne.s32.totalorder %s336_s1, %s7232_s7  ;;  %s7482_s27 = smov [#allocation8]  }
  0x30   : > { %s7237_s6 = sshll.u32 %s7482_s27, 4  ;;  %s7238_s6 = int_to_ptr.vmem [resolvable:$false] %s7237_s6 }
  0x31   : > { %p7235_p5 = pnand %p7233_p4, %p7596_p8  ;;  %s7239_s17 = scalar_lea.vmem %s7238_s6, 131072 }
  0x32   : > { %p7240_p9 = scmp.lt.s32.totalorder %s336_s1, %s7238_s6  ;;  %p7241_p10 = scmp.lt.s32.totalorder %s7239_s17, %s7232_s7 }
  0x33   : > { %p7236_p6 = pneg %p7235_p5 }
  0x34   : > { %p7242_p11 = por %p7241_p10, %p7240_p9 }
  0x36   : > { %p7243_p12 = pnand %p7242_p11, %p7236_p6 }
  0x38   : > { %7246 = shalt.err (!%p7243_p12)
}
  0x39   : > { %7053 = dma.hbm_to_vmem [thread:$0]  (!%p7589_p7), %s334_s23, 65536, %s336_s1, %s8705_s13, %s7480_s14, %s7480_s14, %s7481_s15  }
  0x3a   : > { %s6933_s20 = sshll.u32 %s7473_s28, 13  ;;  %s368_s8 = scalar_lea.vmem [#allocation11], %s6206_s30 }
  0x3b   : > { %s374_s27 = scalar_lea.hbm %s8698_s5, %s6933_s20  ;;  %s375_s9 = sshll.u32 %s368_s8, 4  ;;  %s376_s9 = int_to_ptr.vmem [resolvable:$true] %s375_s9 }
  0x3c   : > { %s8704_s6 = scalar_lea.sflag [#allocation12], %s7576_s10  ;;  %s7260_s7 = scalar_lea.vmem %s376_s9, 8192 }
  0x3d   : > { %p7261_p13 = scmp.ne.s32.totalorder %s376_s9, %s7260_s7  ;;  %s7483_s12 = smov [#allocation11]  }
  0x3e   : > { %s7265_s17 = sshll.u32 %s7483_s12, 4  ;;  %s7266_s17 = int_to_ptr.vmem [resolvable:$false] %s7265_s17 }
  0x3f   : > { %p7263_p0 = pnand %p7261_p13, %p7596_p8  ;;  %s7267_s21 = scalar_lea.vmem %s7266_s17, 16384 }
  0x40   : > { %p7268_p4 = scmp.lt.s32.totalorder %s376_s9, %s7266_s17  ;;  %p7269_p5 = scmp.lt.s32.totalorder %s7267_s21, %s7260_s7 }
  0x41   : > { %p7264_p2 = pneg %p7263_p0 }
  0x42   : > { %p7270_p6 = por %p7269_p5, %p7268_p4 }
  0x44   : > { %p7271_p9 = pnand %p7270_p6, %p7264_p2 }
  0x46   : > { %7274 = shalt.err (!%p7271_p9)
}
  0x47   : > { %s7484_s1 = smov 64   ;;  %s7485_s30 = smov 4  }
  0x48   : > { %7059 = dma.hbm_to_vmem [thread:$0]  (!%p7589_p7), %s374_s27, 8192, %s376_s9, %s8704_s6, %s7484_s1, %s7484_s1, %s7485_s30  }
  0x49   : > { %s7631_s21 = sadd.s32 4294967295, %s7477_s29   ;;  %s6190_s14 = sadd.s32 4294967294, %s7477_s29  }
  0x4a   : > { %p88_p10 = scmp.ne.s32.totalorder %s7461_s25, %s7457_s24  ;;  %p8707_p11 = scmp.eq.s32.totalorder %s7631_s21, 0 }
  0x4b   : > { %p244_p12 = scmp.eq.s32.totalorder %s7631_s21, 1  ;;  %p250_p13 = scmp.eq.s32.totalorder %s6190_s14, 1 }
  0x4c   : > { %p6191_p0 = scmp.ge.s32.totalorder %s7477_s29, 1  ;;  %p7641_p2 = por %p8707_p11, %p88_p10 }
  0x4d   : > { %p7648_p4 = por %p244_p12, %p82_p1  ;;  %p7652_p5 = por %p250_p13, %p88_p10 }
  0x4e   : > { %s8722_s15 = scalar_select %p7641_p2, 1, 0 }
  0x4f   : > { %s8723_s23 = scalar_select %p7648_p4, 1, 0 }
  0x50   : > { %s8724_s20 = scalar_select %p7652_p5, 1, 0 }
  0x51   : > { %p257_p6 = scmp.lt.s32.totalorder %s7477_s29, 3  ;;  %s7486_s19 = smov [#allocation2]  }
  0x52   : > { %s273_s27 = sshll.u32 %s7486_s19, 4  ;;  %s8706_s8 = sshll.u32 %s7579_s11, 3  ;;  %s274_s27 = int_to_ptr.vmem [resolvable:$true] %s273_s27 }
  0x53   : > { %p7657_p9 = pnand %p6191_p0, %p257_p6  ;;  %s6930_s9 = sshll.u32 %s7473_s28, 7 }
  0x54   : > { %s309_s7 = scalar_lea.vmem [#allocation7], %s8706_s8  ;;  %s8727_s2 = sld [smem:[#allocation25_spill]] }
  0x55   : > { %s8725_s16 = scalar_select %p7657_p9, 1, 0 }
  0x56   : > { %p7040_p3 = pneg %p7657_p9  ;;  %s317_s12 = sshll.u32 %s309_s7, 4  ;;  %s318_s12 = int_to_ptr.vmem [resolvable:$true] %s317_s12 }
  0x57   : > { %s7679_s13 = scalar_lea.hbm %s8697_s4, %s6930_s9  ;;  %s7286_s8 = scalar_lea.vmem %s274_s27, 128 }
  0x58   : > { %p7669_p1 = pnand %p7040_p3, %p8707_p11  ;;  %p7287_p12 = scmp.ne.s32.totalorder %s274_s27, %s7286_s8 }
  0x59   : > { %p7294_p0 = scmp.lt.s32.totalorder %s274_s27, %s274_s27  ;;  %p7295_p6 = scmp.lt.s32.totalorder %s7286_s8, %s7286_s8 }
  0x5a   : > { %s315_s14 = scalar_lea.hbm %s8727_s2, %s6930_s9  ;;  %p7277_p10 = pneg %p7669_p1 }
  0x5b   : > { %p7296_p11 = por %p7295_p6, %p7294_p0 }
  0x5c   : > { %p7289_p13 = pnand %p7287_p12, %p7277_p10 }
  0x5e   : > { %p7290_p3 = pneg %p7289_p13 }
  0x60   : > { %p7297_p5 = pnand %p7296_p11, %p7290_p3 }
  0x62   : > { %7300 = shalt.err (!%p7297_p5)
}
  0x63   : > { %s8728_s0 = sld [smem:[#allocation23_spill]]  ;;  %s7314_s6 = scalar_lea.vmem %s318_s12, 128 }
  0x64   : > { %p7315_p4 = scmp.ne.s32.totalorder %s318_s12, %s7314_s6  ;;  %s7487_s9 = smov [#allocation7]  }
  0x65   : > { %s7319_s30 = sshll.u32 %s7487_s9, 4  ;;  %s7320_s30 = int_to_ptr.vmem [resolvable:$false] %s7319_s30 }
  0x66   : > { %p7317_p2 = pnand %p7315_p4, %p7596_p8  ;;  %s7321_s19 = scalar_lea.vmem %s7320_s30, 256 }
  0x67   : > { %p7322_p10 = scmp.lt.s32.totalorder %s318_s12, %s7320_s30  ;;  %p7323_p12 = scmp.lt.s32.totalorder %s7321_s19, %s7314_s6 }
  0x68   : > { %p7318_p9 = pneg %p7317_p2 }
  0x69   : > { %7043 = dma.hbm_to_vmem [thread:$0]  (!%p7669_p1), %s8728_s0, 128, %s274_s27, [#allocation3]  }
  0x6a   : > { %p7324_p11 = por %p7323_p12, %p7322_p10 }
  0x6c   : > { %p7325_p5 = pnand %p7324_p11, %p7318_p9 }
  0x6e   : > { %7328 = shalt.err (!%p7325_p5)
}
  0x6f   : > { %s8729_s8 = scalar_lea.sflag [#allocation6], %s7576_s10  ;;  %s8730_s27 = sshll.u32 %s7579_s11, 3 }
  0x70   : > { %7050 = dma.hbm_to_vmem [thread:$0]  (!%p7589_p7), %s315_s14, 128, %s318_s12, %s8729_s8  }
  0x71   : > { %s349_s17 = scalar_lea.vmem [#allocation10], %s8730_s27  ;;  %s6209_s1 = sshll.u32 %s7473_s28, 4 }
  0x72   : > { %s357_s7 = sshll.u32 %s349_s17, 4  ;;  %s7488_s6 = smov [#allocation10]   ;;  %s358_s7 = int_to_ptr.vmem [resolvable:$true] %s357_s7 }
  0x73   : > { %s7342_s9 = scalar_lea.vmem %s358_s7, 128  ;;  %s7347_s30 = sshll.u32 %s7488_s6, 4  ;;  %s7348_s30 = int_to_ptr.vmem [resolvable:$false] %s7347_s30 }
  0x74   : > { %p7343_p2 = scmp.ne.s32.totalorder %s358_s7, %s7342_s9  ;;  %s7349_s19 = scalar_lea.vmem %s7348_s30, 256 }
  0x75   : > { %p7350_p9 = scmp.lt.s32.totalorder %s358_s7, %s7348_s30  ;;  %p7351_p13 = scmp.lt.s32.totalorder %s7349_s19, %s7342_s9 }
  0x76   : > { %p7345_p4 = pnand %p7343_p2, %p7596_p8 }
  0x77   : > { %p7352_p3 = por %p7351_p13, %p7350_p9 }
  0x78   : > { %p7346_p1 = pneg %p7345_p4 }
  0x7a   : > { %p7353_p0 = pnand %p7352_p3, %p7346_p1 }
  0x7c   : > { %7356 = shalt.err (!%p7353_p0)
}
  0x7d   : > { %s8731_s12 = scalar_lea.sflag [#allocation9], %s7576_s10  ;;  %s8732_s27 = sld [smem:[#allocation26_spill]] }
  0x7e   : > { %7056 = dma.hbm_to_vmem [thread:$0]  (!%p7589_p7), %s7679_s13, 128, %s358_s7, %s8731_s12  }
  0x7f   : > { %s388_s6 = scalar_lea.vmem [#allocation13], %s7579_s11  ;;  %s7489_s9 = smov [#allocation13]  }
  0x80   : > { %s395_s0 = sshll.u32 %s388_s6, 4  ;;  %s7375_s19 = sshll.u32 %s7489_s9, 4  ;;  %s396_s0 = int_to_ptr.vmem [resolvable:$true] %s395_s0  ;;  %s7376_s19 = int_to_ptr.vmem [resolvable:$false] %s7375_s19 }
  0x81   : > { %s7370_s30 = scalar_lea.vmem %s396_s0, 16  ;;  %s7377_s2 = scalar_lea.vmem %s7376_s19, 32 }
  0x82   : > { %p7371_p6 = scmp.ne.s32.totalorder %s396_s0, %s7370_s30  ;;  %p7378_p11 = scmp.lt.s32.totalorder %s396_s0, %s7376_s19 }
  0x83   : > { %s393_s17 = scalar_lea.hbm %s8732_s27, %s6209_s1  ;;  %p7379_p5 = scmp.lt.s32.totalorder %s7377_s2, %s7370_s30 }
  0x84   : > { %p7373_p10 = pnand %p7371_p6, %p7596_p8 }
  0x85   : > { %p7380_p2 = por %p7379_p5, %p7378_p11 }
  0x86   : > { %p7374_p12 = pneg %p7373_p10 }
  0x88   : > { %p7381_p4 = pnand %p7380_p2, %p7374_p12 }
  0x8a   : > { %7384 = shalt.err (!%p7381_p4)
}
  0x8b   : > { %s8733_s11 = scalar_lea.sflag [#allocation12], %s7576_s10  ;;  %p8734_p1 = scmp.ne.s32.totalorder %s8725_s16, 0 }
  0x8c   : > { %7062 = dma.hbm_to_vmem [thread:$0]  (!%p7589_p7), %s393_s17, 16, %s396_s0, %s8733_s11  }
  0x8d   : > { %404 = sbr.rel (%p8734_p1) target bundleno = 1293 (0x50d), region = 48  ;;  %p8735_p8 = scmp.eq.s32.totalorder (!%p8734_p1), %s7631_s21, 0 }
  0x92   : > { %7436 = dma.done.wait (%p8735_p8), [#allocation3], 128   ;;  %p8736_p9 = pmov %p8735_p8 }
  0x93   : > { %s410_s2 = sand.u32 1, %s7631_s21   ;;  %s7722_s13 = sand.u32 1, %s7461_s25  }
  0x94   : > { %7438 = vsyncadd (%p8736_p9), [#allocation3], 4294967168  ;;  %s6212_s18 = sshll.u32 %s7722_s13, 10  ;;  %s411_s22 = scalar_lea.sflag [#allocation6], %s410_s2 }
  0x95   : > { %s7725_s10 = scalar_lea.vmem [#allocation5], %s6212_s18  ;;  %p8737_p7 = scmp.ne.s32.totalorder %s8722_s15, 0 }
  0x97   : > { %7440 = dma.done.wait (%p8737_p7), %s411_s22, 16512  }
  0x98   : > { %7442 = vsyncadd (%p8737_p7), %s411_s22, 4294950784  ;;  %s7732_s0 = sshll.u32 %s7722_s13, 3  ;;  %s6214_s16 = sshll.u32 %s7722_s13, 12 }
  0x99   : > { %s423_s21 = scalar_lea.vmem [#allocation7], %s7732_s0  ;;  %s429_s7 = scalar_lea.sflag [#allocation9], %s410_s2 }
  0x9a   : > { %s7736_s1 = scalar_lea.vmem [#allocation8], %s6214_s16 }
  0x9b   : > { %7444 = dma.done.wait (%p8737_p7), %s429_s7, 65664  }
  0x9c   : > { %7446 = vsyncadd (%p8737_p7), %s429_s7, 4294901632  ;;  %s6216_s12 = sshll.u32 %s7722_s13, 9  ;;  %s441_s14 = scalar_lea.vmem [#allocation10], %s7732_s0 }
  0x9d   : > { %s447_s8 = scalar_lea.sflag [#allocation12], %s410_s2  ;;  %s7744_s27 = scalar_lea.vmem [#allocation11], %s6216_s12 }
  0x9e   : > { %7448 = dma.done.wait (%p8737_p7), %s447_s8, 8208  }
  0x9f   : > { %7450 = vsyncadd (%p8737_p7), %s447_s8, 4294959088  ;;  %v571_v0 = vld [vmem:[%s7725_s10 + $0x1c0] sm:$0xff]  ;;  %v572_v2 = vld [vmem:[%s7725_s10 + $0x1c8] sm:$0xff]  ;;  %s458_s15 = scalar_lea.vmem [#allocation13], %s7722_s13  ;;  %s8738_s17 = sld [smem:[#allocation20_spill]] }
  0xa0   : > { %v575_v1 = vld [vmem:[%s7725_s10 + $0x1e0] sm:$0xff]  ;;  %v576_v4 = vld [vmem:[%s7725_s10 + $0x1e8] sm:$0xff]  ;;  %v7778_v53 = vld [vmem:[#allocation2] sm:$0xff]  ;;  %s512_s30 = scalar_lea.vmem [#allocation14], %s7732_s0  ;;  %s8739_s2 = sld [smem:[#allocation27_spill]] }
  0xa1   : > { %v6277_v3 = vcombine.high %v571_v0, %v575_v1  ;;  %v6276_v5 = vcombine.low %v571_v0, %v575_v1  ;;  %v563_v6 = vld [vmem:[%s7725_s10 + $0x180] sm:$0xff]  ;;  %v6279_v8 = vcombine.high %v572_v2, %v576_v4  ;;  %v6278_v9 = vcombine.low %v572_v2, %v576_v4  ;;  %v564_v11 = vld [vmem:[%s7725_s10 + $0x188] sm:$0xff]  ;;  %s5993_s9 = sshll.u32 %s512_s30, 4  ;;  %s5979_s22 = scalar_lea.sflag [#allocation4], %s7722_s13  ;;  %s5994_s9 = int_to_ptr.vmem [resolvable:$true] %s5993_s9 }
  0xa2   : > { %v567_v7 = vld [vmem:[%s7725_s10 + $0x1a0] sm:$0xff]  ;;  %v568_v12 = vld [vmem:[%s7725_s10 + $0x1a8] sm:$0xff]  ;;  %v7784_v57 = vcombine.high %v7778_v53, %v7778_v53  ;;  %p8740_p3 = scmp.ne.s32.totalorder %s8723_s23, 0  ;;  %s7490_s16 = smov [#allocation14]  }
  0xa3   : > { %v6269_v10 = vcombine.high %v563_v6, %v567_v7  ;;  %v555_v13 = vld [vmem:[%s7725_s10 + $0x140] sm:$0xff]  ;;  %1332 = vmatprep.subr.bf16.mxu0 %v6277_v3  ;;  %v6271_v14 = vcombine.high %v564_v11, %v568_v12  ;;  %v556_v16 = vld [vmem:[%s7725_s10 + $0x148] sm:$0xff]  ;;  %1373 = vmatprep.subr.bf16.mxu1 %v6279_v8  ;;  %v6268_v18 = vcombine.low %v563_v6, %v567_v7  ;;  %s7389_s0 = sshll.u32 %s7490_s16, 4  ;;  %s7390_s0 = int_to_ptr.vmem [resolvable:$false] %s7389_s0 }
  0xa4   : > { %v559_v15 = vld [vmem:[%s7725_s10 + $0x160] sm:$0xff]  ;;  %v560_v17 = vld [vmem:[%s7725_s10 + $0x168] sm:$0xff]  ;;  %1333 = vmatpush1.bf16.msra.mxu0 %v6276_v5  ;;  %1374 = vmatpush1.bf16.msra.mxu1 %v6278_v9  ;;  %v6270_v19 = vcombine.low %v564_v11, %v568_v12  ;;  %p7392_p10 = scmp.lt.s32.totalorder %s5994_s9, %s7390_s0 }
  0xa5   : > { %1334 = vmatprep.subr.bf16.mxu0 %v6269_v10  ;;  %v6261_v20 = vcombine.high %v555_v13, %v559_v15  ;;  %1375 = vmatprep.subr.bf16.mxu1 %v6271_v14  ;;  %v6263_v21 = vcombine.high %v556_v16, %v560_v17  ;;  %v547_v22 = vld [vmem:[%s7725_s10 + $0x100] sm:$0xff]  ;;  %v548_v24 = vld [vmem:[%s7725_s10 + $0x108] sm:$0xff]  ;;  %v6260_v26 = vcombine.low %v555_v13, %v559_v15  ;;  %s6926_s6 = sshll.u32 %s8738_s17, 7 }
  0xa6   : > { %v551_v23 = vld [vmem:[%s7725_s10 + $0x120] sm:$0xff]  ;;  %v552_v25 = vld [vmem:[%s7725_s10 + $0x128] sm:$0xff]  ;;  %v6262_v27 = vcombine.low %v556_v16, %v560_v17  ;;  %1364 = vmatprep.mubr.bf16.mxu0 %v7784_v57  ;;  %1405 = vmatprep.mubr.bf16.mxu1 %v7784_v57  ;;  %s8651_s18 = scalar_lea.hbm %s8739_s2, %s6926_s6 }
  0xa7   : > { %v6253_v28 = vcombine.high %v547_v22, %v551_v23  ;;  %v6255_v29 = vcombine.high %v548_v24, %v552_v25  ;;  %v539_v30 = vld [vmem:[%s7725_s10 + $0xc0] sm:$0xff]  ;;  %v540_v32 = vld [vmem:[%s7725_s10 + $0xc8] sm:$0xff]  ;;  %v6252_v34 = vcombine.low %v547_v22, %v551_v23  ;;  %v6254_v35 = vcombine.low %v548_v24, %v552_v25 }
  0xa8   : > { %1335 = vmatpush1.bf16.msra.mxu0 %v6268_v18  ;;  %1376 = vmatpush1.bf16.msra.mxu1 %v6270_v19  ;;  %v543_v31 = vld [vmem:[%s7725_s10 + $0xe0] sm:$0xff]  ;;  %v544_v33 = vld [vmem:[%s7725_s10 + $0xe8] sm:$0xff] }
  0xa9   : > { %1336 = vmatprep.subr.bf16.mxu0 %v6261_v20  ;;  %1377 = vmatprep.subr.bf16.mxu1 %v6263_v21  ;;  %v6245_v36 = vcombine.high %v539_v30, %v543_v31  ;;  %v6247_v37 = vcombine.high %v540_v32, %v544_v33  ;;  %v531_v38 = vld [vmem:[%s7725_s10 + $0x80] sm:$0xff]  ;;  %v532_v40 = vld [vmem:[%s7725_s10 + $0x88] sm:$0xff]  ;;  %v6244_v42 = vcombine.low %v539_v30, %v543_v31 }
  0xaa   : > { %v535_v39 = vld [vmem:[%s7725_s10 + $0xa0] sm:$0xff]  ;;  %v536_v41 = vld [vmem:[%s7725_s10 + $0xa8] sm:$0xff]  ;;  %v6246_v43 = vcombine.low %v540_v32, %v544_v33 }
  0xab   : > { %v6237_v44 = vcombine.high %v531_v38, %v535_v39  ;;  %v6239_v45 = vcombine.high %v532_v40, %v536_v41  ;;  %v523_v46 = vld [vmem:[%s7725_s10 + $0x40] sm:$0xff]  ;;  %v524_v48 = vld [vmem:[%s7725_s10 + $0x48] sm:$0xff]  ;;  %v6236_v50 = vcombine.low %v531_v38, %v535_v39  ;;  %v6238_v51 = vcombine.low %v532_v40, %v536_v41 }
  0xac   : > { %1337 = vmatpush1.bf16.msra.mxu0 %v6260_v26  ;;  %1378 = vmatpush1.bf16.msra.mxu1 %v6262_v27  ;;  %v527_v47 = vld [vmem:[%s7725_s10 + $0x60] sm:$0xff]  ;;  %v528_v49 = vld [vmem:[%s7725_s10 + $0x68] sm:$0xff] }
  0xad   : > { %1338 = vmatprep.subr.bf16.mxu0 %v6253_v28  ;;  %1379 = vmatprep.subr.bf16.mxu1 %v6255_v29  ;;  %v6229_v52 = vcombine.high %v523_v46, %v527_v47  ;;  %v6231_v54 = vcombine.high %v524_v48, %v528_v49  ;;  %v515_v55 = vld [vmem:[%s7725_s10] sm:$0xff]  ;;  %v516_v58 = vld [vmem:[%s7725_s10 + $0x8] sm:$0xff]  ;;  %v6228_v60 = vcombine.low %v523_v46, %v527_v47 }
  0xae   : > { %v519_v56 = vld [vmem:[%s7725_s10 + $0x20] sm:$0xff]  ;;  %v520_v59 = vld [vmem:[%s7725_s10 + $0x28] sm:$0xff]  ;;  %v6230_v61 = vcombine.low %v524_v48, %v528_v49 }
  0xaf   : > { %v6221_v62 = vcombine.high %v515_v55, %v519_v56  ;;  %v6223_v63 = vcombine.high %v516_v58, %v520_v59  ;;  %v635_v0 = vld [vmem:[%s7725_s10 + $0x3c0] sm:$0xff]  ;;  %v636_v2 = vld [vmem:[%s7725_s10 + $0x3c8] sm:$0xff]  ;;  %v6220_v4 = vcombine.low %v515_v55, %v519_v56  ;;  %v6222_v5 = vcombine.low %v516_v58, %v520_v59 }
  0xb0   : > { %1339 = vmatpush1.bf16.msra.mxu0 %v6252_v34  ;;  %1380 = vmatpush1.bf16.msra.mxu1 %v6254_v35  ;;  %v639_v1 = vld [vmem:[%s7725_s10 + $0x3e0] sm:$0xff]  ;;  %v640_v3 = vld [vmem:[%s7725_s10 + $0x3e8] sm:$0xff] }
  0xb1   : > { %1340 = vmatprep.subr.bf16.mxu0 %v6245_v36  ;;  %1381 = vmatprep.subr.bf16.mxu1 %v6247_v37  ;;  %v6341_v6 = vcombine.high %v635_v0, %v639_v1  ;;  %v6343_v7 = vcombine.high %v636_v2, %v640_v3  ;;  %v627_v8 = vld [vmem:[%s7725_s10 + $0x380] sm:$0xff]  ;;  %v628_v10 = vld [vmem:[%s7725_s10 + $0x388] sm:$0xff]  ;;  %v6340_v12 = vcombine.low %v635_v0, %v639_v1 }
  0xb2   : > { %v631_v9 = vld [vmem:[%s7725_s10 + $0x3a0] sm:$0xff]  ;;  %v632_v11 = vld [vmem:[%s7725_s10 + $0x3a8] sm:$0xff]  ;;  %v6342_v13 = vcombine.low %v636_v2, %v640_v3  ;;  %v573_v2 = vld [vmem:[%s7725_s10 + $0x1d0] sm:$0xff] }
  0xb3   : > { %v6333_v14 = vcombine.high %v627_v8, %v631_v9  ;;  %v6335_v15 = vcombine.high %v628_v10, %v632_v11  ;;  %v619_v16 = vld [vmem:[%s7725_s10 + $0x340] sm:$0xff]  ;;  %v620_v18 = vld [vmem:[%s7725_s10 + $0x348] sm:$0xff]  ;;  %v6332_v20 = vcombine.low %v627_v8, %v631_v9  ;;  %v6334_v21 = vcombine.low %v628_v10, %v632_v11  ;;  %v577_v3 = vld [vmem:[%s7725_s10 + $0x1f0] sm:$0xff] }
  0xb4   : > { %1341 = vmatpush1.bf16.msra.mxu0 %v6244_v42  ;;  %1382 = vmatpush1.bf16.msra.mxu1 %v6246_v43  ;;  %v623_v17 = vld [vmem:[%s7725_s10 + $0x360] sm:$0xff]  ;;  %v624_v19 = vld [vmem:[%s7725_s10 + $0x368] sm:$0xff]  ;;  %v6281_v8 = vcombine.high %v573_v2, %v577_v3  ;;  %v565_v9 = vld [vmem:[%s7725_s10 + $0x190] sm:$0xff] }
  0xb5   : > { %1342 = vmatprep.subr.bf16.mxu0 %v6237_v44  ;;  %1383 = vmatprep.subr.bf16.mxu1 %v6239_v45  ;;  %v6325_v22 = vcombine.high %v619_v16, %v623_v17  ;;  %v6327_v23 = vcombine.high %v620_v18, %v624_v19  ;;  %v611_v24 = vld [vmem:[%s7725_s10 + $0x300] sm:$0xff]  ;;  %v612_v26 = vld [vmem:[%s7725_s10 + $0x308] sm:$0xff]  ;;  %v6324_v28 = vcombine.low %v619_v16, %v623_v17  ;;  %v569_v10 = vld [vmem:[%s7725_s10 + $0x1b0] sm:$0xff] }
  0xb6   : > { %v615_v25 = vld [vmem:[%s7725_s10 + $0x320] sm:$0xff]  ;;  %v616_v27 = vld [vmem:[%s7725_s10 + $0x328] sm:$0xff]  ;;  %v6326_v29 = vcombine.low %v620_v18, %v624_v19  ;;  %v566_v11 = vld [vmem:[%s7725_s10 + $0x198] sm:$0xff]  ;;  %v6273_v19 = vcombine.high %v565_v9, %v569_v10 }
  0xb7   : > { %v6317_v30 = vcombine.high %v611_v24, %v615_v25  ;;  %v6319_v31 = vcombine.high %v612_v26, %v616_v27  ;;  %v603_v32 = vld [vmem:[%s7725_s10 + $0x2c0] sm:$0xff]  ;;  %v604_v34 = vld [vmem:[%s7725_s10 + $0x2c8] sm:$0xff]  ;;  %v6316_v36 = vcombine.low %v611_v24, %v615_v25  ;;  %v6318_v37 = vcombine.low %v612_v26, %v616_v27  ;;  %v557_v16 = vld [vmem:[%s7725_s10 + $0x150] sm:$0xff] }
  0xb8   : > { %1343 = vmatpush1.bf16.msra.mxu0 %v6236_v50  ;;  %1384 = vmatpush1.bf16.msra.mxu1 %v6238_v51  ;;  %v607_v33 = vld [vmem:[%s7725_s10 + $0x2e0] sm:$0xff]  ;;  %v608_v35 = vld [vmem:[%s7725_s10 + $0x2e8] sm:$0xff]  ;;  %v561_v17 = vld [vmem:[%s7725_s10 + $0x170] sm:$0xff] }
  0xb9   : > { %1344 = vmatprep.subr.bf16.mxu0 %v6229_v52  ;;  %1385 = vmatprep.subr.bf16.mxu1 %v6231_v54  ;;  %v6309_v38 = vcombine.high %v603_v32, %v607_v33  ;;  %v6311_v39 = vcombine.high %v604_v34, %v608_v35  ;;  %v595_v40 = vld [vmem:[%s7725_s10 + $0x280] sm:$0xff]  ;;  %v596_v42 = vld [vmem:[%s7725_s10 + $0x288] sm:$0xff]  ;;  %v6308_v44 = vcombine.low %v603_v32, %v607_v33  ;;  %v553_v24 = vld [vmem:[%s7725_s10 + $0x130] sm:$0xff] }
  0xba   : > { %v599_v41 = vld [vmem:[%s7725_s10 + $0x2a0] sm:$0xff]  ;;  %v600_v43 = vld [vmem:[%s7725_s10 + $0x2a8] sm:$0xff]  ;;  %v6310_v45 = vcombine.low %v604_v34, %v608_v35  ;;  %v6265_v26 = vcombine.high %v557_v16, %v561_v17  ;;  %v550_v27 = vld [vmem:[%s7725_s10 + $0x118] sm:$0xff] }
  0xbb   : > { %v6301_v46 = vcombine.high %v595_v40, %v599_v41  ;;  %v6303_v47 = vcombine.high %v596_v42, %v600_v43  ;;  %v587_v48 = vld [vmem:[%s7725_s10 + $0x240] sm:$0xff]  ;;  %v588_v50 = vld [vmem:[%s7725_s10 + $0x248] sm:$0xff]  ;;  %v6300_v52 = vcombine.low %v595_v40, %v599_v41  ;;  %v6302_v54 = vcombine.low %v596_v42, %v600_v43  ;;  %v545_v32 = vld [vmem:[%s7725_s10 + $0xf0] sm:$0xff] }
  0xbc   : > { %1345 = vmatpush1.bf16.msra.mxu0 %v6228_v60  ;;  %1386 = vmatpush1.bf16.msra.mxu1 %v6230_v61  ;;  %v591_v49 = vld [vmem:[%s7725_s10 + $0x260] sm:$0xff]  ;;  %v592_v51 = vld [vmem:[%s7725_s10 + $0x268] sm:$0xff]  ;;  %v542_v35 = vld [vmem:[%s7725_s10 + $0xd8] sm:$0xff] }
  0xbd   : > { %1346 = vmatprep.subr.bf16.mxu0 %v6221_v62  ;;  %1387 = vmatprep.subr.bf16.mxu1 %v6223_v63  ;;  %v6293_v55 = vcombine.high %v587_v48, %v591_v49  ;;  %v6295_v56 = vcombine.high %v588_v50, %v592_v51  ;;  %v579_v58 = vld [vmem:[%s7725_s10 + $0x200] sm:$0xff]  ;;  %v580_v60 = vld [vmem:[%s7725_s10 + $0x208] sm:$0xff]  ;;  %v6292_v62 = vcombine.low %v587_v48, %v591_v49  ;;  %v534_v42 = vld [vmem:[%s7725_s10 + $0x98] sm:$0xff] }
  0xbe   : > { %v583_v59 = vld [vmem:[%s7725_s10 + $0x220] sm:$0xff]  ;;  %v584_v61 = vld [vmem:[%s7725_s10 + $0x228] sm:$0xff]  ;;  %v6294_v63 = vcombine.low %v588_v50, %v592_v51  ;;  %v538_v43 = vld [vmem:[%s7725_s10 + $0xb8] sm:$0xff] }
  0xbf   : > { %v6285_v0 = vcombine.high %v579_v58, %v583_v59  ;;  %v6287_v1 = vcombine.high %v580_v60, %v584_v61  ;;  %v526_v50 = vld [vmem:[%s7725_s10 + $0x58] sm:$0xff] }
  0xc0   : > { %1347 = vmatpush1.bf16.msra.mxu0 %v6220_v4  ;;  %1388 = vmatpush1.bf16.msra.mxu1 %v6222_v5  ;;  %v574_v4 = vld [vmem:[%s7725_s10 + $0x1d8] sm:$0xff] }
  0xc1   : > { %1348 = vmatprep.subr.bf16.mxu0 %v6341_v6  ;;  %1389 = vmatprep.subr.bf16.mxu1 %v6343_v7  ;;  %v578_v5 = vld [vmem:[%s7725_s10 + $0x1f8] sm:$0xff]  ;;  %v6284_v6 = vcombine.low %v579_v58, %v583_v59  ;;  %v6286_v7 = vcombine.low %v580_v60, %v584_v61  ;;  %v6242_v58 = vcombine.low %v534_v42, %v538_v43 }
  0xc2   : > { %v6282_v18 = vcombine.low %v574_v4, %v578_v5  ;;  %v530_v51 = vld [vmem:[%s7725_s10 + $0x78] sm:$0xff] }
  0xc3   : > { %v518_v60 = vld [vmem:[%s7725_s10 + $0x18] sm:$0xff] }
  0xc4   : > { %1349 = vmatpush2.bf16.msra.mxu0 %v6340_v12  ;;  %1390 = vmatpush2.bf16.msra.mxu1 %v6342_v13  ;;  %v6283_v12 = vcombine.high %v574_v4, %v578_v5  ;;  %v570_v13 = vld [vmem:[%s7725_s10 + $0x1b8] sm:$0xff] }
  0xc5   : > { %1350 = vmatprep.subr.bf16.mxu0 %v6333_v14  ;;  %1391 = vmatprep.subr.bf16.mxu1 %v6335_v15  ;;  %v7832_v14 = vcombine.low %v7778_v53, %v7778_v53  ;;  %v6280_v15 = vcombine.low %v573_v2, %v577_v3  ;;  %v6272_v53 = vcombine.low %v565_v9, %v569_v10  ;;  %v522_v61 = vld [vmem:[%s7725_s10 + $0x38] sm:$0xff]  ;;  %v633_v9 = vld [vmem:[%s7725_s10 + $0x3b0] sm:$0xff] }
  0xc6   : > { %v6274_v25 = vcombine.low %v566_v11, %v570_v13  ;;  %v6234_v2 = vcombine.low %v526_v50, %v530_v51  ;;  %v638_v4 = vld [vmem:[%s7725_s10 + $0x3d8] sm:$0xff]  ;;  %v6226_v10 = vcombine.low %v518_v60, %v522_v61 }
  0xc7   : > { %v642_v5 = vld [vmem:[%s7725_s10 + $0x3f8] sm:$0xff] }
  0xc8   : > { %1351 = vmatpush2.bf16.msra.mxu0 %v6332_v20  ;;  %1392 = vmatpush2.bf16.msra.mxu1 %v6334_v21  ;;  %v558_v20 = vld [vmem:[%s7725_s10 + $0x158] sm:$0xff] }
  0xc9   : > { %1352 = vmatprep.subr.bf16.mxu0 %v6325_v22  ;;  %1393 = vmatprep.subr.bf16.mxu1 %v6327_v23  ;;  %v562_v21 = vld [vmem:[%s7725_s10 + $0x178] sm:$0xff]  ;;  %v6275_v22 = vcombine.high %v566_v11, %v570_v13  ;;  %v549_v23 = vld [vmem:[%s7725_s10 + $0x110] sm:$0xff] }
  0xca   : > { %v6266_v33 = vcombine.low %v558_v20, %v562_v21  ;;  %v6257_v34 = vcombine.high %v549_v23, %v553_v24  ;;  %v634_v13 = vld [vmem:[%s7725_s10 + $0x3b8] sm:$0xff] }
  0xcc   : > { %1353 = vmatpush2.bf16.msra.mxu0 %v6324_v28  ;;  %1394 = vmatpush2.bf16.msra.mxu1 %v6326_v29  ;;  %v554_v28 = vld [vmem:[%s7725_s10 + $0x138] sm:$0xff]  ;;  %v6267_v29 = vcombine.high %v558_v20, %v562_v21 }
  0xcd   : > { %1354 = vmatprep.subr.bf16.mxu0 %v6317_v30  ;;  %1395 = vmatprep.subr.bf16.mxu1 %v6319_v31  ;;  %v6264_v30 = vcombine.low %v557_v16, %v561_v17  ;;  %v541_v31 = vld [vmem:[%s7725_s10 + $0xd0] sm:$0xff]  ;;  %v6258_v40 = vcombine.low %v550_v27, %v554_v28  ;;  %v622_v21 = vld [vmem:[%s7725_s10 + $0x358] sm:$0xff] }
  0xce   : > { %v6249_v41 = vcombine.high %v541_v31, %v545_v32  ;;  %v621_v17 = vld [vmem:[%s7725_s10 + $0x350] sm:$0xff] }
  0xd0   : > { %1355 = vmatpush2.bf16.msra.mxu0 %v6316_v36  ;;  %1396 = vmatpush2.bf16.msra.mxu1 %v6318_v37  ;;  %v546_v36 = vld [vmem:[%s7725_s10 + $0xf8] sm:$0xff]  ;;  %v6259_v37 = vcombine.high %v550_v27, %v554_v28 }
  0xd1   : > { %1356 = vmatprep.subr.bf16.mxu0 %v6309_v38  ;;  %1397 = vmatprep.subr.bf16.mxu1 %v6311_v39  ;;  %v6256_v38 = vcombine.low %v549_v23, %v553_v24  ;;  %v537_v39 = vld [vmem:[%s7725_s10 + $0xb0] sm:$0xff]  ;;  %v6250_v48 = vcombine.low %v542_v35, %v546_v36  ;;  %v614_v28 = vld [vmem:[%s7725_s10 + $0x318] sm:$0xff] }
  0xd2   : > { %v613_v24 = vld [vmem:[%s7725_s10 + $0x310] sm:$0xff] }
  0xd4   : > { %1357 = vmatpush2.bf16.msra.mxu0 %v6308_v44  ;;  %1398 = vmatpush2.bf16.msra.mxu1 %v6310_v45  ;;  %v6251_v44 = vcombine.high %v542_v35, %v546_v36  ;;  %v6248_v45 = vcombine.low %v541_v31, %v545_v32  ;;  %v605_v35 = vld [vmem:[%s7725_s10 + $0x2d0] sm:$0xff] }
  0xd5   : > { %1358 = vmatprep.subr.bf16.mxu0 %v6301_v46  ;;  %1399 = vmatprep.subr.bf16.mxu1 %v6303_v47  ;;  %v525_v46 = vld [vmem:[%s7725_s10 + $0x50] sm:$0xff] }
  0xd6   : > { %v529_v47 = vld [vmem:[%s7725_s10 + $0x70] sm:$0xff] }
  0xd7   : > { %v6233_v59 = vcombine.high %v525_v46, %v529_v47  ;;  %v609_v36 = vld [vmem:[%s7725_s10 + $0x2f0] sm:$0xff] }
  0xd8   : > { %1359 = vmatpush2.bf16.msra.mxu0 %v6300_v52  ;;  %1400 = vmatpush2.bf16.msra.mxu1 %v6302_v54  ;;  %v6243_v52 = vcombine.high %v534_v42, %v538_v43  ;;  %v597_v42 = vld [vmem:[%s7725_s10 + $0x290] sm:$0xff] }
  0xd9   : > { %1360 = vmatprep.subr.bf16.mxu0 %v6293_v55  ;;  %1401 = vmatprep.subr.bf16.mxu1 %v6295_v56  ;;  %v517_v55 = vld [vmem:[%s7725_s10 + $0x10] sm:$0xff] }
  0xda   : > { %v521_v56 = vld [vmem:[%s7725_s10 + $0x30] sm:$0xff] }
  0xdb   : > { %v6225_v3 = vcombine.high %v517_v55, %v521_v56  ;;  %v601_v43 = vld [vmem:[%s7725_s10 + $0x2b0] sm:$0xff] }
  0xdc   : > { %1361 = vmatpush2.bf16.msra.mxu0 %v6292_v62  ;;  %1402 = vmatpush2.bf16.msra.mxu1 %v6294_v63  ;;  %v6235_v62 = vcombine.high %v526_v50, %v530_v51  ;;  %v6232_v63 = vcombine.low %v525_v46, %v529_v47  ;;  %v6312_v46 = vcombine.low %v605_v35, %v609_v36  ;;  %v589_v50 = vld [vmem:[%s7725_s10 + $0x250] sm:$0xff] }
  0xdd   : > { %1362 = vmatprep.subr.bf16.mxu0 %v6285_v0  ;;  %1403 = vmatprep.subr.bf16.mxu1 %v6287_v1  ;;  %v637_v0 = vld [vmem:[%s7725_s10 + $0x3d0] sm:$0xff] }
  0xde   : > { %v641_v1 = vld [vmem:[%s7725_s10 + $0x3f0] sm:$0xff] }
  0xdf   : > { %v6345_v11 = vcombine.high %v637_v0, %v641_v1  ;;  %v6344_v16 = vcombine.low %v637_v0, %v641_v1  ;;  %v593_v51 = vld [vmem:[%s7725_s10 + $0x270] sm:$0xff] }
  0xe0   : > { %1363 = vmatpush2.bf16.msra.mxu0 %v6284_v6  ;;  %1404 = vmatpush2.bf16.msra.mxu1 %v6286_v7  ;;  %v6227_v6 = vcombine.high %v518_v60, %v522_v61  ;;  %v6224_v7 = vcombine.low %v517_v55, %v521_v56  ;;  %v6304_v55 = vcombine.low %v597_v42, %v601_v43  ;;  %v581_v60 = vld [vmem:[%s7725_s10 + $0x210] sm:$0xff] }
  0xe1   : > { %1414 = vmatprep.subr.bf16.mxu0 %v6281_v8  ;;  %1455 = vmatprep.subr.bf16.mxu1 %v6283_v12  ;;  %v629_v8 = vld [vmem:[%s7725_s10 + $0x390] sm:$0xff]  ;;  %v630_v12 = vld [vmem:[%s7725_s10 + $0x398] sm:$0xff]  ;;  %v6296_v0 = vcombine.low %v589_v50, %v593_v51 }
  0xe2   : > { %v6337_v20 = vcombine.high %v629_v8, %v633_v9  ;;  %v6336_v23 = vcombine.low %v629_v8, %v633_v9  ;;  %v585_v61 = vld [vmem:[%s7725_s10 + $0x230] sm:$0xff] }
  0xe3   : > { %1365 = vmatmul.mubr.bf16.vlgmr.msra.gmra.mxu0 %v7832_v14  ;;  %1406 = vmatmul.mubr.bf16.vlgmr.msra.gmra.mxu1 %v7832_v14  ;;  %v6288_v8 = vcombine.low %v581_v60, %v585_v61 }
  0xe4   : > { %1415 = vmatpush1.bf16.msra.mxu0 %v6280_v15  ;;  %1456 = vmatpush1.bf16.msra.mxu1 %v6282_v18  ;;  %v6347_v15 = vcombine.high %v638_v4, %v642_v5  ;;  %v625_v18 = vld [vmem:[%s7725_s10 + $0x370] sm:$0xff] }
  0xe5   : > { %1416 = vmatprep.subr.bf16.mxu0 %v6273_v19  ;;  %1457 = vmatprep.subr.bf16.mxu1 %v6275_v22  ;;  %v6346_v19 = vcombine.low %v638_v4, %v642_v5  ;;  %v626_v22 = vld [vmem:[%s7725_s10 + $0x378] sm:$0xff]  ;;  %v6329_v27 = vcombine.high %v621_v17, %v625_v18  ;;  %v6328_v31 = vcombine.low %v621_v17, %v625_v18  ;;  %v1568_v4 = vld [vmem:[%s7736_s1 + $0x1c0] sm:$0xff] }
  0xe6   : > { %1446 = vmatprep.mubr.bf16.mxu0 %v7784_v57  ;;  %1487 = vmatprep.mubr.bf16.mxu1 %v7784_v57  ;;  %v533_v57 = vld [vmem:[%s7725_s10 + $0x90] sm:$0xff]  ;;  %v6330_v32 = vcombine.low %v622_v21, %v626_v22 }
  0xe7   : > { %v6241_v49 = vcombine.high %v533_v57, %v537_v39  ;;  %v6240_v54 = vcombine.low %v533_v57, %v537_v39  ;;  %v1572_v5 = vld [vmem:[%s7736_s1 + $0x1e0] sm:$0xff] }
  0xe8   : > { %1417 = vmatpush1.bf16.msra.mxu0 %v6272_v53  ;;  %1458 = vmatpush1.bf16.msra.mxu1 %v6274_v25  ;;  %v6339_v53 = vcombine.high %v630_v12, %v634_v13  ;;  %v617_v25 = vld [vmem:[%s7725_s10 + $0x330] sm:$0xff]  ;;  %v6404_v17 = vcombine.low %v1568_v4, %v1572_v5 }
  0xe9   : > { %1418 = vmatprep.subr.bf16.mxu0 %v6265_v26  ;;  %1459 = vmatprep.subr.bf16.mxu1 %v6267_v29  ;;  %v6338_v26 = vcombine.low %v630_v12, %v634_v13  ;;  %v618_v29 = vld [vmem:[%s7725_s10 + $0x338] sm:$0xff]  ;;  %v6320_v57 = vcombine.low %v613_v24, %v617_v25  ;;  %v1560_v12 = vld [vmem:[%s7736_s1 + $0x180] sm:$0xff] }
  0xea   : > { %v6322_v39 = vcombine.low %v614_v28, %v618_v29  ;;  %v1564_v13 = vld [vmem:[%s7736_s1 + $0x1a0] sm:$0xff] }
  0xec   : > { %1419 = vmatpush1.bf16.msra.mxu0 %v6264_v30  ;;  %1460 = vmatpush1.bf16.msra.mxu1 %v6266_v33  ;;  %v6331_v30 = vcombine.high %v622_v21, %v626_v22  ;;  %v6321_v33 = vcombine.high %v613_v24, %v617_v25  ;;  %v1552_v21 = vld [vmem:[%s7736_s1 + $0x140] sm:$0xff]  ;;  %v6396_v24 = vcombine.low %v1560_v12, %v1564_v13 }
  0xed   : > { %1420 = vmatprep.subr.bf16.mxu0 %v6257_v34  ;;  %1461 = vmatprep.subr.bf16.mxu1 %v6259_v37  ;;  %v6323_v34 = vcombine.high %v614_v28, %v618_v29  ;;  %v606_v37 = vld [vmem:[%s7725_s10 + $0x2d8] sm:$0xff]  ;;  %v1556_v22 = vld [vmem:[%s7736_s1 + $0x160] sm:$0xff] }
  0xee   : > { %v1544_v28 = vld [vmem:[%s7736_s1 + $0x100] sm:$0xff] }
  0xef   : > { %v1548_v29 = vld [vmem:[%s7736_s1 + $0x120] sm:$0xff] }
  0xf0   : > { %1421 = vmatpush1.bf16.msra.mxu0 %v6256_v38  ;;  %1462 = vmatpush1.bf16.msra.mxu1 %v6258_v40  ;;  %v610_v38 = vld [vmem:[%s7725_s10 + $0x2f8] sm:$0xff]  ;;  %v6313_v40 = vcombine.high %v605_v35, %v609_v36  ;;  %v1540_v35 = vld [vmem:[%s7736_s1 + $0xe0] sm:$0xff] }
  0xf1   : > { %1422 = vmatprep.subr.bf16.mxu0 %v6249_v41  ;;  %1463 = vmatprep.subr.bf16.mxu1 %v6251_v44  ;;  %v6315_v41 = vcombine.high %v606_v37, %v610_v38  ;;  %v598_v44 = vld [vmem:[%s7725_s10 + $0x298] sm:$0xff]  ;;  %v6314_v47 = vcombine.low %v606_v37, %v610_v38  ;;  %v7915_v37 = vld [vmem:[%s7736_s1 + $0x9c0] sm:$0xff] }
  0xf2   : > { %v7918_v38 = vld [vmem:[%s7736_s1 + $0x9e0] sm:$0xff] }
  0xf4   : > { %1423 = vmatpush1.bf16.msra.mxu0 %v6248_v45  ;;  %1464 = vmatpush1.bf16.msra.mxu1 %v6250_v48  ;;  %v602_v45 = vld [vmem:[%s7725_s10 + $0x2b8] sm:$0xff]  ;;  %v6305_v48 = vcombine.high %v597_v42, %v601_v43  ;;  %v6380_v42 = vcombine.low %v1544_v28, %v1548_v29  ;;  %v6660_v43 = vcombine.low %v7915_v37, %v7918_v38 }
  0xf5   : > { %1424 = vmatprep.subr.bf16.mxu0 %v6241_v49  ;;  %1465 = vmatprep.subr.bf16.mxu1 %v6243_v52  ;;  %v6307_v49 = vcombine.high %v598_v44, %v602_v45  ;;  %v590_v52 = vld [vmem:[%s7725_s10 + $0x258] sm:$0xff]  ;;  %v6306_v56 = vcombine.low %v598_v44, %v602_v45 }
  0xf8   : > { %1425 = vmatpush1.bf16.msra.mxu0 %v6240_v54  ;;  %1466 = vmatpush1.bf16.msra.mxu1 %v6242_v58  ;;  %v594_v54 = vld [vmem:[%s7725_s10 + $0x278] sm:$0xff]  ;;  %v6297_v58 = vcombine.high %v589_v50, %v593_v51  ;;  %v1656_v50 = vld [vmem:[%s7736_s1 + $0x480] sm:$0xff] }
  0xf9   : > { %1426 = vmatprep.subr.bf16.mxu0 %v6233_v59  ;;  %1467 = vmatprep.subr.bf16.mxu1 %v6235_v62  ;;  %v6299_v59 = vcombine.high %v590_v52, %v594_v54  ;;  %v582_v62 = vld [vmem:[%s7725_s10 + $0x218] sm:$0xff]  ;;  %v6298_v1 = vcombine.low %v590_v52, %v594_v54  ;;  %v1660_v51 = vld [vmem:[%s7736_s1 + $0x4a0] sm:$0xff] }
  0xfc   : > { %1427 = vmatpush1.bf16.msra.mxu0 %v6232_v63  ;;  %1468 = vmatpush1.bf16.msra.mxu1 %v6234_v2  ;;  %v586_v63 = vld [vmem:[%s7725_s10 + $0x238] sm:$0xff]  ;;  %v6289_v2 = vcombine.high %v581_v60, %v585_v61  ;;  %v1648_v60 = vld [vmem:[%s7736_s1 + $0x440] sm:$0xff]  ;;  %s7385_s10 = scalar_lea.vmem %s5994_s9, 128 }
  0xfd   : > { %1428 = vmatprep.subr.bf16.mxu0 %v6225_v3  ;;  %1469 = vmatprep.subr.bf16.mxu1 %v6227_v6  ;;  %v6291_v3 = vcombine.high %v582_v62, %v586_v63  ;;  %v1696_v6 = vld [vmem:[%s7736_s1 + $0x5c0] sm:$0xff]  ;;  %v6290_v9 = vcombine.low %v582_v62, %v586_v63  ;;  %v6492_v63 = vcombine.low %v1656_v50, %v1660_v51  ;;  %p7386_p13 = scmp.ne.s32.totalorder %s5994_s9, %s7385_s10 }
  0xfe   : > { %v1652_v61 = vld [vmem:[%s7736_s1 + $0x460] sm:$0xff] }
  0xff   : > { %p7387_p0 = pnand %p7386_p13, %p8740_p3 }
 0x100   : > { %1429 = vmatpush1.bf16.msra.mxu0 %v6224_v7  ;;  %1470 = vmatpush1.bf16.msra.mxu1 %v6226_v10  ;;  %v1700_v7 = vld [vmem:[%s7736_s1 + $0x5e0] sm:$0xff]  ;;  %v6405_v10 = vcombine.high %v1568_v4, %v1572_v5 }
 0x101   : > { %1430 = vmatprep.subr.bf16.mxu0 %v6345_v11  ;;  %1471 = vmatprep.subr.bf16.mxu1 %v6347_v15  ;;  %v6533_v11 = vcombine.high %v1696_v6, %v1700_v7  ;;  %v1688_v15 = vld [vmem:[%s7736_s1 + $0x580] sm:$0xff]  ;;  %v6532_v18 = vcombine.low %v1696_v6, %v1700_v7  ;;  %v6484_v7 = vcombine.low %v1648_v60, %v1652_v61  ;;  %p7388_p6 = pneg %p7387_p0 }
 0x102   : > { %v1640_v4 = vld [vmem:[%s7736_s1 + $0x400] sm:$0xff] }
 0x103   : > { %v1644_v5 = vld [vmem:[%s7736_s1 + $0x420] sm:$0xff] }
 0x104   : > { %1431 = vmatpush2.bf16.msra.mxu0 %v6344_v16  ;;  %1472 = vmatpush2.bf16.msra.mxu1 %v6346_v19  ;;  %v1692_v16 = vld [vmem:[%s7736_s1 + $0x5a0] sm:$0xff]  ;;  %v6397_v19 = vcombine.high %v1560_v12, %v1564_v13 }
 0x105   : > { %1432 = vmatprep.subr.bf16.mxu0 %v6337_v20  ;;  %1473 = vmatprep.subr.bf16.mxu1 %v6339_v53  ;;  %v6525_v20 = vcombine.high %v1688_v15, %v1692_v16  ;;  %v1680_v53 = vld [vmem:[%s7736_s1 + $0x540] sm:$0xff]  ;;  %v6524_v25 = vcombine.low %v1688_v15, %v1692_v16  ;;  %v6476_v16 = vcombine.low %v1640_v4, %v1644_v5 }
 0x106   : > { %v1760_v12 = vld [vmem:[%s7736_s1 + $0x7c0] sm:$0xff] }
 0x107   : > { %v1764_v13 = vld [vmem:[%s7736_s1 + $0x7e0] sm:$0xff] }
 0x108   : > { %1433 = vmatpush2.bf16.msra.mxu0 %v6336_v23  ;;  %1474 = vmatpush2.bf16.msra.mxu1 %v6338_v26  ;;  %v1684_v23 = vld [vmem:[%s7736_s1 + $0x560] sm:$0xff]  ;;  %v6389_v26 = vcombine.high %v1552_v21, %v1556_v22 }
 0x109   : > { %1434 = vmatprep.subr.bf16.mxu0 %v6329_v27  ;;  %1475 = vmatprep.subr.bf16.mxu1 %v6331_v30  ;;  %v6517_v27 = vcombine.high %v1680_v53, %v1684_v23  ;;  %v1672_v30 = vld [vmem:[%s7736_s1 + $0x500] sm:$0xff] }
 0x10c   : > { %1435 = vmatpush2.bf16.msra.mxu0 %v6328_v31  ;;  %1476 = vmatpush2.bf16.msra.mxu1 %v6330_v32  ;;  %v1676_v31 = vld [vmem:[%s7736_s1 + $0x520] sm:$0xff]  ;;  %v6516_v32 = vcombine.low %v1680_v53, %v1684_v23  ;;  %v6596_v23 = vcombine.low %v1760_v12, %v1764_v13 }
 0x10d   : > { %1436 = vmatprep.subr.bf16.mxu0 %v6321_v33  ;;  %1477 = vmatprep.subr.bf16.mxu1 %v6323_v34  ;;  %v6381_v33 = vcombine.high %v1544_v28, %v1548_v29  ;;  %v1536_v34 = vld [vmem:[%s7736_s1 + $0xc0] sm:$0xff]  ;;  %v6509_v36 = vcombine.high %v1672_v30, %v1676_v31  ;;  %v6508_v45 = vcombine.low %v1672_v30, %v1676_v31 }
 0x10e   : > { %v6372_v52 = vcombine.low %v1536_v34, %v1540_v35  ;;  %v1744_v28 = vld [vmem:[%s7736_s1 + $0x740] sm:$0xff] }
 0x10f   : > { %v1748_v29 = vld [vmem:[%s7736_s1 + $0x760] sm:$0xff] }
 0x110   : > { %1437 = vmatpush2.bf16.msra.mxu0 %v6320_v57  ;;  %1478 = vmatpush2.bf16.msra.mxu1 %v6322_v39  ;;  %v7921_v57 = vld [vmem:[%s7736_s1 + $0xdc0] sm:$0xff] }
 0x111   : > { %1438 = vmatprep.subr.bf16.mxu0 %v6313_v40  ;;  %1479 = vmatprep.subr.bf16.mxu1 %v6315_v41  ;;  %v1664_v39 = vld [vmem:[%s7736_s1 + $0x4c0] sm:$0xff] }
 0x112   : > { %v1668_v40 = vld [vmem:[%s7736_s1 + $0x4e0] sm:$0xff] }
 0x113   : > { %v7926_v41 = vld [vmem:[%s7736_s1 + $0xde0] sm:$0xff]  ;;  %v6500_v54 = vcombine.low %v1664_v39, %v1668_v40 }
 0x114   : > { %1439 = vmatpush2.bf16.msra.mxu0 %v6312_v46  ;;  %1480 = vmatpush2.bf16.msra.mxu1 %v6314_v47  ;;  %v6788_v44 = vcombine.low %v7921_v57, %v7926_v41  ;;  %v6373_v46 = vcombine.high %v1536_v34, %v1540_v35  ;;  %v6501_v47 = vcombine.high %v1664_v39, %v1668_v40  ;;  %v1612_v34 = vld [vmem:[%s7736_s1 + $0x320] sm:$0xff] }
 0x115   : > { %1440 = vmatprep.subr.bf16.mxu0 %v6305_v48  ;;  %1481 = vmatprep.subr.bf16.mxu1 %v6307_v49  ;;  %v1528_v48 = vld [vmem:[%s7736_s1 + $0x80] sm:$0xff]  ;;  %v6580_v40 = vcombine.low %v1744_v28, %v1748_v29 }
 0x116   : > { %v1532_v49 = vld [vmem:[%s7736_s1 + $0xa0] sm:$0xff] }
 0x117   : > { %v6364_v62 = vcombine.low %v1528_v48, %v1532_v49  ;;  %v1736_v35 = vld [vmem:[%s7736_s1 + $0x700] sm:$0xff] }
 0x118   : > { %1441 = vmatpush2.bf16.msra.mxu0 %v6304_v55  ;;  %1482 = vmatpush2.bf16.msra.mxu1 %v6306_v56  ;;  %v6365_v55 = vcombine.high %v1528_v48, %v1532_v49  ;;  %v6493_v56 = vcombine.high %v1656_v50, %v1660_v51  ;;  %v1728_v48 = vld [vmem:[%s7736_s1 + $0x6c0] sm:$0xff] }
 0x119   : > { %1442 = vmatprep.subr.bf16.mxu0 %v6297_v58  ;;  %1483 = vmatprep.subr.bf16.mxu1 %v6299_v59  ;;  %v1520_v58 = vld [vmem:[%s7736_s1 + $0x40] sm:$0xff] }
 0x11a   : > { %v1524_v59 = vld [vmem:[%s7736_s1 + $0x60] sm:$0xff] }
 0x11b   : > { %v6356_v6 = vcombine.low %v1520_v58, %v1524_v59  ;;  %v1732_v49 = vld [vmem:[%s7736_s1 + $0x6e0] sm:$0xff] }
 0x11c   : > { %1443 = vmatpush2.bf16.msra.mxu0 %v6296_v0  ;;  %1484 = vmatpush2.bf16.msra.mxu1 %v6298_v1  ;;  %v6357_v0 = vcombine.high %v1520_v58, %v1524_v59  ;;  %v6485_v1 = vcombine.high %v1648_v60, %v1652_v61  ;;  %v1720_v58 = vld [vmem:[%s7736_s1 + $0x680] sm:$0xff]  ;;  %v6564_v61 = vcombine.low %v1728_v48, %v1732_v49 }
 0x11d   : > { %1444 = vmatprep.subr.bf16.mxu0 %v6289_v2  ;;  %1485 = vmatprep.subr.bf16.mxu1 %v6291_v3  ;;  %v1512_v2 = vld [vmem:[%s7736_s1] sm:$0xff] }
 0x11e   : > { %v1516_v3 = vld [vmem:[%s7736_s1 + $0x20] sm:$0xff] }
 0x11f   : > { %v6348_v15 = vcombine.low %v1512_v2, %v1516_v3  ;;  %v1724_v59 = vld [vmem:[%s7736_s1 + $0x6a0] sm:$0xff] }
 0x120   : > { %1445 = vmatpush2.bf16.msra.mxu0 %v6288_v8  ;;  %1486 = vmatpush2.bf16.msra.mxu1 %v6290_v9  ;;  %v6349_v8 = vcombine.high %v1512_v2, %v1516_v3  ;;  %v6477_v9 = vcombine.high %v1640_v4, %v1644_v5  ;;  %v1712_v2 = vld [vmem:[%s7736_s1 + $0x640] sm:$0xff]  ;;  %v6556_v5 = vcombine.low %v1720_v58, %v1724_v59 }
 0x121   : > { %4626 = vmatprep.subr.bf16.mxu0 %v6405_v10  ;;  %4667 = vmatprep.subr.bf16.mxu1 %v6533_v11  ;;  %v1632_v10 = vld [vmem:[%s7736_s1 + $0x3c0] sm:$0xff] }
 0x122   : > { %v1636_v11 = vld [vmem:[%s7736_s1 + $0x3e0] sm:$0xff] }
 0x123   : > { %1447 = vmatmul.mubr.bf16.vlgmr.msra.gmra.mxu0 %v7832_v14  ;;  %1488 = vmatmul.mubr.bf16.vlgmr.msra.gmra.mxu1 %v7832_v14  ;;  %v6388_v14 = vcombine.low %v1552_v21, %v1556_v22  ;;  %v1752_v21 = vld [vmem:[%s7736_s1 + $0x780] sm:$0xff]  ;;  %v6468_v53 = vcombine.low %v1632_v10, %v1636_v11 }
 0x124   : > { %4627 = vmatpush1.bf16.msra.mxu0 %v6404_v17  ;;  %4668 = vmatpush1.bf16.msra.mxu1 %v6532_v18  ;;  %v6469_v17 = vcombine.high %v1632_v10, %v1636_v11  ;;  %v6597_v18 = vcombine.high %v1760_v12, %v1764_v13  ;;  %v1756_v22 = vld [vmem:[%s7736_s1 + $0x7a0] sm:$0xff] }
 0x125   : > { %4628 = vmatprep.subr.bf16.mxu0 %v6397_v19  ;;  %4669 = vmatprep.subr.bf16.mxu1 %v6525_v20  ;;  %v1624_v19 = vld [vmem:[%s7736_s1 + $0x380] sm:$0xff]  ;;  %v6588_v31 = vcombine.low %v1752_v21, %v1756_v22 }
 0x126   : > { %v1628_v20 = vld [vmem:[%s7736_s1 + $0x3a0] sm:$0xff] }
 0x127   : > { %v6460_v30 = vcombine.low %v1624_v19, %v1628_v20  ;;  %v1716_v3 = vld [vmem:[%s7736_s1 + $0x660] sm:$0xff] }
 0x128   : > { %4629 = vmatpush1.bf16.msra.mxu0 %v6396_v24  ;;  %4670 = vmatpush1.bf16.msra.mxu1 %v6524_v25  ;;  %v6461_v24 = vcombine.high %v1624_v19, %v1628_v20  ;;  %v6589_v25 = vcombine.high %v1752_v21, %v1756_v22  ;;  %v1704_v10 = vld [vmem:[%s7736_s1 + $0x600] sm:$0xff]  ;;  %v6548_v13 = vcombine.low %v1712_v2, %v1716_v3  ;;  %v645_v21 = vlaneseq }
 0x129   : > { %4630 = vmatprep.subr.bf16.mxu0 %v6389_v26  ;;  %4671 = vmatprep.subr.bf16.mxu1 %v6517_v27  ;;  %v1616_v26 = vld [vmem:[%s7736_s1 + $0x340] sm:$0xff]  ;;  %v6661_v19 = vcombine.high %v7915_v37, %v7918_v38  ;;  %v6789_v20 = vcombine.high %v7921_v57, %v7926_v41 }
 0x12a   : > { %v1620_v27 = vld [vmem:[%s7736_s1 + $0x360] sm:$0xff]  ;;  %v7980_v22 = vshrl.u32 %v645_v21, 7 }
 0x12b   : > { %v6452_v39 = vcombine.low %v1616_v26, %v1620_v27  ;;  %v1708_v11 = vld [vmem:[%s7736_s1 + $0x620] sm:$0xff] }
 0x12c   : > { %4631 = vmatpush1.bf16.msra.mxu0 %v6388_v14  ;;  %4672 = vmatpush1.bf16.msra.mxu1 %v6516_v32  ;;  %v6453_v14 = vcombine.high %v1616_v26, %v1620_v27  ;;  %v6581_v32 = vcombine.high %v1744_v28, %v1748_v29  ;;  %v659_v26 = vsub.s32 3, %v7980_v22  ;;  %v1916_v21 = vld [vmem:[%s7736_s1 + $0xca0] sm:$0xff] }
 0x12d   : > { %4632 = vmatprep.subr.bf16.mxu0 %v6381_v33  ;;  %4673 = vmatprep.subr.bf16.mxu1 %v6509_v36  ;;  %v1608_v33 = vld [vmem:[%s7736_s1 + $0x300] sm:$0xff] }
 0x12e   : > { %v1740_v36 = vld [vmem:[%s7736_s1 + $0x720] sm:$0xff]  ;;  %v6444_v50 = vcombine.low %v1608_v33, %v1612_v34 }
 0x12f   : > { %v6572_v51 = vcombine.low %v1736_v35, %v1740_v36 }
 0x130   : > { %4633 = vmatpush1.bf16.msra.mxu0 %v6380_v42  ;;  %4674 = vmatpush1.bf16.msra.mxu1 %v6508_v45  ;;  %v6445_v42 = vcombine.high %v1608_v33, %v1612_v34  ;;  %v6573_v45 = vcombine.high %v1736_v35, %v1740_v36 }
 0x131   : > { %4634 = vmatprep.subr.bf16.mxu0 %v6373_v46  ;;  %4675 = vmatprep.subr.bf16.mxu1 %v6501_v47  ;;  %v1600_v46 = vld [vmem:[%s7736_s1 + $0x2c0] sm:$0xff] }
 0x132   : > { %v1604_v47 = vld [vmem:[%s7736_s1 + $0x2e0] sm:$0xff] }
 0x133   : > { %v6436_v60 = vcombine.low %v1600_v46, %v1604_v47 }
 0x134   : > { %4635 = vmatpush1.bf16.msra.mxu0 %v6372_v52  ;;  %4676 = vmatpush1.bf16.msra.mxu1 %v6500_v54  ;;  %v6437_v52 = vcombine.high %v1600_v46, %v1604_v47  ;;  %v6565_v54 = vcombine.high %v1728_v48, %v1732_v49  ;;  %v1816_v48 = vld [vmem:[%s7736_s1 + $0x980] sm:$0xff] }
 0x135   : > { %4636 = vmatprep.subr.bf16.mxu0 %v6365_v55  ;;  %4677 = vmatprep.subr.bf16.mxu1 %v6493_v56  ;;  %v1592_v55 = vld [vmem:[%s7736_s1 + $0x280] sm:$0xff] }
 0x136   : > { %v1596_v56 = vld [vmem:[%s7736_s1 + $0x2a0] sm:$0xff] }
 0x137   : > { %v6428_v4 = vcombine.low %v1592_v55, %v1596_v56  ;;  %v1820_v49 = vld [vmem:[%s7736_s1 + $0x9a0] sm:$0xff] }
 0x138   : > { %4637 = vmatpush1.bf16.msra.mxu0 %v6364_v62  ;;  %4678 = vmatpush1.bf16.msra.mxu1 %v6492_v63  ;;  %v6429_v62 = vcombine.high %v1592_v55, %v1596_v56  ;;  %v6557_v63 = vcombine.high %v1720_v58, %v1724_v59 }
 0x139   : > { %4638 = vmatprep.subr.bf16.mxu0 %v6357_v0  ;;  %4679 = vmatprep.subr.bf16.mxu1 %v6485_v1  ;;  %v1584_v0 = vld [vmem:[%s7736_s1 + $0x240] sm:$0xff] }
 0x13a   : > { %v1588_v1 = vld [vmem:[%s7736_s1 + $0x260] sm:$0xff] }
 0x13b   : > { %v6420_v12 = vcombine.low %v1584_v0, %v1588_v1 }
 0x13c   : > { %4639 = vmatpush1.bf16.msra.mxu0 %v6356_v6  ;;  %4680 = vmatpush1.bf16.msra.mxu1 %v6484_v7  ;;  %v6421_v6 = vcombine.high %v1584_v0, %v1588_v1  ;;  %v6549_v7 = vcombine.high %v1712_v2, %v1716_v3  ;;  %v1812_v0 = vld [vmem:[%s7736_s1 + $0x960] sm:$0xff]  ;;  %v6652_v3 = vcombine.low %v1816_v48, %v1820_v49 }
 0x13d   : > { %4640 = vmatprep.subr.bf16.mxu0 %v6349_v8  ;;  %4681 = vmatprep.subr.bf16.mxu1 %v6477_v9  ;;  %v1576_v8 = vld [vmem:[%s7736_s1 + $0x200] sm:$0xff] }
 0x13e   : > { %v1580_v9 = vld [vmem:[%s7736_s1 + $0x220] sm:$0xff] }
 0x13f   : > { %v1936_v1 = vld [vmem:[%s7736_s1 + $0xd40] sm:$0xff] }
 0x140   : > { %4641 = vmatpush1.bf16.msra.mxu0 %v6348_v15  ;;  %4682 = vmatpush1.bf16.msra.mxu1 %v6476_v16  ;;  %v6413_v15 = vcombine.high %v1576_v8, %v1580_v9  ;;  %v6541_v16 = vcombine.high %v1704_v10, %v1708_v11  ;;  %v1940_v2 = vld [vmem:[%s7736_s1 + $0xd60] sm:$0xff] }
 0x141   : > { %4642 = vmatprep.subr.bf16.mxu0 %v6469_v17  ;;  %4683 = vmatprep.subr.bf16.mxu1 %v6597_v18  ;;  %v6412_v17 = vcombine.low %v1576_v8, %v1580_v9  ;;  %v6540_v18 = vcombine.low %v1704_v10, %v1708_v11  ;;  %v1804_v8 = vld [vmem:[%s7736_s1 + $0x920] sm:$0xff]  ;;  %v6772_v38 = vcombine.low %v1936_v1, %v1940_v2 }
 0x142   : > { %v1928_v9 = vld [vmem:[%s7736_s1 + $0xd00] sm:$0xff] }
 0x143   : > { %v1932_v10 = vld [vmem:[%s7736_s1 + $0xd20] sm:$0xff] }
 0x144   : > { %4643 = vmatpush2.bf16.msra.mxu0 %v6468_v53  ;;  %4684 = vmatpush2.bf16.msra.mxu1 %v6596_v23  ;;  %v647_v53 = vsub.s32 0, %v7980_v22  ;;  %v7985_v23 = vld [vmem:[%s423_s21] sm:$0xff]  ;;  %v6765_v41 = vcombine.high %v1928_v9, %v1932_v10  ;;  %v1920_v11 = vld [vmem:[%s7736_s1 + $0xcc0] sm:$0xff]  ;;  %s7391_s21 = scalar_lea.vmem %s7390_s0, 256 }
 0x145   : > { %4644 = vmatprep.subr.bf16.mxu0 %v6461_v24  ;;  %4685 = vmatprep.subr.bf16.mxu1 %v6589_v25  ;;  %v655_v24 = vsub.s32 2, %v7980_v22  ;;  %v651_v25 = vsub.s32 1, %v7980_v22  ;;  %p7393_p12 = scmp.lt.s32.totalorder %s7391_s21, %s7385_s10 }
 0x146   : > { %v648_v27 = vrot.slane %v7985_v23, %v647_v53 }
 0x147   : > { %v656_v28 = vrot.slane %v7985_v23, %v655_v24  ;;  %v652_v29 = vrot.slane %v7985_v23, %v651_v25  ;;  %p7394_p11 = por %p7393_p12, %p7392_p10 }
 0x148   : > { %4645 = vmatpush2.bf16.msra.mxu0 %v6460_v30  ;;  %4686 = vmatpush2.bf16.msra.mxu1 %v6588_v31  ;;  %v660_v31 = vrot.slane %v7985_v23, %v659_v26 }
 0x149   : > { %4646 = vmatprep.subr.bf16.mxu0 %v6453_v14  ;;  %4687 = vmatprep.subr.bf16.mxu1 %v6581_v32  ;;  %p7395_p5 = pnand %p7394_p11, %p7388_p6 }
 0x14c   : > { %4647 = vmatpush2.bf16.msra.mxu0 %v6452_v39  ;;  %4688 = vmatpush2.bf16.msra.mxu1 %v6580_v40 }
 0x14d   : > { %4648 = vmatprep.subr.bf16.mxu0 %v6445_v42  ;;  %4689 = vmatprep.subr.bf16.mxu1 %v6573_v45 }
 0x150   : > { %4649 = vmatpush2.bf16.msra.mxu0 %v6444_v50  ;;  %4690 = vmatpush2.bf16.msra.mxu1 %v6572_v51 }
 0x151   : > { %4650 = vmatprep.subr.bf16.mxu0 %v6437_v52  ;;  %4691 = vmatprep.subr.bf16.mxu1 %v6565_v54  ;;  %v1944_v52 = vld [vmem:[%s7736_s1 + $0xd80] sm:$0xff] }
 0x152   : > { %v1948_v54 = vld [vmem:[%s7736_s1 + $0xda0] sm:$0xff] }
 0x154   : > { %4651 = vmatpush2.bf16.msra.mxu0 %v6436_v60  ;;  %4692 = vmatpush2.bf16.msra.mxu1 %v6564_v61  ;;  %v6653_v61 = vcombine.high %v1816_v48, %v1820_v49 }
 0x155   : > { %4652 = vmatprep.subr.bf16.mxu0 %v6429_v62  ;;  %4693 = vmatprep.subr.bf16.mxu1 %v6557_v63  ;;  %v6781_v62 = vcombine.high %v1944_v52, %v1948_v54  ;;  %v1808_v63 = vld [vmem:[%s7736_s1 + $0x940] sm:$0xff] }
 0x156   : > { %v6644_v37 = vcombine.low %v1808_v63, %v1812_v0 }
 0x158   : > { %4653 = vmatpush2.bf16.msra.mxu0 %v6428_v4  ;;  %4694 = vmatpush2.bf16.msra.mxu1 %v6556_v5  ;;  %v6780_v4 = vcombine.low %v1944_v52, %v1948_v54  ;;  %v6645_v5 = vcombine.high %v1808_v63, %v1812_v0  ;;  %v1892_v52 = vld [vmem:[%s7736_s1 + $0xbe0] sm:$0xff] }
 0x159   : > { %4654 = vmatprep.subr.bf16.mxu0 %v6421_v6  ;;  %4695 = vmatprep.subr.bf16.mxu1 %v6549_v7  ;;  %v6773_v6 = vcombine.high %v1936_v1, %v1940_v2  ;;  %v1800_v7 = vld [vmem:[%s7736_s1 + $0x900] sm:$0xff] }
 0x15a   : > { %v6637_v57 = vcombine.high %v1800_v7, %v1804_v8  ;;  %v2016_v54 = vld [vmem:[%s7736_s1 + $0xfc0] sm:$0xff] }
 0x15b   : > { %v1880_v1 = vld [vmem:[%s7736_s1 + $0xb80] sm:$0xff] }
 0x15c   : > { %4655 = vmatpush2.bf16.msra.mxu0 %v6420_v12  ;;  %4696 = vmatpush2.bf16.msra.mxu1 %v6548_v13  ;;  %v1924_v12 = vld [vmem:[%s7736_s1 + $0xce0] sm:$0xff]  ;;  %v6636_v13 = vcombine.low %v1800_v7, %v1804_v8 }
 0x15d   : > { %4656 = vmatprep.subr.bf16.mxu0 %v6413_v15  ;;  %4697 = vmatprep.subr.bf16.mxu1 %v6541_v16  ;;  %v6764_v15 = vcombine.low %v1928_v9, %v1932_v10  ;;  %v1884_v2 = vld [vmem:[%s7736_s1 + $0xba0] sm:$0xff] }
 0x15e   : > { %v6717_v7 = vcombine.high %v1880_v1, %v1884_v2  ;;  %v1872_v9 = vld [vmem:[%s7736_s1 + $0xb40] sm:$0xff] }
 0x15f   : > { %v1876_v10 = vld [vmem:[%s7736_s1 + $0xb60] sm:$0xff] }
 0x160   : > { %4657 = vmatpush2.bf16.msra.mxu0 %v6412_v17  ;;  %4698 = vmatpush2.bf16.msra.mxu1 %v6540_v18  ;;  %v6757_v17 = vcombine.high %v1920_v11, %v1924_v12  ;;  %v1784_v18 = vld [vmem:[%s7736_s1 + $0x880] sm:$0xff] }
 0x161   : > { %4708 = vmatprep.subr.bf16.mxu0 %v6661_v19  ;;  %4749 = vmatprep.subr.bf16.mxu1 %v6789_v20  ;;  %v1788_v19 = vld [vmem:[%s7736_s1 + $0x8a0] sm:$0xff] }
 0x162   : > { %v1912_v20 = vld [vmem:[%s7736_s1 + $0xc80] sm:$0xff] }
 0x1a3   : > { %v1366_v30 = vpop.f32.mrf.mxu0  ;;  %v1407_v32 = vpop.f32.mrf.mxu1 }
 0x1a4   : > { %v1367_v14 = vadd.f32 %v1366_v30, %v648_v27  ;;  %v1408_v33 = vadd.f32 %v1407_v32, %v656_v28  ;;  %v6756_v28 = vcombine.low %v1920_v11, %v1924_v12  ;;  %v6749_v30 = vcombine.high %v1912_v20, %v1916_v21  ;;  %v1904_v32 = vld [vmem:[%s7736_s1 + $0xc40] sm:$0xff] }
 0x1a5   : > { %v1368_v34 = vpop.f32.mrf.mxu0  ;;  %v1409_v36 = vpop.f32.mrf.mxu1  ;;  %v1864_v11 = vld [vmem:[%s7736_s1 + $0xb00] sm:$0xff] }
 0x1a6   : > { %v1369_v35 = vadd.f32 %v1368_v34, %v652_v29  ;;  %v1496_v39 = vmax.f32 %v1367_v14, 0.0  ;;  %v1498_v40 = vmax.f32 %v1408_v33, 0.0  ;;  %v1410_v42 = vadd.f32 %v1409_v36, %v660_v31  ;;  %v1776_v31 = vld [vmem:[%s7736_s1 + $0x840] sm:$0xff] }
 0x1a7   : > { %v1370_v45 = vpop.f32.mrf.mxu0  ;;  %v1411_v47 = vpop.f32.mrf.mxu1  ;;  %v6621_v29 = vcombine.high %v1784_v18, %v1788_v19  ;;  %v1780_v14 = vld [vmem:[%s7736_s1 + $0x860] sm:$0xff]  ;;  %v6620_v34 = vcombine.low %v1784_v18, %v1788_v19 }
 0x1a8   : > { %v1497_v46 = vmax.f32 %v1369_v35, 0.0  ;;  %v1499_v50 = vmax.f32 %v1410_v42, 0.0  ;;  %v8006_v55 = vpack.c.bf16 %v1498_v40, %v1498_v40  ;;  %v8010_v59 = vpack.c.bf16 %v1496_v39, %v1496_v39  ;;  %v1908_v33 = vld [vmem:[%s7736_s1 + $0xc60] sm:$0xff] }
 0x1a9   : > { %v1371_v51 = vpop.f32.mrf.mxu0  ;;  %v1412_v58 = vpop.f32.mrf.mxu1  ;;  %v6748_v35 = vcombine.low %v1912_v20, %v1916_v21  ;;  %v6613_v36 = vcombine.high %v1776_v31, %v1780_v14  ;;  %v6741_v39 = vcombine.high %v1904_v32, %v1908_v33  ;;  %v1768_v40 = vld [vmem:[%s7736_s1 + $0x800] sm:$0xff]  ;;  %v6612_v47 = vcombine.low %v1776_v31, %v1780_v14 }
 0x1aa   : > { %v8008_v56 = vpack.c.bf16 %v1497_v46, %v1497_v46  ;;  %v8012_v60 = vpack.c.bf16 %v1499_v50, %v1499_v50  ;;  %v1772_v42 = vld [vmem:[%s7736_s1 + $0x820] sm:$0xff]  ;;  %v6740_v48 = vcombine.low %v1904_v32, %v1908_v33 }
 0x1ab   : > { %v1896_v45 = vld [vmem:[%s7736_s1 + $0xc00] sm:$0xff]  ;;  %v6605_v49 = vcombine.high %v1768_v40, %v1772_v42 }
 0x1ac   : > { %4658 = vmatprep.mubr.bf16.mxu0 %v8008_v56  ;;  %4699 = vmatprep.mubr.bf16.mxu1 %v8012_v60  ;;  %v1900_v46 = vld [vmem:[%s7736_s1 + $0xc20] sm:$0xff] }
 0x1ad   : > { %4659 = vmatmul.mubr.bf16.vlgmr.msra.gmra.mxu0 %v8010_v59  ;;  %4700 = vmatmul.mubr.bf16.vlgmr.msra.gmra.mxu1 %v8006_v55  ;;  %v6733_v50 = vcombine.high %v1896_v45, %v1900_v46  ;;  %v1888_v51 = vld [vmem:[%s7736_s1 + $0xbc0] sm:$0xff] }
 0x1ae   : > { %4709 = vmatpush1.bf16.msra.mxu0 %v6660_v43  ;;  %4750 = vmatpush1.bf16.msra.mxu1 %v6788_v44  ;;  %v1792_v43 = vld [vmem:[%s7736_s1 + $0x8c0] sm:$0xff]  ;;  %v6725_v63 = vcombine.high %v1888_v51, %v1892_v52 }
 0x1af   : > { %4710 = vmatprep.subr.bf16.mxu0 %v6653_v61  ;;  %4751 = vmatprep.subr.bf16.mxu1 %v6781_v62  ;;  %v1796_v44 = vld [vmem:[%s7736_s1 + $0x8e0] sm:$0xff]  ;;  %v6604_v61 = vcombine.low %v1768_v40, %v1772_v42  ;;  %v6732_v62 = vcombine.low %v1896_v45, %v1900_v46  ;;  %v663_v45 = vsub.s32 4, %v7980_v22 }
 0x1b0   : > { %v6629_v16 = vcombine.high %v1792_v43, %v1796_v44  ;;  %v6628_v27 = vcombine.low %v1792_v43, %v1796_v44  ;;  %v2020_v58 = vld [vmem:[%s7736_s1 + $0xfe0] sm:$0xff]  ;;  %v6709_v43 = vcombine.high %v1872_v9, %v1876_v10 }
 0x1b1   : > { %v6853_v0 = vcombine.high %v2016_v54, %v2020_v58  ;;  %v1868_v12 = vld [vmem:[%s7736_s1 + $0xb20] sm:$0xff] }
 0x1b2   : > { %4711 = vmatpush1.bf16.msra.mxu0 %v6652_v3  ;;  %4752 = vmatpush1.bf16.msra.mxu1 %v6780_v4  ;;  %v2008_v3 = vld [vmem:[%s7736_s1 + $0xf80] sm:$0xff]  ;;  %v6701_v18 = vcombine.high %v1864_v11, %v1868_v12 }
 0x1b3   : > { %4712 = vmatprep.subr.bf16.mxu0 %v6645_v5  ;;  %4753 = vmatprep.subr.bf16.mxu1 %v6773_v6  ;;  %v2012_v4 = vld [vmem:[%s7736_s1 + $0xfa0] sm:$0xff]  ;;  %v6724_v5 = vcombine.low %v1888_v51, %v1892_v52  ;;  %v6852_v6 = vcombine.low %v2016_v54, %v2020_v58  ;;  %v667_v52 = vsub.s32 5, %v7980_v22 }
 0x1b4   : > { %v6845_v8 = vcombine.high %v2008_v3, %v2012_v4  ;;  %v1856_v20 = vld [vmem:[%s7736_s1 + $0xac0] sm:$0xff] }
 0x1b5   : > { %v1860_v21 = vld [vmem:[%s7736_s1 + $0xae0] sm:$0xff] }
 0x1b6   : > { %4713 = vmatpush1.bf16.msra.mxu0 %v6644_v37  ;;  %4754 = vmatpush1.bf16.msra.mxu1 %v6772_v38  ;;  %v2000_v37 = vld [vmem:[%s7736_s1 + $0xf40] sm:$0xff]  ;;  %v6693_v31 = vcombine.high %v1856_v20, %v1860_v21 }
 0x1b7   : > { %4714 = vmatprep.subr.bf16.mxu0 %v6637_v57  ;;  %4755 = vmatprep.subr.bf16.mxu1 %v6765_v41  ;;  %v2004_v38 = vld [vmem:[%s7736_s1 + $0xf60] sm:$0xff]  ;;  %v6716_v57 = vcombine.low %v1880_v1, %v1884_v2  ;;  %v6844_v41 = vcombine.low %v2008_v3, %v2012_v4 }
 0x1b8   : > { %v6837_v44 = vcombine.high %v2000_v37, %v2004_v38  ;;  %v1848_v32 = vld [vmem:[%s7736_s1 + $0xa80] sm:$0xff] }
 0x1b9   : > { %v1852_v33 = vld [vmem:[%s7736_s1 + $0xaa0] sm:$0xff] }
 0x1ba   : > { %4715 = vmatpush1.bf16.msra.mxu0 %v6636_v13  ;;  %4756 = vmatpush1.bf16.msra.mxu1 %v6764_v15  ;;  %v1992_v13 = vld [vmem:[%s7736_s1 + $0xf00] sm:$0xff]  ;;  %v6685_v40 = vcombine.high %v1848_v32, %v1852_v33  ;;  %v6684_v51 = vcombine.low %v1848_v32, %v1852_v33  ;;  %v1561_v32 = vld [vmem:[%s7736_s1 + $0x188] sm:$0xff] }
 0x1bb   : > { %4716 = vmatprep.subr.bf16.mxu0 %v6629_v16  ;;  %4757 = vmatprep.subr.bf16.mxu1 %v6757_v17  ;;  %v1996_v15 = vld [vmem:[%s7736_s1 + $0xf20] sm:$0xff]  ;;  %v6708_v16 = vcombine.low %v1872_v9, %v1876_v10  ;;  %v6836_v17 = vcombine.low %v2000_v37, %v2004_v38  ;;  %v1565_v33 = vld [vmem:[%s7736_s1 + $0x1a8] sm:$0xff] }
 0x1bc   : > { %v6829_v19 = vcombine.high %v1992_v13, %v1996_v15  ;;  %v1840_v46 = vld [vmem:[%s7736_s1 + $0xa40] sm:$0xff] }
 0x1bd   : > { %v1836_v1 = vld [vmem:[%s7736_s1 + $0xa20] sm:$0xff] }
 0x1be   : > { %4717 = vmatpush1.bf16.msra.mxu0 %v6628_v27  ;;  %4758 = vmatpush1.bf16.msra.mxu1 %v6756_v28  ;;  %v1984_v27 = vld [vmem:[%s7736_s1 + $0xec0] sm:$0xff] }
 0x1bf   : > { %4718 = vmatprep.subr.bf16.mxu0 %v6621_v29  ;;  %4759 = vmatprep.subr.bf16.mxu1 %v6749_v30  ;;  %v1988_v28 = vld [vmem:[%s7736_s1 + $0xee0] sm:$0xff]  ;;  %v6700_v29 = vcombine.low %v1864_v11, %v1868_v12  ;;  %v6828_v30 = vcombine.low %v1992_v13, %v1996_v15  ;;  %v1697_v12 = vld [vmem:[%s7736_s1 + $0x5c8] sm:$0xff] }
 0x1c0   : > { %v6821_v14 = vcombine.high %v1984_v27, %v1988_v28  ;;  %v1960_v3 = vld [vmem:[%s7736_s1 + $0xe00] sm:$0xff]  ;;  %v1701_v13 = vld [vmem:[%s7736_s1 + $0x5e8] sm:$0xff] }
 0x1c1   : > { %v1964_v4 = vld [vmem:[%s7736_s1 + $0xe20] sm:$0xff] }
 0x1c2   : > { %4719 = vmatpush1.bf16.msra.mxu0 %v6620_v34  ;;  %4760 = vmatpush1.bf16.msra.mxu1 %v6748_v35  ;;  %v1976_v34 = vld [vmem:[%s7736_s1 + $0xe80] sm:$0xff] }
 0x1c3   : > { %4720 = vmatprep.subr.bf16.mxu0 %v6613_v36  ;;  %4761 = vmatprep.subr.bf16.mxu1 %v6741_v39  ;;  %v1980_v35 = vld [vmem:[%s7736_s1 + $0xea0] sm:$0xff]  ;;  %v6692_v36 = vcombine.low %v1856_v20, %v1860_v21  ;;  %v6820_v39 = vcombine.low %v1984_v27, %v1988_v28 }
 0x1c4   : > { %v6813_v42 = vcombine.high %v1976_v34, %v1980_v35  ;;  %v6812_v54 = vcombine.low %v1976_v34, %v1980_v35 }
 0x1c6   : > { %4721 = vmatpush1.bf16.msra.mxu0 %v6612_v47  ;;  %4762 = vmatpush1.bf16.msra.mxu1 %v6740_v48  ;;  %v1844_v47 = vld [vmem:[%s7736_s1 + $0xa60] sm:$0xff]  ;;  %v671_v48 = vsub.s32 6, %v7980_v22 }
 0x1c7   : > { %4722 = vmatprep.subr.bf16.mxu0 %v6605_v49  ;;  %4763 = vmatprep.subr.bf16.mxu1 %v6733_v50  ;;  %v1968_v49 = vld [vmem:[%s7736_s1 + $0xe40] sm:$0xff]  ;;  %v6677_v58 = vcombine.high %v1840_v46, %v1844_v47 }
 0x1c8   : > { %v1972_v50 = vld [vmem:[%s7736_s1 + $0xe60] sm:$0xff]  ;;  %v672_v2 = vrot.slane %v7985_v23, %v671_v48 }
 0x1ca   : > { %4723 = vmatpush1.bf16.msra.mxu0 %v6604_v61  ;;  %4764 = vmatpush1.bf16.msra.mxu1 %v6732_v62  ;;  %v675_v61 = vsub.s32 7, %v7980_v22  ;;  %v664_v62 = vrot.slane %v7985_v23, %v663_v45 }
 0x1cb   : > { %4724 = vmatprep.subr.bf16.mxu0 %v6725_v63  ;;  %4765 = vmatprep.subr.bf16.mxu1 %v6853_v0  ;;  %v6805_v63 = vcombine.high %v1968_v49, %v1972_v50  ;;  %v1832_v0 = vld [vmem:[%s7736_s1 + $0xa00] sm:$0xff] }
 0x1cc   : > { %v676_v9 = vrot.slane %v7985_v23, %v675_v61  ;;  %v6669_v10 = vcombine.high %v1832_v0, %v1836_v1 }
 0x1ce   : > { %4725 = vmatpush2.bf16.msra.mxu0 %v6724_v5  ;;  %4766 = vmatpush2.bf16.msra.mxu1 %v6852_v6  ;;  %v6676_v5 = vcombine.low %v1840_v46, %v1844_v47  ;;  %v668_v6 = vrot.slane %v7985_v23, %v667_v52 }
 0x1cf   : > { %4726 = vmatprep.subr.bf16.mxu0 %v6717_v7  ;;  %4767 = vmatprep.subr.bf16.mxu1 %v6845_v8  ;;  %v6804_v8 = vcombine.low %v1968_v49, %v1972_v50  ;;  %v6534_v49 = vcombine.low %v1697_v12, %v1701_v13  ;;  %v6399_v50 = vcombine.high %v1561_v32, %v1565_v33 }
 0x1d2   : > { %4727 = vmatpush2.bf16.msra.mxu0 %v6716_v57  ;;  %4768 = vmatpush2.bf16.msra.mxu1 %v6844_v41  ;;  %v6797_v57 = vcombine.high %v1960_v3, %v1964_v4  ;;  %v1569_v41 = vld [vmem:[%s7736_s1 + $0x1c8] sm:$0xff] }
 0x1d3   : > { %4728 = vmatprep.subr.bf16.mxu0 %v6709_v43  ;;  %4769 = vmatprep.subr.bf16.mxu1 %v6837_v44  ;;  %v1573_v43 = vld [vmem:[%s7736_s1 + $0x1e8] sm:$0xff] }
 0x1d4   : > { %v6407_v27 = vcombine.high %v1569_v41, %v1573_v43 }
 0x1d6   : > { %4729 = vmatpush2.bf16.msra.mxu0 %v6708_v16  ;;  %4770 = vmatpush2.bf16.msra.mxu1 %v6836_v17  ;;  %v6668_v17 = vcombine.low %v1832_v0, %v1836_v1  ;;  %v6398_v0 = vcombine.low %v1561_v32, %v1565_v33 }
 0x1d7   : > { %4730 = vmatprep.subr.bf16.mxu0 %v6701_v18  ;;  %4771 = vmatprep.subr.bf16.mxu1 %v6829_v19  ;;  %v6796_v18 = vcombine.low %v1960_v3, %v1964_v4  ;;  %v1545_v4 = vld [vmem:[%s7736_s1 + $0x108] sm:$0xff] }
 0x1da   : > { %4731 = vmatpush2.bf16.msra.mxu0 %v6700_v29  ;;  %4772 = vmatpush2.bf16.msra.mxu1 %v6828_v30  ;;  %v6535_v30 = vcombine.high %v1697_v12, %v1701_v13 }
 0x1db   : > { %4732 = vmatprep.subr.bf16.mxu0 %v6693_v31  ;;  %4773 = vmatprep.subr.bf16.mxu1 %v6821_v14 }
 0x1de   : > { %4733 = vmatpush2.bf16.msra.mxu0 %v6692_v36  ;;  %4774 = vmatpush2.bf16.msra.mxu1 %v6820_v39  ;;  %v6406_v39 = vcombine.low %v1569_v41, %v1573_v43  ;;  %v1665_v41 = vld [vmem:[%s7736_s1 + $0x4c8] sm:$0xff] }
 0x1df   : > { %4734 = vmatprep.subr.bf16.mxu0 %v6685_v40  ;;  %4775 = vmatprep.subr.bf16.mxu1 %v6813_v42  ;;  %v1689_v40 = vld [vmem:[%s7736_s1 + $0x588] sm:$0xff] }
 0x1e0   : > { %v1693_v42 = vld [vmem:[%s7736_s1 + $0x5a8] sm:$0xff] }
 0x1e1   : > { %v6526_v1 = vcombine.low %v1689_v40, %v1693_v42  ;;  %v1669_v43 = vld [vmem:[%s7736_s1 + $0x4e8] sm:$0xff] }
 0x1e2   : > { %4735 = vmatpush2.bf16.msra.mxu0 %v6684_v51  ;;  %4776 = vmatpush2.bf16.msra.mxu1 %v6812_v54  ;;  %v1553_v51 = vld [vmem:[%s7736_s1 + $0x148] sm:$0xff]  ;;  %v6503_v13 = vcombine.high %v1665_v41, %v1669_v43 }
 0x1e3   : > { %v1448_v7 = vpop.f32.mrf.mxu0  ;;  %4736 = vmatprep.subr.bf16.mxu0 %v6677_v58  ;;  %v1489_v38 = vpop.f32.mrf.mxu1  ;;  %4777 = vmatprep.subr.bf16.mxu1 %v6805_v63  ;;  %v1557_v54 = vld [vmem:[%s7736_s1 + $0x168] sm:$0xff]  ;;  %v6527_v58 = vcombine.high %v1689_v40, %v1693_v42 }
 0x1e4   : > { %v1449_v37 = vadd.f32 %v1448_v7, %v664_v62  ;;  %v1490_v44 = vadd.f32 %v1489_v38, %v672_v2  ;;  %v1681_v62 = vld [vmem:[%s7736_s1 + $0x548] sm:$0xff]  ;;  %v6391_v2 = vcombine.high %v1553_v51, %v1557_v54 }
 0x1e5   : > { %v1450_v11 = vpop.f32.mrf.mxu0  ;;  %v1491_v16 = vpop.f32.mrf.mxu1  ;;  %v1685_v63 = vld [vmem:[%s7736_s1 + $0x568] sm:$0xff] }
 0x1e6   : > { %v1451_v15 = vadd.f32 %v1450_v11, %v668_v6  ;;  %4737 = vmatpush2.bf16.msra.mxu0 %v6676_v5  ;;  %v1500_v19 = vmax.f32 %v1449_v37, 0.0  ;;  %v1502_v23 = vmax.f32 %v1490_v44, 0.0  ;;  %v1492_v20 = vadd.f32 %v1491_v16, %v676_v9  ;;  %4778 = vmatpush2.bf16.msra.mxu1 %v6804_v8  ;;  %v1549_v5 = vld [vmem:[%s7736_s1 + $0x128] sm:$0xff] }
 0x1e7   : > { %v1452_v21 = vpop.f32.mrf.mxu0  ;;  %4738 = vmatprep.subr.bf16.mxu0 %v6669_v10  ;;  %v1493_v29 = vpop.f32.mrf.mxu1  ;;  %4779 = vmatprep.subr.bf16.mxu1 %v6797_v57  ;;  %v6519_v3 = vcombine.high %v1681_v62, %v1685_v63  ;;  %v1673_v6 = vld [vmem:[%s7736_s1 + $0x508] sm:$0xff]  ;;  %v6390_v8 = vcombine.low %v1553_v51, %v1557_v54  ;;  %v6518_v9 = vcombine.low %v1681_v62, %v1685_v63 }
 0x1e8   : > { %v1501_v28 = vmax.f32 %v1451_v15, 0.0  ;;  %v1503_v31 = vmax.f32 %v1492_v20, 0.0  ;;  %v8102_v34 = vpack.c.bf16 %v1502_v23, %v1502_v23  ;;  %v8108_v46 = vpack.c.bf16 %v1500_v19, %v1500_v19  ;;  %v1677_v7 = vld [vmem:[%s7736_s1 + $0x528] sm:$0xff] }
 0x1e9   : > { %v1453_v14 = vpop.f32.mrf.mxu0  ;;  %v1494_v36 = vpop.f32.mrf.mxu1  ;;  %v6383_v10 = vcombine.high %v1545_v4, %v1549_v5  ;;  %v6511_v37 = vcombine.high %v1673_v6, %v1677_v7  ;;  %v1537_v38 = vld [vmem:[%s7736_s1 + $0xc8] sm:$0xff]  ;;  %v6382_v44 = vcombine.low %v1545_v4, %v1549_v5  ;;  %v6510_v11 = vcombine.low %v1673_v6, %v1677_v7 }
 0x1ea   : > { %v8104_v35 = vpack.c.bf16 %v1501_v28, %v1501_v28  ;;  %4739 = vmatpush2.bf16.msra.mxu0 %v6668_v17  ;;  %v8110_v47 = vpack.c.bf16 %v1503_v31, %v1503_v31  ;;  %4780 = vmatpush2.bf16.msra.mxu1 %v6796_v18  ;;  %v1541_v57 = vld [vmem:[%s7736_s1 + $0xe8] sm:$0xff]  ;;  %v6502_v23 = vcombine.low %v1665_v41, %v1669_v43 }
 0x1eb   : > { %4790 = vmatprep.subr.bf16.mxu0 %v6407_v27  ;;  %4831 = vmatprep.subr.bf16.mxu1 %v6535_v30  ;;  %v6375_v12 = vcombine.high %v1537_v38, %v1541_v57  ;;  %v1529_v15 = vld [vmem:[%s7736_s1 + $0x88] sm:$0xff]  ;;  %v6374_v19 = vcombine.low %v1537_v38, %v1541_v57 }
 0x1ec   : > { %4740 = vmatprep.mubr.bf16.mxu0 %v8104_v35  ;;  %4781 = vmatprep.mubr.bf16.mxu1 %v8110_v47  ;;  %v1533_v16 = vld [vmem:[%s7736_s1 + $0xa8] sm:$0xff] }
 0x1ed   : > { %4741 = vmatmul.mubr.bf16.vlgmr.msra.gmra.mxu0 %v8108_v46  ;;  %4782 = vmatmul.mubr.bf16.vlgmr.msra.gmra.mxu1 %v8102_v34  ;;  %v1657_v17 = vld [vmem:[%s7736_s1 + $0x488] sm:$0xff]  ;;  %v6367_v20 = vcombine.high %v1529_v15, %v1533_v16  ;;  %v6366_v31 = vcombine.low %v1529_v15, %v1533_v16 }
 0x1ee   : > { %4791 = vmatpush1.bf16.msra.mxu0 %v6406_v39  ;;  %4832 = vmatpush1.bf16.msra.mxu1 %v6534_v49  ;;  %v1661_v18 = vld [vmem:[%s7736_s1 + $0x4a8] sm:$0xff] }
 0x1ef   : > { %4822 = vmatprep.mubr.bf16.mxu0 %v8008_v56  ;;  %4863 = vmatprep.mubr.bf16.mxu1 %v8012_v60  ;;  %v6495_v21 = vcombine.high %v1657_v17, %v1661_v18  ;;  %v1521_v27 = vld [vmem:[%s7736_s1 + $0x48] sm:$0xff]  ;;  %v6494_v14 = vcombine.low %v1657_v17, %v1661_v18 }
 0x1f0   : > { %4792 = vmatprep.subr.bf16.mxu0 %v6399_v50  ;;  %4833 = vmatprep.subr.bf16.mxu1 %v6527_v58  ;;  %v1525_v28 = vld [vmem:[%s7736_s1 + $0x68] sm:$0xff] }
 0x1f1   : > { %v1649_v29 = vld [vmem:[%s7736_s1 + $0x448] sm:$0xff]  ;;  %v6359_v32 = vcombine.high %v1521_v27, %v1525_v28  ;;  %v6358_v49 = vcombine.low %v1521_v27, %v1525_v28 }
 0x1f2   : > { %4793 = vmatpush1.bf16.msra.mxu0 %v6398_v0  ;;  %4834 = vmatpush1.bf16.msra.mxu1 %v6526_v1  ;;  %v1653_v30 = vld [vmem:[%s7736_s1 + $0x468] sm:$0xff] }
 0x1f3   : > { %4794 = vmatprep.subr.bf16.mxu0 %v6391_v2  ;;  %4835 = vmatprep.subr.bf16.mxu1 %v6519_v3  ;;  %v6487_v33 = vcombine.high %v1649_v29, %v1653_v30  ;;  %v1513_v36 = vld [vmem:[%s7736_s1 + $0x8] sm:$0xff]  ;;  %v6486_v50 = vcombine.low %v1649_v29, %v1653_v30 }
 0x1f4   : > { %v1517_v39 = vld [vmem:[%s7736_s1 + $0x28] sm:$0xff] }
 0x1f5   : > { %v1641_v40 = vld [vmem:[%s7736_s1 + $0x408] sm:$0xff]  ;;  %v6351_v51 = vcombine.high %v1513_v36, %v1517_v39  ;;  %v6350_v1 = vcombine.low %v1513_v36, %v1517_v39 }
 0x1f6   : > { %4795 = vmatpush1.bf16.msra.mxu0 %v6390_v8  ;;  %4836 = vmatpush1.bf16.msra.mxu1 %v6518_v9  ;;  %v1645_v42 = vld [vmem:[%s7736_s1 + $0x428] sm:$0xff] }
 0x1f7   : > { %4796 = vmatprep.subr.bf16.mxu0 %v6383_v10  ;;  %4837 = vmatprep.subr.bf16.mxu1 %v6511_v37  ;;  %v6479_v54 = vcombine.high %v1641_v40, %v1645_v42  ;;  %v1633_v58 = vld [vmem:[%s7736_s1 + $0x3c8] sm:$0xff]  ;;  %v6478_v2 = vcombine.low %v1641_v40, %v1645_v42 }
 0x1f8   : > { %v1637_v62 = vld [vmem:[%s7736_s1 + $0x3e8] sm:$0xff] }
 0x1f9   : > { %v1761_v63 = vld [vmem:[%s7736_s1 + $0x7c8] sm:$0xff]  ;;  %v6471_v3 = vcombine.high %v1633_v58, %v1637_v62  ;;  %v6470_v9 = vcombine.low %v1633_v58, %v1637_v62 }
 0x1fa   : > { %4797 = vmatpush1.bf16.msra.mxu0 %v6382_v44  ;;  %4838 = vmatpush1.bf16.msra.mxu1 %v6510_v11  ;;  %v1765_v0 = vld [vmem:[%s7736_s1 + $0x7e8] sm:$0xff] }
 0x1fb   : > { %4798 = vmatprep.subr.bf16.mxu0 %v6375_v12  ;;  %4839 = vmatprep.subr.bf16.mxu1 %v6503_v13  ;;  %v6599_v4 = vcombine.high %v1761_v63, %v1765_v0  ;;  %v1625_v5 = vld [vmem:[%s7736_s1 + $0x388] sm:$0xff]  ;;  %v6598_v10 = vcombine.low %v1761_v63, %v1765_v0 }
 0x1fc   : > { %v1629_v6 = vld [vmem:[%s7736_s1 + $0x3a8] sm:$0xff] }
 0x1fd   : > { %v1753_v7 = vld [vmem:[%s7736_s1 + $0x788] sm:$0xff]  ;;  %v6463_v37 = vcombine.high %v1625_v5, %v1629_v6  ;;  %v6462_v11 = vcombine.low %v1625_v5, %v1629_v6 }
 0x1fe   : > { %4799 = vmatpush1.bf16.msra.mxu0 %v6374_v19  ;;  %4840 = vmatpush1.bf16.msra.mxu1 %v6502_v23  ;;  %v1757_v8 = vld [vmem:[%s7736_s1 + $0x7a8] sm:$0xff] }
 0x1ff   : > { %4800 = vmatprep.subr.bf16.mxu0 %v6367_v20  ;;  %4841 = vmatprep.subr.bf16.mxu1 %v6495_v21  ;;  %v6591_v38 = vcombine.high %v1753_v7, %v1757_v8  ;;  %v1617_v57 = vld [vmem:[%s7736_s1 + $0x348] sm:$0xff]  ;;  %v6590_v12 = vcombine.low %v1753_v7, %v1757_v8 }
 0x200   : > { %v1621_v41 = vld [vmem:[%s7736_s1 + $0x368] sm:$0xff] }
 0x201   : > { %v1745_v43 = vld [vmem:[%s7736_s1 + $0x748] sm:$0xff]  ;;  %v6455_v13 = vcombine.high %v1617_v57, %v1621_v41  ;;  %v6454_v23 = vcombine.low %v1617_v57, %v1621_v41 }
 0x202   : > { %4801 = vmatpush1.bf16.msra.mxu0 %v6366_v31  ;;  %4842 = vmatpush1.bf16.msra.mxu1 %v6494_v14  ;;  %v1749_v44 = vld [vmem:[%s7736_s1 + $0x768] sm:$0xff] }
 0x203   : > { %4802 = vmatprep.subr.bf16.mxu0 %v6359_v32  ;;  %4843 = vmatprep.subr.bf16.mxu1 %v6487_v33  ;;  %v6583_v15 = vcombine.high %v1745_v43, %v1749_v44  ;;  %v1609_v16 = vld [vmem:[%s7736_s1 + $0x308] sm:$0xff]  ;;  %v6582_v20 = vcombine.low %v1745_v43, %v1749_v44 }
 0x204   : > { %v1613_v17 = vld [vmem:[%s7736_s1 + $0x328] sm:$0xff] }
 0x205   : > { %v1737_v18 = vld [vmem:[%s7736_s1 + $0x708] sm:$0xff]  ;;  %v6447_v21 = vcombine.high %v1609_v16, %v1613_v17  ;;  %v6446_v14 = vcombine.low %v1609_v16, %v1613_v17 }
 0x206   : > { %4803 = vmatpush1.bf16.msra.mxu0 %v6358_v49  ;;  %4844 = vmatpush1.bf16.msra.mxu1 %v6486_v50  ;;  %v1741_v19 = vld [vmem:[%s7736_s1 + $0x728] sm:$0xff] }
 0x207   : > { %4804 = vmatprep.subr.bf16.mxu0 %v6351_v51  ;;  %4845 = vmatprep.subr.bf16.mxu1 %v6479_v54  ;;  %v6575_v27 = vcombine.high %v1737_v18, %v1741_v19  ;;  %v1601_v28 = vld [vmem:[%s7736_s1 + $0x2c8] sm:$0xff]  ;;  %v6574_v32 = vcombine.low %v1737_v18, %v1741_v19 }
 0x208   : > { %v1605_v29 = vld [vmem:[%s7736_s1 + $0x2e8] sm:$0xff] }
 0x209   : > { %v1729_v30 = vld [vmem:[%s7736_s1 + $0x6c8] sm:$0xff]  ;;  %v6439_v33 = vcombine.high %v1601_v28, %v1605_v29  ;;  %v6438_v50 = vcombine.low %v1601_v28, %v1605_v29 }
 0x20a   : > { %4805 = vmatpush1.bf16.msra.mxu0 %v6350_v1  ;;  %4846 = vmatpush1.bf16.msra.mxu1 %v6478_v2  ;;  %v1733_v31 = vld [vmem:[%s7736_s1 + $0x6e8] sm:$0xff] }
 0x20b   : > { %4806 = vmatprep.subr.bf16.mxu0 %v6471_v3  ;;  %4847 = vmatprep.subr.bf16.mxu1 %v6599_v4  ;;  %v6567_v36 = vcombine.high %v1729_v30, %v1733_v31  ;;  %v1593_v39 = vld [vmem:[%s7736_s1 + $0x288] sm:$0xff]  ;;  %v6566_v51 = vcombine.low %v1729_v30, %v1733_v31 }
 0x20c   : > { %v1597_v40 = vld [vmem:[%s7736_s1 + $0x2a8] sm:$0xff] }
 0x20d   : > { %v1721_v42 = vld [vmem:[%s7736_s1 + $0x688] sm:$0xff]  ;;  %v6431_v54 = vcombine.high %v1593_v39, %v1597_v40  ;;  %v6430_v2 = vcombine.low %v1593_v39, %v1597_v40 }
 0x20e   : > { %4807 = vmatpush2.bf16.msra.mxu0 %v6470_v9  ;;  %4848 = vmatpush2.bf16.msra.mxu1 %v6598_v10  ;;  %v1725_v49 = vld [vmem:[%s7736_s1 + $0x6a8] sm:$0xff] }
 0x20f   : > { %4808 = vmatprep.subr.bf16.mxu0 %v6463_v37  ;;  %4849 = vmatprep.subr.bf16.mxu1 %v6591_v38  ;;  %v6559_v58 = vcombine.high %v1721_v42, %v1725_v49  ;;  %v1585_v62 = vld [vmem:[%s7736_s1 + $0x248] sm:$0xff]  ;;  %v6558_v3 = vcombine.low %v1721_v42, %v1725_v49 }
 0x210   : > { %v1589_v63 = vld [vmem:[%s7736_s1 + $0x268] sm:$0xff] }
 0x211   : > { %v1713_v0 = vld [vmem:[%s7736_s1 + $0x648] sm:$0xff]  ;;  %v6423_v4 = vcombine.high %v1585_v62, %v1589_v63  ;;  %v6422_v10 = vcombine.low %v1585_v62, %v1589_v63 }
 0x212   : > { %4809 = vmatpush2.bf16.msra.mxu0 %v6462_v11  ;;  %4850 = vmatpush2.bf16.msra.mxu1 %v6590_v12  ;;  %v1717_v1 = vld [vmem:[%s7736_s1 + $0x668] sm:$0xff] }
 0x213   : > { %4810 = vmatprep.subr.bf16.mxu0 %v6455_v13  ;;  %4851 = vmatprep.subr.bf16.mxu1 %v6583_v15  ;;  %v6551_v5 = vcombine.high %v1713_v0, %v1717_v1  ;;  %v1577_v6 = vld [vmem:[%s7736_s1 + $0x208] sm:$0xff]  ;;  %v6550_v37 = vcombine.low %v1713_v0, %v1717_v1 }
 0x214   : > { %v1581_v7 = vld [vmem:[%s7736_s1 + $0x228] sm:$0xff] }
 0x215   : > { %v1705_v8 = vld [vmem:[%s7736_s1 + $0x608] sm:$0xff]  ;;  %v6415_v38 = vcombine.high %v1577_v6, %v1581_v7  ;;  %v6414_v12 = vcombine.low %v1577_v6, %v1581_v7 }
 0x216   : > { %4811 = vmatpush2.bf16.msra.mxu0 %v6454_v23  ;;  %4852 = vmatpush2.bf16.msra.mxu1 %v6582_v20  ;;  %v1709_v9 = vld [vmem:[%s7736_s1 + $0x628] sm:$0xff] }
 0x217   : > { %4812 = vmatprep.subr.bf16.mxu0 %v6447_v21  ;;  %4853 = vmatprep.subr.bf16.mxu1 %v6575_v27  ;;  %v6543_v57 = vcombine.high %v1705_v8, %v1709_v9  ;;  %v1825_v41 = vld [vmem:[%s7736_s1 + $0x9c8] sm:$0xff]  ;;  %v6542_v13 = vcombine.low %v1705_v8, %v1709_v9 }
 0x218   : > { %v1829_v43 = vld [vmem:[%s7736_s1 + $0x9e8] sm:$0xff] }
 0x219   : > { %v1953_v44 = vld [vmem:[%s7736_s1 + $0xdc8] sm:$0xff]  ;;  %v6663_v15 = vcombine.high %v1825_v41, %v1829_v43  ;;  %v6662_v19 = vcombine.low %v1825_v41, %v1829_v43 }
 0x21a   : > { %4813 = vmatpush2.bf16.msra.mxu0 %v6446_v14  ;;  %4854 = vmatpush2.bf16.msra.mxu1 %v6574_v32  ;;  %v1957_v11 = vld [vmem:[%s7736_s1 + $0xde8] sm:$0xff] }
 0x21b   : > { %4814 = vmatprep.subr.bf16.mxu0 %v6439_v33  ;;  %4855 = vmatprep.subr.bf16.mxu1 %v6567_v36  ;;  %v6791_v16 = vcombine.high %v1953_v44, %v1957_v11  ;;  %v1817_v17 = vld [vmem:[%s7736_s1 + $0x988] sm:$0xff]  ;;  %v6790_v21 = vcombine.low %v1953_v44, %v1957_v11 }
 0x21c   : > { %v1821_v18 = vld [vmem:[%s7736_s1 + $0x9a8] sm:$0xff] }
 0x21d   : > { %v1945_v23 = vld [vmem:[%s7736_s1 + $0xd88] sm:$0xff]  ;;  %v6655_v27 = vcombine.high %v1817_v17, %v1821_v18  ;;  %v6654_v32 = vcombine.low %v1817_v17, %v1821_v18 }
 0x21e   : > { %4815 = vmatpush2.bf16.msra.mxu0 %v6438_v50  ;;  %4856 = vmatpush2.bf16.msra.mxu1 %v6566_v51  ;;  %v1949_v20 = vld [vmem:[%s7736_s1 + $0xda8] sm:$0xff] }
 0x21f   : > { %4816 = vmatprep.subr.bf16.mxu0 %v6431_v54  ;;  %4857 = vmatprep.subr.bf16.mxu1 %v6559_v58  ;;  %v1809_v28 = vld [vmem:[%s7736_s1 + $0x948] sm:$0xff]  ;;  %v6783_v30 = vcombine.high %v1945_v23, %v1949_v20  ;;  %v6782_v33 = vcombine.low %v1945_v23, %v1949_v20 }
 0x220   : > { %v1813_v29 = vld [vmem:[%s7736_s1 + $0x968] sm:$0xff] }
 0x221   : > { %v1937_v31 = vld [vmem:[%s7736_s1 + $0xd48] sm:$0xff]  ;;  %v6647_v36 = vcombine.high %v1809_v28, %v1813_v29  ;;  %v6646_v51 = vcombine.low %v1809_v28, %v1813_v29 }
 0x222   : > { %4817 = vmatpush2.bf16.msra.mxu0 %v6430_v2  ;;  %4858 = vmatpush2.bf16.msra.mxu1 %v6558_v3  ;;  %v1941_v14 = vld [vmem:[%s7736_s1 + $0xd68] sm:$0xff] }
 0x223   : > { %4818 = vmatprep.subr.bf16.mxu0 %v6423_v4  ;;  %4859 = vmatprep.subr.bf16.mxu1 %v6551_v5  ;;  %v6775_v39 = vcombine.high %v1937_v31, %v1941_v14  ;;  %v1801_v40 = vld [vmem:[%s7736_s1 + $0x908] sm:$0xff]  ;;  %v6774_v54 = vcombine.low %v1937_v31, %v1941_v14 }
 0x224   : > { %v1805_v42 = vld [vmem:[%s7736_s1 + $0x928] sm:$0xff] }
 0x225   : > { %v1929_v49 = vld [vmem:[%s7736_s1 + $0xd08] sm:$0xff]  ;;  %v6639_v58 = vcombine.high %v1801_v40, %v1805_v42  ;;  %v6638_v3 = vcombine.low %v1801_v40, %v1805_v42 }
 0x226   : > { %4819 = vmatpush2.bf16.msra.mxu0 %v6422_v10  ;;  %4860 = vmatpush2.bf16.msra.mxu1 %v6550_v37  ;;  %v1933_v50 = vld [vmem:[%s7736_s1 + $0xd28] sm:$0xff] }
 0x227   : > { %4820 = vmatprep.subr.bf16.mxu0 %v6415_v38  ;;  %4861 = vmatprep.subr.bf16.mxu1 %v6543_v57  ;;  %v6767_v62 = vcombine.high %v1929_v49, %v1933_v50  ;;  %v1793_v63 = vld [vmem:[%s7736_s1 + $0x8c8] sm:$0xff]  ;;  %v6766_v4 = vcombine.low %v1929_v49, %v1933_v50 }
 0x228   : > { %v1797_v0 = vld [vmem:[%s7736_s1 + $0x8e8] sm:$0xff] }
 0x229   : > { %v1921_v1 = vld [vmem:[%s7736_s1 + $0xcc8] sm:$0xff]  ;;  %v6631_v5 = vcombine.high %v1793_v63, %v1797_v0  ;;  %v6630_v37 = vcombine.low %v1793_v63, %v1797_v0 }
 0x22a   : > { %4821 = vmatpush2.bf16.msra.mxu0 %v6414_v12  ;;  %4862 = vmatpush2.bf16.msra.mxu1 %v6542_v13  ;;  %v1925_v2 = vld [vmem:[%s7736_s1 + $0xce8] sm:$0xff] }
 0x22b   : > { %4872 = vmatprep.subr.bf16.mxu0 %v6663_v15  ;;  %4913 = vmatprep.subr.bf16.mxu1 %v6791_v16  ;;  %v6759_v6 = vcombine.high %v1921_v1, %v1925_v2  ;;  %v1785_v7 = vld [vmem:[%s7736_s1 + $0x888] sm:$0xff]  ;;  %v6758_v38 = vcombine.low %v1921_v1, %v1925_v2 }
 0x22c   : > { %v1789_v8 = vld [vmem:[%s7736_s1 + $0x8a8] sm:$0xff] }
 0x22d   : > { %4823 = vmatmul.mubr.bf16.vlgmr.msra.gmra.mxu0 %v8010_v59  ;;  %4864 = vmatmul.mubr.bf16.vlgmr.msra.gmra.mxu1 %v8006_v55  ;;  %v1913_v9 = vld [vmem:[%s7736_s1 + $0xc88] sm:$0xff]  ;;  %v6623_v57 = vcombine.high %v1785_v7, %v1789_v8  ;;  %v6622_v13 = vcombine.low %v1785_v7, %v1789_v8 }
 0x22e   : > { %4873 = vmatpush1.bf16.msra.mxu0 %v6662_v19  ;;  %4904 = vmatprep.mubr.bf16.mxu0 %v8104_v35  ;;  %v1917_v10 = vld [vmem:[%s7736_s1 + $0xca8] sm:$0xff] }
 0x22f   : > { %4914 = vmatpush1.bf16.msra.mxu1 %v6790_v21  ;;  %4945 = vmatprep.mubr.bf16.mxu1 %v8110_v47  ;;  %v6751_v41 = vcombine.high %v1913_v9, %v1917_v10  ;;  %v1777_v43 = vld [vmem:[%s7736_s1 + $0x848] sm:$0xff]  ;;  %v6750_v15 = vcombine.low %v1913_v9, %v1917_v10 }
 0x230   : > { %4874 = vmatprep.subr.bf16.mxu0 %v6655_v27  ;;  %4915 = vmatprep.subr.bf16.mxu1 %v6783_v30  ;;  %v1781_v44 = vld [vmem:[%s7736_s1 + $0x868] sm:$0xff] }
 0x231   : > { %v1905_v11 = vld [vmem:[%s7736_s1 + $0xc48] sm:$0xff]  ;;  %v6615_v16 = vcombine.high %v1777_v43, %v1781_v44  ;;  %v6614_v21 = vcombine.low %v1777_v43, %v1781_v44 }
 0x232   : > { %4875 = vmatpush1.bf16.msra.mxu0 %v6654_v32  ;;  %v1909_v12 = vld [vmem:[%s7736_s1 + $0xc68] sm:$0xff] }
 0x233   : > { %4916 = vmatpush1.bf16.msra.mxu1 %v6782_v33  ;;  %4876 = vmatprep.subr.bf16.mxu0 %v6647_v36  ;;  %v6743_v17 = vcombine.high %v1905_v11, %v1909_v12  ;;  %v1769_v18 = vld [vmem:[%s7736_s1 + $0x808] sm:$0xff]  ;;  %v6742_v27 = vcombine.low %v1905_v11, %v1909_v12 }
 0x234   : > { %4917 = vmatprep.subr.bf16.mxu1 %v6775_v39  ;;  %v1773_v19 = vld [vmem:[%s7736_s1 + $0x828] sm:$0xff] }
 0x235   : > { %v1897_v23 = vld [vmem:[%s7736_s1 + $0xc08] sm:$0xff]  ;;  %v6607_v28 = vcombine.high %v1769_v18, %v1773_v19  ;;  %v6606_v33 = vcombine.low %v1769_v18, %v1773_v19 }
 0x236   : > { %4877 = vmatpush1.bf16.msra.mxu0 %v6646_v51  ;;  %v1901_v20 = vld [vmem:[%s7736_s1 + $0xc28] sm:$0xff] }
 0x237   : > { %4918 = vmatpush1.bf16.msra.mxu1 %v6774_v54  ;;  %4878 = vmatprep.subr.bf16.mxu0 %v6639_v58  ;;  %v6735_v29 = vcombine.high %v1897_v23, %v1901_v20  ;;  %v1889_v30 = vld [vmem:[%s7736_s1 + $0xbc8] sm:$0xff]  ;;  %v6734_v36 = vcombine.low %v1897_v23, %v1901_v20 }
 0x238   : > { %4919 = vmatprep.subr.bf16.mxu1 %v6767_v62  ;;  %v1893_v31 = vld [vmem:[%s7736_s1 + $0xbe8] sm:$0xff] }
 0x239   : > { %v2017_v14 = vld [vmem:[%s7736_s1 + $0xfc8] sm:$0xff]  ;;  %v6727_v39 = vcombine.high %v1889_v30, %v1893_v31  ;;  %v6726_v54 = vcombine.low %v1889_v30, %v1893_v31 }
 0x23a   : > { %4879 = vmatpush1.bf16.msra.mxu0 %v6638_v3  ;;  %v2021_v32 = vld [vmem:[%s7736_s1 + $0xfe8] sm:$0xff] }
 0x23b   : > { %4920 = vmatpush1.bf16.msra.mxu1 %v6766_v4  ;;  %4880 = vmatprep.subr.bf16.mxu0 %v6631_v5  ;;  %v6855_v40 = vcombine.high %v2017_v14, %v2021_v32  ;;  %v1881_v42 = vld [vmem:[%s7736_s1 + $0xb88] sm:$0xff]  ;;  %v6854_v58 = vcombine.low %v2017_v14, %v2021_v32 }
 0x23c   : > { %4921 = vmatprep.subr.bf16.mxu1 %v6759_v6  ;;  %v1885_v49 = vld [vmem:[%s7736_s1 + $0xba8] sm:$0xff] }
 0x23d   : > { %v2009_v50 = vld [vmem:[%s7736_s1 + $0xf88] sm:$0xff]  ;;  %v6719_v62 = vcombine.high %v1881_v42, %v1885_v49  ;;  %v6718_v4 = vcombine.low %v1881_v42, %v1885_v49 }
 0x23e   : > { %4881 = vmatpush1.bf16.msra.mxu0 %v6630_v37  ;;  %v2013_v51 = vld [vmem:[%s7736_s1 + $0xfa8] sm:$0xff] }
 0x23f   : > { %4922 = vmatpush1.bf16.msra.mxu1 %v6758_v38  ;;  %4882 = vmatprep.subr.bf16.mxu0 %v6623_v57  ;;  %v6847_v63 = vcombine.high %v2009_v50, %v2013_v51  ;;  %v1873_v0 = vld [vmem:[%s7736_s1 + $0xb48] sm:$0xff]  ;;  %v6846_v5 = vcombine.low %v2009_v50, %v2013_v51 }
 0x240   : > { %4923 = vmatprep.subr.bf16.mxu1 %v6751_v41  ;;  %v1877_v1 = vld [vmem:[%s7736_s1 + $0xb68] sm:$0xff] }
 0x241   : > { %v2001_v2 = vld [vmem:[%s7736_s1 + $0xf48] sm:$0xff]  ;;  %v6711_v6 = vcombine.high %v1873_v0, %v1877_v1  ;;  %v6710_v38 = vcombine.low %v1873_v0, %v1877_v1  ;;  %v1570_v1 = vld [vmem:[%s7736_s1 + $0x1d0] sm:$0xff] }
 0x242   : > { %4883 = vmatpush1.bf16.msra.mxu0 %v6622_v13  ;;  %v2005_v3 = vld [vmem:[%s7736_s1 + $0xf68] sm:$0xff] }
 0x243   : > { %4924 = vmatpush1.bf16.msra.mxu1 %v6750_v15  ;;  %4884 = vmatprep.subr.bf16.mxu0 %v6615_v16  ;;  %v6839_v7 = vcombine.high %v2001_v2, %v2005_v3  ;;  %v1865_v8 = vld [vmem:[%s7736_s1 + $0xb08] sm:$0xff]  ;;  %v6838_v57 = vcombine.low %v2001_v2, %v2005_v3  ;;  %v1574_v2 = vld [vmem:[%s7736_s1 + $0x1f0] sm:$0xff] }
 0x244   : > { %4925 = vmatprep.subr.bf16.mxu1 %v6743_v17  ;;  %v1869_v9 = vld [vmem:[%s7736_s1 + $0xb28] sm:$0xff]  ;;  %v1698_v3 = vld [vmem:[%s7736_s1 + $0x5d0] sm:$0xff] }
 0x245   : > { %v1993_v10 = vld [vmem:[%s7736_s1 + $0xf08] sm:$0xff]  ;;  %v6703_v41 = vcombine.high %v1865_v8, %v1869_v9  ;;  %v6702_v15 = vcombine.low %v1865_v8, %v1869_v9 }
 0x246   : > { %4885 = vmatpush1.bf16.msra.mxu0 %v6614_v21  ;;  %v1997_v37 = vld [vmem:[%s7736_s1 + $0xf28] sm:$0xff] }
 0x247   : > { %4926 = vmatpush1.bf16.msra.mxu1 %v6742_v27  ;;  %4886 = vmatprep.subr.bf16.mxu0 %v6607_v28  ;;  %v6831_v43 = vcombine.high %v1993_v10, %v1997_v37  ;;  %v1857_v44 = vld [vmem:[%s7736_s1 + $0xac8] sm:$0xff]  ;;  %v6830_v16 = vcombine.low %v1993_v10, %v1997_v37  ;;  %v1562_v10 = vld [vmem:[%s7736_s1 + $0x190] sm:$0xff] }
 0x248   : > { %4927 = vmatprep.subr.bf16.mxu1 %v6735_v29  ;;  %v1861_v11 = vld [vmem:[%s7736_s1 + $0xae8] sm:$0xff]  ;;  %v1566_v37 = vld [vmem:[%s7736_s1 + $0x1b0] sm:$0xff] }
 0x249   : > { %v1985_v12 = vld [vmem:[%s7736_s1 + $0xec8] sm:$0xff]  ;;  %v6695_v17 = vcombine.high %v1857_v44, %v1861_v11  ;;  %v6694_v27 = vcombine.low %v1857_v44, %v1861_v11 }
 0x24a   : > { %4887 = vmatpush1.bf16.msra.mxu0 %v6606_v33  ;;  %v1989_v13 = vld [vmem:[%s7736_s1 + $0xee8] sm:$0xff] }
 0x24b   : > { %4928 = vmatpush1.bf16.msra.mxu1 %v6734_v36  ;;  %4888 = vmatprep.subr.bf16.mxu0 %v6727_v39  ;;  %v6823_v18 = vcombine.high %v1985_v12, %v1989_v13  ;;  %v1849_v19 = vld [vmem:[%s7736_s1 + $0xa88] sm:$0xff]  ;;  %v6822_v28 = vcombine.low %v1985_v12, %v1989_v13  ;;  %v6401_v12 = vcombine.high %v1562_v10, %v1566_v37  ;;  %v1554_v13 = vld [vmem:[%s7736_s1 + $0x150] sm:$0xff] }
 0x24c   : > { %4929 = vmatprep.subr.bf16.mxu1 %v6855_v40  ;;  %v1853_v23 = vld [vmem:[%s7736_s1 + $0xaa8] sm:$0xff] }
 0x24d   : > { %v1977_v20 = vld [vmem:[%s7736_s1 + $0xe88] sm:$0xff]  ;;  %v6687_v29 = vcombine.high %v1849_v19, %v1853_v23  ;;  %v6686_v36 = vcombine.low %v1849_v19, %v1853_v23  ;;  %v1686_v19 = vld [vmem:[%s7736_s1 + $0x570] sm:$0xff] }
 0x24e   : > { %4889 = vmatpush2.bf16.msra.mxu0 %v6726_v54  ;;  %v1981_v21 = vld [vmem:[%s7736_s1 + $0xea8] sm:$0xff] }
 0x24f   : > { %4930 = vmatpush2.bf16.msra.mxu1 %v6854_v58  ;;  %4890 = vmatprep.subr.bf16.mxu0 %v6719_v62  ;;  %v6815_v30 = vcombine.high %v1977_v20, %v1981_v21  ;;  %v1841_v31 = vld [vmem:[%s7736_s1 + $0xa48] sm:$0xff]  ;;  %v6814_v39 = vcombine.low %v1977_v20, %v1981_v21  ;;  %v6400_v20 = vcombine.low %v1562_v10, %v1566_v37  ;;  %v1658_v10 = vld [vmem:[%s7736_s1 + $0x490] sm:$0xff] }
 0x250   : > { %4931 = vmatprep.subr.bf16.mxu1 %v6847_v63  ;;  %v1845_v14 = vld [vmem:[%s7736_s1 + $0xa68] sm:$0xff]  ;;  %v1662_v37 = vld [vmem:[%s7736_s1 + $0x4b0] sm:$0xff] }
 0x251   : > { %v1969_v32 = vld [vmem:[%s7736_s1 + $0xe48] sm:$0xff]  ;;  %v6679_v40 = vcombine.high %v1841_v31, %v1845_v14  ;;  %v6678_v58 = vcombine.low %v1841_v31, %v1845_v14  ;;  %v1546_v14 = vld [vmem:[%s7736_s1 + $0x110] sm:$0xff] }
 0x252   : > { %4891 = vmatpush2.bf16.msra.mxu0 %v6718_v4  ;;  %v1973_v33 = vld [vmem:[%s7736_s1 + $0xe68] sm:$0xff]  ;;  %v1702_v4 = vld [vmem:[%s7736_s1 + $0x5f0] sm:$0xff] }
 0x253   : > { %4932 = vmatpush2.bf16.msra.mxu1 %v6846_v5  ;;  %4892 = vmatprep.subr.bf16.mxu0 %v6711_v6  ;;  %v6807_v42 = vcombine.high %v1969_v32, %v1973_v33  ;;  %v1833_v49 = vld [vmem:[%s7736_s1 + $0xa08] sm:$0xff]  ;;  %v6806_v62 = vcombine.low %v1969_v32, %v1973_v33  ;;  %v6537_v9 = vcombine.high %v1698_v3, %v1702_v4  ;;  %v1550_v32 = vld [vmem:[%s7736_s1 + $0x130] sm:$0xff] }
 0x254   : > { %4933 = vmatprep.subr.bf16.mxu1 %v6839_v7  ;;  %v1837_v50 = vld [vmem:[%s7736_s1 + $0xa28] sm:$0xff]  ;;  %v6409_v7 = vcombine.high %v1570_v1, %v1574_v2  ;;  %v6536_v44 = vcombine.low %v1698_v3, %v1702_v4  ;;  %v6384_v3 = vcombine.low %v1546_v14, %v1550_v32 }
 0x255   : > { %v1961_v51 = vld [vmem:[%s7736_s1 + $0xe08] sm:$0xff]  ;;  %v6671_v63 = vcombine.high %v1833_v49, %v1837_v50  ;;  %v6670_v5 = vcombine.low %v1833_v49, %v1837_v50 }
 0x256   : > { %4893 = vmatpush2.bf16.msra.mxu0 %v6710_v38  ;;  %v1965_v54 = vld [vmem:[%s7736_s1 + $0xe28] sm:$0xff]  ;;  %v6408_v38 = vcombine.low %v1570_v1, %v1574_v2  ;;  %v1666_v1 = vld [vmem:[%s7736_s1 + $0x4d0] sm:$0xff] }
 0x257   : > { %4934 = vmatpush2.bf16.msra.mxu1 %v6838_v57  ;;  %4894 = vmatprep.subr.bf16.mxu0 %v6703_v41  ;;  %v6799_v0 = vcombine.high %v1961_v51, %v1965_v54  ;;  %v6798_v6 = vcombine.low %v1961_v51, %v1965_v54  ;;  %v8248_v8 = vld [vmem:[%s441_s14] sm:$0xff]  ;;  %v1690_v41 = vld [vmem:[%s7736_s1 + $0x590] sm:$0xff]  ;;  %v6385_v54 = vcombine.high %v1546_v14, %v1550_v32 }
 0x258   : > { %4935 = vmatprep.subr.bf16.mxu1 %v6831_v43  ;;  %v2029_v57 = vrot.slane %v8248_v8, %v647_v53  ;;  %v1694_v43 = vld [vmem:[%s7736_s1 + $0x5b0] sm:$0xff]  ;;  %v2033_v11 = vrot.slane %v8248_v8, %v651_v25 }
 0x259   : > { %v6528_v21 = vcombine.low %v1690_v41, %v1694_v43  ;;  %v1670_v2 = vld [vmem:[%s7736_s1 + $0x4f0] sm:$0xff] }
 0x25a   : > { %4895 = vmatpush2.bf16.msra.mxu0 %v6702_v15  ;;  %v1558_v15 = vld [vmem:[%s7736_s1 + $0x170] sm:$0xff] }
 0x25b   : > { %4936 = vmatpush2.bf16.msra.mxu1 %v6830_v16  ;;  %4896 = vmatprep.subr.bf16.mxu0 %v6695_v17  ;;  %v6529_v17 = vcombine.high %v1690_v41, %v1694_v43  ;;  %v6392_v49 = vcombine.low %v1554_v13, %v1558_v15  ;;  %v6497_v43 = vcombine.high %v1658_v10, %v1662_v37  ;;  %v1762_v14 = vld [vmem:[%s7736_s1 + $0x7d0] sm:$0xff] }
 0x25c   : > { %4937 = vmatprep.subr.bf16.mxu1 %v6823_v18  ;;  %v1682_v18 = vld [vmem:[%s7736_s1 + $0x550] sm:$0xff] }
 0x25d   : > { %v6521_v31 = vcombine.high %v1682_v18, %v1686_v19  ;;  %v6520_v51 = vcombine.low %v1682_v18, %v1686_v19  ;;  %v1514_v19 = vld [vmem:[%s7736_s1 + $0x10] sm:$0xff] }
 0x25e   : > { %4897 = vmatpush2.bf16.msra.mxu0 %v6694_v27  ;;  %v6393_v27 = vcombine.high %v1554_v13, %v1558_v15  ;;  %v1654_v13 = vld [vmem:[%s7736_s1 + $0x470] sm:$0xff] }
 0x25f   : > { %4938 = vmatpush2.bf16.msra.mxu1 %v6822_v28  ;;  %4898 = vmatprep.subr.bf16.mxu0 %v6687_v29  ;;  %v1766_v32 = vld [vmem:[%s7736_s1 + $0x7f0] sm:$0xff] }
 0x260   : > { %4939 = vmatprep.subr.bf16.mxu1 %v6815_v30 }
 0x262   : > { %4899 = vmatpush2.bf16.msra.mxu0 %v6686_v36  ;;  %v1674_v36 = vld [vmem:[%s7736_s1 + $0x510] sm:$0xff] }
 0x263   : > { %4940 = vmatpush2.bf16.msra.mxu1 %v6814_v39  ;;  %4900 = vmatprep.subr.bf16.mxu0 %v6679_v40  ;;  %v1678_v39 = vld [vmem:[%s7736_s1 + $0x530] sm:$0xff] }
 0x264   : > { %4941 = vmatprep.subr.bf16.mxu1 %v6807_v42  ;;  %v6512_v4 = vcombine.low %v1674_v36, %v1678_v39 }
 0x266   : > { %4901 = vmatpush2.bf16.msra.mxu0 %v6678_v58 }
 0x267   : > { %4942 = vmatpush2.bf16.msra.mxu1 %v6806_v62  ;;  %4902 = vmatprep.subr.bf16.mxu0 %v6671_v63  ;;  %v6513_v62 = vcombine.high %v1674_v36, %v1678_v39  ;;  %v1538_v63 = vld [vmem:[%s7736_s1 + $0xd0] sm:$0xff] }
 0x268   : > { %4943 = vmatprep.subr.bf16.mxu1 %v6799_v0  ;;  %v1542_v0 = vld [vmem:[%s7736_s1 + $0xf0] sm:$0xff] }
 0x26a   : > { %4903 = vmatpush2.bf16.msra.mxu0 %v6670_v5  ;;  %v6377_v5 = vcombine.high %v1538_v63, %v1542_v0 }
 0x26b   : > { %4944 = vmatpush2.bf16.msra.mxu1 %v6798_v6  ;;  %4954 = vmatprep.subr.bf16.mxu0 %v6409_v7  ;;  %v6505_v6 = vcombine.high %v1666_v1, %v1670_v2  ;;  %v1530_v7 = vld [vmem:[%s7736_s1 + $0x90] sm:$0xff] }
 0x26c   : > { %4995 = vmatprep.subr.bf16.mxu1 %v6537_v9  ;;  %v1534_v9 = vld [vmem:[%s7736_s1 + $0xb0] sm:$0xff] }
 0x26d   : > { %4905 = vmatmul.mubr.bf16.vlgmr.msra.gmra.mxu0 %v8108_v46  ;;  %v4660_v16 = vpop.f32.mrf.mxu0  ;;  %v4701_v23 = vpop.f32.mrf.mxu1  ;;  %v6369_v41 = vcombine.high %v1530_v7, %v1534_v9  ;;  %v6368_v15 = vcombine.low %v1530_v7, %v1534_v9 }
 0x26e   : > { %4946 = vmatmul.mubr.bf16.vlgmr.msra.gmra.mxu1 %v8102_v34  ;;  %v4661_v53 = vadd.f32 %v4660_v16, %v2029_v57  ;;  %4955 = vmatpush1.bf16.msra.mxu0 %v6408_v38  ;;  %v6376_v38 = vcombine.low %v1538_v63, %v1542_v0  ;;  %v6504_v57 = vcombine.low %v1666_v1, %v1670_v2  ;;  %v1618_v1 = vld [vmem:[%s7736_s1 + $0x350] sm:$0xff] }
 0x26f   : > { %4986 = vmatprep.mubr.bf16.mxu0 %v8008_v56  ;;  %4996 = vmatpush1.bf16.msra.mxu1 %v6536_v44  ;;  %v4662_v25 = vpop.f32.mrf.mxu0  ;;  %v4703_v30 = vpop.f32.mrf.mxu1  ;;  %v1522_v44 = vld [vmem:[%s7736_s1 + $0x50] sm:$0xff]  ;;  %v6496_v16 = vcombine.low %v1658_v10, %v1662_v37 }
 0x270   : > { %v8267_v28 = vadd.f32 %v4701_v23, %v4661_v53  ;;  %5027 = vmatprep.mubr.bf16.mxu1 %v8012_v60  ;;  %v4663_v29 = vadd.f32 %v4662_v25, %v2033_v11  ;;  %4956 = vmatprep.subr.bf16.mxu0 %v6401_v12  ;;  %v1526_v11 = vld [vmem:[%s7736_s1 + $0x70] sm:$0xff] }
 0x271   : > { %4997 = vmatprep.subr.bf16.mxu1 %v6529_v17  ;;  %v4664_v33 = vpop.f32.mrf.mxu0  ;;  %v4705_v42 = vpop.f32.mrf.mxu1  ;;  %v1650_v12 = vld [vmem:[%s7736_s1 + $0x450] sm:$0xff]  ;;  %v6361_v17 = vcombine.high %v1522_v44, %v1526_v11  ;;  %v6360_v25 = vcombine.low %v1522_v44, %v1526_v11 }
 0x272   : > { %v8274_v40 = vadd.f32 %v4703_v30, %v4663_v29  ;;  %4957 = vmatpush1.bf16.msra.mxu0 %v6400_v20  ;;  %v6489_v18 = vcombine.high %v1650_v12, %v1654_v13  ;;  %v1518_v53 = vld [vmem:[%s7736_s1 + $0x30] sm:$0xff]  ;;  %v6601_v42 = vcombine.high %v1762_v14, %v1766_v32 }
 0x273   : > { %4998 = vmatpush1.bf16.msra.mxu1 %v6528_v21  ;;  %v4665_v50 = vpop.f32.mrf.mxu0  ;;  %4958 = vmatprep.subr.bf16.mxu0 %v6393_v27  ;;  %v4706_v58 = vpop.f32.mrf.mxu1  ;;  %v1642_v23 = vld [vmem:[%s7736_s1 + $0x410] sm:$0xff]  ;;  %v6488_v21 = vcombine.low %v1650_v12, %v1654_v13  ;;  %v6353_v27 = vcombine.high %v1514_v19, %v1518_v53  ;;  %v6352_v33 = vcombine.low %v1514_v19, %v1518_v53 }
 0x274   : > { %4999 = vmatprep.subr.bf16.mxu1 %v6521_v31  ;;  %v1646_v20 = vld [vmem:[%s7736_s1 + $0x430] sm:$0xff] }
 0x275   : > { %v6481_v29 = vcombine.high %v1642_v23, %v1646_v20  ;;  %v1634_v30 = vld [vmem:[%s7736_s1 + $0x3d0] sm:$0xff]  ;;  %v6480_v36 = vcombine.low %v1642_v23, %v1646_v20 }
 0x276   : > { %4959 = vmatpush1.bf16.msra.mxu0 %v6392_v49  ;;  %v1638_v31 = vld [vmem:[%s7736_s1 + $0x3f0] sm:$0xff] }
 0x277   : > { %5000 = vmatpush1.bf16.msra.mxu1 %v6520_v51  ;;  %4960 = vmatprep.subr.bf16.mxu0 %v6385_v54  ;;  %v6473_v39 = vcombine.high %v1634_v30, %v1638_v31  ;;  %v1626_v49 = vld [vmem:[%s7736_s1 + $0x390] sm:$0xff]  ;;  %v6472_v58 = vcombine.low %v1634_v30, %v1638_v31 }
 0x278   : > { %5001 = vmatprep.subr.bf16.mxu1 %v6513_v62  ;;  %v1630_v50 = vld [vmem:[%s7736_s1 + $0x3b0] sm:$0xff]  ;;  %v6600_v62 = vcombine.low %v1762_v14, %v1766_v32 }
 0x279   : > { %v1754_v51 = vld [vmem:[%s7736_s1 + $0x790] sm:$0xff]  ;;  %v6465_v63 = vcombine.high %v1626_v49, %v1630_v50 }
 0x27a   : > { %4961 = vmatpush1.bf16.msra.mxu0 %v6384_v3  ;;  %v1758_v54 = vld [vmem:[%s7736_s1 + $0x7b0] sm:$0xff] }
 0x27b   : > { %5002 = vmatpush1.bf16.msra.mxu1 %v6512_v4  ;;  %4962 = vmatprep.subr.bf16.mxu0 %v6377_v5  ;;  %v6593_v0 = vcombine.high %v1754_v51, %v1758_v54  ;;  %v1622_v2 = vld [vmem:[%s7736_s1 + $0x370] sm:$0xff]  ;;  %v6464_v5 = vcombine.low %v1626_v49, %v1630_v50 }
 0x27c   : > { %5003 = vmatprep.subr.bf16.mxu1 %v6505_v6  ;;  %v1746_v3 = vld [vmem:[%s7736_s1 + $0x750] sm:$0xff]  ;;  %v6592_v6 = vcombine.low %v1754_v51, %v1758_v54  ;;  %v6457_v7 = vcombine.high %v1618_v1, %v1622_v2 }
 0x27d   : > { %v1750_v4 = vld [vmem:[%s7736_s1 + $0x770] sm:$0xff] }
 0x27e   : > { %4963 = vmatpush1.bf16.msra.mxu0 %v6376_v38  ;;  %v6585_v9 = vcombine.high %v1746_v3, %v1750_v4  ;;  %v1610_v10 = vld [vmem:[%s7736_s1 + $0x310] sm:$0xff] }
 0x27f   : > { %5004 = vmatpush1.bf16.msra.mxu1 %v6504_v57  ;;  %4964 = vmatprep.subr.bf16.mxu0 %v6369_v41  ;;  %v1614_v37 = vld [vmem:[%s7736_s1 + $0x330] sm:$0xff]  ;;  %v6456_v41 = vcombine.low %v1618_v1, %v1622_v2 }
 0x280   : > { %5005 = vmatprep.subr.bf16.mxu1 %v6497_v43  ;;  %v1738_v38 = vld [vmem:[%s7736_s1 + $0x710] sm:$0xff]  ;;  %v6584_v43 = vcombine.low %v1746_v3, %v1750_v4  ;;  %v6449_v44 = vcombine.high %v1610_v10, %v1614_v37 }
 0x281   : > { %v1742_v57 = vld [vmem:[%s7736_s1 + $0x730] sm:$0xff] }
 0x282   : > { %4965 = vmatpush1.bf16.msra.mxu0 %v6368_v15  ;;  %v6577_v11 = vcombine.high %v1738_v38, %v1742_v57  ;;  %v1602_v12 = vld [vmem:[%s7736_s1 + $0x2d0] sm:$0xff] }
 0x283   : > { %5006 = vmatpush1.bf16.msra.mxu1 %v6496_v16  ;;  %4966 = vmatprep.subr.bf16.mxu0 %v6361_v17  ;;  %v1606_v13 = vld [vmem:[%s7736_s1 + $0x2f0] sm:$0xff]  ;;  %v6448_v17 = vcombine.low %v1610_v10, %v1614_v37 }
 0x284   : > { %5007 = vmatprep.subr.bf16.mxu1 %v6489_v18  ;;  %v1730_v15 = vld [vmem:[%s7736_s1 + $0x6d0] sm:$0xff]  ;;  %v6576_v18 = vcombine.low %v1738_v38, %v1742_v57  ;;  %v6441_v19 = vcombine.high %v1602_v12, %v1606_v13 }
 0x285   : > { %v1734_v16 = vld [vmem:[%s7736_s1 + $0x6f0] sm:$0xff] }
 0x286   : > { %4967 = vmatpush1.bf16.msra.mxu0 %v6360_v25  ;;  %v6569_v53 = vcombine.high %v1730_v15, %v1734_v16  ;;  %v1594_v23 = vld [vmem:[%s7736_s1 + $0x290] sm:$0xff] }
 0x287   : > { %5008 = vmatpush1.bf16.msra.mxu1 %v6488_v21  ;;  %4968 = vmatprep.subr.bf16.mxu0 %v6353_v27  ;;  %v1598_v20 = vld [vmem:[%s7736_s1 + $0x2b0] sm:$0xff]  ;;  %v6440_v27 = vcombine.low %v1602_v12, %v1606_v13 }
 0x288   : > { %5009 = vmatprep.subr.bf16.mxu1 %v6481_v29  ;;  %v1722_v25 = vld [vmem:[%s7736_s1 + $0x690] sm:$0xff]  ;;  %v6568_v29 = vcombine.low %v1730_v15, %v1734_v16  ;;  %v6433_v30 = vcombine.high %v1594_v23, %v1598_v20 }
 0x289   : > { %v1726_v21 = vld [vmem:[%s7736_s1 + $0x6b0] sm:$0xff] }
 0x28a   : > { %4969 = vmatpush1.bf16.msra.mxu0 %v6352_v33  ;;  %v6561_v31 = vcombine.high %v1722_v25, %v1726_v21  ;;  %v1586_v14 = vld [vmem:[%s7736_s1 + $0x250] sm:$0xff] }
 0x28b   : > { %5010 = vmatpush1.bf16.msra.mxu1 %v6480_v36  ;;  %4970 = vmatprep.subr.bf16.mxu0 %v6473_v39  ;;  %v1590_v32 = vld [vmem:[%s7736_s1 + $0x270] sm:$0xff]  ;;  %v6432_v39 = vcombine.low %v1594_v23, %v1598_v20 }
 0x28c   : > { %5011 = vmatprep.subr.bf16.mxu1 %v6601_v42  ;;  %v1714_v33 = vld [vmem:[%s7736_s1 + $0x650] sm:$0xff]  ;;  %v6560_v42 = vcombine.low %v1722_v25, %v1726_v21  ;;  %v6425_v49 = vcombine.high %v1586_v14, %v1590_v32 }
 0x28d   : > { %v1718_v36 = vld [vmem:[%s7736_s1 + $0x670] sm:$0xff] }
 0x28e   : > { %4971 = vmatpush2.bf16.msra.mxu0 %v6472_v58  ;;  %v6553_v50 = vcombine.high %v1714_v33, %v1718_v36  ;;  %v1578_v51 = vld [vmem:[%s7736_s1 + $0x210] sm:$0xff] }
 0x28f   : > { %5012 = vmatpush2.bf16.msra.mxu1 %v6600_v62  ;;  %4972 = vmatprep.subr.bf16.mxu0 %v6465_v63  ;;  %v1582_v54 = vld [vmem:[%s7736_s1 + $0x230] sm:$0xff]  ;;  %v6424_v63 = vcombine.low %v1586_v14, %v1590_v32 }
 0x290   : > { %5013 = vmatprep.subr.bf16.mxu1 %v6593_v0  ;;  %v1706_v58 = vld [vmem:[%s7736_s1 + $0x610] sm:$0xff]  ;;  %v6552_v0 = vcombine.low %v1714_v33, %v1718_v36  ;;  %v6417_v1 = vcombine.high %v1578_v51, %v1582_v54 }
 0x291   : > { %v1710_v62 = vld [vmem:[%s7736_s1 + $0x630] sm:$0xff] }
 0x292   : > { %4973 = vmatpush2.bf16.msra.mxu0 %v6464_v5  ;;  %v6545_v2 = vcombine.high %v1706_v58, %v1710_v62  ;;  %v1826_v3 = vld [vmem:[%s7736_s1 + $0x9d0] sm:$0xff] }
 0x293   : > { %5014 = vmatpush2.bf16.msra.mxu1 %v6592_v6  ;;  %4974 = vmatprep.subr.bf16.mxu0 %v6457_v7  ;;  %v1830_v4 = vld [vmem:[%s7736_s1 + $0x9f0] sm:$0xff]  ;;  %v6416_v7 = vcombine.low %v1578_v51, %v1582_v54 }
 0x294   : > { %5015 = vmatprep.subr.bf16.mxu1 %v6585_v9  ;;  %v1954_v5 = vld [vmem:[%s7736_s1 + $0xdd0] sm:$0xff]  ;;  %v6544_v9 = vcombine.low %v1706_v58, %v1710_v62  ;;  %v6665_v10 = vcombine.high %v1826_v3, %v1830_v4 }
 0x295   : > { %v1958_v6 = vld [vmem:[%s7736_s1 + $0xdf0] sm:$0xff] }
 0x296   : > { %4975 = vmatpush2.bf16.msra.mxu0 %v6456_v41  ;;  %v6793_v37 = vcombine.high %v1954_v5, %v1958_v6  ;;  %v1818_v38 = vld [vmem:[%s7736_s1 + $0x990] sm:$0xff]  ;;  %v6664_v41 = vcombine.low %v1826_v3, %v1830_v4 }
 0x297   : > { %5016 = vmatpush2.bf16.msra.mxu1 %v6584_v43  ;;  %4976 = vmatprep.subr.bf16.mxu0 %v6449_v44  ;;  %v1822_v57 = vld [vmem:[%s7736_s1 + $0x9b0] sm:$0xff] }
 0x298   : > { %5017 = vmatprep.subr.bf16.mxu1 %v6577_v11  ;;  %v1946_v43 = vld [vmem:[%s7736_s1 + $0xd90] sm:$0xff]  ;;  %v6792_v11 = vcombine.low %v1954_v5, %v1958_v6  ;;  %v6657_v12 = vcombine.high %v1818_v38, %v1822_v57  ;;  %v6656_v20 = vcombine.low %v1818_v38, %v1822_v57 }
 0x299   : > { %v1950_v44 = vld [vmem:[%s7736_s1 + $0xdb0] sm:$0xff] }
 0x29a   : > { %4977 = vmatpush2.bf16.msra.mxu0 %v6448_v17  ;;  %v1810_v13 = vld [vmem:[%s7736_s1 + $0x950] sm:$0xff]  ;;  %v6785_v17 = vcombine.high %v1946_v43, %v1950_v44  ;;  %v6784_v21 = vcombine.low %v1946_v43, %v1950_v44 }
 0x29b   : > { %5018 = vmatpush2.bf16.msra.mxu1 %v6576_v18  ;;  %4978 = vmatprep.subr.bf16.mxu0 %v6441_v19  ;;  %v1814_v15 = vld [vmem:[%s7736_s1 + $0x970] sm:$0xff] }
 0x29c   : > { %5019 = vmatprep.subr.bf16.mxu1 %v6569_v53  ;;  %v1938_v18 = vld [vmem:[%s7736_s1 + $0xd50] sm:$0xff] }
 0x29d   : > { %v1942_v19 = vld [vmem:[%s7736_s1 + $0xd70] sm:$0xff] }
 0x29e   : > { %4979 = vmatpush2.bf16.msra.mxu0 %v6440_v27  ;;  %v6649_v27 = vcombine.high %v1810_v13, %v1814_v15  ;;  %v1802_v14 = vld [vmem:[%s7736_s1 + $0x910] sm:$0xff]  ;;  %v6776_v51 = vcombine.low %v1938_v18, %v1942_v19 }
 0x29f   : > { %5020 = vmatpush2.bf16.msra.mxu1 %v6568_v29  ;;  %4980 = vmatprep.subr.bf16.mxu0 %v6433_v30  ;;  %v1806_v32 = vld [vmem:[%s7736_s1 + $0x930] sm:$0xff] }
 0x2a0   : > { %5021 = vmatprep.subr.bf16.mxu1 %v6561_v31  ;;  %v1930_v36 = vld [vmem:[%s7736_s1 + $0xd10] sm:$0xff]  ;;  %v6641_v54 = vcombine.high %v1802_v14, %v1806_v32  ;;  %v6640_v3 = vcombine.low %v1802_v14, %v1806_v32 }
 0x2a1   : > { %v1778_v44 = vld [vmem:[%s7736_s1 + $0x850] sm:$0xff] }
 0x2a2   : > { %4981 = vmatpush2.bf16.msra.mxu0 %v6432_v39  ;;  %v1934_v39 = vld [vmem:[%s7736_s1 + $0xd30] sm:$0xff] }
 0x2a3   : > { %5022 = vmatpush2.bf16.msra.mxu1 %v6560_v42  ;;  %4982 = vmatprep.subr.bf16.mxu0 %v6425_v49  ;;  %v6769_v62 = vcombine.high %v1930_v36, %v1934_v39  ;;  %v6768_v4 = vcombine.low %v1930_v36, %v1934_v39  ;;  %v2018_v14 = vld [vmem:[%s7736_s1 + $0xfd0] sm:$0xff] }
 0x2a4   : > { %5023 = vmatprep.subr.bf16.mxu1 %v6553_v50  ;;  %v6648_v50 = vcombine.low %v1810_v13, %v1814_v15  ;;  %v1910_v13 = vld [vmem:[%s7736_s1 + $0xc70] sm:$0xff] }
 0x2a5   : > { %v2022_v32 = vld [vmem:[%s7736_s1 + $0xff0] sm:$0xff] }
 0x2a6   : > { %4983 = vmatpush2.bf16.msra.mxu0 %v6424_v63  ;;  %v1794_v63 = vld [vmem:[%s7736_s1 + $0x8d0] sm:$0xff] }
 0x2a7   : > { %5024 = vmatpush2.bf16.msra.mxu1 %v6552_v0  ;;  %4984 = vmatprep.subr.bf16.mxu0 %v6417_v1  ;;  %v1798_v0 = vld [vmem:[%s7736_s1 + $0x8f0] sm:$0xff] }
 0x2a8   : > { %5025 = vmatprep.subr.bf16.mxu1 %v6545_v2  ;;  %v1922_v1 = vld [vmem:[%s7736_s1 + $0xcd0] sm:$0xff]  ;;  %v6633_v5 = vcombine.high %v1794_v63, %v1798_v0  ;;  %v6632_v38 = vcombine.low %v1794_v63, %v1798_v0 }
 0x2a9   : > { %v1926_v2 = vld [vmem:[%s7736_s1 + $0xcf0] sm:$0xff] }
 0x2aa   : > { %4985 = vmatpush2.bf16.msra.mxu0 %v6416_v7  ;;  %v6761_v6 = vcombine.high %v1922_v1, %v1926_v2  ;;  %v1786_v7 = vld [vmem:[%s7736_s1 + $0x890] sm:$0xff]  ;;  %v6760_v57 = vcombine.low %v1922_v1, %v1926_v2 }
 0x2ab   : > { %5026 = vmatpush2.bf16.msra.mxu1 %v6544_v9  ;;  %5036 = vmatprep.subr.bf16.mxu0 %v6665_v10  ;;  %v1790_v9 = vld [vmem:[%s7736_s1 + $0x8b0] sm:$0xff] }
 0x2ac   : > { %5077 = vmatprep.subr.bf16.mxu1 %v6793_v37  ;;  %v1914_v10 = vld [vmem:[%s7736_s1 + $0xc90] sm:$0xff]  ;;  %v6624_v15 = vcombine.low %v1786_v7, %v1790_v9 }
 0x2ad   : > { %4987 = vmatmul.mubr.bf16.vlgmr.msra.gmra.mxu0 %v8010_v59  ;;  %v4742_v16 = vpop.f32.mrf.mxu0  ;;  %v4783_v23 = vpop.f32.mrf.mxu1  ;;  %v1918_v37 = vld [vmem:[%s7736_s1 + $0xcb0] sm:$0xff] }
 0x2ae   : > { %5028 = vmatmul.mubr.bf16.vlgmr.msra.gmra.mxu1 %v8006_v55  ;;  %v4743_v53 = vadd.f32 %v4742_v16, %v8267_v28  ;;  %5037 = vmatpush1.bf16.msra.mxu0 %v6664_v41  ;;  %v6777_v28 = vcombine.high %v1938_v18, %v1942_v19  ;;  %v6625_v41 = vcombine.high %v1786_v7, %v1790_v9  ;;  %v1770_v19 = vld [vmem:[%s7736_s1 + $0x810] sm:$0xff] }
 0x2af   : > { %5068 = vmatprep.mubr.bf16.mxu0 %v8104_v35  ;;  %5078 = vmatpush1.bf16.msra.mxu1 %v6792_v11  ;;  %v4744_v25 = vpop.f32.mrf.mxu0  ;;  %v4785_v31 = vpop.f32.mrf.mxu1  ;;  %v6753_v43 = vcombine.high %v1914_v10, %v1918_v37  ;;  %v1782_v11 = vld [vmem:[%s7736_s1 + $0x870] sm:$0xff]  ;;  %v6752_v16 = vcombine.low %v1914_v10, %v1918_v37 }
 0x2b0   : > { %v8340_v29 = vadd.f32 %v4783_v23, %v4743_v53  ;;  %5109 = vmatprep.mubr.bf16.mxu1 %v8110_v47  ;;  %v4745_v30 = vadd.f32 %v4744_v25, %v8274_v40  ;;  %5038 = vmatprep.subr.bf16.mxu0 %v6657_v12  ;;  %v1906_v12 = vld [vmem:[%s7736_s1 + $0xc50] sm:$0xff]  ;;  %v6616_v25 = vcombine.low %v1778_v44, %v1782_v11 }
 0x2b1   : > { %5079 = vmatprep.subr.bf16.mxu1 %v6785_v17  ;;  %v4746_v33 = vpop.f32.mrf.mxu0  ;;  %v4787_v49 = vpop.f32.mrf.mxu1  ;;  %v6617_v17 = vcombine.high %v1778_v44, %v1782_v11  ;;  %v6745_v18 = vcombine.high %v1906_v12, %v1910_v13  ;;  %v1774_v53 = vld [vmem:[%s7736_s1 + $0x830] sm:$0xff] }
 0x2b2   : > { %v8348_v42 = vadd.f32 %v4785_v31, %v4745_v30  ;;  %5039 = vmatpush1.bf16.msra.mxu0 %v6656_v20  ;;  %v1898_v23 = vld [vmem:[%s7736_s1 + $0xc10] sm:$0xff]  ;;  %v6608_v33 = vcombine.low %v1770_v19, %v1774_v53  ;;  %v6857_v49 = vcombine.high %v2018_v14, %v2022_v32 }
 0x2b3   : > { %5080 = vmatpush1.bf16.msra.mxu1 %v6784_v21  ;;  %v4747_v40 = vpop.f32.mrf.mxu0  ;;  %5040 = vmatprep.subr.bf16.mxu0 %v6649_v27  ;;  %v4788_v58 = vpop.f32.mrf.mxu1  ;;  %v1902_v20 = vld [vmem:[%s7736_s1 + $0xc30] sm:$0xff]  ;;  %v6744_v21 = vcombine.low %v1906_v12, %v1910_v13  ;;  %v6609_v27 = vcombine.high %v1770_v19, %v1774_v53 }
 0x2b4   : > { %5081 = vmatprep.subr.bf16.mxu1 %v6777_v28  ;;  %v6737_v30 = vcombine.high %v1898_v23, %v1902_v20  ;;  %v1890_v31 = vld [vmem:[%s7736_s1 + $0xbd0] sm:$0xff]  ;;  %v6736_v36 = vcombine.low %v1898_v23, %v1902_v20 }
 0x2b5   : > { %v1894_v28 = vld [vmem:[%s7736_s1 + $0xbf0] sm:$0xff] }
 0x2b6   : > { %5041 = vmatpush1.bf16.msra.mxu0 %v6648_v50  ;;  %v6729_v39 = vcombine.high %v1890_v31, %v1894_v28  ;;  %v1882_v50 = vld [vmem:[%s7736_s1 + $0xb90] sm:$0xff]  ;;  %v6728_v58 = vcombine.low %v1890_v31, %v1894_v28 }
 0x2b7   : > { %5082 = vmatpush1.bf16.msra.mxu1 %v6776_v51  ;;  %5042 = vmatprep.subr.bf16.mxu0 %v6641_v54  ;;  %v1886_v40 = vld [vmem:[%s7736_s1 + $0xbb0] sm:$0xff] }
 0x2b8   : > { %5083 = vmatprep.subr.bf16.mxu1 %v6769_v62  ;;  %v2010_v51 = vld [vmem:[%s7736_s1 + $0xf90] sm:$0xff]  ;;  %v6856_v62 = vcombine.low %v2018_v14, %v2022_v32  ;;  %v6721_v63 = vcombine.high %v1882_v50, %v1886_v40 }
 0x2b9   : > { %v2014_v54 = vld [vmem:[%s7736_s1 + $0xfb0] sm:$0xff] }
 0x2ba   : > { %5043 = vmatpush1.bf16.msra.mxu0 %v6640_v3  ;;  %v6849_v0 = vcombine.high %v2010_v51, %v2014_v54  ;;  %v1874_v1 = vld [vmem:[%s7736_s1 + $0xb50] sm:$0xff] }
 0x2bb   : > { %5084 = vmatpush1.bf16.msra.mxu1 %v6768_v4  ;;  %5044 = vmatprep.subr.bf16.mxu0 %v6633_v5  ;;  %v1878_v2 = vld [vmem:[%s7736_s1 + $0xb70] sm:$0xff]  ;;  %v6720_v5 = vcombine.low %v1882_v50, %v1886_v40 }
 0x2bc   : > { %5085 = vmatprep.subr.bf16.mxu1 %v6761_v6  ;;  %v2002_v3 = vld [vmem:[%s7736_s1 + $0xf50] sm:$0xff]  ;;  %v6848_v6 = vcombine.low %v2010_v51, %v2014_v54  ;;  %v6713_v7 = vcombine.high %v1874_v1, %v1878_v2 }
 0x2bd   : > { %v2006_v4 = vld [vmem:[%s7736_s1 + $0xf70] sm:$0xff] }
 0x2be   : > { %5045 = vmatpush1.bf16.msra.mxu0 %v6632_v38  ;;  %v6841_v9 = vcombine.high %v2002_v3, %v2006_v4  ;;  %v1866_v10 = vld [vmem:[%s7736_s1 + $0xb10] sm:$0xff] }
 0x2bf   : > { %5086 = vmatpush1.bf16.msra.mxu1 %v6760_v57  ;;  %5046 = vmatprep.subr.bf16.mxu0 %v6625_v41  ;;  %v1870_v37 = vld [vmem:[%s7736_s1 + $0xb30] sm:$0xff]  ;;  %v6712_v41 = vcombine.low %v1874_v1, %v1878_v2 }
 0x2c0   : > { %5087 = vmatprep.subr.bf16.mxu1 %v6753_v43  ;;  %v1994_v38 = vld [vmem:[%s7736_s1 + $0xf10] sm:$0xff]  ;;  %v6840_v43 = vcombine.low %v2002_v3, %v2006_v4  ;;  %v6705_v44 = vcombine.high %v1866_v10, %v1870_v37  ;;  %v1571_v3 = vld [vmem:[%s7736_s1 + $0x1d8] sm:$0xff] }
 0x2c1   : > { %v1998_v57 = vld [vmem:[%s7736_s1 + $0xf30] sm:$0xff]  ;;  %v1575_v4 = vld [vmem:[%s7736_s1 + $0x1f8] sm:$0xff] }
 0x2c2   : > { %5047 = vmatpush1.bf16.msra.mxu0 %v6624_v15  ;;  %v6833_v11 = vcombine.high %v1994_v38, %v1998_v57  ;;  %v1858_v12 = vld [vmem:[%s7736_s1 + $0xad0] sm:$0xff] }
 0x2c3   : > { %5088 = vmatpush1.bf16.msra.mxu1 %v6752_v16  ;;  %5048 = vmatprep.subr.bf16.mxu0 %v6617_v17  ;;  %v1862_v13 = vld [vmem:[%s7736_s1 + $0xaf0] sm:$0xff]  ;;  %v6704_v17 = vcombine.low %v1866_v10, %v1870_v37  ;;  %v6411_v10 = vcombine.high %v1571_v3, %v1575_v4 }
 0x2c4   : > { %5089 = vmatprep.subr.bf16.mxu1 %v6745_v18  ;;  %v1986_v15 = vld [vmem:[%s7736_s1 + $0xed0] sm:$0xff]  ;;  %v6832_v18 = vcombine.low %v1994_v38, %v1998_v57  ;;  %v6697_v19 = vcombine.high %v1858_v12, %v1862_v13  ;;  %v1563_v38 = vld [vmem:[%s7736_s1 + $0x198] sm:$0xff] }
 0x2c5   : > { %v1990_v16 = vld [vmem:[%s7736_s1 + $0xef0] sm:$0xff]  ;;  %v1567_v57 = vld [vmem:[%s7736_s1 + $0x1b8] sm:$0xff] }
 0x2c6   : > { %5049 = vmatpush1.bf16.msra.mxu0 %v6616_v25  ;;  %v6825_v53 = vcombine.high %v1986_v15, %v1990_v16  ;;  %v1850_v23 = vld [vmem:[%s7736_s1 + $0xa90] sm:$0xff] }
 0x2c7   : > { %5090 = vmatpush1.bf16.msra.mxu1 %v6744_v21  ;;  %5050 = vmatprep.subr.bf16.mxu0 %v6609_v27  ;;  %v1854_v20 = vld [vmem:[%s7736_s1 + $0xab0] sm:$0xff]  ;;  %v6696_v27 = vcombine.low %v1858_v12, %v1862_v13  ;;  %v2041_v13 = vrot.slane %v8248_v8, %v659_v26 }
 0x2c8   : > { %5091 = vmatprep.subr.bf16.mxu1 %v6737_v30  ;;  %v1978_v25 = vld [vmem:[%s7736_s1 + $0xe90] sm:$0xff]  ;;  %v6824_v30 = vcombine.low %v1986_v15, %v1990_v16  ;;  %v6689_v31 = vcombine.high %v1850_v23, %v1854_v20  ;;  %v6403_v15 = vcombine.high %v1563_v38, %v1567_v57  ;;  %v1555_v16 = vld [vmem:[%s7736_s1 + $0x158] sm:$0xff] }
 0x2c9   : > { %v1982_v21 = vld [vmem:[%s7736_s1 + $0xeb0] sm:$0xff] }
 0x2ca   : > { %5051 = vmatpush1.bf16.msra.mxu0 %v6608_v33  ;;  %v6817_v28 = vcombine.high %v1978_v25, %v1982_v21  ;;  %v1842_v14 = vld [vmem:[%s7736_s1 + $0xa50] sm:$0xff] }
 0x2cb   : > { %5092 = vmatpush1.bf16.msra.mxu1 %v6736_v36  ;;  %5052 = vmatprep.subr.bf16.mxu0 %v6729_v39  ;;  %v1846_v32 = vld [vmem:[%s7736_s1 + $0xa70] sm:$0xff]  ;;  %v6688_v39 = vcombine.low %v1850_v23, %v1854_v20 }
 0x2cc   : > { %5093 = vmatprep.subr.bf16.mxu1 %v6857_v49  ;;  %v1970_v33 = vld [vmem:[%s7736_s1 + $0xe50] sm:$0xff]  ;;  %v6816_v49 = vcombine.low %v1978_v25, %v1982_v21  ;;  %v6681_v50 = vcombine.high %v1842_v14, %v1846_v32  ;;  %v6402_v25 = vcombine.low %v1563_v38, %v1567_v57 }
 0x2cd   : > { %v1974_v36 = vld [vmem:[%s7736_s1 + $0xe70] sm:$0xff] }
 0x2ce   : > { %5053 = vmatpush2.bf16.msra.mxu0 %v6728_v58  ;;  %v6809_v40 = vcombine.high %v1970_v33, %v1974_v36  ;;  %v1834_v51 = vld [vmem:[%s7736_s1 + $0xa10] sm:$0xff] }
 0x2cf   : > { %5094 = vmatpush2.bf16.msra.mxu1 %v6856_v62  ;;  %5054 = vmatprep.subr.bf16.mxu0 %v6721_v63  ;;  %v1838_v54 = vld [vmem:[%s7736_s1 + $0xa30] sm:$0xff]  ;;  %v6680_v63 = vcombine.low %v1842_v14, %v1846_v32  ;;  %v1547_v14 = vld [vmem:[%s7736_s1 + $0x118] sm:$0xff] }
 0x2d0   : > { %5095 = vmatprep.subr.bf16.mxu1 %v6849_v0  ;;  %v1962_v58 = vld [vmem:[%s7736_s1 + $0xe10] sm:$0xff]  ;;  %v6808_v0 = vcombine.low %v1970_v33, %v1974_v36  ;;  %v6673_v1 = vcombine.high %v1834_v51, %v1838_v54  ;;  %v1551_v32 = vld [vmem:[%s7736_s1 + $0x138] sm:$0xff] }
 0x2d1   : > { %v1966_v62 = vld [vmem:[%s7736_s1 + $0xe30] sm:$0xff]  ;;  %v1679_v36 = vld [vmem:[%s7736_s1 + $0x538] sm:$0xff] }
 0x2d2   : > { %5055 = vmatpush2.bf16.msra.mxu0 %v6720_v5  ;;  %v6801_v2 = vcombine.high %v1962_v58, %v1966_v62  ;;  %v1699_v5 = vld [vmem:[%s7736_s1 + $0x5d8] sm:$0xff] }
 0x2d3   : > { %5096 = vmatpush2.bf16.msra.mxu1 %v6848_v6  ;;  %5056 = vmatprep.subr.bf16.mxu0 %v6713_v7  ;;  %v1703_v6 = vld [vmem:[%s7736_s1 + $0x5f8] sm:$0xff]  ;;  %v6672_v7 = vcombine.low %v1834_v51, %v1838_v54  ;;  %v6387_v51 = vcombine.high %v1547_v14, %v1551_v32 }
 0x2d4   : > { %5097 = vmatprep.subr.bf16.mxu1 %v6841_v9  ;;  %v6800_v9 = vcombine.low %v1962_v58, %v1966_v62  ;;  %v6539_v37 = vcombine.high %v1699_v5, %v1703_v6  ;;  %v6538_v12 = vcombine.low %v1699_v5, %v1703_v6  ;;  %v1539_v62 = vld [vmem:[%s7736_s1 + $0xd8] sm:$0xff] }
 0x2d5   : > { %v1531_v6 = vld [vmem:[%s7736_s1 + $0x98] sm:$0xff] }
 0x2d6   : > { %5057 = vmatpush2.bf16.msra.mxu0 %v6712_v41  ;;  %v2037_v41 = vrot.slane %v8248_v8, %v655_v24  ;;  %v1683_v24 = vld [vmem:[%s7736_s1 + $0x558] sm:$0xff] }
 0x2d7   : > { %5098 = vmatpush2.bf16.msra.mxu1 %v6840_v43  ;;  %5058 = vmatprep.subr.bf16.mxu0 %v6705_v44  ;;  %v6410_v43 = vcombine.low %v1571_v3, %v1575_v4  ;;  %v1691_v44 = vld [vmem:[%s7736_s1 + $0x598] sm:$0xff] }
 0x2d8   : > { %5099 = vmatprep.subr.bf16.mxu1 %v6833_v11  ;;  %v1695_v11 = vld [vmem:[%s7736_s1 + $0x5b8] sm:$0xff] }
 0x2d9   : > { %v6530_v8 = vcombine.low %v1691_v44, %v1695_v11 }
 0x2da   : > { %5059 = vmatpush2.bf16.msra.mxu0 %v6704_v17  ;;  %v1559_v17 = vld [vmem:[%s7736_s1 + $0x178] sm:$0xff] }
 0x2db   : > { %5100 = vmatpush2.bf16.msra.mxu1 %v6832_v18  ;;  %5060 = vmatprep.subr.bf16.mxu0 %v6697_v19  ;;  %v6531_v19 = vcombine.high %v1691_v44, %v1695_v11  ;;  %v6395_v21 = vcombine.high %v1555_v16, %v1559_v17  ;;  %v1527_v44 = vld [vmem:[%s7736_s1 + $0x78] sm:$0xff] }
 0x2dc   : > { %5101 = vmatprep.subr.bf16.mxu1 %v6825_v53  ;;  %v1687_v53 = vld [vmem:[%s7736_s1 + $0x578] sm:$0xff] }
 0x2dd   : > { %v1651_v11 = vld [vmem:[%s7736_s1 + $0x458] sm:$0xff] }
 0x2de   : > { %5061 = vmatpush2.bf16.msra.mxu0 %v6696_v27 }
 0x2df   : > { %5102 = vmatpush2.bf16.msra.mxu1 %v6824_v30  ;;  %5062 = vmatprep.subr.bf16.mxu0 %v6689_v31 }
 0x2e0   : > { %5103 = vmatprep.subr.bf16.mxu1 %v6817_v28  ;;  %v6523_v28 = vcombine.high %v1683_v24, %v1687_v53 }
 0x2e2   : > { %5063 = vmatpush2.bf16.msra.mxu0 %v6688_v39 }
 0x2e3   : > { %5104 = vmatpush2.bf16.msra.mxu1 %v6816_v49  ;;  %5064 = vmatprep.subr.bf16.mxu0 %v6681_v50  ;;  %v6394_v50 = vcombine.low %v1555_v16, %v1559_v17 }
 0x2e4   : > { %5105 = vmatprep.subr.bf16.mxu1 %v6809_v40  ;;  %v6522_v40 = vcombine.low %v1683_v24, %v1687_v53  ;;  %v1643_v24 = vld [vmem:[%s7736_s1 + $0x418] sm:$0xff] }
 0x2e5   : > { %v1647_v53 = vld [vmem:[%s7736_s1 + $0x438] sm:$0xff] }
 0x2e6   : > { %5065 = vmatpush2.bf16.msra.mxu0 %v6680_v63  ;;  %v1543_v63 = vld [vmem:[%s7736_s1 + $0xf8] sm:$0xff] }
 0x2e7   : > { %5106 = vmatpush2.bf16.msra.mxu1 %v6808_v0  ;;  %5066 = vmatprep.subr.bf16.mxu0 %v6673_v1  ;;  %v1667_v0 = vld [vmem:[%s7736_s1 + $0x4d8] sm:$0xff]  ;;  %v6379_v4 = vcombine.high %v1539_v62, %v1543_v63 }
 0x2e8   : > { %5107 = vmatprep.subr.bf16.mxu1 %v6801_v2  ;;  %v1671_v1 = vld [vmem:[%s7736_s1 + $0x4f8] sm:$0xff]  ;;  %v6386_v2 = vcombine.low %v1547_v14, %v1551_v32  ;;  %v6482_v14 = vcombine.low %v1643_v24, %v1647_v53 }
 0x2e9   : > { %v6507_v5 = vcombine.high %v1667_v0, %v1671_v1  ;;  %v6506_v38 = vcombine.low %v1667_v0, %v1671_v1  ;;  %v1751_v0 = vld [vmem:[%s7736_s1 + $0x778] sm:$0xff] }
 0x2ea   : > { %5067 = vmatpush2.bf16.msra.mxu0 %v6672_v7  ;;  %v1535_v7 = vld [vmem:[%s7736_s1 + $0xb8] sm:$0xff] }
 0x2eb   : > { %5108 = vmatpush2.bf16.msra.mxu1 %v6800_v9  ;;  %5118 = vmatprep.subr.bf16.mxu0 %v6411_v10  ;;  %v1659_v9 = vld [vmem:[%s7736_s1 + $0x498] sm:$0xff]  ;;  %v6371_v57 = vcombine.high %v1531_v6, %v1535_v7 }
 0x2ec   : > { %5159 = vmatprep.subr.bf16.mxu1 %v6539_v37  ;;  %v1663_v10 = vld [vmem:[%s7736_s1 + $0x4b8] sm:$0xff]  ;;  %v6378_v37 = vcombine.low %v1539_v62, %v1543_v63 }
 0x2ed   : > { %v4824_v18 = vpop.f32.mrf.mxu0  ;;  %5069 = vmatmul.mubr.bf16.vlgmr.msra.gmra.mxu0 %v8108_v46  ;;  %v4865_v20 = vpop.f32.mrf.mxu1  ;;  %v1623_v62 = vld [vmem:[%s7736_s1 + $0x378] sm:$0xff] }
 0x2ee   : > { %v4825_v23 = vadd.f32 %v4824_v18, %v2037_v41  ;;  %5110 = vmatmul.mubr.bf16.vlgmr.msra.gmra.mxu1 %v8102_v34  ;;  %5119 = vmatpush1.bf16.msra.mxu0 %v6410_v43  ;;  %v6499_v41 = vcombine.high %v1659_v9, %v1663_v10  ;;  %v1523_v43 = vld [vmem:[%s7736_s1 + $0x58] sm:$0xff] }
 0x2ef   : > { %5150 = vmatprep.mubr.bf16.mxu0 %v8008_v56  ;;  %5160 = vmatpush1.bf16.msra.mxu1 %v6538_v12  ;;  %v4826_v26 = vpop.f32.mrf.mxu0  ;;  %v4867_v31 = vpop.f32.mrf.mxu1  ;;  %v1675_v56 = vld [vmem:[%s7736_s1 + $0x518] sm:$0xff]  ;;  %v6363_v16 = vcombine.high %v1523_v43, %v1527_v44 }
 0x2f0   : > { %v8419_v27 = vadd.f32 %v4865_v20, %v4825_v23  ;;  %5191 = vmatprep.mubr.bf16.mxu1 %v8012_v60  ;;  %v4827_v30 = vadd.f32 %v4826_v26, %v2041_v13  ;;  %5120 = vmatprep.subr.bf16.mxu0 %v6403_v15  ;;  %v6515_v58 = vcombine.high %v1675_v56, %v1679_v36  ;;  %v1655_v12 = vld [vmem:[%s7736_s1 + $0x478] sm:$0xff] }
 0x2f1   : > { %v4828_v33 = vpop.f32.mrf.mxu0  ;;  %5161 = vmatprep.subr.bf16.mxu1 %v6531_v19  ;;  %v4869_v49 = vpop.f32.mrf.mxu1  ;;  %v6514_v3 = vcombine.low %v1675_v56, %v1679_v36  ;;  %v6370_v13 = vcombine.low %v1531_v6, %v1535_v7  ;;  %v6498_v15 = vcombine.low %v1659_v9, %v1663_v10  ;;  %v6491_v17 = vcombine.high %v1651_v11, %v1655_v12  ;;  %v1515_v18 = vld [vmem:[%s7736_s1 + $0x18] sm:$0xff] }
 0x2f2   : > { %v8426_v39 = vadd.f32 %v4867_v31, %v4827_v30  ;;  %5121 = vmatpush1.bf16.msra.mxu0 %v6402_v25  ;;  %v1519_v19 = vld [vmem:[%s7736_s1 + $0x38] sm:$0xff]  ;;  %v6362_v23 = vcombine.low %v1523_v43, %v1527_v44  ;;  %v6490_v20 = vcombine.low %v1651_v11, %v1655_v12  ;;  %v6483_v26 = vcombine.high %v1643_v24, %v1647_v53 }
 0x2f3   : > { %5162 = vmatpush1.bf16.msra.mxu1 %v6530_v8  ;;  %v4829_v60 = vpop.f32.mrf.mxu0  ;;  %5122 = vmatprep.subr.bf16.mxu0 %v6395_v21  ;;  %v4870_v54 = vpop.f32.mrf.mxu1  ;;  %v6355_v25 = vcombine.high %v1515_v18, %v1519_v19  ;;  %v1635_v8 = vld [vmem:[%s7736_s1 + $0x3d8] sm:$0xff] }
 0x2f4   : > { %5163 = vmatprep.subr.bf16.mxu1 %v6523_v28  ;;  %v1639_v21 = vld [vmem:[%s7736_s1 + $0x3f8] sm:$0xff]  ;;  %v6354_v28 = vcombine.low %v1515_v18, %v1519_v19 }
 0x2f5   : > { %v1763_v30 = vld [vmem:[%s7736_s1 + $0x7d8] sm:$0xff]  ;;  %v6475_v32 = vcombine.high %v1635_v8, %v1639_v21  ;;  %v6474_v60 = vcombine.low %v1635_v8, %v1639_v21 }
 0x2f6   : > { %5123 = vmatpush1.bf16.msra.mxu0 %v6394_v50  ;;  %v1767_v31 = vld [vmem:[%s7736_s1 + $0x7f8] sm:$0xff] }
 0x2f7   : > { %5164 = vmatpush1.bf16.msra.mxu1 %v6522_v40  ;;  %5124 = vmatprep.subr.bf16.mxu0 %v6387_v51  ;;  %v6603_v33 = vcombine.high %v1763_v30, %v1767_v31  ;;  %v1627_v56 = vld [vmem:[%s7736_s1 + $0x398] sm:$0xff]  ;;  %v6602_v40 = vcombine.low %v1763_v30, %v1767_v31 }
 0x2f8   : > { %5165 = vmatprep.subr.bf16.mxu1 %v6515_v58  ;;  %v1631_v36 = vld [vmem:[%s7736_s1 + $0x3b8] sm:$0xff] }
 0x2f9   : > { %v1755_v49 = vld [vmem:[%s7736_s1 + $0x798] sm:$0xff]  ;;  %v6467_v51 = vcombine.high %v1627_v56, %v1631_v36  ;;  %v6466_v1 = vcombine.low %v1627_v56, %v1631_v36 }
 0x2fa   : > { %5125 = vmatpush1.bf16.msra.mxu0 %v6386_v2  ;;  %v1759_v50 = vld [vmem:[%s7736_s1 + $0x7b8] sm:$0xff] }
 0x2fb   : > { %5166 = vmatpush1.bf16.msra.mxu1 %v6514_v3  ;;  %5126 = vmatprep.subr.bf16.mxu0 %v6379_v4  ;;  %v6595_v54 = vcombine.high %v1755_v49, %v1759_v50  ;;  %v1619_v58 = vld [vmem:[%s7736_s1 + $0x358] sm:$0xff]  ;;  %v6594_v2 = vcombine.low %v1755_v49, %v1759_v50 }
 0x2fc   : > { %5167 = vmatprep.subr.bf16.mxu1 %v6507_v5  ;;  %v1747_v63 = vld [vmem:[%s7736_s1 + $0x758] sm:$0xff]  ;;  %v6459_v3 = vcombine.high %v1619_v58, %v1623_v62  ;;  %v6458_v10 = vcombine.low %v1619_v58, %v1623_v62 }
 0x2fd   : > { %v6587_v4 = vcombine.high %v1747_v63, %v1751_v0  ;;  %v1611_v5 = vld [vmem:[%s7736_s1 + $0x318] sm:$0xff] }
 0x2fe   : > { %5127 = vmatpush1.bf16.msra.mxu0 %v6378_v37  ;;  %v1615_v6 = vld [vmem:[%s7736_s1 + $0x338] sm:$0xff]  ;;  %v6586_v37 = vcombine.low %v1747_v63, %v1751_v0 }
 0x2ff   : > { %5168 = vmatpush1.bf16.msra.mxu1 %v6506_v38  ;;  %5128 = vmatprep.subr.bf16.mxu0 %v6371_v57  ;;  %v1739_v7 = vld [vmem:[%s7736_s1 + $0x718] sm:$0xff]  ;;  %v6451_v38 = vcombine.high %v1611_v5, %v1615_v6  ;;  %v6450_v12 = vcombine.low %v1611_v5, %v1615_v6 }
 0x300   : > { %5169 = vmatprep.subr.bf16.mxu1 %v6499_v41  ;;  %v1743_v9 = vld [vmem:[%s7736_s1 + $0x738] sm:$0xff] }
 0x301   : > { %v6579_v57 = vcombine.high %v1739_v7, %v1743_v9  ;;  %v1603_v41 = vld [vmem:[%s7736_s1 + $0x2d8] sm:$0xff] }
 0x302   : > { %5129 = vmatpush1.bf16.msra.mxu0 %v6370_v13  ;;  %v1607_v43 = vld [vmem:[%s7736_s1 + $0x2f8] sm:$0xff]  ;;  %v6578_v13 = vcombine.low %v1739_v7, %v1743_v9 }
 0x303   : > { %5170 = vmatpush1.bf16.msra.mxu1 %v6498_v15  ;;  %5130 = vmatprep.subr.bf16.mxu0 %v6363_v16  ;;  %v1731_v44 = vld [vmem:[%s7736_s1 + $0x6d8] sm:$0xff]  ;;  %v6443_v15 = vcombine.high %v1603_v41, %v1607_v43  ;;  %v6442_v53 = vcombine.low %v1603_v41, %v1607_v43 }
 0x304   : > { %5171 = vmatprep.subr.bf16.mxu1 %v6491_v17  ;;  %v1735_v11 = vld [vmem:[%s7736_s1 + $0x6f8] sm:$0xff] }
 0x305   : > { %v6571_v16 = vcombine.high %v1731_v44, %v1735_v11  ;;  %v1595_v17 = vld [vmem:[%s7736_s1 + $0x298] sm:$0xff] }
 0x306   : > { %5131 = vmatpush1.bf16.msra.mxu0 %v6362_v23  ;;  %v1599_v18 = vld [vmem:[%s7736_s1 + $0x2b8] sm:$0xff]  ;;  %v6570_v23 = vcombine.low %v1731_v44, %v1735_v11 }
 0x307   : > { %5172 = vmatpush1.bf16.msra.mxu1 %v6490_v20  ;;  %5132 = vmatprep.subr.bf16.mxu0 %v6355_v25  ;;  %v1723_v19 = vld [vmem:[%s7736_s1 + $0x698] sm:$0xff]  ;;  %v6435_v20 = vcombine.high %v1595_v17, %v1599_v18  ;;  %v6434_v31 = vcombine.low %v1595_v17, %v1599_v18 }
 0x308   : > { %5173 = vmatprep.subr.bf16.mxu1 %v6483_v26  ;;  %v1727_v24 = vld [vmem:[%s7736_s1 + $0x6b8] sm:$0xff] }
 0x309   : > { %v6563_v25 = vcombine.high %v1723_v19, %v1727_v24  ;;  %v1587_v26 = vld [vmem:[%s7736_s1 + $0x258] sm:$0xff] }
 0x30a   : > { %5133 = vmatpush1.bf16.msra.mxu0 %v6354_v28  ;;  %v1591_v8 = vld [vmem:[%s7736_s1 + $0x278] sm:$0xff]  ;;  %v6562_v28 = vcombine.low %v1723_v19, %v1727_v24 }
 0x30b   : > { %5174 = vmatpush1.bf16.msra.mxu1 %v6482_v14  ;;  %5134 = vmatprep.subr.bf16.mxu0 %v6475_v32  ;;  %v1715_v21 = vld [vmem:[%s7736_s1 + $0x658] sm:$0xff]  ;;  %v6427_v14 = vcombine.high %v1587_v26, %v1591_v8  ;;  %v6426_v50 = vcombine.low %v1587_v26, %v1591_v8 }
 0x30c   : > { %5175 = vmatprep.subr.bf16.mxu1 %v6603_v33  ;;  %v1719_v30 = vld [vmem:[%s7736_s1 + $0x678] sm:$0xff] }
 0x30d   : > { %v6555_v32 = vcombine.high %v1715_v21, %v1719_v30  ;;  %v1579_v33 = vld [vmem:[%s7736_s1 + $0x218] sm:$0xff] }
 0x30e   : > { %5135 = vmatpush2.bf16.msra.mxu0 %v6474_v60  ;;  %v1583_v56 = vld [vmem:[%s7736_s1 + $0x238] sm:$0xff]  ;;  %v6554_v60 = vcombine.low %v1715_v21, %v1719_v30 }
 0x30f   : > { %5176 = vmatpush2.bf16.msra.mxu1 %v6602_v40  ;;  %5136 = vmatprep.subr.bf16.mxu0 %v6467_v51  ;;  %v1707_v36 = vld [vmem:[%s7736_s1 + $0x618] sm:$0xff]  ;;  %v6419_v40 = vcombine.high %v1579_v33, %v1583_v56  ;;  %v6418_v0 = vcombine.low %v1579_v33, %v1583_v56 }
 0x310   : > { %5177 = vmatprep.subr.bf16.mxu1 %v6595_v54  ;;  %v1711_v49 = vld [vmem:[%s7736_s1 + $0x638] sm:$0xff] }
 0x311   : > { %v6547_v51 = vcombine.high %v1707_v36, %v1711_v49  ;;  %v1827_v54 = vld [vmem:[%s7736_s1 + $0x9d8] sm:$0xff] }
 0x312   : > { %5137 = vmatpush2.bf16.msra.mxu0 %v6466_v1  ;;  %v1831_v58 = vld [vmem:[%s7736_s1 + $0x9f8] sm:$0xff]  ;;  %v6546_v1 = vcombine.low %v1707_v36, %v1711_v49 }
 0x313   : > { %5178 = vmatpush2.bf16.msra.mxu1 %v6594_v2  ;;  %5138 = vmatprep.subr.bf16.mxu0 %v6459_v3  ;;  %v1955_v62 = vld [vmem:[%s7736_s1 + $0xdd8] sm:$0xff]  ;;  %v6667_v2 = vcombine.high %v1827_v54, %v1831_v58  ;;  %v6666_v6 = vcombine.low %v1827_v54, %v1831_v58 }
 0x314   : > { %5179 = vmatprep.subr.bf16.mxu1 %v6587_v4  ;;  %v1959_v63 = vld [vmem:[%s7736_s1 + $0xdf8] sm:$0xff] }
 0x315   : > { %v6795_v3 = vcombine.high %v1955_v62, %v1959_v63  ;;  %v1819_v4 = vld [vmem:[%s7736_s1 + $0x998] sm:$0xff] }
 0x316   : > { %5139 = vmatpush2.bf16.msra.mxu0 %v6458_v10  ;;  %v1823_v5 = vld [vmem:[%s7736_s1 + $0x9b8] sm:$0xff]  ;;  %v6794_v10 = vcombine.low %v1955_v62, %v1959_v63 }
 0x317   : > { %5180 = vmatpush2.bf16.msra.mxu1 %v6586_v37  ;;  %5140 = vmatprep.subr.bf16.mxu0 %v6451_v38  ;;  %v1947_v7 = vld [vmem:[%s7736_s1 + $0xd98] sm:$0xff]  ;;  %v6659_v37 = vcombine.high %v1819_v4, %v1823_v5 }
 0x318   : > { %5181 = vmatprep.subr.bf16.mxu1 %v6579_v57  ;;  %v1951_v9 = vld [vmem:[%s7736_s1 + $0xdb8] sm:$0xff] }
 0x319   : > { %v1811_v38 = vld [vmem:[%s7736_s1 + $0x958] sm:$0xff]  ;;  %v6787_v43 = vcombine.high %v1947_v7, %v1951_v9 }
 0x31a   : > { %5141 = vmatpush2.bf16.msra.mxu0 %v6450_v12  ;;  %v1815_v57 = vld [vmem:[%s7736_s1 + $0x978] sm:$0xff] }
 0x31b   : > { %5182 = vmatpush2.bf16.msra.mxu1 %v6578_v13  ;;  %5142 = vmatprep.subr.bf16.mxu0 %v6443_v15  ;;  %v1939_v44 = vld [vmem:[%s7736_s1 + $0xd58] sm:$0xff]  ;;  %v6658_v15 = vcombine.low %v1819_v4, %v1823_v5  ;;  %v6651_v17 = vcombine.high %v1811_v38, %v1815_v57 }
 0x31c   : > { %5183 = vmatprep.subr.bf16.mxu1 %v6571_v16  ;;  %v1943_v11 = vld [vmem:[%s7736_s1 + $0xd78] sm:$0xff] }
 0x31d   : > { %v6779_v19 = vcombine.high %v1939_v44, %v1943_v11  ;;  %v1807_v24 = vld [vmem:[%s7736_s1 + $0x938] sm:$0xff] }
 0x31e   : > { %5143 = vmatpush2.bf16.msra.mxu0 %v6442_v53 }
 0x31f   : > { %5184 = vmatpush2.bf16.msra.mxu1 %v6570_v23  ;;  %5144 = vmatprep.subr.bf16.mxu0 %v6435_v20  ;;  %v1935_v23 = vld [vmem:[%s7736_s1 + $0xd38] sm:$0xff] }
 0x320   : > { %5185 = vmatprep.subr.bf16.mxu1 %v6563_v25  ;;  %v6650_v25 = vcombine.low %v1811_v38, %v1815_v57  ;;  %v1903_v38 = vld [vmem:[%s7736_s1 + $0xc38] sm:$0xff] }
 0x322   : > { %5145 = vmatpush2.bf16.msra.mxu0 %v6434_v31  ;;  %v1795_v31 = vld [vmem:[%s7736_s1 + $0x8d8] sm:$0xff] }
 0x323   : > { %5186 = vmatpush2.bf16.msra.mxu1 %v6562_v28  ;;  %5146 = vmatprep.subr.bf16.mxu0 %v6427_v14  ;;  %v1799_v28 = vld [vmem:[%s7736_s1 + $0x8f8] sm:$0xff] }
 0x324   : > { %5187 = vmatprep.subr.bf16.mxu1 %v6555_v32  ;;  %v1923_v14 = vld [vmem:[%s7736_s1 + $0xcd8] sm:$0xff]  ;;  %v6635_v36 = vcombine.high %v1795_v31, %v1799_v28  ;;  %v6634_v54 = vcombine.low %v1795_v31, %v1799_v28 }
 0x325   : > { %v1927_v32 = vld [vmem:[%s7736_s1 + $0xcf8] sm:$0xff] }
 0x326   : > { %5147 = vmatpush2.bf16.msra.mxu0 %v6426_v50  ;;  %v6763_v49 = vcombine.high %v1923_v14, %v1927_v32  ;;  %v1787_v50 = vld [vmem:[%s7736_s1 + $0x898] sm:$0xff]  ;;  %v6762_v58 = vcombine.low %v1923_v14, %v1927_v32 }
 0x327   : > { %5188 = vmatpush2.bf16.msra.mxu1 %v6554_v60  ;;  %5148 = vmatprep.subr.bf16.mxu0 %v6419_v40  ;;  %v1791_v60 = vld [vmem:[%s7736_s1 + $0x8b8] sm:$0xff] }
 0x328   : > { %5189 = vmatprep.subr.bf16.mxu1 %v6547_v51  ;;  %v1915_v40 = vld [vmem:[%s7736_s1 + $0xc98] sm:$0xff]  ;;  %v6627_v62 = vcombine.high %v1787_v50, %v1791_v60  ;;  %v6626_v4 = vcombine.low %v1787_v50, %v1791_v60 }
 0x329   : > { %v1919_v51 = vld [vmem:[%s7736_s1 + $0xcb8] sm:$0xff] }
 0x32a   : > { %5149 = vmatpush2.bf16.msra.mxu0 %v6418_v0  ;;  %v6755_v63 = vcombine.high %v1915_v40, %v1919_v51  ;;  %v1779_v0 = vld [vmem:[%s7736_s1 + $0x858] sm:$0xff]  ;;  %v6754_v5 = vcombine.low %v1915_v40, %v1919_v51 }
 0x32b   : > { %5190 = vmatpush2.bf16.msra.mxu1 %v6546_v1  ;;  %5200 = vmatprep.subr.bf16.mxu0 %v6667_v2  ;;  %v1783_v1 = vld [vmem:[%s7736_s1 + $0x878] sm:$0xff] }
 0x32c   : > { %5241 = vmatprep.subr.bf16.mxu1 %v6795_v3  ;;  %v1907_v2 = vld [vmem:[%s7736_s1 + $0xc58] sm:$0xff]  ;;  %v6618_v57 = vcombine.low %v1779_v0, %v1783_v1 }
 0x32d   : > { %v4906_v41 = vpop.f32.mrf.mxu0  ;;  %5151 = vmatmul.mubr.bf16.vlgmr.msra.gmra.mxu0 %v8010_v59  ;;  %v6786_v59 = vcombine.low %v1947_v7, %v1951_v9  ;;  %v1911_v3 = vld [vmem:[%s7736_s1 + $0xc78] sm:$0xff] }
 0x32e   : > { %v4907_v12 = vadd.f32 %v4906_v41, %v8419_v27  ;;  %v4947_v13 = vpop.f32.mrf.mxu1  ;;  %5192 = vmatmul.mubr.bf16.vlgmr.msra.gmra.mxu1 %v8006_v55  ;;  %5201 = vmatpush1.bf16.msra.mxu0 %v6666_v6  ;;  %v1803_v55 = vld [vmem:[%s7736_s1 + $0x918] sm:$0xff]  ;;  %v6619_v6 = vcombine.high %v1779_v0, %v1783_v1  ;;  %v6747_v7 = vcombine.high %v1907_v2, %v1911_v3 }
 0x32f   : > { %5232 = vmatprep.mubr.bf16.mxu0 %v8104_v35  ;;  %5242 = vmatpush1.bf16.msra.mxu1 %v6794_v10  ;;  %v8492_v16 = vpop.f32.mrf.mxu0  ;;  %v1931_v35 = vld [vmem:[%s7736_s1 + $0xd18] sm:$0xff]  ;;  %v6643_v8 = vcombine.high %v1803_v55, %v1807_v24  ;;  %v6642_v33 = vcombine.low %v1803_v55, %v1807_v24  ;;  %v6746_v41 = vcombine.low %v1907_v2, %v1911_v3 }
 0x330   : > { %v8494_v18 = vadd.f32 %v4947_v13, %v4907_v12  ;;  %5273 = vmatprep.mubr.bf16.mxu1 %v8110_v47  ;;  %v8497_v27 = vpop.f32.mrf.mxu1  ;;  %5202 = vmatprep.subr.bf16.mxu0 %v6659_v37  ;;  %v6778_v47 = vcombine.low %v1939_v44, %v1943_v11  ;;  %v6771_v30 = vcombine.high %v1931_v35, %v1935_v23  ;;  %v1771_v9 = vld [vmem:[%s7736_s1 + $0x818] sm:$0xff] }
 0x331   : > { %v4910_v53 = vpop.f32.mrf.mxu0  ;;  %5243 = vmatprep.subr.bf16.mxu1 %v6787_v43  ;;  %v6770_v56 = vcombine.low %v1931_v35, %v1935_v23  ;;  %v1775_v10 = vld [vmem:[%s7736_s1 + $0x838] sm:$0xff] }
 0x332   : > { %v4951_v20 = vpop.f32.mrf.mxu1  ;;  %5203 = vmatpush1.bf16.msra.mxu0 %v6658_v15  ;;  %v1899_v37 = vld [vmem:[%s7736_s1 + $0xc18] sm:$0xff]  ;;  %v6611_v43 = vcombine.high %v1771_v9, %v1775_v10 }
 0x333   : > { %5244 = vmatpush1.bf16.msra.mxu1 %v6786_v59  ;;  %v4911_v26 = vpop.f32.mrf.mxu0  ;;  %5204 = vmatprep.subr.bf16.mxu0 %v6651_v17  ;;  %v6739_v44 = vcombine.high %v1899_v37, %v1903_v38  ;;  %v1891_v11 = vld [vmem:[%s7736_s1 + $0xbd8] sm:$0xff]  ;;  %v6610_v59 = vcombine.low %v1771_v9, %v1775_v10  ;;  %v6738_v17 = vcombine.low %v1899_v37, %v1903_v38 }
 0x334   : > { %v4952_v21 = vpop.f32.mrf.mxu1  ;;  %5245 = vmatprep.subr.bf16.mxu1 %v6779_v19  ;;  %v1895_v12 = vld [vmem:[%s7736_s1 + $0xbf8] sm:$0xff] }
 0x335   : > { %v2019_v13 = vld [vmem:[%s7736_s1 + $0xfd8] sm:$0xff]  ;;  %v6731_v19 = vcombine.high %v1891_v11, %v1895_v12  ;;  %v6730_v20 = vcombine.low %v1891_v11, %v1895_v12 }
 0x336   : > { %5205 = vmatpush1.bf16.msra.mxu0 %v6650_v25  ;;  %v2023_v15 = vld [vmem:[%s7736_s1 + $0xff8] sm:$0xff] }
 0x337   : > { %5246 = vmatpush1.bf16.msra.mxu1 %v6778_v47  ;;  %5206 = vmatprep.subr.bf16.mxu0 %v6643_v8  ;;  %v6859_v55 = vcombine.high %v2019_v13, %v2023_v15  ;;  %v1883_v24 = vld [vmem:[%s7736_s1 + $0xb98] sm:$0xff]  ;;  %v6858_v25 = vcombine.low %v2019_v13, %v2023_v15 }
 0x338   : > { %5247 = vmatprep.subr.bf16.mxu1 %v6771_v30  ;;  %v1887_v53 = vld [vmem:[%s7736_s1 + $0xbb8] sm:$0xff] }
 0x339   : > { %v2011_v35 = vld [vmem:[%s7736_s1 + $0xf98] sm:$0xff]  ;;  %v6723_v26 = vcombine.high %v1883_v24, %v1887_v53  ;;  %v6722_v28 = vcombine.low %v1883_v24, %v1887_v53  ;;  %v4909_v53 = vadd.f32 %v8492_v16, %v8426_v39  ;;  %v7126_v39 = vld [vmem:[%s7744_s27 + $0x78] sm:$0xff]  }
 0x33a   : > { %5207 = vmatpush1.bf16.msra.mxu0 %v6642_v33  ;;  %v2015_v23 = vld [vmem:[%s7736_s1 + $0xfb8] sm:$0xff]  ;;  %v7127_v16 = vld [vmem:[%s7744_s27 + $0xf8] sm:$0xff]  }
 0x33b   : > { %5248 = vmatpush1.bf16.msra.mxu1 %v6770_v56  ;;  %5208 = vmatprep.subr.bf16.mxu0 %v6635_v36  ;;  %v6851_v47 = vcombine.high %v2011_v35, %v2015_v23  ;;  %v1875_v8 = vld [vmem:[%s7736_s1 + $0xb58] sm:$0xff]  ;;  %v6850_v14 = vcombine.low %v2011_v35, %v2015_v23 }
 0x33c   : > { %5249 = vmatprep.subr.bf16.mxu1 %v6763_v49  ;;  %v1879_v21 = vld [vmem:[%s7736_s1 + $0xb78] sm:$0xff] }
 0x33d   : > { %v2003_v30 = vld [vmem:[%s7736_s1 + $0xf58] sm:$0xff]  ;;  %v6715_v32 = vcombine.high %v1875_v8, %v1879_v21  ;;  %v6714_v60 = vcombine.low %v1875_v8, %v1879_v21  ;;  %v5283_v21 = vmax.f32 %v8348_v42, 0.0 }
 0x33e   : > { %5209 = vmatpush1.bf16.msra.mxu0 %v6634_v54  ;;  %v2007_v31 = vld [vmem:[%s7736_s1 + $0xf78] sm:$0xff] }
 0x33f   : > { %5250 = vmatpush1.bf16.msra.mxu1 %v6762_v58  ;;  %5210 = vmatprep.subr.bf16.mxu0 %v6627_v62  ;;  %v6843_v33 = vcombine.high %v2003_v30, %v2007_v31  ;;  %v1867_v56 = vld [vmem:[%s7736_s1 + $0xb18] sm:$0xff]  ;;  %v6842_v40 = vcombine.low %v2003_v30, %v2007_v31  ;;  %v7128_v31 = vld [vmem:[%s7744_s27 + $0x38] sm:$0xff]  }
 0x340   : > { %5251 = vmatprep.subr.bf16.mxu1 %v6755_v63  ;;  %v1871_v36 = vld [vmem:[%s7736_s1 + $0xb38] sm:$0xff] }
 0x341   : > { %v1995_v49 = vld [vmem:[%s7736_s1 + $0xf18] sm:$0xff]  ;;  %v6707_v51 = vcombine.high %v1867_v56, %v1871_v36  ;;  %v6706_v1 = vcombine.low %v1867_v56, %v1871_v36  ;;  %v7132_v36 = vld [vmem:[%s7744_s27 + $0x30] sm:$0xff]  }
 0x342   : > { %5211 = vmatpush1.bf16.msra.mxu0 %v6626_v4  ;;  %v1999_v50 = vld [vmem:[%s7736_s1 + $0xf38] sm:$0xff] }
 0x343   : > { %5252 = vmatpush1.bf16.msra.mxu1 %v6754_v5  ;;  %5212 = vmatprep.subr.bf16.mxu0 %v6619_v6  ;;  %v6835_v54 = vcombine.high %v1995_v49, %v1999_v50  ;;  %v1859_v58 = vld [vmem:[%s7736_s1 + $0xad8] sm:$0xff]  ;;  %v6834_v2 = vcombine.low %v1995_v49, %v1999_v50  ;;  %v7133_v50 = vld [vmem:[%s7744_s27 + $0xb0] sm:$0xff]  }
 0x344   : > { %5253 = vmatprep.subr.bf16.mxu1 %v6747_v7  ;;  %v1863_v62 = vld [vmem:[%s7736_s1 + $0xaf8] sm:$0xff] }
 0x345   : > { %v1987_v63 = vld [vmem:[%s7736_s1 + $0xed8] sm:$0xff]  ;;  %v6699_v3 = vcombine.high %v1859_v58, %v1863_v62  ;;  %v6698_v10 = vcombine.low %v1859_v58, %v1863_v62 }
 0x346   : > { %5213 = vmatpush1.bf16.msra.mxu0 %v6618_v57  ;;  %v1991_v0 = vld [vmem:[%s7736_s1 + $0xef8] sm:$0xff] }
 0x347   : > { %5254 = vmatpush1.bf16.msra.mxu1 %v6746_v41  ;;  %5214 = vmatprep.subr.bf16.mxu0 %v6611_v43  ;;  %v6827_v4 = vcombine.high %v1987_v63, %v1991_v0  ;;  %v1851_v5 = vld [vmem:[%s7736_s1 + $0xa98] sm:$0xff]  ;;  %v6826_v37 = vcombine.low %v1987_v63, %v1991_v0  ;;  %v7138_v63 = vld [vmem:[%s7744_s27 + $0x60] sm:$0xff]  }
 0x348   : > { %5255 = vmatprep.subr.bf16.mxu1 %v6739_v44  ;;  %v1855_v6 = vld [vmem:[%s7736_s1 + $0xab8] sm:$0xff] }
 0x349   : > { %v1979_v7 = vld [vmem:[%s7736_s1 + $0xe98] sm:$0xff]  ;;  %v6691_v38 = vcombine.high %v1851_v5, %v1855_v6  ;;  %v6690_v12 = vcombine.low %v1851_v5, %v1855_v6  ;;  %v7143_v5 = vld [vmem:[%s7744_s27 + $0xd8] sm:$0xff]  }
 0x34a   : > { %5215 = vmatpush1.bf16.msra.mxu0 %v6610_v59  ;;  %v1983_v9 = vld [vmem:[%s7736_s1 + $0xeb8] sm:$0xff]  ;;  %v7144_v6 = vld [vmem:[%s7744_s27 + $0x18] sm:$0xff]  }
 0x34b   : > { %5256 = vmatpush1.bf16.msra.mxu1 %v6738_v17  ;;  %5216 = vmatprep.subr.bf16.mxu0 %v6731_v19  ;;  %v6819_v57 = vcombine.high %v1979_v7, %v1983_v9  ;;  %v1843_v41 = vld [vmem:[%s7736_s1 + $0xa58] sm:$0xff]  ;;  %v6818_v13 = vcombine.low %v1979_v7, %v1983_v9  ;;  %v7145_v7 = vld [vmem:[%s7744_s27 + $0x98] sm:$0xff]   ;;  %v7146_v9 = vld [vmem:[%s7744_s27 + $0x50] sm:$0xff]  }
 0x34c   : > { %5257 = vmatprep.subr.bf16.mxu1 %v6859_v55  ;;  %v1847_v43 = vld [vmem:[%s7736_s1 + $0xa78] sm:$0xff] }
 0x34d   : > { %v1971_v44 = vld [vmem:[%s7736_s1 + $0xe58] sm:$0xff]  ;;  %v6683_v15 = vcombine.high %v1843_v41, %v1847_v43  ;;  %v6682_v35 = vcombine.low %v1843_v41, %v1847_v43 }
 0x34e   : > { %5217 = vmatpush2.bf16.msra.mxu0 %v6730_v20  ;;  %v1975_v11 = vld [vmem:[%s7736_s1 + $0xe78] sm:$0xff] }
 0x34f   : > { %5258 = vmatpush2.bf16.msra.mxu1 %v6858_v25  ;;  %5218 = vmatprep.subr.bf16.mxu0 %v6723_v26  ;;  %v6811_v59 = vcombine.high %v1971_v44, %v1975_v11  ;;  %v1835_v17 = vld [vmem:[%s7736_s1 + $0xa18] sm:$0xff]  ;;  %v6810_v23 = vcombine.low %v1971_v44, %v1975_v11  ;;  %v4950_v26 = vadd.f32 %v8497_v27, %v4909_v53  ;;  %v7129_v27 = vld [vmem:[%s7744_s27 + $0xb8] sm:$0xff]   ;;  %v7154_v11 = vld [vmem:[%s7744_s27 + $0x40] sm:$0xff]  }
 0x350   : > { %5259 = vmatprep.subr.bf16.mxu1 %v6851_v47  ;;  %v1839_v19 = vld [vmem:[%s7736_s1 + $0xa38] sm:$0xff] }
 0x351   : > { %v1963_v55 = vld [vmem:[%s7736_s1 + $0xe18] sm:$0xff]  ;;  %v6675_v20 = vcombine.high %v1835_v17, %v1839_v19  ;;  %v6674_v47 = vcombine.low %v1835_v17, %v1839_v19  ;;  %v5285_v30 = vmax.f32 %v4950_v26, 0.0  ;;  %v7158_v17 = vld [vmem:[%s7744_s27 + $0x178] sm:$0xff]   ;;  %v5284_v19 = vmax.f32 %v8494_v18, 0.0  ;;  %v7161_v18 = vld [vmem:[%s7744_s27 + $0x130] sm:$0xff]  }
 0x352   : > { %5219 = vmatpush2.bf16.msra.mxu0 %v6722_v28  ;;  %v1967_v24 = vld [vmem:[%s7736_s1 + $0xe38] sm:$0xff]  ;;  %v7130_v28 = vld [vmem:[%s7744_s27 + $0x70] sm:$0xff]  }
 0x353   : > { %5260 = vmatpush2.bf16.msra.mxu1 %v6850_v14  ;;  %5220 = vmatprep.subr.bf16.mxu0 %v6715_v32  ;;  %v6803_v25 = vcombine.high %v1963_v55, %v1967_v24  ;;  %v6802_v8 = vcombine.low %v1963_v55, %v1967_v24  ;;  %v5291_v14 = vpack.c.bf16 %v5283_v21, %v5283_v21  ;;  %v7137_v62 = vld [vmem:[%s7744_s27 + $0xa8] sm:$0xff]   ;;  %v7174_v55 = vld [vmem:[%s7744_s27 + $0x1f8] sm:$0xff]   ;;  %v7177_v26 = vld [vmem:[%s7744_s27 + $0x1b0] sm:$0xff]  }
 0x354   : > { %5261 = vmatprep.subr.bf16.mxu1 %v6843_v33  ;;  %v7131_v33 = vld [vmem:[%s7744_s27 + $0xf0] sm:$0xff]   ;;  %v5293_v56 = vpack.c.bf16 %v5285_v30, %v5285_v30  ;;  %v7151_v41 = vld [vmem:[%s7744_s27 + $0xc8] sm:$0xff]   ;;  %v7159_v24 = vld [vmem:[%s7744_s27 + $0x138] sm:$0xff]  }
 0x355   : > { %v7152_v43 = vld [vmem:[%s7744_s27 + $0x8] sm:$0xff]   ;;  %v7180_v21 = vld [vmem:[%s7744_s27 + $0x1e0] sm:$0xff]  }
 0x356   : > { %5221 = vmatpush2.bf16.msra.mxu0 %v6714_v60  ;;  %v7134_v60 = vld [vmem:[%s7744_s27 + $0x68] sm:$0xff]   ;;  %v7165_v30 = vld [vmem:[%s7744_s27 + $0x120] sm:$0xff]  }
 0x357   : > { %5262 = vmatpush2.bf16.msra.mxu1 %v6842_v40  ;;  %5222 = vmatprep.subr.bf16.mxu0 %v6707_v51  ;;  %v7135_v40 = vld [vmem:[%s7744_s27 + $0xe8] sm:$0xff]  }
 0x358   : > { %5263 = vmatprep.subr.bf16.mxu1 %v6835_v54  ;;  %v7136_v54 = vld [vmem:[%s7744_s27 + $0x28] sm:$0xff]  }
 0x359   : > { %v7153_v44 = vld [vmem:[%s7744_s27 + $0x88] sm:$0xff]  }
 0x35a   : > { %5223 = vmatpush2.bf16.msra.mxu0 %v6706_v1  ;;  %v7139_v1 = vld [vmem:[%s7744_s27 + $0xe0] sm:$0xff]  }
 0x35b   : > { %5264 = vmatpush2.bf16.msra.mxu1 %v6834_v2  ;;  %5224 = vmatprep.subr.bf16.mxu0 %v6699_v3  ;;  %v7140_v2 = vld [vmem:[%s7744_s27 + $0x20] sm:$0xff]  }
 0x35c   : > { %5265 = vmatprep.subr.bf16.mxu1 %v6827_v4  ;;  %v7141_v3 = vld [vmem:[%s7744_s27 + $0xa0] sm:$0xff]   ;;  %v7142_v4 = vld [vmem:[%s7744_s27 + $0x58] sm:$0xff]  }
 0x35e   : > { %5225 = vmatpush2.bf16.msra.mxu0 %v6698_v10  ;;  %v7147_v10 = vld [vmem:[%s7744_s27 + $0xd0] sm:$0xff]  }
 0x35f   : > { %5266 = vmatpush2.bf16.msra.mxu1 %v6826_v37  ;;  %5226 = vmatprep.subr.bf16.mxu0 %v6691_v38  ;;  %v7148_v37 = vld [vmem:[%s7744_s27 + $0x10] sm:$0xff]  }
 0x360   : > { %5267 = vmatprep.subr.bf16.mxu1 %v6819_v57  ;;  %v7149_v38 = vld [vmem:[%s7744_s27 + $0x90] sm:$0xff]   ;;  %v7150_v57 = vld [vmem:[%s7744_s27 + $0x48] sm:$0xff]  }
 0x362   : > { %5227 = vmatpush2.bf16.msra.mxu0 %v6690_v12  ;;  %v7155_v12 = vld [vmem:[%s7744_s27 + $0xc0] sm:$0xff]  }
 0x363   : > { %5268 = vmatpush2.bf16.msra.mxu1 %v6818_v13  ;;  %5228 = vmatprep.subr.bf16.mxu0 %v6683_v15  ;;  %v7156_v13 = vld [vmem:[%s7744_s27] sm:$0xff]   ;;  %v5282_v15 = vmax.f32 %v8340_v29, 0.0  ;;  %v7175_v29 = vld [vmem:[%s7744_s27 + $0x1b8] sm:$0xff]  }
 0x364   : > { %5269 = vmatprep.subr.bf16.mxu1 %v6811_v59  ;;  %v7157_v59 = vld [vmem:[%s7744_s27 + $0x80] sm:$0xff]  }
 0x365   : > { %v5290_v53 = vpack.c.bf16 %v5282_v15, %v5282_v15 }
 0x366   : > { %5229 = vmatpush2.bf16.msra.mxu0 %v6682_v35  ;;  %v7160_v35 = vld [vmem:[%s7744_s27 + $0x170] sm:$0xff]  }
 0x367   : > { %5270 = vmatpush2.bf16.msra.mxu1 %v6810_v23  ;;  %5230 = vmatprep.subr.bf16.mxu0 %v6675_v20  ;;  %v5292_v23 = vpack.c.bf16 %v5284_v19, %v5284_v19  ;;  %v7176_v20 = vld [vmem:[%s7744_s27 + $0x1f0] sm:$0xff]  }
 0x368   : > { %5271 = vmatprep.subr.bf16.mxu1 %v6803_v25  ;;  %v7162_v25 = vld [vmem:[%s7744_s27 + $0x168] sm:$0xff]  }
 0x36a   : > { %5231 = vmatpush2.bf16.msra.mxu0 %v6674_v47  ;;  %v7178_v47 = vld [vmem:[%s7744_s27 + $0x1e8] sm:$0xff]  }
 0x36b   : > { %5272 = vmatpush2.bf16.msra.mxu1 %v6802_v8  ;;  %6934 = vmatprep.subr.bf16.mxu0 %v7126_v39  ;;  %v7163_v8 = vld [vmem:[%s7744_s27 + $0x128] sm:$0xff]   ;;  %v7164_v39 = vld [vmem:[%s7744_s27 + $0x160] sm:$0xff]  }
 0x36c   : > { %6956 = vmatprep.subr.bf16.mxu1 %v7127_v16  ;;  %v7179_v16 = vld [vmem:[%s7744_s27 + $0x1a8] sm:$0xff]  }
 0x36d   : > { %v8560_v32 = vpop.f32.mrf.mxu0  ;;  %5233 = vmatmul.mubr.bf16.vlgmr.msra.gmra.mxu0 %v8108_v46 }
 0x36e   : > { %v8564_v42 = vpop.f32.mrf.mxu1  ;;  %5274 = vmatmul.mubr.bf16.vlgmr.msra.gmra.mxu1 %v8102_v34  ;;  %6935 = vmatpush3.bf16.msra.mxu0 %v7128_v31  ;;  %v7166_v31 = vld [vmem:[%s7744_s27 + $0x158] sm:$0xff]  }
 0x36f   : > { %5849 = vmatprep.mubr.bf16.mxu0 %v5291_v14  ;;  %6957 = vmatpush3.bf16.msra.mxu1 %v7129_v27  ;;  %v8568_v49 = vpop.f32.mrf.mxu0  ;;  %v7181_v27 = vld [vmem:[%s7744_s27 + $0x1a0] sm:$0xff]   ;;  %v7167_v14 = vld [vmem:[%s7744_s27 + $0x118] sm:$0xff]  }
 0x370   : > { %5889 = vmatprep.mubr.bf16.mxu1 %v5293_v56  ;;  %v8572_v46 = vpop.f32.mrf.mxu1  ;;  %6936 = vmatprep.subr.bf16.mxu0 %v7130_v28  ;;  %v7182_v28 = vld [vmem:[%s7744_s27 + $0x1d8] sm:$0xff]  }
 0x371   : > { %v4992_v51 = vpop.f32.mrf.mxu0  ;;  %6958 = vmatprep.subr.bf16.mxu1 %v7131_v33  ;;  %v7168_v33 = vld [vmem:[%s7744_s27 + $0x150] sm:$0xff]   ;;  %v7183_v56 = vld [vmem:[%s7744_s27 + $0x198] sm:$0xff]  }
 0x372   : > { %v5033_v34 = vpop.f32.mrf.mxu1  ;;  %6937 = vmatpush3.bf16.msra.mxu0 %v7132_v36  ;;  %v7169_v36 = vld [vmem:[%s7744_s27 + $0x110] sm:$0xff]  }
 0x373   : > { %6959 = vmatpush3.bf16.msra.mxu1 %v7133_v50  ;;  %v4993_v58 = vpop.f32.mrf.mxu0  ;;  %6938 = vmatprep.subr.bf16.mxu0 %v7134_v60  ;;  %v7170_v50 = vld [vmem:[%s7744_s27 + $0x148] sm:$0xff]   ;;  %v7190_v51 = vld [vmem:[%s441_s14] sm:$0xff] }
 0x374   : > { %v5034_v0 = vpop.f32.mrf.mxu1  ;;  %6960 = vmatprep.subr.bf16.mxu1 %v7135_v40  ;;  %v7171_v60 = vld [vmem:[%s7744_s27 + $0x108] sm:$0xff]   ;;  %v7172_v40 = vld [vmem:[%s7744_s27 + $0x140] sm:$0xff]   ;;  %v2045_v34 = vrot.slane %v7190_v51, %v663_v45 }
 0x375   : > { %v7173_v58 = vld [vmem:[%s7744_s27 + $0x100] sm:$0xff]  }
 0x376   : > { %6939 = vmatpush3.bf16.msra.mxu0 %v7136_v54  ;;  %v2049_v54 = vrot.slane %v7190_v51, %v667_v52 }
 0x377   : > { %6961 = vmatpush3.bf16.msra.mxu1 %v7137_v62  ;;  %6940 = vmatprep.subr.bf16.mxu0 %v7138_v63  ;;  %v4989_v62 = vadd.f32 %v8560_v32, %v2045_v34 }
 0x378   : > { %6962 = vmatprep.subr.bf16.mxu1 %v7139_v1  ;;  %v4991_v63 = vadd.f32 %v8568_v49, %v2049_v54 }
 0x379   : > { %v5030_v0 = vadd.f32 %v8564_v42, %v4989_v62 }
 0x37a   : > { %6941 = vmatpush3.bf16.msra.mxu0 %v7140_v2  ;;  %v7184_v2 = vld [vmem:[%s7744_s27 + $0x1d0] sm:$0xff]  }
 0x37b   : > { %6963 = vmatpush3.bf16.msra.mxu1 %v7141_v3  ;;  %6942 = vmatprep.subr.bf16.mxu0 %v7142_v4  ;;  %v5032_v3 = vadd.f32 %v8572_v46, %v4991_v63 }
 0x37c   : > { %6964 = vmatprep.subr.bf16.mxu1 %v7143_v5  ;;  %v7185_v5 = vld [vmem:[%s7744_s27 + $0x190] sm:$0xff]  }
 0x37e   : > { %6943 = vmatpush3.bf16.msra.mxu0 %v7144_v6 }
 0x37f   : > { %6965 = vmatpush3.bf16.msra.mxu1 %v7145_v7  ;;  %6944 = vmatprep.subr.bf16.mxu0 %v7146_v9  ;;  %v7186_v9 = vld [vmem:[%s7744_s27 + $0x1c8] sm:$0xff]  }
 0x380   : > { %6966 = vmatprep.subr.bf16.mxu1 %v7147_v10 }
 0x382   : > { %6945 = vmatpush3.bf16.msra.mxu0 %v7148_v37  ;;  %v7187_v37 = vld [vmem:[%s7744_s27 + $0x188] sm:$0xff]  }
 0x383   : > { %6967 = vmatpush3.bf16.msra.mxu1 %v7149_v38  ;;  %6946 = vmatprep.subr.bf16.mxu0 %v7150_v57 }
 0x384   : > { %6968 = vmatprep.subr.bf16.mxu1 %v7151_v41 }
 0x386   : > { %6947 = vmatpush3.bf16.msra.mxu0 %v7152_v43  ;;  %v7188_v43 = vld [vmem:[%s7744_s27 + $0x1c0] sm:$0xff]  }
 0x387   : > { %6969 = vmatpush3.bf16.msra.mxu1 %v7153_v44  ;;  %6948 = vmatprep.subr.bf16.mxu0 %v7154_v11  ;;  %v7189_v11 = vld [vmem:[%s7744_s27 + $0x180] sm:$0xff]  }
 0x388   : > { %6970 = vmatprep.subr.bf16.mxu1 %v7155_v12 }
 0x38a   : > { %6949 = vmatpush3.bf16.msra.mxu0 %v7156_v13 }
 0x38b   : > { %6971 = vmatpush3.bf16.msra.mxu1 %v7157_v59  ;;  %6978 = vmatprep.subr.bf16.mxu0 %v7158_v17 }
 0x38c   : > { %7000 = vmatprep.subr.bf16.mxu1 %v7174_v55 }
 0x38d   : > { %5850 = vmatmul.mubr.bf16.vlgmr.msra.gmra.mxu0 %v5290_v53 }
 0x38e   : > { %5890 = vmatmul.mubr.bf16.vlgmr.msra.gmra.mxu1 %v5292_v23  ;;  %6979 = vmatpush3.bf16.msra.mxu0 %v7159_v24 }
 0x38f   : > { %6980 = vmatprep.subr.bf16.mxu0 %v7160_v35  ;;  %7001 = vmatpush3.bf16.msra.mxu1 %v7175_v29  ;;  %v2053_v35 = vrot.slane %v7190_v51, %v671_v48  ;;  %v2057_v29 = vrot.slane %v7190_v51, %v675_v61 }
 0x390   : > { %7002 = vmatprep.subr.bf16.mxu1 %v7176_v20 }
 0x392   : > { %6981 = vmatpush3.bf16.msra.mxu0 %v7161_v18 }
 0x393   : > { %6982 = vmatprep.subr.bf16.mxu0 %v7162_v25  ;;  %7003 = vmatpush3.bf16.msra.mxu1 %v7177_v26 }
 0x394   : > { %7004 = vmatprep.subr.bf16.mxu1 %v7178_v47 }
 0x396   : > { %6983 = vmatpush3.bf16.msra.mxu0 %v7163_v8 }
 0x397   : > { %6984 = vmatprep.subr.bf16.mxu0 %v7164_v39  ;;  %7005 = vmatpush3.bf16.msra.mxu1 %v7179_v16 }
 0x398   : > { %7006 = vmatprep.subr.bf16.mxu1 %v7180_v21 }
 0x39a   : > { %6985 = vmatpush3.bf16.msra.mxu0 %v7165_v30 }
 0x39b   : > { %6986 = vmatprep.subr.bf16.mxu0 %v7166_v31  ;;  %7007 = vmatpush3.bf16.msra.mxu1 %v7181_v27 }
 0x39c   : > { %7008 = vmatprep.subr.bf16.mxu1 %v7182_v28 }
 0x39e   : > { %6987 = vmatpush3.bf16.msra.mxu0 %v7167_v14 }
 0x39f   : > { %6988 = vmatprep.subr.bf16.mxu0 %v7168_v33  ;;  %7009 = vmatpush3.bf16.msra.mxu1 %v7183_v56 }
 0x3a0   : > { %7010 = vmatprep.subr.bf16.mxu1 %v7184_v2 }
 0x3a2   : > { %6989 = vmatpush3.bf16.msra.mxu0 %v7169_v36 }
 0x3a3   : > { %6990 = vmatprep.subr.bf16.mxu0 %v7170_v50  ;;  %7011 = vmatpush3.bf16.msra.mxu1 %v7185_v5 }
 0x3a4   : > { %7012 = vmatprep.subr.bf16.mxu1 %v7186_v9 }
 0x3a6   : > { %6991 = vmatpush3.bf16.msra.mxu0 %v7171_v60  ;;  %v6860_v60 = vld [vmem:[%s458_s15] ss:$0 sm:$0xff] }
 0x3a7   : > { %6992 = vmatprep.subr.bf16.mxu0 %v7172_v40  ;;  %7013 = vmatpush3.bf16.msra.mxu1 %v7187_v37 }
 0x3a8   : > { %7014 = vmatprep.subr.bf16.mxu1 %v7188_v43 }
 0x3aa   : > { %6993 = vmatpush3.bf16.msra.mxu0 %v7173_v58 }
 0x3ab   : > { %7015 = vmatpush3.bf16.msra.mxu1 %v7189_v11 }
 0x3ad   : > { %v5070_v1 = vpop.f32.mrf.mxu0 }
 0x3ae   : > { %v5071_v45 = vadd.f32 %v5070_v1, %v5030_v0  ;;  %v5111_v4 = vpop.f32.mrf.mxu1 }
 0x3af   : > { %v5072_v52 = vpop.f32.mrf.mxu0 }
 0x3b0   : > { %v5112_v6 = vadd.f32 %v5111_v4, %v5071_v45  ;;  %v5073_v7 = vadd.f32 %v5072_v52, %v5032_v3  ;;  %v5113_v32 = vpop.f32.mrf.mxu1 }
 0x3b1   : > { %v5074_v49 = vpop.f32.mrf.mxu0 }
 0x3b2   : > { %v5114_v10 = vadd.f32 %v5113_v32, %v5073_v7  ;;  %v5115_v42 = vpop.f32.mrf.mxu1  ;;  %v5286_v38 = vmax.f32 %v5112_v6, 0.0 }
 0x3b3   : > { %v5075_v57 = vpop.f32.mrf.mxu0 }
 0x3b4   : > { %v5287_v46 = vmax.f32 %v5114_v10, 0.0  ;;  %v5116_v41 = vpop.f32.mrf.mxu1  ;;  %v5294_v12 = vpack.c.bf16 %v5286_v38, %v5286_v38 }
 0x3b6   : > { %v5295_v44 = vpack.c.bf16 %v5287_v46, %v5287_v46 }
 0x3b8   : > { %5929 = vmatprep.mubr.bf16.mxu0 %v5295_v44 }
 0x3b9   : > { %5930 = vmatmul.mubr.bf16.vlgmr.msra.gmra.mxu0 %v5294_v12 }
 0x3ed   : > { %v5152_v13 = vpop.f32.mrf.mxu0 }
 0x3ee   : > { %v5193_v15 = vpop.f32.mrf.mxu1  ;;  %v5153_v23 = vadd.f32 %v5152_v13, %v2053_v35 }
 0x3ef   : > { %v5154_v59 = vpop.f32.mrf.mxu0 }
 0x3f0   : > { %v5195_v17 = vpop.f32.mrf.mxu1  ;;  %v5155_v20 = vadd.f32 %v5154_v59, %v2057_v29  ;;  %v5194_v18 = vadd.f32 %v5193_v15, %v5153_v23 }
 0x3f1   : > { %v5156_v19 = vpop.f32.mrf.mxu0 }
 0x3f2   : > { %v5197_v55 = vpop.f32.mrf.mxu1  ;;  %v5196_v26 = vadd.f32 %v5195_v17, %v5155_v20 }
 0x3f3   : > { %v5157_v24 = vpop.f32.mrf.mxu0 }
 0x3f4   : > { %v5198_v53 = vpop.f32.mrf.mxu1 }
 0x42d   : > { %v5234_v25 = vpop.f32.mrf.mxu0 }
 0x42e   : > { %v5235_v47 = vadd.f32 %v5234_v25, %v5194_v18  ;;  %v5275_v8 = vpop.f32.mrf.mxu1 }
 0x42f   : > { %v5236_v39 = vpop.f32.mrf.mxu0 }
 0x430   : > { %v5276_v16 = vadd.f32 %v5275_v8, %v5235_v47  ;;  %v5237_v21 = vadd.f32 %v5236_v39, %v5196_v26  ;;  %v5277_v30 = vpop.f32.mrf.mxu1 }
 0x431   : > { %v5238_v31 = vpop.f32.mrf.mxu0 }
 0x432   : > { %v5278_v27 = vadd.f32 %v5277_v30, %v5237_v21  ;;  %v5279_v28 = vpop.f32.mrf.mxu1  ;;  %v5288_v14 = vmax.f32 %v5276_v16, 0.0 }
 0x433   : > { %v5239_v48 = vpop.f32.mrf.mxu0 }
 0x434   : > { %v5289_v33 = vmax.f32 %v5278_v27, 0.0  ;;  %v5280_v22 = vpop.f32.mrf.mxu1  ;;  %v5296_v56 = vpack.c.bf16 %v5288_v14, %v5288_v14 }
 0x436   : > { %v5297_v61 = vpack.c.bf16 %v5289_v33, %v5289_v33 }
 0x438   : > { %5969 = vmatprep.mubr.bf16.mxu1 %v5297_v61 }
 0x439   : > { %5970 = vmatmul.mubr.bf16.vlgmr.msra.gmra.mxu1 %v5296_v56 }
 0x44d   : > { %v6950_v36 = vpop.f32.mrf.mxu0 }
 0x44e   : > { %v6972_v50 = vpop.f32.mrf.mxu1 }
 0x44f   : > { %v6951_v40 = vpop.f32.mrf.mxu0 }
 0x450   : > { %v6952_v51 = vadd.f32 %v6951_v40, %v6950_v36  ;;  %v6973_v34 = vpop.f32.mrf.mxu1 }
 0x451   : > { %v6974_v54 = vadd.f32 %v6973_v34, %v6972_v50  ;;  %v6953_v58 = vpop.f32.mrf.mxu0 }
 0x452   : > { %v5852_v62 = vadd.f32 %v6952_v51, %v6860_v60  ;;  %v6975_v63 = vpop.f32.mrf.mxu1 }
 0x453   : > { %v6954_v0 = vpop.f32.mrf.mxu0 }
 0x454   : > { %v5892_v1 = vadd.f32 %v6974_v54, %v5852_v62  ;;  %v6976_v2 = vpop.f32.mrf.mxu1 }
 0x479   : > { %v6994_v3 = vpop.f32.mrf.mxu0 }
 0x47b   : > { %v6995_v45 = vpop.f32.mrf.mxu0 }
 0x47c   : > { %v6996_v4 = vadd.f32 %v6995_v45, %v6994_v3 }
 0x47d   : > { %v6997_v5 = vpop.f32.mrf.mxu0 }
 0x47e   : > { %v5932_v52 = vadd.f32 %v6996_v4, %v5892_v1 }
 0x47f   : > { %v6998_v6 = vpop.f32.mrf.mxu0 }
 0x4f9   : > { %v7016_v7 = vpop.f32.mrf.mxu1 }
 0x4fb   : > { %v7017_v32 = vpop.f32.mrf.mxu1 }
 0x4fc   : > { %v7018_v49 = vadd.f32 %v7017_v32, %v7016_v7 }
 0x4fd   : > { %v7019_v9 = vpop.f32.mrf.mxu1 }
 0x4fe   : > { %v5972_v10 = vadd.f32 %v7018_v49, %v5932_v52 }
 0x4ff   : > { %v7020_v42 = vpop.f32.mrf.mxu1 }
 0x500   : > { %5977 = vst [vmem:[%s512_s30] sm:$0xff] %v5972_v10 }
 0x501   : > { %7398 = shalt.err (!%p7395_p5)
}
 0x502   : > { %s7399_s7 = scalar_lea.hbm %s8651_s18, 128  ;;  %s7403_s12 = scalar_lea.hbm %s8739_s2, 256 }
 0x503   : > { %p7400_p2 = scmp.ne.s32.totalorder %s8651_s18, %s7399_s7  ;;  %p7404_p8 = scmp.lt.s32.totalorder %s8651_s18, %s8739_s2 }
 0x504   : > { %p7405_p9 = scmp.lt.s32.totalorder %s7403_s12, %s7399_s7 }
 0x505   : > { %p7401_p4 = pnand %p7400_p2, %p8740_p3 }
 0x506   : > { %p7406_p7 = por %p7405_p9, %p7404_p8 }
 0x507   : > { %p7402_p1 = pneg %p7401_p4 }
 0x509   : > { %p7407_p13 = pnand %p7406_p7, %p7402_p1 }
 0x50b   : > { %7410 = shalt.err (!%p7407_p13)
}
 0x50c   : > { %7038 = dma.vmem_to_hbm [thread:$0]  (%p8740_p3), %s5994_s9, 128, %s8651_s18, %s5979_s22  }
 0x50d PF: > { %s6005_s27 = sand.u32 1, %s7457_s24   ;;  %p8741_p0 = scmp.ne.s32.totalorder %s8724_s20, 0 }
 0x50e   : > { %p8742_p6 = scmp.ge.s32.totalorder %s7477_s29, 2  ;;  %s6006_s15 = scalar_lea.sflag [#allocation4], %s6005_s27 }
 0x510   : > { %p7064_p10 = pnand %p8742_p6, %p8741_p0 }
 0x512   : > { %p7065_p12 = pneg %p7064_p10 }
 0x514   : > { %7452 = dma.done.wait (%p7065_p12), %s6006_s15, 128  }
 0x515   : > { %7454 = vsyncadd (%p7065_p12), %s6006_s15, 4294967168  ;;  %s30_s29 = sadd.s32 1, %s7477_s29   ;;  %s8743_s23 = sld [smem:[#allocation22_spill]] }
 0x516   : > { %p27_p11 = scmp.ge.s32.totalorder %s30_s29, 4   ;;  %s8744_s17 = sld [smem:[#allocation21_spill]] }
 0x517   : > { %s8745_s24 = smov %s7461_s25  ;;  %s8746_s25 = smov %s7465_s26 }
 0x518   : > { %s8748_s27 = smov %s7473_s28  ;;  %29 = sbr.rel (!%p27_p11) target bundleno = 17 (0x11), region = 158 }
 0x51b   : > { %s8747_s26 = smov %s8743_s23 }
 0x51c   : > { %s8749_s28 = smov %s8744_s17 }
 0x51d   :  { %6011 = vsyncpa [#allocation3], 1 }
 0x51e   :  { %6013 = vsyncpa [#allocation3 + $0x1], 1 }
 0x51f   :  { %6014 = vsyncpa [#allocation6], 1 }
 0x520   :  { %6016 = vsyncpa [#allocation6 + $0x1], 1 }
 0x521   :  { %6017 = vsyncpa [#allocation9], 1 }
 0x522   :  { %6019 = vsyncpa [#allocation9 + $0x1], 1 }
 0x523   :  { %6020 = vsyncpa [#allocation12], 1 }
 0x524   :  { %6022 = vsyncpa [#allocation12 + $0x1], 1 }
 0x525   :  { %6023 = vsyncpa [#allocation4], 1 }
 0x526   :  { %6025 = vsyncpa [#allocation4 + $0x1], 1 }

// kernel: tpu_custom_call.1
= control target key start
LH: loop header
LB: loop body
LE: loop exit
PB: predicated region body
PF: predicated region fallthrough
CT: control target
= control target key end

     0   :  { %s8693_s0 = inlined_call_operand.hbm [shape: bf16[8,256], index: 0, kind: input, shape index: {}]   ;;  %s8694_s1 = inlined_call_operand.hbm [shape: bf16[2,256,1024], index: 1, kind: input, shape index: {}]   ;;  %s8695_s2 = inlined_call_operand.hbm [shape: f32[2,1,1024], index: 2, kind: input, shape index: {}]   ;;  %s8696_s3 = inlined_call_operand.hbm [shape: bf16[2,1024,1024], index: 3, kind: input, shape index: {}]   ;;  %s8697_s4 = inlined_call_operand.hbm [shape: f32[2,1,1024], index: 4, kind: input, shape index: {}]   ;;  %s8698_s5 = inlined_call_operand.hbm [shape: bf16[2,1024,128], index: 5, kind: input, shape index: {}]   ;;  %s8699_s6 = inlined_call_operand.hbm [shape: f32[2,1,128], index: 6, kind: input, shape index: {}]   ;;  %s8700_s7 = inlined_call_operand.hbm [shape: f32[2,8,128], index: 7, kind: output, shape index: {}]  }
   0x1   :  { %8711 = sst [smem:[#allocation23_spill]] %s8693_s0 }
   0x2   :  { %8712 = sst [smem:[#allocation24_spill]] %s8694_s1 }
   0x3   :  { %8713 = sst [smem:[#allocation25_spill]] %s8695_s2 }
   0x4   :  { %8714 = sst [smem:[#allocation26_spill]] %s8699_s6 }
   0x5   :  { %8715 = sst [smem:[#allocation27_spill]] %s8700_s7 }
   0x6   :  { %12 = vsyncpa [#allocation3], 0 }
   0x7   :  { %13 = vsyncpa [#allocation6], 0 }
   0x8   :  { %15 = vsyncpa [#allocation6 + $0x1], 0 }
   0x9   :  { %16 = vsyncpa [#allocation9], 0 }
   0xa   :  { %18 = vsyncpa [#allocation9 + $0x1], 0 }
   0xb   :  { %19 = vsyncpa [#allocation12], 0 }
   0xc   :  { %21 = vsyncpa [#allocation12 + $0x1], 0 }
   0xd   :  { %22 = vsyncpa [#allocation4], 0 }
   0xe   :  { %24 = vsyncpa [#allocation4 + $0x1], 0  ;;  %s7531_s24 = smov 0   ;;  %s7533_s25 = smov 0  }
   0xf   :  { %s7535_s26 = smov 0   ;;  %s7537_s27 = smov 0  }
  0x10   :  { %s7539_s28 = smov 0   ;;  %s7541_s29 = smov 0  }
  0x11 LB: > { %8716 = sst [smem:[#allocation20_spill]] %s7469_s27  ;;  %s42_s30 = sadd.s32 1, %s7473_s28  ;;  %s7477_s29 = sphi %s7541_s29, %s30_s29   ;;  %s7473_s28 = sphi %s7539_s28, %s8749_s28   ;;  %s7469_s27 = sphi %s7537_s27, %s8748_s27   ;;  %s7465_s26 = sphi %s7535_s26, %s8747_s26   ;;  %s7461_s25 = sphi %s7533_s25, %s8746_s25   ;;  %s7457_s24 = sphi %s7531_s24, %s8745_s24  }
  0x12   : > { %s75_s8 = sadd.s32 1, %s7465_s26  ;;  %p44_p0 = scmp.ge.s32.totalorder %s42_s30, 2 }
  0x13   : > { %p82_p1 = scmp.ne.s32.totalorder %s7465_s26, %s7461_s25  ;;  %p83_p2 = scmp.eq.s32.totalorder %s7477_s29, 0 }
  0x14   : > { %s8751_s30 = smov (%p44_p0, %s42_s30), 0  ;;  %p7068_p5 = scmp.lt.s32.totalorder %s7477_s29, 2 }
  0x15   : > { %8717 = sst [smem:[#allocation21_spill]] %s8751_s30  ;;  %p84_p4 = por %p83_p2, %p82_p1 }
  0x16   : > { %s72_s9 = ssub.s32 %s7473_s28, %s8751_s30  ;;  %s7576_s10 = sand.u32 1, %s7477_s29  }
  0x17   : > { %p73_p6 = scmp.eq.s32.totalorder %s72_s9, 0  ;;  %s7579_s11 = sand.u32 1, %s7465_s26  }
  0x18   : > { %s6929_s12 = sshll.u32 %s7473_s28, 14  ;;  %s6194_s14 = sshll.u32 %s7579_s11, 10 }
  0x19   : > { %s7583_s13 = scalar_select %p73_p6, %s7465_s26, %s75_s8  }
  0x1a   : > { %s8719_s1 = sld [smem:[#allocation24_spill]]  ;;  %p7589_p7 = pnand %p7068_p5, %p84_p4 }
  0x1b   : > { %8718 = sst [smem:[#allocation22_spill]] %s7583_s13  ;;  %s288_s19 = scalar_lea.vmem [#allocation5], %s6194_s14 }
  0x1c   : > { %s295_s20 = sshll.u32 %s288_s19, 4  ;;  %s8703_s21 = scalar_lea.sflag [#allocation6], %s7576_s10  ;;  %s296_s20 = int_to_ptr.vmem [resolvable:$true] %s295_s20 }
  0x1d   : > { %p7596_p8 = pneg %p7589_p7  ;;  %s7204_s23 = scalar_lea.vmem %s296_s20, 16384 }
  0x1e   : > { %p7205_p9 = scmp.ne.s32.totalorder %s296_s20, %s7204_s23  ;;  %s7479_s8 = smov [#allocation5]  }
  0x1f   : > { %s7209_s9 = sshll.u32 %s7479_s8, 4  ;;  %s7210_s9 = int_to_ptr.vmem [resolvable:$false] %s7209_s9 }
  0x20   : > { %s294_s17 = scalar_lea.hbm %s8719_s1, %s6929_s12  ;;  %p7207_p10 = pnand %p7205_p9, %p7596_p8 }
  0x21   : > { %s7211_s12 = scalar_lea.vmem %s7210_s9, 32768  ;;  %p7212_p12 = scmp.lt.s32.totalorder %s296_s20, %s7210_s9 }
  0x22   : > { %p7208_p11 = pneg %p7207_p10  ;;  %p7213_p13 = scmp.lt.s32.totalorder %s7211_s12, %s7204_s23 }
  0x24   : > { %p7214_p0 = por %p7213_p13, %p7212_p12 }
  0x26   : > { %p7215_p2 = pnand %p7214_p0, %p7208_p11 }
  0x28   : > { %7218 = shalt.err (!%p7215_p2)
}
  0x29   : > { %s7480_s14 = smov 512   ;;  %s7481_s15 = smov 32  }
  0x2a   : > { %7047 = dma.hbm_to_vmem [thread:$0]  (!%p7589_p7), %s294_s17, 16384, %s296_s20, %s8703_s21, %s7480_s14, %s7480_s14, %s7481_s15  }
  0x2b   : > { %s6200_s16 = sshll.u32 %s7579_s11, 12  ;;  %s6931_s19 = sshll.u32 %s7473_s28, 16 }
  0x2c   : > { %s334_s23 = scalar_lea.hbm %s8696_s3, %s6931_s19  ;;  %s328_s12 = scalar_lea.vmem [#allocation8], %s6200_s16 }
  0x2d   : > { %s335_s1 = sshll.u32 %s328_s12, 4  ;;  %s6206_s30 = sshll.u32 %s7579_s11, 9  ;;  %s336_s1 = int_to_ptr.vmem [resolvable:$true] %s335_s1 }
  0x2e   : > { %s8705_s13 = scalar_lea.sflag [#allocation9], %s7576_s10  ;;  %s7232_s7 = scalar_lea.vmem %s336_s1, 65536 }
  0x2f   : > { %p7233_p4 = scmp.ne.s32.totalorder %s336_s1, %s7232_s7  ;;  %s7482_s27 = smov [#allocation8]  }
  0x30   : > { %s7237_s6 = sshll.u32 %s7482_s27, 4  ;;  %s7238_s6 = int_to_ptr.vmem [resolvable:$false] %s7237_s6 }
  0x31   : > { %p7235_p5 = pnand %p7233_p4, %p7596_p8  ;;  %s7239_s17 = scalar_lea.vmem %s7238_s6, 131072 }
  0x32   : > { %p7240_p9 = scmp.lt.s32.totalorder %s336_s1, %s7238_s6  ;;  %p7241_p10 = scmp.lt.s32.totalorder %s7239_s17, %s7232_s7 }
  0x33   : > { %p7236_p6 = pneg %p7235_p5 }
  0x34   : > { %p7242_p11 = por %p7241_p10, %p7240_p9 }
  0x36   : > { %p7243_p12 = pnand %p7242_p11, %p7236_p6 }
  0x38   : > { %7246 = shalt.err (!%p7243_p12)
}
  0x39   : > { %7053 = dma.hbm_to_vmem [thread:$0]  (!%p7589_p7), %s334_s23, 65536, %s336_s1, %s8705_s13, %s7480_s14, %s7480_s14, %s7481_s15  }
  0x3a   : > { %s6933_s20 = sshll.u32 %s7473_s28, 13  ;;  %s368_s8 = scalar_lea.vmem [#allocation11], %s6206_s30 }
  0x3b   : > { %s374_s27 = scalar_lea.hbm %s8698_s5, %s6933_s20  ;;  %s375_s9 = sshll.u32 %s368_s8, 4  ;;  %s376_s9 = int_to_ptr.vmem [resolvable:$true] %s375_s9 }
  0x3c   : > { %s8704_s6 = scalar_lea.sflag [#allocation12], %s7576_s10  ;;  %s7260_s7 = scalar_lea.vmem %s376_s9, 8192 }
  0x3d   : > { %p7261_p13 = scmp.ne.s32.totalorder %s376_s9, %s7260_s7  ;;  %s7483_s12 = smov [#allocation11]  }
  0x3e   : > { %s7265_s17 = sshll.u32 %s7483_s12, 4  ;;  %s7266_s17 = int_to_ptr.vmem [resolvable:$false] %s7265_s17 }
  0x3f   : > { %p7263_p0 = pnand %p7261_p13, %p7596_p8  ;;  %s7267_s21 = scalar_lea.vmem %s7266_s17, 16384 }
  0x40   : > { %p7268_p4 = scmp.lt.s32.totalorder %s376_s9, %s7266_s17  ;;  %p7269_p5 = scmp.lt.s32.totalorder %s7267_s21, %s7260_s7 }
  0x41   : > { %p7264_p2 = pneg %p7263_p0 }
  0x42   : > { %p7270_p6 = por %p7269_p5, %p7268_p4 }
  0x44   : > { %p7271_p9 = pnand %p7270_p6, %p7264_p2 }
  0x46   : > { %7274 = shalt.err (!%p7271_p9)
}
  0x47   : > { %s7484_s1 = smov 64   ;;  %s7485_s30 = smov 4  }
  0x48   : > { %7059 = dma.hbm_to_vmem [thread:$0]  (!%p7589_p7), %s374_s27, 8192, %s376_s9, %s8704_s6, %s7484_s1, %s7484_s1, %s7485_s30  }
  0x49   : > { %s7631_s21 = sadd.s32 4294967295, %s7477_s29   ;;  %s6190_s14 = sadd.s32 4294967294, %s7477_s29  }
  0x4a   : > { %p88_p10 = scmp.ne.s32.totalorder %s7461_s25, %s7457_s24  ;;  %p8707_p11 = scmp.eq.s32.totalorder %s7631_s21, 0 }
  0x4b   : > { %p244_p12 = scmp.eq.s32.totalorder %s7631_s21, 1  ;;  %p250_p13 = scmp.eq.s32.totalorder %s6190_s14, 1 }
  0x4c   : > { %p6191_p0 = scmp.ge.s32.totalorder %s7477_s29, 1  ;;  %p7641_p2 = por %p8707_p11, %p88_p10 }
  0x4d   : > { %p7648_p4 = por %p244_p12, %p82_p1  ;;  %p7652_p5 = por %p250_p13, %p88_p10 }
  0x4e   : > { %s8722_s15 = scalar_select %p7641_p2, 1, 0 }
  0x4f   : > { %s8723_s23 = scalar_select %p7648_p4, 1, 0 }
  0x50   : > { %s8724_s20 = scalar_select %p7652_p5, 1, 0 }
  0x51   : > { %p257_p6 = scmp.lt.s32.totalorder %s7477_s29, 3  ;;  %s7486_s19 = smov [#allocation2]  }
  0x52   : > { %s273_s27 = sshll.u32 %s7486_s19, 4  ;;  %s8706_s8 = sshll.u32 %s7579_s11, 3  ;;  %s274_s27 = int_to_ptr.vmem [resolvable:$true] %s273_s27 }
  0x53   : > { %p7657_p9 = pnand %p6191_p0, %p257_p6  ;;  %s6930_s9 = sshll.u32 %s7473_s28, 7 }
  0x54   : > { %s309_s7 = scalar_lea.vmem [#allocation7], %s8706_s8  ;;  %s8727_s2 = sld [smem:[#allocation25_spill]] }
  0x55   : > { %s8725_s16 = scalar_select %p7657_p9, 1, 0 }
  0x56   : > { %p7040_p3 = pneg %p7657_p9  ;;  %s317_s12 = sshll.u32 %s309_s7, 4  ;;  %s318_s12 = int_to_ptr.vmem [resolvable:$true] %s317_s12 }
  0x57   : > { %s7679_s13 = scalar_lea.hbm %s8697_s4, %s6930_s9  ;;  %s7286_s8 = scalar_lea.vmem %s274_s27, 128 }
  0x58   : > { %p7669_p1 = pnand %p7040_p3, %p8707_p11  ;;  %p7287_p12 = scmp.ne.s32.totalorder %s274_s27, %s7286_s8 }
  0x59   : > { %p7294_p0 = scmp.lt.s32.totalorder %s274_s27, %s274_s27  ;;  %p7295_p6 = scmp.lt.s32.totalorder %s7286_s8, %s7286_s8 }
  0x5a   : > { %s315_s14 = scalar_lea.hbm %s8727_s2, %s6930_s9  ;;  %p7277_p10 = pneg %p7669_p1 }
  0x5b   : > { %p7296_p11 = por %p7295_p6, %p7294_p0 }
  0x5c   : > { %p7289_p13 = pnand %p7287_p12, %p7277_p10 }
  0x5e   : > { %p7290_p3 = pneg %p7289_p13 }
  0x60   : > { %p7297_p5 = pnand %p7296_p11, %p7290_p3 }
  0x62   : > { %7300 = shalt.err (!%p7297_p5)
}
  0x63   : > { %s8728_s0 = sld [smem:[#allocation23_spill]]  ;;  %s7314_s6 = scalar_lea.vmem %s318_s12, 128 }
  0x64   : > { %p7315_p4 = scmp.ne.s32.totalorder %s318_s12, %s7314_s6  ;;  %s7487_s9 = smov [#allocation7]  }
  0x65   : > { %s7319_s30 = sshll.u32 %s7487_s9, 4  ;;  %s7320_s30 = int_to_ptr.vmem [resolvable:$false] %s7319_s30 }
  0x66   : > { %p7317_p2 = pnand %p7315_p4, %p7596_p8  ;;  %s7321_s19 = scalar_lea.vmem %s7320_s30, 256 }
  0x67   : > { %p7322_p10 = scmp.lt.s32.totalorder %s318_s12, %s7320_s30  ;;  %p7323_p12 = scmp.lt.s32.totalorder %s7321_s19, %s7314_s6 }
  0x68   : > { %p7318_p9 = pneg %p7317_p2 }
  0x69   : > { %7043 = dma.hbm_to_vmem [thread:$0]  (!%p7669_p1), %s8728_s0, 128, %s274_s27, [#allocation3]  }
  0x6a   : > { %p7324_p11 = por %p7323_p12, %p7322_p10 }
  0x6c   : > { %p7325_p5 = pnand %p7324_p11, %p7318_p9 }
  0x6e   : > { %7328 = shalt.err (!%p7325_p5)
}
  0x6f   : > { %s8729_s8 = scalar_lea.sflag [#allocation6], %s7576_s10  ;;  %s8730_s27 = sshll.u32 %s7579_s11, 3 }
  0x70   : > { %7050 = dma.hbm_to_vmem [thread:$0]  (!%p7589_p7), %s315_s14, 128, %s318_s12, %s8729_s8  }
  0x71   : > { %s349_s17 = scalar_lea.vmem [#allocation10], %s8730_s27  ;;  %s6209_s1 = sshll.u32 %s7473_s28, 4 }
  0x72   : > { %s357_s7 = sshll.u32 %s349_s17, 4  ;;  %s7488_s6 = smov [#allocation10]   ;;  %s358_s7 = int_to_ptr.vmem [resolvable:$true] %s357_s7 }
  0x73   : > { %s7342_s9 = scalar_lea.vmem %s358_s7, 128  ;;  %s7347_s30 = sshll.u32 %s7488_s6, 4  ;;  %s7348_s30 = int_to_ptr.vmem [resolvable:$false] %s7347_s30 }
  0x74   : > { %p7343_p2 = scmp.ne.s32.totalorder %s358_s7, %s7342_s9  ;;  %s7349_s19 = scalar_lea.vmem %s7348_s30, 256 }
  0x75   : > { %p7350_p9 = scmp.lt.s32.totalorder %s358_s7, %s7348_s30  ;;  %p7351_p13 = scmp.lt.s32.totalorder %s7349_s19, %s7342_s9 }
  0x76   : > { %p7345_p4 = pnand %p7343_p2, %p7596_p8 }
  0x77   : > { %p7352_p3 = por %p7351_p13, %p7350_p9 }
  0x78   : > { %p7346_p1 = pneg %p7345_p4 }
  0x7a   : > { %p7353_p0 = pnand %p7352_p3, %p7346_p1 }
  0x7c   : > { %7356 = shalt.err (!%p7353_p0)
}
  0x7d   : > { %s8731_s12 = scalar_lea.sflag [#allocation9], %s7576_s10  ;;  %s8732_s27 = sld [smem:[#allocation26_spill]] }
  0x7e   : > { %7056 = dma.hbm_to_vmem [thread:$0]  (!%p7589_p7), %s7679_s13, 128, %s358_s7, %s8731_s12  }
  0x7f   : > { %s388_s6 = scalar_lea.vmem [#allocation13], %s7579_s11  ;;  %s7489_s9 = smov [#allocation13]  }
  0x80   : > { %s395_s0 = sshll.u32 %s388_s6, 4  ;;  %s7375_s19 = sshll.u32 %s7489_s9, 4  ;;  %s396_s0 = int_to_ptr.vmem [resolvable:$true] %s395_s0  ;;  %s7376_s19 = int_to_ptr.vmem [resolvable:$false] %s7375_s19 }
  0x81   : > { %s7370_s30 = scalar_lea.vmem %s396_s0, 16  ;;  %s7377_s2 = scalar_lea.vmem %s7376_s19, 32 }
  0x82   : > { %p7371_p6 = scmp.ne.s32.totalorder %s396_s0, %s7370_s30  ;;  %p7378_p11 = scmp.lt.s32.totalorder %s396_s0, %s7376_s19 }
  0x83   : > { %s393_s17 = scalar_lea.hbm %s8732_s27, %s6209_s1  ;;  %p7379_p5 = scmp.lt.s32.totalorder %s7377_s2, %s7370_s30 }
  0x84   : > { %p7373_p10 = pnand %p7371_p6, %p7596_p8 }
  0x85   : > { %p7380_p2 = por %p7379_p5, %p7378_p11 }
  0x86   : > { %p7374_p12 = pneg %p7373_p10 }
  0x88   : > { %p7381_p4 = pnand %p7380_p2, %p7374_p12 }
  0x8a   : > { %7384 = shalt.err (!%p7381_p4)
}
  0x8b   : > { %s8733_s11 = scalar_lea.sflag [#allocation12], %s7576_s10  ;;  %p8734_p1 = scmp.ne.s32.totalorder %s8725_s16, 0 }
  0x8c   : > { %7062 = dma.hbm_to_vmem [thread:$0]  (!%p7589_p7), %s393_s17, 16, %s396_s0, %s8733_s11  }
  0x8d   : > { %404 = sbr.rel (%p8734_p1) target bundleno = 1293 (0x50d), region = 48  ;;  %p8735_p8 = scmp.eq.s32.totalorder (!%p8734_p1), %s7631_s21, 0 }
  0x92   : > { %7436 = dma.done.wait (%p8735_p8), [#allocation3], 128   ;;  %p8736_p9 = pmov %p8735_p8 }
  0x93   : > { %s410_s2 = sand.u32 1, %s7631_s21   ;;  %s7722_s13 = sand.u32 1, %s7461_s25  }
  0x94   : > { %7438 = vsyncadd (%p8736_p9), [#allocation3], 4294967168  ;;  %s6212_s18 = sshll.u32 %s7722_s13, 10  ;;  %s411_s22 = scalar_lea.sflag [#allocation6], %s410_s2 }
  0x95   : > { %s7725_s10 = scalar_lea.vmem [#allocation5], %s6212_s18  ;;  %p8737_p7 = scmp.ne.s32.totalorder %s8722_s15, 0 }
  0x97   : > { %7440 = dma.done.wait (%p8737_p7), %s411_s22, 16512  }
  0x98   : > { %7442 = vsyncadd (%p8737_p7), %s411_s22, 4294950784  ;;  %s7732_s0 = sshll.u32 %s7722_s13, 3  ;;  %s6214_s16 = sshll.u32 %s7722_s13, 12 }
  0x99   : > { %s423_s21 = scalar_lea.vmem [#allocation7], %s7732_s0  ;;  %s429_s7 = scalar_lea.sflag [#allocation9], %s410_s2 }
  0x9a   : > { %s7736_s1 = scalar_lea.vmem [#allocation8], %s6214_s16 }
  0x9b   : > { %7444 = dma.done.wait (%p8737_p7), %s429_s7, 65664  }
  0x9c   : > { %7446 = vsyncadd (%p8737_p7), %s429_s7, 4294901632  ;;  %s6216_s12 = sshll.u32 %s7722_s13, 9  ;;  %s441_s14 = scalar_lea.vmem [#allocation10], %s7732_s0 }
  0x9d   : > { %s447_s8 = scalar_lea.sflag [#allocation12], %s410_s2  ;;  %s7744_s27 = scalar_lea.vmem [#allocation11], %s6216_s12 }
  0x9e   : > { %7448 = dma.done.wait (%p8737_p7), %s447_s8, 8208  }
  0x9f   : > { %7450 = vsyncadd (%p8737_p7), %s447_s8, 4294959088  ;;  %v571_v0 = vld [vmem:[%s7725_s10 + $0x1c0] sm:$0xff]  ;;  %v572_v2 = vld [vmem:[%s7725_s10 + $0x1c8] sm:$0xff]  ;;  %s458_s15 = scalar_lea.vmem [#allocation13], %s7722_s13  ;;  %s8738_s17 = sld [smem:[#allocation20_spill]] }
  0xa0   : > { %v575_v1 = vld [vmem:[%s7725_s10 + $0x1e0] sm:$0xff]  ;;  %v576_v4 = vld [vmem:[%s7725_s10 + $0x1e8] sm:$0xff]  ;;  %v7778_v53 = vld [vmem:[#allocation2] sm:$0xff]  ;;  %s512_s30 = scalar_lea.vmem [#allocation14], %s7732_s0  ;;  %s8739_s2 = sld [smem:[#allocation27_spill]] }
  0xa1   : > { %v6277_v3 = vcombine.high %v571_v0, %v575_v1  ;;  %v6276_v5 = vcombine.low %v571_v0, %v575_v1  ;;  %v563_v6 = vld [vmem:[%s7725_s10 + $0x180] sm:$0xff]  ;;  %v6279_v8 = vcombine.high %v572_v2, %v576_v4  ;;  %v6278_v9 = vcombine.low %v572_v2, %v576_v4  ;;  %v564_v11 = vld [vmem:[%s7725_s10 + $0x188] sm:$0xff]  ;;  %s5993_s9 = sshll.u32 %s512_s30, 4  ;;  %s5979_s22 = scalar_lea.sflag [#allocation4], %s7722_s13  ;;  %s5994_s9 = int_to_ptr.vmem [resolvable:$true] %s5993_s9 }
  0xa2   : > { %v567_v7 = vld [vmem:[%s7725_s10 + $0x1a0] sm:$0xff]  ;;  %v568_v12 = vld [vmem:[%s7725_s10 + $0x1a8] sm:$0xff]  ;;  %v7784_v57 = vcombine.high %v7778_v53, %v7778_v53  ;;  %p8740_p3 = scmp.ne.s32.totalorder %s8723_s23, 0  ;;  %s7490_s16 = smov [#allocation14]  }
  0xa3   : > { %v6269_v10 = vcombine.high %v563_v6, %v567_v7  ;;  %v555_v13 = vld [vmem:[%s7725_s10 + $0x140] sm:$0xff]  ;;  %1332 = vmatprep.subr.bf16.mxu0 %v6277_v3  ;;  %v6271_v14 = vcombine.high %v564_v11, %v568_v12  ;;  %v556_v16 = vld [vmem:[%s7725_s10 + $0x148] sm:$0xff]  ;;  %1373 = vmatprep.subr.bf16.mxu1 %v6279_v8  ;;  %v6268_v18 = vcombine.low %v563_v6, %v567_v7  ;;  %s7389_s0 = sshll.u32 %s7490_s16, 4  ;;  %s7390_s0 = int_to_ptr.vmem [resolvable:$false] %s7389_s0 }
  0xa4   : > { %v559_v15 = vld [vmem:[%s7725_s10 + $0x160] sm:$0xff]  ;;  %v560_v17 = vld [vmem:[%s7725_s10 + $0x168] sm:$0xff]  ;;  %1333 = vmatpush1.bf16.msra.mxu0 %v6276_v5  ;;  %1374 = vmatpush1.bf16.msra.mxu1 %v6278_v9  ;;  %v6270_v19 = vcombine.low %v564_v11, %v568_v12  ;;  %p7392_p10 = scmp.lt.s32.totalorder %s5994_s9, %s7390_s0 }
  0xa5   : > { %1334 = vmatprep.subr.bf16.mxu0 %v6269_v10  ;;  %v6261_v20 = vcombine.high %v555_v13, %v559_v15  ;;  %1375 = vmatprep.subr.bf16.mxu1 %v6271_v14  ;;  %v6263_v21 = vcombine.high %v556_v16, %v560_v17  ;;  %v547_v22 = vld [vmem:[%s7725_s10 + $0x100] sm:$0xff]  ;;  %v548_v24 = vld [vmem:[%s7725_s10 + $0x108] sm:$0xff]  ;;  %v6260_v26 = vcombine.low %v555_v13, %v559_v15  ;;  %s6926_s6 = sshll.u32 %s8738_s17, 7 }
  0xa6   : > { %v551_v23 = vld [vmem:[%s7725_s10 + $0x120] sm:$0xff]  ;;  %v552_v25 = vld [vmem:[%s7725_s10 + $0x128] sm:$0xff]  ;;  %v6262_v27 = vcombine.low %v556_v16, %v560_v17  ;;  %1364 = vmatprep.mubr.bf16.mxu0 %v7784_v57  ;;  %1405 = vmatprep.mubr.bf16.mxu1 %v7784_v57  ;;  %s8651_s18 = scalar_lea.hbm %s8739_s2, %s6926_s6 }
  0xa7   : > { %v6253_v28 = vcombine.high %v547_v22, %v551_v23  ;;  %v6255_v29 = vcombine.high %v548_v24, %v552_v25  ;;  %v539_v30 = vld [vmem:[%s7725_s10 + $0xc0] sm:$0xff]  ;;  %v540_v32 = vld [vmem:[%s7725_s10 + $0xc8] sm:$0xff]  ;;  %v6252_v34 = vcombine.low %v547_v22, %v551_v23  ;;  %v6254_v35 = vcombine.low %v548_v24, %v552_v25 }
  0xa8   : > { %1335 = vmatpush1.bf16.msra.mxu0 %v6268_v18  ;;  %1376 = vmatpush1.bf16.msra.mxu1 %v6270_v19  ;;  %v543_v31 = vld [vmem:[%s7725_s10 + $0xe0] sm:$0xff]  ;;  %v544_v33 = vld [vmem:[%s7725_s10 + $0xe8] sm:$0xff] }
  0xa9   : > { %1336 = vmatprep.subr.bf16.mxu0 %v6261_v20  ;;  %1377 = vmatprep.subr.bf16.mxu1 %v6263_v21  ;;  %v6245_v36 = vcombine.high %v539_v30, %v543_v31  ;;  %v6247_v37 = vcombine.high %v540_v32, %v544_v33  ;;  %v531_v38 = vld [vmem:[%s7725_s10 + $0x80] sm:$0xff]  ;;  %v532_v40 = vld [vmem:[%s7725_s10 + $0x88] sm:$0xff]  ;;  %v6244_v42 = vcombine.low %v539_v30, %v543_v31 }
  0xaa   : > { %v535_v39 = vld [vmem:[%s7725_s10 + $0xa0] sm:$0xff]  ;;  %v536_v41 = vld [vmem:[%s7725_s10 + $0xa8] sm:$0xff]  ;;  %v6246_v43 = vcombine.low %v540_v32, %v544_v33 }
  0xab   : > { %v6237_v44 = vcombine.high %v531_v38, %v535_v39  ;;  %v6239_v45 = vcombine.high %v532_v40, %v536_v41  ;;  %v523_v46 = vld [vmem:[%s7725_s10 + $0x40] sm:$0xff]  ;;  %v524_v48 = vld [vmem:[%s7725_s10 + $0x48] sm:$0xff]  ;;  %v6236_v50 = vcombine.low %v531_v38, %v535_v39  ;;  %v6238_v51 = vcombine.low %v532_v40, %v536_v41 }
  0xac   : > { %1337 = vmatpush1.bf16.msra.mxu0 %v6260_v26  ;;  %1378 = vmatpush1.bf16.msra.mxu1 %v6262_v27  ;;  %v527_v47 = vld [vmem:[%s7725_s10 + $0x60] sm:$0xff]  ;;  %v528_v49 = vld [vmem:[%s7725_s10 + $0x68] sm:$0xff] }
  0xad   : > { %1338 = vmatprep.subr.bf16.mxu0 %v6253_v28  ;;  %1379 = vmatprep.subr.bf16.mxu1 %v6255_v29  ;;  %v6229_v52 = vcombine.high %v523_v46, %v527_v47  ;;  %v6231_v54 = vcombine.high %v524_v48, %v528_v49  ;;  %v515_v55 = vld [vmem:[%s7725_s10] sm:$0xff]  ;;  %v516_v58 = vld [vmem:[%s7725_s10 + $0x8] sm:$0xff]  ;;  %v6228_v60 = vcombine.low %v523_v46, %v527_v47 }
  0xae   : > { %v519_v56 = vld [vmem:[%s7725_s10 + $0x20] sm:$0xff]  ;;  %v520_v59 = vld [vmem:[%s7725_s10 + $0x28] sm:$0xff]  ;;  %v6230_v61 = vcombine.low %v524_v48, %v528_v49 }
  0xaf   : > { %v6221_v62 = vcombine.high %v515_v55, %v519_v56  ;;  %v6223_v63 = vcombine.high %v516_v58, %v520_v59  ;;  %v635_v0 = vld [vmem:[%s7725_s10 + $0x3c0] sm:$0xff]  ;;  %v636_v2 = vld [vmem:[%s7725_s10 + $0x3c8] sm:$0xff]  ;;  %v6220_v4 = vcombine.low %v515_v55, %v519_v56  ;;  %v6222_v5 = vcombine.low %v516_v58, %v520_v59 }
  0xb0   : > { %1339 = vmatpush1.bf16.msra.mxu0 %v6252_v34  ;;  %1380 = vmatpush1.bf16.msra.mxu1 %v6254_v35  ;;  %v639_v1 = vld [vmem:[%s7725_s10 + $0x3e0] sm:$0xff]  ;;  %v640_v3 = vld [vmem:[%s7725_s10 + $0x3e8] sm:$0xff] }
  0xb1   : > { %1340 = vmatprep.subr.bf16.mxu0 %v6245_v36  ;;  %1381 = vmatprep.subr.bf16.mxu1 %v6247_v37  ;;  %v6341_v6 = vcombine.high %v635_v0, %v639_v1  ;;  %v6343_v7 = vcombine.high %v636_v2, %v640_v3  ;;  %v627_v8 = vld [vmem:[%s7725_s10 + $0x380] sm:$0xff]  ;;  %v628_v10 = vld [vmem:[%s7725_s10 + $0x388] sm:$0xff]  ;;  %v6340_v12 = vcombine.low %v635_v0, %v639_v1 }
  0xb2   : > { %v631_v9 = vld [vmem:[%s7725_s10 + $0x3a0] sm:$0xff]  ;;  %v632_v11 = vld [vmem:[%s7725_s10 + $0x3a8] sm:$0xff]  ;;  %v6342_v13 = vcombine.low %v636_v2, %v640_v3  ;;  %v573_v2 = vld [vmem:[%s7725_s10 + $0x1d0] sm:$0xff] }
  0xb3   : > { %v6333_v14 = vcombine.high %v627_v8, %v631_v9  ;;  %v6335_v15 = vcombine.high %v628_v10, %v632_v11  ;;  %v619_v16 = vld [vmem:[%s7725_s10 + $0x340] sm:$0xff]  ;;  %v620_v18 = vld [vmem:[%s7725_s10 + $0x348] sm:$0xff]  ;;  %v6332_v20 = vcombine.low %v627_v8, %v631_v9  ;;  %v6334_v21 = vcombine.low %v628_v10, %v632_v11  ;;  %v577_v3 = vld [vmem:[%s7725_s10 + $0x1f0] sm:$0xff] }
  0xb4   : > { %1341 = vmatpush1.bf16.msra.mxu0 %v6244_v42  ;;  %1382 = vmatpush1.bf16.msra.mxu1 %v6246_v43  ;;  %v623_v17 = vld [vmem:[%s7725_s10 + $0x360] sm:$0xff]  ;;  %v624_v19 = vld [vmem:[%s7725_s10 + $0x368] sm:$0xff]  ;;  %v6281_v8 = vcombine.high %v573_v2, %v577_v3  ;;  %v565_v9 = vld [vmem:[%s7725_s10 + $0x190] sm:$0xff] }
  0xb5   : > { %1342 = vmatprep.subr.bf16.mxu0 %v6237_v44  ;;  %1383 = vmatprep.subr.bf16.mxu1 %v6239_v45  ;;  %v6325_v22 = vcombine.high %v619_v16, %v623_v17  ;;  %v6327_v23 = vcombine.high %v620_v18, %v624_v19  ;;  %v611_v24 = vld [vmem:[%s7725_s10 + $0x300] sm:$0xff]  ;;  %v612_v26 = vld [vmem:[%s7725_s10 + $0x308] sm:$0xff]  ;;  %v6324_v28 = vcombine.low %v619_v16, %v623_v17  ;;  %v569_v10 = vld [vmem:[%s7725_s10 + $0x1b0] sm:$0xff] }
  0xb6   : > { %v615_v25 = vld [vmem:[%s7725_s10 + $0x320] sm:$0xff]  ;;  %v616_v27 = vld [vmem:[%s7725_s10 + $0x328] sm:$0xff]  ;;  %v6326_v29 = vcombine.low %v620_v18, %v624_v19  ;;  %v566_v11 = vld [vmem:[%s7725_s10 + $0x198] sm:$0xff]  ;;  %v6273_v19 = vcombine.high %v565_v9, %v569_v10 }
  0xb7   : > { %v6317_v30 = vcombine.high %v611_v24, %v615_v25  ;;  %v6319_v31 = vcombine.high %v612_v26, %v616_v27  ;;  %v603_v32 = vld [vmem:[%s7725_s10 + $0x2c0] sm:$0xff]  ;;  %v604_v34 = vld [vmem:[%s7725_s10 + $0x2c8] sm:$0xff]  ;;  %v6316_v36 = vcombine.low %v611_v24, %v615_v25  ;;  %v6318_v37 = vcombine.low %v612_v26, %v616_v27  ;;  %v557_v16 = vld [vmem:[%s7725_s10 + $0x150] sm:$0xff] }
  0xb8   : > { %1343 = vmatpush1.bf16.msra.mxu0 %v6236_v50  ;;  %1384 = vmatpush1.bf16.msra.mxu1 %v6238_v51  ;;  %v607_v33 = vld [vmem:[%s7725_s10 + $0x2e0] sm:$0xff]  ;;  %v608_v35 = vld [vmem:[%s7725_s10 + $0x2e8] sm:$0xff]  ;;  %v561_v17 = vld [vmem:[%s7725_s10 + $0x170] sm:$0xff] }
  0xb9   : > { %1344 = vmatprep.subr.bf16.mxu0 %v6229_v52  ;;  %1385 = vmatprep.subr.bf16.mxu1 %v6231_v54  ;;  %v6309_v38 = vcombine.high %v603_v32, %v607_v33  ;;  %v6311_v39 = vcombine.high %v604_v34, %v608_v35  ;;  %v595_v40 = vld [vmem:[%s7725_s10 + $0x280] sm:$0xff]  ;;  %v596_v42 = vld [vmem:[%s7725_s10 + $0x288] sm:$0xff]  ;;  %v6308_v44 = vcombine.low %v603_v32, %v607_v33  ;;  %v553_v24 = vld [vmem:[%s7725_s10 + $0x130] sm:$0xff] }
  0xba   : > { %v599_v41 = vld [vmem:[%s7725_s10 + $0x2a0] sm:$0xff]  ;;  %v600_v43 = vld [vmem:[%s7725_s10 + $0x2a8] sm:$0xff]  ;;  %v6310_v45 = vcombine.low %v604_v34, %v608_v35  ;;  %v6265_v26 = vcombine.high %v557_v16, %v561_v17  ;;  %v550_v27 = vld [vmem:[%s7725_s10 + $0x118] sm:$0xff] }
  0xbb   : > { %v6301_v46 = vcombine.high %v595_v40, %v599_v41  ;;  %v6303_v47 = vcombine.high %v596_v42, %v600_v43  ;;  %v587_v48 = vld [vmem:[%s7725_s10 + $0x240] sm:$0xff]  ;;  %v588_v50 = vld [vmem:[%s7725_s10 + $0x248] sm:$0xff]  ;;  %v6300_v52 = vcombine.low %v595_v40, %v599_v41  ;;  %v6302_v54 = vcombine.low %v596_v42, %v600_v43  ;;  %v545_v32 = vld [vmem:[%s7725_s10 + $0xf0] sm:$0xff] }
  0xbc   : > { %1345 = vmatpush1.bf16.msra.mxu0 %v6228_v60  ;;  %1386 = vmatpush1.bf16.msra.mxu1 %v6230_v61  ;;  %v591_v49 = vld [vmem:[%s7725_s10 + $0x260] sm:$0xff]  ;;  %v592_v51 = vld [vmem:[%s7725_s10 + $0x268] sm:$0xff]  ;;  %v542_v35 = vld [vmem:[%s7725_s10 + $0xd8] sm:$0xff] }
  0xbd   : > { %1346 = vmatprep.subr.bf16.mxu0 %v6221_v62  ;;  %1387 = vmatprep.subr.bf16.mxu1 %v6223_v63  ;;  %v6293_v55 = vcombine.high %v587_v48, %v591_v49  ;;  %v6295_v56 = vcombine.high %v588_v50, %v592_v51  ;;  %v579_v58 = vld [vmem:[%s7725_s10 + $0x200] sm:$0xff]  ;;  %v580_v60 = vld [vmem:[%s7725_s10 + $0x208] sm:$0xff]  ;;  %v6292_v62 = vcombine.low %v587_v48, %v591_v49  ;;  %v534_v42 = vld [vmem:[%s7725_s10 + $0x98] sm:$0xff] }
  0xbe   : > { %v583_v59 = vld [vmem:[%s7725_s10 + $0x220] sm:$0xff]  ;;  %v584_v61 = vld [vmem:[%s7725_s10 + $0x228] sm:$0xff]  ;;  %v6294_v63 = vcombine.low %v588_v50, %v592_v51  ;;  %v538_v43 = vld [vmem:[%s7725_s10 + $0xb8] sm:$0xff] }
  0xbf   : > { %v6285_v0 = vcombine.high %v579_v58, %v583_v59  ;;  %v6287_v1 = vcombine.high %v580_v60, %v584_v61  ;;  %v526_v50 = vld [vmem:[%s7725_s10 + $0x58] sm:$0xff] }
  0xc0   : > { %1347 = vmatpush1.bf16.msra.mxu0 %v6220_v4  ;;  %1388 = vmatpush1.bf16.msra.mxu1 %v6222_v5  ;;  %v574_v4 = vld [vmem:[%s7725_s10 + $0x1d8] sm:$0xff] }
  0xc1   : > { %1348 = vmatprep.subr.bf16.mxu0 %v6341_v6  ;;  %1389 = vmatprep.subr.bf16.mxu1 %v6343_v7  ;;  %v578_v5 = vld [vmem:[%s7725_s10 + $0x1f8] sm:$0xff]  ;;  %v6284_v6 = vcombine.low %v579_v58, %v583_v59  ;;  %v6286_v7 = vcombine.low %v580_v60, %v584_v61  ;;  %v6242_v58 = vcombine.low %v534_v42, %v538_v43 }
  0xc2   : > { %v6282_v18 = vcombine.low %v574_v4, %v578_v5  ;;  %v530_v51 = vld [vmem:[%s7725_s10 + $0x78] sm:$0xff] }
  0xc3   : > { %v518_v60 = vld [vmem:[%s7725_s10 + $0x18] sm:$0xff] }
  0xc4   : > { %1349 = vmatpush2.bf16.msra.mxu0 %v6340_v12  ;;  %1390 = vmatpush2.bf16.msra.mxu1 %v6342_v13  ;;  %v6283_v12 = vcombine.high %v574_v4, %v578_v5  ;;  %v570_v13 = vld [vmem:[%s7725_s10 + $0x1b8] sm:$0xff] }
  0xc5   : > { %1350 = vmatprep.subr.bf16.mxu0 %v6333_v14  ;;  %1391 = vmatprep.subr.bf16.mxu1 %v6335_v15  ;;  %v7832_v14 = vcombine.low %v7778_v53, %v7778_v53  ;;  %v6280_v15 = vcombine.low %v573_v2, %v577_v3  ;;  %v6272_v53 = vcombine.low %v565_v9, %v569_v10  ;;  %v522_v61 = vld [vmem:[%s7725_s10 + $0x38] sm:$0xff]  ;;  %v633_v9 = vld [vmem:[%s7725_s10 + $0x3b0] sm:$0xff] }
  0xc6   : > { %v6274_v25 = vcombine.low %v566_v11, %v570_v13  ;;  %v6234_v2 = vcombine.low %v526_v50, %v530_v51  ;;  %v638_v4 = vld [vmem:[%s7725_s10 + $0x3d8] sm:$0xff]  ;;  %v6226_v10 = vcombine.low %v518_v60, %v522_v61 }
  0xc7   : > { %v642_v5 = vld [vmem:[%s7725_s10 + $0x3f8] sm:$0xff] }
  0xc8   : > { %1351 = vmatpush2.bf16.msra.mxu0 %v6332_v20  ;;  %1392 = vmatpush2.bf16.msra.mxu1 %v6334_v21  ;;  %v558_v20 = vld [vmem:[%s7725_s10 + $0x158] sm:$0xff] }
  0xc9   : > { %1352 = vmatprep.subr.bf16.mxu0 %v6325_v22  ;;  %1393 = vmatprep.subr.bf16.mxu1 %v6327_v23  ;;  %v562_v21 = vld [vmem:[%s7725_s10 + $0x178] sm:$0xff]  ;;  %v6275_v22 = vcombine.high %v566_v11, %v570_v13  ;;  %v549_v23 = vld [vmem:[%s7725_s10 + $0x110] sm:$0xff] }
  0xca   : > { %v6266_v33 = vcombine.low %v558_v20, %v562_v21  ;;  %v6257_v34 = vcombine.high %v549_v23, %v553_v24  ;;  %v634_v13 = vld [vmem:[%s7725_s10 + $0x3b8] sm:$0xff] }
  0xcc   : > { %1353 = vmatpush2.bf16.msra.mxu0 %v6324_v28  ;;  %1394 = vmatpush2.bf16.msra.mxu1 %v6326_v29  ;;  %v554_v28 = vld [vmem:[%s7725_s10 + $0x138] sm:$0xff]  ;;  %v6267_v29 = vcombine.high %v558_v20, %v562_v21 }
  0xcd   : > { %1354 = vmatprep.subr.bf16.mxu0 %v6317_v30  ;;  %1395 = vmatprep.subr.bf16.mxu1 %v6319_v31  ;;  %v6264_v30 = vcombine.low %v557_v16, %v561_v17  ;;  %v541_v31 = vld [vmem:[%s7725_s10 + $0xd0] sm:$0xff]  ;;  %v6258_v40 = vcombine.low %v550_v27, %v554_v28  ;;  %v622_v21 = vld [vmem:[%s7725_s10 + $0x358] sm:$0xff] }
  0xce   : > { %v6249_v41 = vcombine.high %v541_v31, %v545_v32  ;;  %v621_v17 = vld [vmem:[%s7725_s10 + $0x350] sm:$0xff] }
  0xd0   : > { %1355 = vmatpush2.bf16.msra.mxu0 %v6316_v36  ;;  %1396 = vmatpush2.bf16.msra.mxu1 %v6318_v37  ;;  %v546_v36 = vld [vmem:[%s7725_s10 + $0xf8] sm:$0xff]  ;;  %v6259_v37 = vcombine.high %v550_v27, %v554_v28 }
  0xd1   : > { %1356 = vmatprep.subr.bf16.mxu0 %v6309_v38  ;;  %1397 = vmatprep.subr.bf16.mxu1 %v6311_v39  ;;  %v6256_v38 = vcombine.low %v549_v23, %v553_v24  ;;  %v537_v39 = vld [vmem:[%s7725_s10 + $0xb0] sm:$0xff]  ;;  %v6250_v48 = vcombine.low %v542_v35, %v546_v36  ;;  %v614_v28 = vld [vmem:[%s7725_s10 + $0x318] sm:$0xff] }
  0xd2   : > { %v613_v24 = vld [vmem:[%s7725_s10 + $0x310] sm:$0xff] }
  0xd4   : > { %1357 = vmatpush2.bf16.msra.mxu0 %v6308_v44  ;;  %1398 = vmatpush2.bf16.msra.mxu1 %v6310_v45  ;;  %v6251_v44 = vcombine.high %v542_v35, %v546_v36  ;;  %v6248_v45 = vcombine.low %v541_v31, %v545_v32  ;;  %v605_v35 = vld [vmem:[%s7725_s10 + $0x2d0] sm:$0xff] }
  0xd5   : > { %1358 = vmatprep.subr.bf16.mxu0 %v6301_v46  ;;  %1399 = vmatprep.subr.bf16.mxu1 %v6303_v47  ;;  %v525_v46 = vld [vmem:[%s7725_s10 + $0x50] sm:$0xff] }
  0xd6   : > { %v529_v47 = vld [vmem:[%s7725_s10 + $0x70] sm:$0xff] }
  0xd7   : > { %v6233_v59 = vcombine.high %v525_v46, %v529_v47  ;;  %v609_v36 = vld [vmem:[%s7725_s10 + $0x2f0] sm:$0xff] }
  0xd8   : > { %1359 = vmatpush2.bf16.msra.mxu0 %v6300_v52  ;;  %1400 = vmatpush2.bf16.msra.mxu1 %v6302_v54  ;;  %v6243_v52 = vcombine.high %v534_v42, %v538_v43  ;;  %v597_v42 = vld [vmem:[%s7725_s10 + $0x290] sm:$0xff] }
  0xd9   : > { %1360 = vmatprep.subr.bf16.mxu0 %v6293_v55  ;;  %1401 = vmatprep.subr.bf16.mxu1 %v6295_v56  ;;  %v517_v55 = vld [vmem:[%s7725_s10 + $0x10] sm:$0xff] }
  0xda   : > { %v521_v56 = vld [vmem:[%s7725_s10 + $0x30] sm:$0xff] }
  0xdb   : > { %v6225_v3 = vcombine.high %v517_v55, %v521_v56  ;;  %v601_v43 = vld [vmem:[%s7725_s10 + $0x2b0] sm:$0xff] }
  0xdc   : > { %1361 = vmatpush2.bf16.msra.mxu0 %v6292_v62  ;;  %1402 = vmatpush2.bf16.msra.mxu1 %v6294_v63  ;;  %v6235_v62 = vcombine.high %v526_v50, %v530_v51  ;;  %v6232_v63 = vcombine.low %v525_v46, %v529_v47  ;;  %v6312_v46 = vcombine.low %v605_v35, %v609_v36  ;;  %v589_v50 = vld [vmem:[%s7725_s10 + $0x250] sm:$0xff] }
  0xdd   : > { %1362 = vmatprep.subr.bf16.mxu0 %v6285_v0  ;;  %1403 = vmatprep.subr.bf16.mxu1 %v6287_v1  ;;  %v637_v0 = vld [vmem:[%s7725_s10 + $0x3d0] sm:$0xff] }
  0xde   : > { %v641_v1 = vld [vmem:[%s7725_s10 + $0x3f0] sm:$0xff] }
  0xdf   : > { %v6345_v11 = vcombine.high %v637_v0, %v641_v1  ;;  %v6344_v16 = vcombine.low %v637_v0, %v641_v1  ;;  %v593_v51 = vld [vmem:[%s7725_s10 + $0x270] sm:$0xff] }
  0xe0   : > { %1363 = vmatpush2.bf16.msra.mxu0 %v6284_v6  ;;  %1404 = vmatpush2.bf16.msra.mxu1 %v6286_v7  ;;  %v6227_v6 = vcombine.high %v518_v60, %v522_v61  ;;  %v6224_v7 = vcombine.low %v517_v55, %v521_v56  ;;  %v6304_v55 = vcombine.low %v597_v42, %v601_v43  ;;  %v581_v60 = vld [vmem:[%s7725_s10 + $0x210] sm:$0xff] }
  0xe1   : > { %1414 = vmatprep.subr.bf16.mxu0 %v6281_v8  ;;  %1455 = vmatprep.subr.bf16.mxu1 %v6283_v12  ;;  %v629_v8 = vld [vmem:[%s7725_s10 + $0x390] sm:$0xff]  ;;  %v630_v12 = vld [vmem:[%s7725_s10 + $0x398] sm:$0xff]  ;;  %v6296_v0 = vcombine.low %v589_v50, %v593_v51 }
  0xe2   : > { %v6337_v20 = vcombine.high %v629_v8, %v633_v9  ;;  %v6336_v23 = vcombine.low %v629_v8, %v633_v9  ;;  %v585_v61 = vld [vmem:[%s7725_s10 + $0x230] sm:$0xff] }
  0xe3   : > { %1365 = vmatmul.mubr.bf16.vlgmr.msra.gmra.mxu0 %v7832_v14  ;;  %1406 = vmatmul.mubr.bf16.vlgmr.msra.gmra.mxu1 %v7832_v14  ;;  %v6288_v8 = vcombine.low %v581_v60, %v585_v61 }
  0xe4   : > { %1415 = vmatpush1.bf16.msra.mxu0 %v6280_v15  ;;  %1456 = vmatpush1.bf16.msra.mxu1 %v6282_v18  ;;  %v6347_v15 = vcombine.high %v638_v4, %v642_v5  ;;  %v625_v18 = vld [vmem:[%s7725_s10 + $0x370] sm:$0xff] }
  0xe5   : > { %1416 = vmatprep.subr.bf16.mxu0 %v6273_v19  ;;  %1457 = vmatprep.subr.bf16.mxu1 %v6275_v22  ;;  %v6346_v19 = vcombine.low %v638_v4, %v642_v5  ;;  %v626_v22 = vld [vmem:[%s7725_s10 + $0x378] sm:$0xff]  ;;  %v6329_v27 = vcombine.high %v621_v17, %v625_v18  ;;  %v6328_v31 = vcombine.low %v621_v17, %v625_v18  ;;  %v1568_v4 = vld [vmem:[%s7736_s1 + $0x1c0] sm:$0xff] }
  0xe6   : > { %1446 = vmatprep.mubr.bf16.mxu0 %v7784_v57  ;;  %1487 = vmatprep.mubr.bf16.mxu1 %v7784_v57  ;;  %v533_v57 = vld [vmem:[%s7725_s10 + $0x90] sm:$0xff]  ;;  %v6330_v32 = vcombine.low %v622_v21, %v626_v22 }
  0xe7   : > { %v6241_v49 = vcombine.high %v533_v57, %v537_v39  ;;  %v6240_v54 = vcombine.low %v533_v57, %v537_v39  ;;  %v1572_v5 = vld [vmem:[%s7736_s1 + $0x1e0] sm:$0xff] }
  0xe8   : > { %1417 = vmatpush1.bf16.msra.mxu0 %v6272_v53  ;;  %1458 = vmatpush1.bf16.msra.mxu1 %v6274_v25  ;;  %v6339_v53 = vcombine.high %v630_v12, %v634_v13  ;;  %v617_v25 = vld [vmem:[%s7725_s10 + $0x330] sm:$0xff]  ;;  %v6404_v17 = vcombine.low %v1568_v4, %v1572_v5 }
  0xe9   : > { %1418 = vmatprep.subr.bf16.mxu0 %v6265_v26  ;;  %1459 = vmatprep.subr.bf16.mxu1 %v6267_v29  ;;  %v6338_v26 = vcombine.low %v630_v12, %v634_v13  ;;  %v618_v29 = vld [vmem:[%s7725_s10 + $0x338] sm:$0xff]  ;;  %v6320_v57 = vcombine.low %v613_v24, %v617_v25  ;;  %v1560_v12 = vld [vmem:[%s7736_s1 + $0x180] sm:$0xff] }
  0xea   : > { %v6322_v39 = vcombine.low %v614_v28, %v618_v29  ;;  %v1564_v13 = vld [vmem:[%s7736_s1 + $0x1a0] sm:$0xff] }
  0xec   : > { %1419 = vmatpush1.bf16.msra.mxu0 %v6264_v30  ;;  %1460 = vmatpush1.bf16.msra.mxu1 %v6266_v33  ;;  %v6331_v30 = vcombine.high %v622_v21, %v626_v22  ;;  %v6321_v33 = vcombine.high %v613_v24, %v617_v25  ;;  %v1552_v21 = vld [vmem:[%s7736_s1 + $0x140] sm:$0xff]  ;;  %v6396_v24 = vcombine.low %v1560_v12, %v1564_v13 }
  0xed   : > { %1420 = vmatprep.subr.bf16.mxu0 %v6257_v34  ;;  %1461 = vmatprep.subr.bf16.mxu1 %v6259_v37  ;;  %v6323_v34 = vcombine.high %v614_v28, %v618_v29  ;;  %v606_v37 = vld [vmem:[%s7725_s10 + $0x2d8] sm:$0xff]  ;;  %v1556_v22 = vld [vmem:[%s7736_s1 + $0x160] sm:$0xff] }
  0xee   : > { %v1544_v28 = vld [vmem:[%s7736_s1 + $0x100] sm:$0xff] }
  0xef   : > { %v1548_v29 = vld [vmem:[%s7736_s1 + $0x120] sm:$0xff] }
  0xf0   : > { %1421 = vmatpush1.bf16.msra.mxu0 %v6256_v38  ;;  %1462 = vmatpush1.bf16.msra.mxu1 %v6258_v40  ;;  %v610_v38 = vld [vmem:[%s7725_s10 + $0x2f8] sm:$0xff]  ;;  %v6313_v40 = vcombine.high %v605_v35, %v609_v36  ;;  %v1540_v35 = vld [vmem:[%s7736_s1 + $0xe0] sm:$0xff] }
  0xf1   : > { %1422 = vmatprep.subr.bf16.mxu0 %v6249_v41  ;;  %1463 = vmatprep.subr.bf16.mxu1 %v6251_v44  ;;  %v6315_v41 = vcombine.high %v606_v37, %v610_v38  ;;  %v598_v44 = vld [vmem:[%s7725_s10 + $0x298] sm:$0xff]  ;;  %v6314_v47 = vcombine.low %v606_v37, %v610_v38  ;;  %v7915_v37 = vld [vmem:[%s7736_s1 + $0x9c0] sm:$0xff] }
  0xf2   : > { %v7918_v38 = vld [vmem:[%s7736_s1 + $0x9e0] sm:$0xff] }
  0xf4   : > { %1423 = vmatpush1.bf16.msra.mxu0 %v6248_v45  ;;  %1464 = vmatpush1.bf16.msra.mxu1 %v6250_v48  ;;  %v602_v45 = vld [vmem:[%s7725_s10 + $0x2b8] sm:$0xff]  ;;  %v6305_v48 = vcombine.high %v597_v42, %v601_v43  ;;  %v6380_v42 = vcombine.low %v1544_v28, %v1548_v29  ;;  %v6660_v43 = vcombine.low %v7915_v37, %v7918_v38 }
  0xf5   : > { %1424 = vmatprep.subr.bf16.mxu0 %v6241_v49  ;;  %1465 = vmatprep.subr.bf16.mxu1 %v6243_v52  ;;  %v6307_v49 = vcombine.high %v598_v44, %v602_v45  ;;  %v590_v52 = vld [vmem:[%s7725_s10 + $0x258] sm:$0xff]  ;;  %v6306_v56 = vcombine.low %v598_v44, %v602_v45 }
  0xf8   : > { %1425 = vmatpush1.bf16.msra.mxu0 %v6240_v54  ;;  %1466 = vmatpush1.bf16.msra.mxu1 %v6242_v58  ;;  %v594_v54 = vld [vmem:[%s7725_s10 + $0x278] sm:$0xff]  ;;  %v6297_v58 = vcombine.high %v589_v50, %v593_v51  ;;  %v1656_v50 = vld [vmem:[%s7736_s1 + $0x480] sm:$0xff] }
  0xf9   : > { %1426 = vmatprep.subr.bf16.mxu0 %v6233_v59  ;;  %1467 = vmatprep.subr.bf16.mxu1 %v6235_v62  ;;  %v6299_v59 = vcombine.high %v590_v52, %v594_v54  ;;  %v582_v62 = vld [vmem:[%s7725_s10 + $0x218] sm:$0xff]  ;;  %v6298_v1 = vcombine.low %v590_v52, %v594_v54  ;;  %v1660_v51 = vld [vmem:[%s7736_s1 + $0x4a0] sm:$0xff] }
  0xfc   : > { %1427 = vmatpush1.bf16.msra.mxu0 %v6232_v63  ;;  %1468 = vmatpush1.bf16.msra.mxu1 %v6234_v2  ;;  %v586_v63 = vld [vmem:[%s7725_s10 + $0x238] sm:$0xff]  ;;  %v6289_v2 = vcombine.high %v581_v60, %v585_v61  ;;  %v1648_v60 = vld [vmem:[%s7736_s1 + $0x440] sm:$0xff]  ;;  %s7385_s10 = scalar_lea.vmem %s5994_s9, 128 }
  0xfd   : > { %1428 = vmatprep.subr.bf16.mxu0 %v6225_v3  ;;  %1469 = vmatprep.subr.bf16.mxu1 %v6227_v6  ;;  %v6291_v3 = vcombine.high %v582_v62, %v586_v63  ;;  %v1696_v6 = vld [vmem:[%s7736_s1 + $0x5c0] sm:$0xff]  ;;  %v6290_v9 = vcombine.low %v582_v62, %v586_v63  ;;  %v6492_v63 = vcombine.low %v1656_v50, %v1660_v51  ;;  %p7386_p13 = scmp.ne.s32.totalorder %s5994_s9, %s7385_s10 }
  0xfe   : > { %v1652_v61 = vld [vmem:[%s7736_s1 + $0x460] sm:$0xff] }
  0xff   : > { %p7387_p0 = pnand %p7386_p13, %p8740_p3 }
 0x100   : > { %1429 = vmatpush1.bf16.msra.mxu0 %v6224_v7  ;;  %1470 = vmatpush1.bf16.msra.mxu1 %v6226_v10  ;;  %v1700_v7 = vld [vmem:[%s7736_s1 + $0x5e0] sm:$0xff]  ;;  %v6405_v10 = vcombine.high %v1568_v4, %v1572_v5 }
 0x101   : > { %1430 = vmatprep.subr.bf16.mxu0 %v6345_v11  ;;  %1471 = vmatprep.subr.bf16.mxu1 %v6347_v15  ;;  %v6533_v11 = vcombine.high %v1696_v6, %v1700_v7  ;;  %v1688_v15 = vld [vmem:[%s7736_s1 + $0x580] sm:$0xff]  ;;  %v6532_v18 = vcombine.low %v1696_v6, %v1700_v7  ;;  %v6484_v7 = vcombine.low %v1648_v60, %v1652_v61  ;;  %p7388_p6 = pneg %p7387_p0 }
 0x102   : > { %v1640_v4 = vld [vmem:[%s7736_s1 + $0x400] sm:$0xff] }
 0x103   : > { %v1644_v5 = vld [vmem:[%s7736_s1 + $0x420] sm:$0xff] }
 0x104   : > { %1431 = vmatpush2.bf16.msra.mxu0 %v6344_v16  ;;  %1472 = vmatpush2.bf16.msra.mxu1 %v6346_v19  ;;  %v1692_v16 = vld [vmem:[%s7736_s1 + $0x5a0] sm:$0xff]  ;;  %v6397_v19 = vcombine.high %v1560_v12, %v1564_v13 }
 0x105   : > { %1432 = vmatprep.subr.bf16.mxu0 %v6337_v20  ;;  %1473 = vmatprep.subr.bf16.mxu1 %v6339_v53  ;;  %v6525_v20 = vcombine.high %v1688_v15, %v1692_v16  ;;  %v1680_v53 = vld [vmem:[%s7736_s1 + $0x540] sm:$0xff]  ;;  %v6524_v25 = vcombine.low %v1688_v15, %v1692_v16  ;;  %v6476_v16 = vcombine.low %v1640_v4, %v1644_v5 }
 0x106   : > { %v1760_v12 = vld [vmem:[%s7736_s1 + $0x7c0] sm:$0xff] }
 0x107   : > { %v1764_v13 = vld [vmem:[%s7736_s1 + $0x7e0] sm:$0xff] }
 0x108   : > { %1433 = vmatpush2.bf16.msra.mxu0 %v6336_v23  ;;  %1474 = vmatpush2.bf16.msra.mxu1 %v6338_v26  ;;  %v1684_v23 = vld [vmem:[%s7736_s1 + $0x560] sm:$0xff]  ;;  %v6389_v26 = vcombine.high %v1552_v21, %v1556_v22 }
 0x109   : > { %1434 = vmatprep.subr.bf16.mxu0 %v6329_v27  ;;  %1475 = vmatprep.subr.bf16.mxu1 %v6331_v30  ;;  %v6517_v27 = vcombine.high %v1680_v53, %v1684_v23  ;;  %v1672_v30 = vld [vmem:[%s7736_s1 + $0x500] sm:$0xff] }
 0x10c   : > { %1435 = vmatpush2.bf16.msra.mxu0 %v6328_v31  ;;  %1476 = vmatpush2.bf16.msra.mxu1 %v6330_v32  ;;  %v1676_v31 = vld [vmem:[%s7736_s1 + $0x520] sm:$0xff]  ;;  %v6516_v32 = vcombine.low %v1680_v53, %v1684_v23  ;;  %v6596_v23 = vcombine.low %v1760_v12, %v1764_v13 }
 0x10d   : > { %1436 = vmatprep.subr.bf16.mxu0 %v6321_v33  ;;  %1477 = vmatprep.subr.bf16.mxu1 %v6323_v34  ;;  %v6381_v33 = vcombine.high %v1544_v28, %v1548_v29  ;;  %v1536_v34 = vld [vmem:[%s7736_s1 + $0xc0] sm:$0xff]  ;;  %v6509_v36 = vcombine.high %v1672_v30, %v1676_v31  ;;  %v6508_v45 = vcombine.low %v1672_v30, %v1676_v31 }
 0x10e   : > { %v6372_v52 = vcombine.low %v1536_v34, %v1540_v35  ;;  %v1744_v28 = vld [vmem:[%s7736_s1 + $0x740] sm:$0xff] }
 0x10f   : > { %v1748_v29 = vld [vmem:[%s7736_s1 + $0x760] sm:$0xff] }
 0x110   : > { %1437 = vmatpush2.bf16.msra.mxu0 %v6320_v57  ;;  %1478 = vmatpush2.bf16.msra.mxu1 %v6322_v39  ;;  %v7921_v57 = vld [vmem:[%s7736_s1 + $0xdc0] sm:$0xff] }
 0x111   : > { %1438 = vmatprep.subr.bf16.mxu0 %v6313_v40  ;;  %1479 = vmatprep.subr.bf16.mxu1 %v6315_v41  ;;  %v1664_v39 = vld [vmem:[%s7736_s1 + $0x4c0] sm:$0xff] }
 0x112   : > { %v1668_v40 = vld [vmem:[%s7736_s1 + $0x4e0] sm:$0xff] }
 0x113   : > { %v7926_v41 = vld [vmem:[%s7736_s1 + $0xde0] sm:$0xff]  ;;  %v6500_v54 = vcombine.low %v1664_v39, %v1668_v40 }
 0x114   : > { %1439 = vmatpush2.bf16.msra.mxu0 %v6312_v46  ;;  %1480 = vmatpush2.bf16.msra.mxu1 %v6314_v47  ;;  %v6788_v44 = vcombine.low %v7921_v57, %v7926_v41  ;;  %v6373_v46 = vcombine.high %v1536_v34, %v1540_v35  ;;  %v6501_v47 = vcombine.high %v1664_v39, %v1668_v40  ;;  %v1612_v34 = vld [vmem:[%s7736_s1 + $0x320] sm:$0xff] }
 0x115   : > { %1440 = vmatprep.subr.bf16.mxu0 %v6305_v48  ;;  %1481 = vmatprep.subr.bf16.mxu1 %v6307_v49  ;;  %v1528_v48 = vld [vmem:[%s7736_s1 + $0x80] sm:$0xff]  ;;  %v6580_v40 = vcombine.low %v1744_v28, %v1748_v29 }
 0x116   : > { %v1532_v49 = vld [vmem:[%s7736_s1 + $0xa0] sm:$0xff] }
 0x117   : > { %v6364_v62 = vcombine.low %v1528_v48, %v1532_v49  ;;  %v1736_v35 = vld [vmem:[%s7736_s1 + $0x700] sm:$0xff] }
 0x118   : > { %1441 = vmatpush2.bf16.msra.mxu0 %v6304_v55  ;;  %1482 = vmatpush2.bf16.msra.mxu1 %v6306_v56  ;;  %v6365_v55 = vcombine.high %v1528_v48, %v1532_v49  ;;  %v6493_v56 = vcombine.high %v1656_v50, %v1660_v51  ;;  %v1728_v48 = vld [vmem:[%s7736_s1 + $0x6c0] sm:$0xff] }
 0x119   : > { %1442 = vmatprep.subr.bf16.mxu0 %v6297_v58  ;;  %1483 = vmatprep.subr.bf16.mxu1 %v6299_v59  ;;  %v1520_v58 = vld [vmem:[%s7736_s1 + $0x40] sm:$0xff] }
 0x11a   : > { %v1524_v59 = vld [vmem:[%s7736_s1 + $0x60] sm:$0xff] }
 0x11b   : > { %v6356_v6 = vcombine.low %v1520_v58, %v1524_v59  ;;  %v1732_v49 = vld [vmem:[%s7736_s1 + $0x6e0] sm:$0xff] }
 0x11c   : > { %1443 = vmatpush2.bf16.msra.mxu0 %v6296_v0  ;;  %1484 = vmatpush2.bf16.msra.mxu1 %v6298_v1  ;;  %v6357_v0 = vcombine.high %v1520_v58, %v1524_v59  ;;  %v6485_v1 = vcombine.high %v1648_v60, %v1652_v61  ;;  %v1720_v58 = vld [vmem:[%s7736_s1 + $0x680] sm:$0xff]  ;;  %v6564_v61 = vcombine.low %v1728_v48, %v1732_v49 }
 0x11d   : > { %1444 = vmatprep.subr.bf16.mxu0 %v6289_v2  ;;  %1485 = vmatprep.subr.bf16.mxu1 %v6291_v3  ;;  %v1512_v2 = vld [vmem:[%s7736_s1] sm:$0xff] }
 0x11e   : > { %v1516_v3 = vld [vmem:[%s7736_s1 + $0x20] sm:$0xff] }
 0x11f   : > { %v6348_v15 = vcombine.low %v1512_v2, %v1516_v3  ;;  %v1724_v59 = vld [vmem:[%s7736_s1 + $0x6a0] sm:$0xff] }
 0x120   : > { %1445 = vmatpush2.bf16.msra.mxu0 %v6288_v8  ;;  %1486 = vmatpush2.bf16.msra.mxu1 %v6290_v9  ;;  %v6349_v8 = vcombine.high %v1512_v2, %v1516_v3  ;;  %v6477_v9 = vcombine.high %v1640_v4, %v1644_v5  ;;  %v1712_v2 = vld [vmem:[%s7736_s1 + $0x640] sm:$0xff]  ;;  %v6556_v5 = vcombine.low %v1720_v58, %v1724_v59 }
 0x121   : > { %4626 = vmatprep.subr.bf16.mxu0 %v6405_v10  ;;  %4667 = vmatprep.subr.bf16.mxu1 %v6533_v11  ;;  %v1632_v10 = vld [vmem:[%s7736_s1 + $0x3c0] sm:$0xff] }
 0x122   : > { %v1636_v11 = vld [vmem:[%s7736_s1 + $0x3e0] sm:$0xff] }
 0x123   : > { %1447 = vmatmul.mubr.bf16.vlgmr.msra.gmra.mxu0 %v7832_v14  ;;  %1488 = vmatmul.mubr.bf16.vlgmr.msra.gmra.mxu1 %v7832_v14  ;;  %v6388_v14 = vcombine.low %v1552_v21, %v1556_v22  ;;  %v1752_v21 = vld [vmem:[%s7736_s1 + $0x780] sm:$0xff]  ;;  %v6468_v53 = vcombine.low %v1632_v10, %v1636_v11 }
 0x124   : > { %4627 = vmatpush1.bf16.msra.mxu0 %v6404_v17  ;;  %4668 = vmatpush1.bf16.msra.mxu1 %v6532_v18  ;;  %v6469_v17 = vcombine.high %v1632_v10, %v1636_v11  ;;  %v6597_v18 = vcombine.high %v1760_v12, %v1764_v13  ;;  %v1756_v22 = vld [vmem:[%s7736_s1 + $0x7a0] sm:$0xff] }
 0x125   : > { %4628 = vmatprep.subr.bf16.mxu0 %v6397_v19  ;;  %4669 = vmatprep.subr.bf16.mxu1 %v6525_v20  ;;  %v1624_v19 = vld [vmem:[%s7736_s1 + $0x380] sm:$0xff]  ;;  %v6588_v31 = vcombine.low %v1752_v21, %v1756_v22 }
 0x126   : > { %v1628_v20 = vld [vmem:[%s7736_s1 + $0x3a0] sm:$0xff] }
 0x127   : > { %v6460_v30 = vcombine.low %v1624_v19, %v1628_v20  ;;  %v1716_v3 = vld [vmem:[%s7736_s1 + $0x660] sm:$0xff] }
 0x128   : > { %4629 = vmatpush1.bf16.msra.mxu0 %v6396_v24  ;;  %4670 = vmatpush1.bf16.msra.mxu1 %v6524_v25  ;;  %v6461_v24 = vcombine.high %v1624_v19, %v1628_v20  ;;  %v6589_v25 = vcombine.high %v1752_v21, %v1756_v22  ;;  %v1704_v10 = vld [vmem:[%s7736_s1 + $0x600] sm:$0xff]  ;;  %v6548_v13 = vcombine.low %v1712_v2, %v1716_v3  ;;  %v645_v21 = vlaneseq }
 0x129   : > { %4630 = vmatprep.subr.bf16.mxu0 %v6389_v26  ;;  %4671 = vmatprep.subr.bf16.mxu1 %v6517_v27  ;;  %v1616_v26 = vld [vmem:[%s7736_s1 + $0x340] sm:$0xff]  ;;  %v6661_v19 = vcombine.high %v7915_v37, %v7918_v38  ;;  %v6789_v20 = vcombine.high %v7921_v57, %v7926_v41 }
 0x12a   : > { %v1620_v27 = vld [vmem:[%s7736_s1 + $0x360] sm:$0xff]  ;;  %v7980_v22 = vshrl.u32 %v645_v21, 7 }
 0x12b   : > { %v6452_v39 = vcombine.low %v1616_v26, %v1620_v27  ;;  %v1708_v11 = vld [vmem:[%s7736_s1 + $0x620] sm:$0xff] }
 0x12c   : > { %4631 = vmatpush1.bf16.msra.mxu0 %v6388_v14  ;;  %4672 = vmatpush1.bf16.msra.mxu1 %v6516_v32  ;;  %v6453_v14 = vcombine.high %v1616_v26, %v1620_v27  ;;  %v6581_v32 = vcombine.high %v1744_v28, %v1748_v29  ;;  %v659_v26 = vsub.s32 3, %v7980_v22  ;;  %v1916_v21 = vld [vmem:[%s7736_s1 + $0xca0] sm:$0xff] }
 0x12d   : > { %4632 = vmatprep.subr.bf16.mxu0 %v6381_v33  ;;  %4673 = vmatprep.subr.bf16.mxu1 %v6509_v36  ;;  %v1608_v33 = vld [vmem:[%s7736_s1 + $0x300] sm:$0xff] }
 0x12e   : > { %v1740_v36 = vld [vmem:[%s7736_s1 + $0x720] sm:$0xff]  ;;  %v6444_v50 = vcombine.low %v1608_v33, %v1612_v34 }
 0x12f   : > { %v6572_v51 = vcombine.low %v1736_v35, %v1740_v36 }
 0x130   : > { %4633 = vmatpush1.bf16.msra.mxu0 %v6380_v42  ;;  %4674 = vmatpush1.bf16.msra.mxu1 %v6508_v45  ;;  %v6445_v42 = vcombine.high %v1608_v33, %v1612_v34  ;;  %v6573_v45 = vcombine.high %v1736_v35, %v1740_v36 }
 0x131   : > { %4634 = vmatprep.subr.bf16.mxu0 %v6373_v46  ;;  %4675 = vmatprep.subr.bf16.mxu1 %v6501_v47  ;;  %v1600_v46 = vld [vmem:[%s7736_s1 + $0x2c0] sm:$0xff] }
 0x132   : > { %v1604_v47 = vld [vmem:[%s7736_s1 + $0x2e0] sm:$0xff] }
 0x133   : > { %v6436_v60 = vcombine.low %v1600_v46, %v1604_v47 }
 0x134   : > { %4635 = vmatpush1.bf16.msra.mxu0 %v6372_v52  ;;  %4676 = vmatpush1.bf16.msra.mxu1 %v6500_v54  ;;  %v6437_v52 = vcombine.high %v1600_v46, %v1604_v47  ;;  %v6565_v54 = vcombine.high %v1728_v48, %v1732_v49  ;;  %v1816_v48 = vld [vmem:[%s7736_s1 + $0x980] sm:$0xff] }
 0x135   : > { %4636 = vmatprep.subr.bf16.mxu0 %v6365_v55  ;;  %4677 = vmatprep.subr.bf16.mxu1 %v6493_v56  ;;  %v1592_v55 = vld [vmem:[%s7736_s1 + $0x280] sm:$0xff] }
 0x136   : > { %v1596_v56 = vld [vmem:[%s7736_s1 + $0x2a0] sm:$0xff] }
 0x137   : > { %v6428_v4 = vcombine.low %v1592_v55, %v1596_v56  ;;  %v1820_v49 = vld [vmem:[%s7736_s1 + $0x9a0] sm:$0xff] }
 0x138   : > { %4637 = vmatpush1.bf16.msra.mxu0 %v6364_v62  ;;  %4678 = vmatpush1.bf16.msra.mxu1 %v6492_v63  ;;  %v6429_v62 = vcombine.high %v1592_v55, %v1596_v56  ;;  %v6557_v63 = vcombine.high %v1720_v58, %v1724_v59 }
 0x139   : > { %4638 = vmatprep.subr.bf16.mxu0 %v6357_v0  ;;  %4679 = vmatprep.subr.bf16.mxu1 %v6485_v1  ;;  %v1584_v0 = vld [vmem:[%s7736_s1 + $0x240] sm:$0xff] }
 0x13a   : > { %v1588_v1 = vld [vmem:[%s7736_s1 + $0x260] sm:$0xff] }
 0x13b   : > { %v6420_v12 = vcombine.low %v1584_v0, %v1588_v1 }
 0x13c   : > { %4639 = vmatpush1.bf16.msra.mxu0 %v6356_v6  ;;  %4680 = vmatpush1.bf16.msra.mxu1 %v6484_v7  ;;  %v6421_v6 = vcombine.high %v1584_v0, %v1588_v1  ;;  %v6549_v7 = vcombine.high %v1712_v2, %v1716_v3  ;;  %v1812_v0 = vld [vmem:[%s7736_s1 + $0x960] sm:$0xff]  ;;  %v6652_v3 = vcombine.low %v1816_v48, %v1820_v49 }
 0x13d   : > { %4640 = vmatprep.subr.bf16.mxu0 %v6349_v8  ;;  %4681 = vmatprep.subr.bf16.mxu1 %v6477_v9  ;;  %v1576_v8 = vld [vmem:[%s7736_s1 + $0x200] sm:$0xff] }
 0x13e   : > { %v1580_v9 = vld [vmem:[%s7736_s1 + $0x220] sm:$0xff] }
 0x13f   : > { %v1936_v1 = vld [vmem:[%s7736_s1 + $0xd40] sm:$0xff] }
 0x140   : > { %4641 = vmatpush1.bf16.msra.mxu0 %v6348_v15  ;;  %4682 = vmatpush1.bf16.msra.mxu1 %v6476_v16  ;;  %v6413_v15 = vcombine.high %v1576_v8, %v1580_v9  ;;  %v6541_v16 = vcombine.high %v1704_v10, %v1708_v11  ;;  %v1940_v2 = vld [vmem:[%s7736_s1 + $0xd60] sm:$0xff] }
 0x141   : > { %4642 = vmatprep.subr.bf16.mxu0 %v6469_v17  ;;  %4683 = vmatprep.subr.bf16.mxu1 %v6597_v18  ;;  %v6412_v17 = vcombine.low %v1576_v8, %v1580_v9  ;;  %v6540_v18 = vcombine.low %v1704_v10, %v1708_v11  ;;  %v1804_v8 = vld [vmem:[%s7736_s1 + $0x920] sm:$0xff]  ;;  %v6772_v38 = vcombine.low %v1936_v1, %v1940_v2 }
 0x142   : > { %v1928_v9 = vld [vmem:[%s7736_s1 + $0xd00] sm:$0xff] }
 0x143   : > { %v1932_v10 = vld [vmem:[%s7736_s1 + $0xd20] sm:$0xff] }
 0x144   : > { %4643 = vmatpush2.bf16.msra.mxu0 %v6468_v53  ;;  %4684 = vmatpush2.bf16.msra.mxu1 %v6596_v23  ;;  %v647_v53 = vsub.s32 0, %v7980_v22  ;;  %v7985_v23 = vld [vmem:[%s423_s21] sm:$0xff]  ;;  %v6765_v41 = vcombine.high %v1928_v9, %v1932_v10  ;;  %v1920_v11 = vld [vmem:[%s7736_s1 + $0xcc0] sm:$0xff]  ;;  %s7391_s21 = scalar_lea.vmem %s7390_s0, 256 }
 0x145   : > { %4644 = vmatprep.subr.bf16.mxu0 %v6461_v24  ;;  %4685 = vmatprep.subr.bf16.mxu1 %v6589_v25  ;;  %v655_v24 = vsub.s32 2, %v7980_v22  ;;  %v651_v25 = vsub.s32 1, %v7980_v22  ;;  %p7393_p12 = scmp.lt.s32.totalorder %s7391_s21, %s7385_s10 }
 0x146   : > { %v648_v27 = vrot.slane %v7985_v23, %v647_v53 }
 0x147   : > { %v656_v28 = vrot.slane %v7985_v23, %v655_v24  ;;  %v652_v29 = vrot.slane %v7985_v23, %v651_v25  ;;  %p7394_p11 = por %p7393_p12, %p7392_p10 }
 0x148   : > { %4645 = vmatpush2.bf16.msra.mxu0 %v6460_v30  ;;  %4686 = vmatpush2.bf16.msra.mxu1 %v6588_v31  ;;  %v660_v31 = vrot.slane %v7985_v23, %v659_v26 }
 0x149   : > { %4646 = vmatprep.subr.bf16.mxu0 %v6453_v14  ;;  %4687 = vmatprep.subr.bf16.mxu1 %v6581_v32  ;;  %p7395_p5 = pnand %p7394_p11, %p7388_p6 }
 0x14c   : > { %4647 = vmatpush2.bf16.msra.mxu0 %v6452_v39  ;;  %4688 = vmatpush2.bf16.msra.mxu1 %v6580_v40 }
 0x14d   : > { %4648 = vmatprep.subr.bf16.mxu0 %v6445_v42  ;;  %4689 = vmatprep.subr.bf16.mxu1 %v6573_v45 }
 0x150   : > { %4649 = vmatpush2.bf16.msra.mxu0 %v6444_v50  ;;  %4690 = vmatpush2.bf16.msra.mxu1 %v6572_v51 }
 0x151   : > { %4650 = vmatprep.subr.bf16.mxu0 %v6437_v52  ;;  %4691 = vmatprep.subr.bf16.mxu1 %v6565_v54  ;;  %v1944_v52 = vld [vmem:[%s7736_s1 + $0xd80] sm:$0xff] }
 0x152   : > { %v1948_v54 = vld [vmem:[%s7736_s1 + $0xda0] sm:$0xff] }
 0x154   : > { %4651 = vmatpush2.bf16.msra.mxu0 %v6436_v60  ;;  %4692 = vmatpush2.bf16.msra.mxu1 %v6564_v61  ;;  %v6653_v61 = vcombine.high %v1816_v48, %v1820_v49 }
 0x155   : > { %4652 = vmatprep.subr.bf16.mxu0 %v6429_v62  ;;  %4693 = vmatprep.subr.bf16.mxu1 %v6557_v63  ;;  %v6781_v62 = vcombine.high %v1944_v52, %v1948_v54  ;;  %v1808_v63 = vld [vmem:[%s7736_s1 + $0x940] sm:$0xff] }
 0x156   : > { %v6644_v37 = vcombine.low %v1808_v63, %v1812_v0 }
 0x158   : > { %4653 = vmatpush2.bf16.msra.mxu0 %v6428_v4  ;;  %4694 = vmatpush2.bf16.msra.mxu1 %v6556_v5  ;;  %v6780_v4 = vcombine.low %v1944_v52, %v1948_v54  ;;  %v6645_v5 = vcombine.high %v1808_v63, %v1812_v0  ;;  %v1892_v52 = vld [vmem:[%s7736_s1 + $0xbe0] sm:$0xff] }
 0x159   : > { %4654 = vmatprep.subr.bf16.mxu0 %v6421_v6  ;;  %4695 = vmatprep.subr.bf16.mxu1 %v6549_v7  ;;  %v6773_v6 = vcombine.high %v1936_v1, %v1940_v2  ;;  %v1800_v7 = vld [vmem:[%s7736_s1 + $0x900] sm:$0xff] }
 0x15a   : > { %v6637_v57 = vcombine.high %v1800_v7, %v1804_v8  ;;  %v2016_v54 = vld [vmem:[%s7736_s1 + $0xfc0] sm:$0xff] }
 0x15b   : > { %v1880_v1 = vld [vmem:[%s7736_s1 + $0xb80] sm:$0xff] }
 0x15c   : > { %4655 = vmatpush2.bf16.msra.mxu0 %v6420_v12  ;;  %4696 = vmatpush2.bf16.msra.mxu1 %v6548_v13  ;;  %v1924_v12 = vld [vmem:[%s7736_s1 + $0xce0] sm:$0xff]  ;;  %v6636_v13 = vcombine.low %v1800_v7, %v1804_v8 }
 0x15d   : > { %4656 = vmatprep.subr.bf16.mxu0 %v6413_v15  ;;  %4697 = vmatprep.subr.bf16.mxu1 %v6541_v16  ;;  %v6764_v15 = vcombine.low %v1928_v9, %v1932_v10  ;;  %v1884_v2 = vld [vmem:[%s7736_s1 + $0xba0] sm:$0xff] }
 0x15e   : > { %v6717_v7 = vcombine.high %v1880_v1, %v1884_v2  ;;  %v1872_v9 = vld [vmem:[%s7736_s1 + $0xb40] sm:$0xff] }
 0x15f   : > { %v1876_v10 = vld [vmem:[%s7736_s1 + $0xb60] sm:$0xff] }
 0x160   : > { %4657 = vmatpush2.bf16.msra.mxu0 %v6412_v17  ;;  %4698 = vmatpush2.bf16.msra.mxu1 %v6540_v18  ;;  %v6757_v17 = vcombine.high %v1920_v11, %v1924_v12  ;;  %v1784_v18 = vld [vmem:[%s7736_s1 + $0x880] sm:$0xff] }
 0x161   : > { %4708 = vmatprep.subr.bf16.mxu0 %v6661_v19  ;;  %4749 = vmatprep.subr.bf16.mxu1 %v6789_v20  ;;  %v1788_v19 = vld [vmem:[%s7736_s1 + $0x8a0] sm:$0xff] }
 0x162   : > { %v1912_v20 = vld [vmem:[%s7736_s1 + $0xc80] sm:$0xff] }
 0x1a3   : > { %v1366_v30 = vpop.f32.mrf.mxu0  ;;  %v1407_v32 = vpop.f32.mrf.mxu1 }
 0x1a4   : > { %v1367_v14 = vadd.f32 %v1366_v30, %v648_v27  ;;  %v1408_v33 = vadd.f32 %v1407_v32, %v656_v28  ;;  %v6756_v28 = vcombine.low %v1920_v11, %v1924_v12  ;;  %v6749_v30 = vcombine.high %v1912_v20, %v1916_v21  ;;  %v1904_v32 = vld [vmem:[%s7736_s1 + $0xc40] sm:$0xff] }
 0x1a5   : > { %v1368_v34 = vpop.f32.mrf.mxu0  ;;  %v1409_v36 = vpop.f32.mrf.mxu1  ;;  %v1864_v11 = vld [vmem:[%s7736_s1 + $0xb00] sm:$0xff] }
 0x1a6   : > { %v1369_v35 = vadd.f32 %v1368_v34, %v652_v29  ;;  %v1496_v39 = vmax.f32 %v1367_v14, 0.0  ;;  %v1498_v40 = vmax.f32 %v1408_v33, 0.0  ;;  %v1410_v42 = vadd.f32 %v1409_v36, %v660_v31  ;;  %v1776_v31 = vld [vmem:[%s7736_s1 + $0x840] sm:$0xff] }
 0x1a7   : > { %v1370_v45 = vpop.f32.mrf.mxu0  ;;  %v1411_v47 = vpop.f32.mrf.mxu1  ;;  %v6621_v29 = vcombine.high %v1784_v18, %v1788_v19  ;;  %v1780_v14 = vld [vmem:[%s7736_s1 + $0x860] sm:$0xff]  ;;  %v6620_v34 = vcombine.low %v1784_v18, %v1788_v19 }
 0x1a8   : > { %v1497_v46 = vmax.f32 %v1369_v35, 0.0  ;;  %v1499_v50 = vmax.f32 %v1410_v42, 0.0  ;;  %v8006_v55 = vpack.c.bf16 %v1498_v40, %v1498_v40  ;;  %v8010_v59 = vpack.c.bf16 %v1496_v39, %v1496_v39  ;;  %v1908_v33 = vld [vmem:[%s7736_s1 + $0xc60] sm:$0xff] }
 0x1a9   : > { %v1371_v51 = vpop.f32.mrf.mxu0  ;;  %v1412_v58 = vpop.f32.mrf.mxu1  ;;  %v6748_v35 = vcombine.low %v1912_v20, %v1916_v21  ;;  %v6613_v36 = vcombine.high %v1776_v31, %v1780_v14  ;;  %v6741_v39 = vcombine.high %v1904_v32, %v1908_v33  ;;  %v1768_v40 = vld [vmem:[%s7736_s1 + $0x800] sm:$0xff]  ;;  %v6612_v47 = vcombine.low %v1776_v31, %v1780_v14 }
 0x1aa   : > { %v8008_v56 = vpack.c.bf16 %v1497_v46, %v1497_v46  ;;  %v8012_v60 = vpack.c.bf16 %v1499_v50, %v1499_v50  ;;  %v1772_v42 = vld [vmem:[%s7736_s1 + $0x820] sm:$0xff]  ;;  %v6740_v48 = vcombine.low %v1904_v32, %v1908_v33 }
 0x1ab   : > { %v1896_v45 = vld [vmem:[%s7736_s1 + $0xc00] sm:$0xff]  ;;  %v6605_v49 = vcombine.high %v1768_v40, %v1772_v42 }
 0x1ac   : > { %4658 = vmatprep.mubr.bf16.mxu0 %v8008_v56  ;;  %4699 = vmatprep.mubr.bf16.mxu1 %v8012_v60  ;;  %v1900_v46 = vld [vmem:[%s7736_s1 + $0xc20] sm:$0xff] }
 0x1ad   : > { %4659 = vmatmul.mubr.bf16.vlgmr.msra.gmra.mxu0 %v8010_v59  ;;  %4700 = vmatmul.mubr.bf16.vlgmr.msra.gmra.mxu1 %v8006_v55  ;;  %v6733_v50 = vcombine.high %v1896_v45, %v1900_v46  ;;  %v1888_v51 = vld [vmem:[%s7736_s1 + $0xbc0] sm:$0xff] }
 0x1ae   : > { %4709 = vmatpush1.bf16.msra.mxu0 %v6660_v43  ;;  %4750 = vmatpush1.bf16.msra.mxu1 %v6788_v44  ;;  %v1792_v43 = vld [vmem:[%s7736_s1 + $0x8c0] sm:$0xff]  ;;  %v6725_v63 = vcombine.high %v1888_v51, %v1892_v52 }
 0x1af   : > { %4710 = vmatprep.subr.bf16.mxu0 %v6653_v61  ;;  %4751 = vmatprep.subr.bf16.mxu1 %v6781_v62  ;;  %v1796_v44 = vld [vmem:[%s7736_s1 + $0x8e0] sm:$0xff]  ;;  %v6604_v61 = vcombine.low %v1768_v40, %v1772_v42  ;;  %v6732_v62 = vcombine.low %v1896_v45, %v1900_v46  ;;  %v663_v45 = vsub.s32 4, %v7980_v22 }
 0x1b0   : > { %v6629_v16 = vcombine.high %v1792_v43, %v1796_v44  ;;  %v6628_v27 = vcombine.low %v1792_v43, %v1796_v44  ;;  %v2020_v58 = vld [vmem:[%s7736_s1 + $0xfe0] sm:$0xff]  ;;  %v6709_v43 = vcombine.high %v1872_v9, %v1876_v10 }
 0x1b1   : > { %v6853_v0 = vcombine.high %v2016_v54, %v2020_v58  ;;  %v1868_v12 = vld [vmem:[%s7736_s1 + $0xb20] sm:$0xff] }
 0x1b2   : > { %4711 = vmatpush1.bf16.msra.mxu0 %v6652_v3  ;;  %4752 = vmatpush1.bf16.msra.mxu1 %v6780_v4  ;;  %v2008_v3 = vld [vmem:[%s7736_s1 + $0xf80] sm:$0xff]  ;;  %v6701_v18 = vcombine.high %v1864_v11, %v1868_v12 }
 0x1b3   : > { %4712 = vmatprep.subr.bf16.mxu0 %v6645_v5  ;;  %4753 = vmatprep.subr.bf16.mxu1 %v6773_v6  ;;  %v2012_v4 = vld [vmem:[%s7736_s1 + $0xfa0] sm:$0xff]  ;;  %v6724_v5 = vcombine.low %v1888_v51, %v1892_v52  ;;  %v6852_v6 = vcombine.low %v2016_v54, %v2020_v58  ;;  %v667_v52 = vsub.s32 5, %v7980_v22 }
 0x1b4   : > { %v6845_v8 = vcombine.high %v2008_v3, %v2012_v4  ;;  %v1856_v20 = vld [vmem:[%s7736_s1 + $0xac0] sm:$0xff] }
 0x1b5   : > { %v1860_v21 = vld [vmem:[%s7736_s1 + $0xae0] sm:$0xff] }
 0x1b6   : > { %4713 = vmatpush1.bf16.msra.mxu0 %v6644_v37  ;;  %4754 = vmatpush1.bf16.msra.mxu1 %v6772_v38  ;;  %v2000_v37 = vld [vmem:[%s7736_s1 + $0xf40] sm:$0xff]  ;;  %v6693_v31 = vcombine.high %v1856_v20, %v1860_v21 }
 0x1b7   : > { %4714 = vmatprep.subr.bf16.mxu0 %v6637_v57  ;;  %4755 = vmatprep.subr.bf16.mxu1 %v6765_v41  ;;  %v2004_v38 = vld [vmem:[%s7736_s1 + $0xf60] sm:$0xff]  ;;  %v6716_v57 = vcombine.low %v1880_v1, %v1884_v2  ;;  %v6844_v41 = vcombine.low %v2008_v3, %v2012_v4 }
 0x1b8   : > { %v6837_v44 = vcombine.high %v2000_v37, %v2004_v38  ;;  %v1848_v32 = vld [vmem:[%s7736_s1 + $0xa80] sm:$0xff] }
 0x1b9   : > { %v1852_v33 = vld [vmem:[%s7736_s1 + $0xaa0] sm:$0xff] }
 0x1ba   : > { %4715 = vmatpush1.bf16.msra.mxu0 %v6636_v13  ;;  %4756 = vmatpush1.bf16.msra.mxu1 %v6764_v15  ;;  %v1992_v13 = vld [vmem:[%s7736_s1 + $0xf00] sm:$0xff]  ;;  %v6685_v40 = vcombine.high %v1848_v32, %v1852_v33  ;;  %v6684_v51 = vcombine.low %v1848_v32, %v1852_v33  ;;  %v1561_v32 = vld [vmem:[%s7736_s1 + $0x188] sm:$0xff] }
 0x1bb   : > { %4716 = vmatprep.subr.bf16.mxu0 %v6629_v16  ;;  %4757 = vmatprep.subr.bf16.mxu1 %v6757_v17  ;;  %v1996_v15 = vld [vmem:[%s7736_s1 + $0xf20] sm:$0xff]  ;;  %v6708_v16 = vcombine.low %v1872_v9, %v1876_v10  ;;  %v6836_v17 = vcombine.low %v2000_v37, %v2004_v38  ;;  %v1565_v33 = vld [vmem:[%s7736_s1 + $0x1a8] sm:$0xff] }
 0x1bc   : > { %v6829_v19 = vcombine.high %v1992_v13, %v1996_v15  ;;  %v1840_v46 = vld [vmem:[%s7736_s1 + $0xa40] sm:$0xff] }
 0x1bd   : > { %v1836_v1 = vld [vmem:[%s7736_s1 + $0xa20] sm:$0xff] }
 0x1be   : > { %4717 = vmatpush1.bf16.msra.mxu0 %v6628_v27  ;;  %4758 = vmatpush1.bf16.msra.mxu1 %v6756_v28  ;;  %v1984_v27 = vld [vmem:[%s7736_s1 + $0xec0] sm:$0xff] }
 0x1bf   : > { %4718 = vmatprep.subr.bf16.mxu0 %v6621_v29  ;;  %4759 = vmatprep.subr.bf16.mxu1 %v6749_v30  ;;  %v1988_v28 = vld [vmem:[%s7736_s1 + $0xee0] sm:$0xff]  ;;  %v6700_v29 = vcombine.low %v1864_v11, %v1868_v12  ;;  %v6828_v30 = vcombine.low %v1992_v13, %v1996_v15  ;;  %v1697_v12 = vld [vmem:[%s7736_s1 + $0x5c8] sm:$0xff] }
 0x1c0   : > { %v6821_v14 = vcombine.high %v1984_v27, %v1988_v28  ;;  %v1960_v3 = vld [vmem:[%s7736_s1 + $0xe00] sm:$0xff]  ;;  %v1701_v13 = vld [vmem:[%s7736_s1 + $0x5e8] sm:$0xff] }
 0x1c1   : > { %v1964_v4 = vld [vmem:[%s7736_s1 + $0xe20] sm:$0xff] }
 0x1c2   : > { %4719 = vmatpush1.bf16.msra.mxu0 %v6620_v34  ;;  %4760 = vmatpush1.bf16.msra.mxu1 %v6748_v35  ;;  %v1976_v34 = vld [vmem:[%s7736_s1 + $0xe80] sm:$0xff] }
 0x1c3   : > { %4720 = vmatprep.subr.bf16.mxu0 %v6613_v36  ;;  %4761 = vmatprep.subr.bf16.mxu1 %v6741_v39  ;;  %v1980_v35 = vld [vmem:[%s7736_s1 + $0xea0] sm:$0xff]  ;;  %v6692_v36 = vcombine.low %v1856_v20, %v1860_v21  ;;  %v6820_v39 = vcombine.low %v1984_v27, %v1988_v28 }
 0x1c4   : > { %v6813_v42 = vcombine.high %v1976_v34, %v1980_v35  ;;  %v6812_v54 = vcombine.low %v1976_v34, %v1980_v35 }
 0x1c6   : > { %4721 = vmatpush1.bf16.msra.mxu0 %v6612_v47  ;;  %4762 = vmatpush1.bf16.msra.mxu1 %v6740_v48  ;;  %v1844_v47 = vld [vmem:[%s7736_s1 + $0xa60] sm:$0xff]  ;;  %v671_v48 = vsub.s32 6, %v7980_v22 }
 0x1c7   : > { %4722 = vmatprep.subr.bf16.mxu0 %v6605_v49  ;;  %4763 = vmatprep.subr.bf16.mxu1 %v6733_v50  ;;  %v1968_v49 = vld [vmem:[%s7736_s1 + $0xe40] sm:$0xff]  ;;  %v6677_v58 = vcombine.high %v1840_v46, %v1844_v47 }
 0x1c8   : > { %v1972_v50 = vld [vmem:[%s7736_s1 + $0xe60] sm:$0xff]  ;;  %v672_v2 = vrot.slane %v7985_v23, %v671_v48 }
 0x1ca   : > { %4723 = vmatpush1.bf16.msra.mxu0 %v6604_v61  ;;  %4764 = vmatpush1.bf16.msra.mxu1 %v6732_v62  ;;  %v675_v61 = vsub.s32 7, %v7980_v22  ;;  %v664_v62 = vrot.slane %v7985_v23, %v663_v45 }
 0x1cb   : > { %4724 = vmatprep.subr.bf16.mxu0 %v6725_v63  ;;  %4765 = vmatprep.subr.bf16.mxu1 %v6853_v0  ;;  %v6805_v63 = vcombine.high %v1968_v49, %v1972_v50  ;;  %v1832_v0 = vld [vmem:[%s7736_s1 + $0xa00] sm:$0xff] }
 0x1cc   : > { %v676_v9 = vrot.slane %v7985_v23, %v675_v61  ;;  %v6669_v10 = vcombine.high %v1832_v0, %v1836_v1 }
 0x1ce   : > { %4725 = vmatpush2.bf16.msra.mxu0 %v6724_v5  ;;  %4766 = vmatpush2.bf16.msra.mxu1 %v6852_v6  ;;  %v6676_v5 = vcombine.low %v1840_v46, %v1844_v47  ;;  %v668_v6 = vrot.slane %v7985_v23, %v667_v52 }
 0x1cf   : > { %4726 = vmatprep.subr.bf16.mxu0 %v6717_v7  ;;  %4767 = vmatprep.subr.bf16.mxu1 %v6845_v8  ;;  %v6804_v8 = vcombine.low %v1968_v49, %v1972_v50  ;;  %v6534_v49 = vcombine.low %v1697_v12, %v1701_v13  ;;  %v6399_v50 = vcombine.high %v1561_v32, %v1565_v33 }
 0x1d2   : > { %4727 = vmatpush2.bf16.msra.mxu0 %v6716_v57  ;;  %4768 = vmatpush2.bf16.msra.mxu1 %v6844_v41  ;;  %v6797_v57 = vcombine.high %v1960_v3, %v1964_v4  ;;  %v1569_v41 = vld [vmem:[%s7736_s1 + $0x1c8] sm:$0xff] }
 0x1d3   : > { %4728 = vmatprep.subr.bf16.mxu0 %v6709_v43  ;;  %4769 = vmatprep.subr.bf16.mxu1 %v6837_v44  ;;  %v1573_v43 = vld [vmem:[%s7736_s1 + $0x1e8] sm:$0xff] }
 0x1d4   : > { %v6407_v27 = vcombine.high %v1569_v41, %v1573_v43 }
 0x1d6   : > { %4729 = vmatpush2.bf16.msra.mxu0 %v6708_v16  ;;  %4770 = vmatpush2.bf16.msra.mxu1 %v6836_v17  ;;  %v6668_v17 = vcombine.low %v1832_v0, %v1836_v1  ;;  %v6398_v0 = vcombine.low %v1561_v32, %v1565_v33 }
 0x1d7   : > { %4730 = vmatprep.subr.bf16.mxu0 %v6701_v18  ;;  %4771 = vmatprep.subr.bf16.mxu1 %v6829_v19  ;;  %v6796_v18 = vcombine.low %v1960_v3, %v1964_v4  ;;  %v1545_v4 = vld [vmem:[%s7736_s1 + $0x108] sm:$0xff] }
 0x1da   : > { %4731 = vmatpush2.bf16.msra.mxu0 %v6700_v29  ;;  %4772 = vmatpush2.bf16.msra.mxu1 %v6828_v30  ;;  %v6535_v30 = vcombine.high %v1697_v12, %v1701_v13 }
 0x1db   : > { %4732 = vmatprep.subr.bf16.mxu0 %v6693_v31  ;;  %4773 = vmatprep.subr.bf16.mxu1 %v6821_v14 }
 0x1de   : > { %4733 = vmatpush2.bf16.msra.mxu0 %v6692_v36  ;;  %4774 = vmatpush2.bf16.msra.mxu1 %v6820_v39  ;;  %v6406_v39 = vcombine.low %v1569_v41, %v1573_v43  ;;  %v1665_v41 = vld [vmem:[%s7736_s1 + $0x4c8] sm:$0xff] }
 0x1df   : > { %4734 = vmatprep.subr.bf16.mxu0 %v6685_v40  ;;  %4775 = vmatprep.subr.bf16.mxu1 %v6813_v42  ;;  %v1689_v40 = vld [vmem:[%s7736_s1 + $0x588] sm:$0xff] }
 0x1e0   : > { %v1693_v42 = vld [vmem:[%s7736_s1 + $0x5a8] sm:$0xff] }
 0x1e1   : > { %v6526_v1 = vcombine.low %v1689_v40, %v1693_v42  ;;  %v1669_v43 = vld [vmem:[%s7736_s1 + $0x4e8] sm:$0xff] }
 0x1e2   : > { %4735 = vmatpush2.bf16.msra.mxu0 %v6684_v51  ;;  %4776 = vmatpush2.bf16.msra.mxu1 %v6812_v54  ;;  %v1553_v51 = vld [vmem:[%s7736_s1 + $0x148] sm:$0xff]  ;;  %v6503_v13 = vcombine.high %v1665_v41, %v1669_v43 }
 0x1e3   : > { %v1448_v7 = vpop.f32.mrf.mxu0  ;;  %4736 = vmatprep.subr.bf16.mxu0 %v6677_v58  ;;  %v1489_v38 = vpop.f32.mrf.mxu1  ;;  %4777 = vmatprep.subr.bf16.mxu1 %v6805_v63  ;;  %v1557_v54 = vld [vmem:[%s7736_s1 + $0x168] sm:$0xff]  ;;  %v6527_v58 = vcombine.high %v1689_v40, %v1693_v42 }
 0x1e4   : > { %v1449_v37 = vadd.f32 %v1448_v7, %v664_v62  ;;  %v1490_v44 = vadd.f32 %v1489_v38, %v672_v2  ;;  %v1681_v62 = vld [vmem:[%s7736_s1 + $0x548] sm:$0xff]  ;;  %v6391_v2 = vcombine.high %v1553_v51, %v1557_v54 }
 0x1e5   : > { %v1450_v11 = vpop.f32.mrf.mxu0  ;;  %v1491_v16 = vpop.f32.mrf.mxu1  ;;  %v1685_v63 = vld [vmem:[%s7736_s1 + $0x568] sm:$0xff] }
 0x1e6   : > { %v1451_v15 = vadd.f32 %v1450_v11, %v668_v6  ;;  %4737 = vmatpush2.bf16.msra.mxu0 %v6676_v5  ;;  %v1500_v19 = vmax.f32 %v1449_v37, 0.0  ;;  %v1502_v23 = vmax.f32 %v1490_v44, 0.0  ;;  %v1492_v20 = vadd.f32 %v1491_v16, %v676_v9  ;;  %4778 = vmatpush2.bf16.msra.mxu1 %v6804_v8  ;;  %v1549_v5 = vld [vmem:[%s7736_s1 + $0x128] sm:$0xff] }
 0x1e7   : > { %v1452_v21 = vpop.f32.mrf.mxu0  ;;  %4738 = vmatprep.subr.bf16.mxu0 %v6669_v10  ;;  %v1493_v29 = vpop.f32.mrf.mxu1  ;;  %4779 = vmatprep.subr.bf16.mxu1 %v6797_v57  ;;  %v6519_v3 = vcombine.high %v1681_v62, %v1685_v63  ;;  %v1673_v6 = vld [vmem:[%s7736_s1 + $0x508] sm:$0xff]  ;;  %v6390_v8 = vcombine.low %v1553_v51, %v1557_v54  ;;  %v6518_v9 = vcombine.low %v1681_v62, %v1685_v63 }
 0x1e8   : > { %v1501_v28 = vmax.f32 %v1451_v15, 0.0  ;;  %v1503_v31 = vmax.f32 %v1492_v20, 0.0  ;;  %v8102_v34 = vpack.c.bf16 %v1502_v23, %v1502_v23  ;;  %v8108_v46 = vpack.c.bf16 %v1500_v19, %v1500_v19  ;;  %v1677_v7 = vld [vmem:[%s7736_s1 + $0x528] sm:$0xff] }
 0x1e9   : > { %v1453_v14 = vpop.f32.mrf.mxu0  ;;  %v1494_v36 = vpop.f32.mrf.mxu1  ;;  %v6383_v10 = vcombine.high %v1545_v4, %v1549_v5  ;;  %v6511_v37 = vcombine.high %v1673_v6, %v1677_v7  ;;  %v1537_v38 = vld [vmem:[%s7736_s1 + $0xc8] sm:$0xff]  ;;  %v6382_v44 = vcombine.low %v1545_v4, %v1549_v5  ;;  %v6510_v11 = vcombine.low %v1673_v6, %v1677_v7 }
 0x1ea   : > { %v8104_v35 = vpack.c.bf16 %v1501_v28, %v1501_v28  ;;  %4739 = vmatpush2.bf16.msra.mxu0 %v6668_v17  ;;  %v8110_v47 = vpack.c.bf16 %v1503_v31, %v1503_v31  ;;  %4780 = vmatpush2.bf16.msra.mxu1 %v6796_v18  ;;  %v1541_v57 = vld [vmem:[%s7736_s1 + $0xe8] sm:$0xff]  ;;  %v6502_v23 = vcombine.low %v1665_v41, %v1669_v43 }
 0x1eb   : > { %4790 = vmatprep.subr.bf16.mxu0 %v6407_v27  ;;  %4831 = vmatprep.subr.bf16.mxu1 %v6535_v30  ;;  %v6375_v12 = vcombine.high %v1537_v38, %v1541_v57  ;;  %v1529_v15 = vld [vmem:[%s7736_s1 + $0x88] sm:$0xff]  ;;  %v6374_v19 = vcombine.low %v1537_v38, %v1541_v57 }
 0x1ec   : > { %4740 = vmatprep.mubr.bf16.mxu0 %v8104_v35  ;;  %4781 = vmatprep.mubr.bf16.mxu1 %v8110_v47  ;;  %v1533_v16 = vld [vmem:[%s7736_s1 + $0xa8] sm:$0xff] }
 0x1ed   : > { %4741 = vmatmul.mubr.bf16.vlgmr.msra.gmra.mxu0 %v8108_v46  ;;  %4782 = vmatmul.mubr.bf16.vlgmr.msra.gmra.mxu1 %v8102_v34  ;;  %v1657_v17 = vld [vmem:[%s7736_s1 + $0x488] sm:$0xff]  ;;  %v6367_v20 = vcombine.high %v1529_v15, %v1533_v16  ;;  %v6366_v31 = vcombine.low %v1529_v15, %v1533_v16 }
 0x1ee   : > { %4791 = vmatpush1.bf16.msra.mxu0 %v6406_v39  ;;  %4832 = vmatpush1.bf16.msra.mxu1 %v6534_v49  ;;  %v1661_v18 = vld [vmem:[%s7736_s1 + $0x4a8] sm:$0xff] }
 0x1ef   : > { %4822 = vmatprep.mubr.bf16.mxu0 %v8008_v56  ;;  %4863 = vmatprep.mubr.bf16.mxu1 %v8012_v60  ;;  %v6495_v21 = vcombine.high %v1657_v17, %v1661_v18  ;;  %v1521_v27 = vld [vmem:[%s7736_s1 + $0x48] sm:$0xff]  ;;  %v6494_v14 = vcombine.low %v1657_v17, %v1661_v18 }
 0x1f0   : > { %4792 = vmatprep.subr.bf16.mxu0 %v6399_v50  ;;  %4833 = vmatprep.subr.bf16.mxu1 %v6527_v58  ;;  %v1525_v28 = vld [vmem:[%s7736_s1 + $0x68] sm:$0xff] }
 0x1f1   : > { %v1649_v29 = vld [vmem:[%s7736_s1 + $0x448] sm:$0xff]  ;;  %v6359_v32 = vcombine.high %v1521_v27, %v1525_v28  ;;  %v6358_v49 = vcombine.low %v1521_v27, %v1525_v28 }
 0x1f2   : > { %4793 = vmatpush1.bf16.msra.mxu0 %v6398_v0  ;;  %4834 = vmatpush1.bf16.msra.mxu1 %v6526_v1  ;;  %v1653_v30 = vld [vmem:[%s7736_s1 + $0x468] sm:$0xff] }
 0x1f3   : > { %4794 = vmatprep.subr.bf16.mxu0 %v6391_v2  ;;  %4835 = vmatprep.subr.bf16.mxu1 %v6519_v3  ;;  %v6487_v33 = vcombine.high %v1649_v29, %v1653_v30  ;;  %v1513_v36 = vld [vmem:[%s7736_s1 + $0x8] sm:$0xff]  ;;  %v6486_v50 = vcombine.low %v1649_v29, %v1653_v30 }
 0x1f4   : > { %v1517_v39 = vld [vmem:[%s7736_s1 + $0x28] sm:$0xff] }
 0x1f5   : > { %v1641_v40 = vld [vmem:[%s7736_s1 + $0x408] sm:$0xff]  ;;  %v6351_v51 = vcombine.high %v1513_v36, %v1517_v39  ;;  %v6350_v1 = vcombine.low %v1513_v36, %v1517_v39 }
 0x1f6   : > { %4795 = vmatpush1.bf16.msra.mxu0 %v6390_v8  ;;  %4836 = vmatpush1.bf16.msra.mxu1 %v6518_v9  ;;  %v1645_v42 = vld [vmem:[%s7736_s1 + $0x428] sm:$0xff] }
 0x1f7   : > { %4796 = vmatprep.subr.bf16.mxu0 %v6383_v10  ;;  %4837 = vmatprep.subr.bf16.mxu1 %v6511_v37  ;;  %v6479_v54 = vcombine.high %v1641_v40, %v1645_v42  ;;  %v1633_v58 = vld [vmem:[%s7736_s1 + $0x3c8] sm:$0xff]  ;;  %v6478_v2 = vcombine.low %v1641_v40, %v1645_v42 }
 0x1f8   : > { %v1637_v62 = vld [vmem:[%s7736_s1 + $0x3e8] sm:$0xff] }
 0x1f9   : > { %v1761_v63 = vld [vmem:[%s7736_s1 + $0x7c8] sm:$0xff]  ;;  %v6471_v3 = vcombine.high %v1633_v58, %v1637_v62  ;;  %v6470_v9 = vcombine.low %v1633_v58, %v1637_v62 }
 0x1fa   : > { %4797 = vmatpush1.bf16.msra.mxu0 %v6382_v44  ;;  %4838 = vmatpush1.bf16.msra.mxu1 %v6510_v11  ;;  %v1765_v0 = vld [vmem:[%s7736_s1 + $0x7e8] sm:$0xff] }
 0x1fb   : > { %4798 = vmatprep.subr.bf16.mxu0 %v6375_v12  ;;  %4839 = vmatprep.subr.bf16.mxu1 %v6503_v13  ;;  %v6599_v4 = vcombine.high %v1761_v63, %v1765_v0  ;;  %v1625_v5 = vld [vmem:[%s7736_s1 + $0x388] sm:$0xff]  ;;  %v6598_v10 = vcombine.low %v1761_v63, %v1765_v0 }
 0x1fc   : > { %v1629_v6 = vld [vmem:[%s7736_s1 + $0x3a8] sm:$0xff] }
 0x1fd   : > { %v1753_v7 = vld [vmem:[%s7736_s1 + $0x788] sm:$0xff]  ;;  %v6463_v37 = vcombine.high %v1625_v5, %v1629_v6  ;;  %v6462_v11 = vcombine.low %v1625_v5, %v1629_v6 }
 0x1fe   : > { %4799 = vmatpush1.bf16.msra.mxu0 %v6374_v19  ;;  %4840 = vmatpush1.bf16.msra.mxu1 %v6502_v23  ;;  %v1757_v8 = vld [vmem:[%s7736_s1 + $0x7a8] sm:$0xff] }
 0x1ff   : > { %4800 = vmatprep.subr.bf16.mxu0 %v6367_v20  ;;  %4841 = vmatprep.subr.bf16.mxu1 %v6495_v21  ;;  %v6591_v38 = vcombine.high %v1753_v7, %v1757_v8  ;;  %v1617_v57 = vld [vmem:[%s7736_s1 + $0x348] sm:$0xff]  ;;  %v6590_v12 = vcombine.low %v1753_v7, %v1757_v8 }
 0x200   : > { %v1621_v41 = vld [vmem:[%s7736_s1 + $0x368] sm:$0xff] }
 0x201   : > { %v1745_v43 = vld [vmem:[%s7736_s1 + $0x748] sm:$0xff]  ;;  %v6455_v13 = vcombine.high %v1617_v57, %v1621_v41  ;;  %v6454_v23 = vcombine.low %v1617_v57, %v1621_v41 }
 0x202   : > { %4801 = vmatpush1.bf16.msra.mxu0 %v6366_v31  ;;  %4842 = vmatpush1.bf16.msra.mxu1 %v6494_v14  ;;  %v1749_v44 = vld [vmem:[%s7736_s1 + $0x768] sm:$0xff] }
 0x203   : > { %4802 = vmatprep.subr.bf16.mxu0 %v6359_v32  ;;  %4843 = vmatprep.subr.bf16.mxu1 %v6487_v33  ;;  %v6583_v15 = vcombine.high %v1745_v43, %v1749_v44  ;;  %v1609_v16 = vld [vmem:[%s7736_s1 + $0x308] sm:$0xff]  ;;  %v6582_v20 = vcombine.low %v1745_v43, %v1749_v44 }
 0x204   : > { %v1613_v17 = vld [vmem:[%s7736_s1 + $0x328] sm:$0xff] }
 0x205   : > { %v1737_v18 = vld [vmem:[%s7736_s1 + $0x708] sm:$0xff]  ;;  %v6447_v21 = vcombine.high %v1609_v16, %v1613_v17  ;;  %v6446_v14 = vcombine.low %v1609_v16, %v1613_v17 }
 0x206   : > { %4803 = vmatpush1.bf16.msra.mxu0 %v6358_v49  ;;  %4844 = vmatpush1.bf16.msra.mxu1 %v6486_v50  ;;  %v1741_v19 = vld [vmem:[%s7736_s1 + $0x728] sm:$0xff] }
 0x207   : > { %4804 = vmatprep.subr.bf16.mxu0 %v6351_v51  ;;  %4845 = vmatprep.subr.bf16.mxu1 %v6479_v54  ;;  %v6575_v27 = vcombine.high %v1737_v18, %v1741_v19  ;;  %v1601_v28 = vld [vmem:[%s7736_s1 + $0x2c8] sm:$0xff]  ;;  %v6574_v32 = vcombine.low %v1737_v18, %v1741_v19 }
 0x208   : > { %v1605_v29 = vld [vmem:[%s7736_s1 + $0x2e8] sm:$0xff] }
 0x209   : > { %v1729_v30 = vld [vmem:[%s7736_s1 + $0x6c8] sm:$0xff]  ;;  %v6439_v33 = vcombine.high %v1601_v28, %v1605_v29  ;;  %v6438_v50 = vcombine.low %v1601_v28, %v1605_v29 }
 0x20a   : > { %4805 = vmatpush1.bf16.msra.mxu0 %v6350_v1  ;;  %4846 = vmatpush1.bf16.msra.mxu1 %v6478_v2  ;;  %v1733_v31 = vld [vmem:[%s7736_s1 + $0x6e8] sm:$0xff] }
 0x20b   : > { %4806 = vmatprep.subr.bf16.mxu0 %v6471_v3  ;;  %4847 = vmatprep.subr.bf16.mxu1 %v6599_v4  ;;  %v6567_v36 = vcombine.high %v1729_v30, %v1733_v31  ;;  %v1593_v39 = vld [vmem:[%s7736_s1 + $0x288] sm:$0xff]  ;;  %v6566_v51 = vcombine.low %v1729_v30, %v1733_v31 }
 0x20c   : > { %v1597_v40 = vld [vmem:[%s7736_s1 + $0x2a8] sm:$0xff] }
 0x20d   : > { %v1721_v42 = vld [vmem:[%s7736_s1 + $0x688] sm:$0xff]  ;;  %v6431_v54 = vcombine.high %v1593_v39, %v1597_v40  ;;  %v6430_v2 = vcombine.low %v1593_v39, %v1597_v40 }
 0x20e   : > { %4807 = vmatpush2.bf16.msra.mxu0 %v6470_v9  ;;  %4848 = vmatpush2.bf16.msra.mxu1 %v6598_v10  ;;  %v1725_v49 = vld [vmem:[%s7736_s1 + $0x6a8] sm:$0xff] }
 0x20f   : > { %4808 = vmatprep.subr.bf16.mxu0 %v6463_v37  ;;  %4849 = vmatprep.subr.bf16.mxu1 %v6591_v38  ;;  %v6559_v58 = vcombine.high %v1721_v42, %v1725_v49  ;;  %v1585_v62 = vld [vmem:[%s7736_s1 + $0x248] sm:$0xff]  ;;  %v6558_v3 = vcombine.low %v1721_v42, %v1725_v49 }
 0x210   : > { %v1589_v63 = vld [vmem:[%s7736_s1 + $0x268] sm:$0xff] }
 0x211   : > { %v1713_v0 = vld [vmem:[%s7736_s1 + $0x648] sm:$0xff]  ;;  %v6423_v4 = vcombine.high %v1585_v62, %v1589_v63  ;;  %v6422_v10 = vcombine.low %v1585_v62, %v1589_v63 }
 0x212   : > { %4809 = vmatpush2.bf16.msra.mxu0 %v6462_v11  ;;  %4850 = vmatpush2.bf16.msra.mxu1 %v6590_v12  ;;  %v1717_v1 = vld [vmem:[%s7736_s1 + $0x668] sm:$0xff] }
 0x213   : > { %4810 = vmatprep.subr.bf16.mxu0 %v6455_v13  ;;  %4851 = vmatprep.subr.bf16.mxu1 %v6583_v15  ;;  %v6551_v5 = vcombine.high %v1713_v0, %v1717_v1  ;;  %v1577_v6 = vld [vmem:[%s7736_s1 + $0x208] sm:$0xff]  ;;  %v6550_v37 = vcombine.low %v1713_v0, %v1717_v1 }
 0x214   : > { %v1581_v7 = vld [vmem:[%s7736_s1 + $0x228] sm:$0xff] }
 0x215   : > { %v1705_v8 = vld [vmem:[%s7736_s1 + $0x608] sm:$0xff]  ;;  %v6415_v38 = vcombine.high %v1577_v6, %v1581_v7  ;;  %v6414_v12 = vcombine.low %v1577_v6, %v1581_v7 }
 0x216   : > { %4811 = vmatpush2.bf16.msra.mxu0 %v6454_v23  ;;  %4852 = vmatpush2.bf16.msra.mxu1 %v6582_v20  ;;  %v1709_v9 = vld [vmem:[%s7736_s1 + $0x628] sm:$0xff] }
 0x217   : > { %4812 = vmatprep.subr.bf16.mxu0 %v6447_v21  ;;  %4853 = vmatprep.subr.bf16.mxu1 %v6575_v27  ;;  %v6543_v57 = vcombine.high %v1705_v8, %v1709_v9  ;;  %v1825_v41 = vld [vmem:[%s7736_s1 + $0x9c8] sm:$0xff]  ;;  %v6542_v13 = vcombine.low %v1705_v8, %v1709_v9 }
 0x218   : > { %v1829_v43 = vld [vmem:[%s7736_s1 + $0x9e8] sm:$0xff] }
 0x219   : > { %v1953_v44 = vld [vmem:[%s7736_s1 + $0xdc8] sm:$0xff]  ;;  %v6663_v15 = vcombine.high %v1825_v41, %v1829_v43  ;;  %v6662_v19 = vcombine.low %v1825_v41, %v1829_v43 }
 0x21a   : > { %4813 = vmatpush2.bf16.msra.mxu0 %v6446_v14  ;;  %4854 = vmatpush2.bf16.msra.mxu1 %v6574_v32  ;;  %v1957_v11 = vld [vmem:[%s7736_s1 + $0xde8] sm:$0xff] }
 0x21b   : > { %4814 = vmatprep.subr.bf16.mxu0 %v6439_v33  ;;  %4855 = vmatprep.subr.bf16.mxu1 %v6567_v36  ;;  %v6791_v16 = vcombine.high %v1953_v44, %v1957_v11  ;;  %v1817_v17 = vld [vmem:[%s7736_s1 + $0x988] sm:$0xff]  ;;  %v6790_v21 = vcombine.low %v1953_v44, %v1957_v11 }
 0x21c   : > { %v1821_v18 = vld [vmem:[%s7736_s1 + $0x9a8] sm:$0xff] }
 0x21d   : > { %v1945_v23 = vld [vmem:[%s7736_s1 + $0xd88] sm:$0xff]  ;;  %v6655_v27 = vcombine.high %v1817_v17, %v1821_v18  ;;  %v6654_v32 = vcombine.low %v1817_v17, %v1821_v18 }
 0x21e   : > { %4815 = vmatpush2.bf16.msra.mxu0 %v6438_v50  ;;  %4856 = vmatpush2.bf16.msra.mxu1 %v6566_v51  ;;  %v1949_v20 = vld [vmem:[%s7736_s1 + $0xda8] sm:$0xff] }
 0x21f   : > { %4816 = vmatprep.subr.bf16.mxu0 %v6431_v54  ;;  %4857 = vmatprep.subr.bf16.mxu1 %v6559_v58  ;;  %v1809_v28 = vld [vmem:[%s7736_s1 + $0x948] sm:$0xff]  ;;  %v6783_v30 = vcombine.high %v1945_v23, %v1949_v20  ;;  %v6782_v33 = vcombine.low %v1945_v23, %v1949_v20 }
 0x220   : > { %v1813_v29 = vld [vmem:[%s7736_s1 + $0x968] sm:$0xff] }
 0x221   : > { %v1937_v31 = vld [vmem:[%s7736_s1 + $0xd48] sm:$0xff]  ;;  %v6647_v36 = vcombine.high %v1809_v28, %v1813_v29  ;;  %v6646_v51 = vcombine.low %v1809_v28, %v1813_v29 }
 0x222   : > { %4817 = vmatpush2.bf16.msra.mxu0 %v6430_v2  ;;  %4858 = vmatpush2.bf16.msra.mxu1 %v6558_v3  ;;  %v1941_v14 = vld [vmem:[%s7736_s1 + $0xd68] sm:$0xff] }
 0x223   : > { %4818 = vmatprep.subr.bf16.mxu0 %v6423_v4  ;;  %4859 = vmatprep.subr.bf16.mxu1 %v6551_v5  ;;  %v6775_v39 = vcombine.high %v1937_v31, %v1941_v14  ;;  %v1801_v40 = vld [vmem:[%s7736_s1 + $0x908] sm:$0xff]  ;;  %v6774_v54 = vcombine.low %v1937_v31, %v1941_v14 }
 0x224   : > { %v1805_v42 = vld [vmem:[%s7736_s1 + $0x928] sm:$0xff] }
 0x225   : > { %v1929_v49 = vld [vmem:[%s7736_s1 + $0xd08] sm:$0xff]  ;;  %v6639_v58 = vcombine.high %v1801_v40, %v1805_v42  ;;  %v6638_v3 = vcombine.low %v1801_v40, %v1805_v42 }
 0x226   : > { %4819 = vmatpush2.bf16.msra.mxu0 %v6422_v10  ;;  %4860 = vmatpush2.bf16.msra.mxu1 %v6550_v37  ;;  %v1933_v50 = vld [vmem:[%s7736_s1 + $0xd28] sm:$0xff] }
 0x227   : > { %4820 = vmatprep.subr.bf16.mxu0 %v6415_v38  ;;  %4861 = vmatprep.subr.bf16.mxu1 %v6543_v57  ;;  %v6767_v62 = vcombine.high %v1929_v49, %v1933_v50  ;;  %v1793_v63 = vld [vmem:[%s7736_s1 + $0x8c8] sm:$0xff]  ;;  %v6766_v4 = vcombine.low %v1929_v49, %v1933_v50 }
 0x228   : > { %v1797_v0 = vld [vmem:[%s7736_s1 + $0x8e8] sm:$0xff] }
 0x229   : > { %v1921_v1 = vld [vmem:[%s7736_s1 + $0xcc8] sm:$0xff]  ;;  %v6631_v5 = vcombine.high %v1793_v63, %v1797_v0  ;;  %v6630_v37 = vcombine.low %v1793_v63, %v1797_v0 }
 0x22a   : > { %4821 = vmatpush2.bf16.msra.mxu0 %v6414_v12  ;;  %4862 = vmatpush2.bf16.msra.mxu1 %v6542_v13  ;;  %v1925_v2 = vld [vmem:[%s7736_s1 + $0xce8] sm:$0xff] }
 0x22b   : > { %4872 = vmatprep.subr.bf16.mxu0 %v6663_v15  ;;  %4913 = vmatprep.subr.bf16.mxu1 %v6791_v16  ;;  %v6759_v6 = vcombine.high %v1921_v1, %v1925_v2  ;;  %v1785_v7 = vld [vmem:[%s7736_s1 + $0x888] sm:$0xff]  ;;  %v6758_v38 = vcombine.low %v1921_v1, %v1925_v2 }
 0x22c   : > { %v1789_v8 = vld [vmem:[%s7736_s1 + $0x8a8] sm:$0xff] }
 0x22d   : > { %4823 = vmatmul.mubr.bf16.vlgmr.msra.gmra.mxu0 %v8010_v59  ;;  %4864 = vmatmul.mubr.bf16.vlgmr.msra.gmra.mxu1 %v8006_v55  ;;  %v1913_v9 = vld [vmem:[%s7736_s1 + $0xc88] sm:$0xff]  ;;  %v6623_v57 = vcombine.high %v1785_v7, %v1789_v8  ;;  %v6622_v13 = vcombine.low %v1785_v7, %v1789_v8 }
 0x22e   : > { %4873 = vmatpush1.bf16.msra.mxu0 %v6662_v19  ;;  %4904 = vmatprep.mubr.bf16.mxu0 %v8104_v35  ;;  %v1917_v10 = vld [vmem:[%s7736_s1 + $0xca8] sm:$0xff] }
 0x22f   : > { %4914 = vmatpush1.bf16.msra.mxu1 %v6790_v21  ;;  %4945 = vmatprep.mubr.bf16.mxu1 %v8110_v47  ;;  %v6751_v41 = vcombine.high %v1913_v9, %v1917_v10  ;;  %v1777_v43 = vld [vmem:[%s7736_s1 + $0x848] sm:$0xff]  ;;  %v6750_v15 = vcombine.low %v1913_v9, %v1917_v10 }
 0x230   : > { %4874 = vmatprep.subr.bf16.mxu0 %v6655_v27  ;;  %4915 = vmatprep.subr.bf16.mxu1 %v6783_v30  ;;  %v1781_v44 = vld [vmem:[%s7736_s1 + $0x868] sm:$0xff] }
 0x231   : > { %v1905_v11 = vld [vmem:[%s7736_s1 + $0xc48] sm:$0xff]  ;;  %v6615_v16 = vcombine.high %v1777_v43, %v1781_v44  ;;  %v6614_v21 = vcombine.low %v1777_v43, %v1781_v44 }
 0x232   : > { %4875 = vmatpush1.bf16.msra.mxu0 %v6654_v32  ;;  %v1909_v12 = vld [vmem:[%s7736_s1 + $0xc68] sm:$0xff] }
 0x233   : > { %4916 = vmatpush1.bf16.msra.mxu1 %v6782_v33  ;;  %4876 = vmatprep.subr.bf16.mxu0 %v6647_v36  ;;  %v6743_v17 = vcombine.high %v1905_v11, %v1909_v12  ;;  %v1769_v18 = vld [vmem:[%s7736_s1 + $0x808] sm:$0xff]  ;;  %v6742_v27 = vcombine.low %v1905_v11, %v1909_v12 }
 0x234   : > { %4917 = vmatprep.subr.bf16.mxu1 %v6775_v39  ;;  %v1773_v19 = vld [vmem:[%s7736_s1 + $0x828] sm:$0xff] }
 0x235   : > { %v1897_v23 = vld [vmem:[%s7736_s1 + $0xc08] sm:$0xff]  ;;  %v6607_v28 = vcombine.high %v1769_v18, %v1773_v19  ;;  %v6606_v33 = vcombine.low %v1769_v18, %v1773_v19 }
 0x236   : > { %4877 = vmatpush1.bf16.msra.mxu0 %v6646_v51  ;;  %v1901_v20 = vld [vmem:[%s7736_s1 + $0xc28] sm:$0xff] }
 0x237   : > { %4918 = vmatpush1.bf16.msra.mxu1 %v6774_v54  ;;  %4878 = vmatprep.subr.bf16.mxu0 %v6639_v58  ;;  %v6735_v29 = vcombine.high %v1897_v23, %v1901_v20  ;;  %v1889_v30 = vld [vmem:[%s7736_s1 + $0xbc8] sm:$0xff]  ;;  %v6734_v36 = vcombine.low %v1897_v23, %v1901_v20 }
 0x238   : > { %4919 = vmatprep.subr.bf16.mxu1 %v6767_v62  ;;  %v1893_v31 = vld [vmem:[%s7736_s1 + $0xbe8] sm:$0xff] }
 0x239   : > { %v2017_v14 = vld [vmem:[%s7736_s1 + $0xfc8] sm:$0xff]  ;;  %v6727_v39 = vcombine.high %v1889_v30, %v1893_v31  ;;  %v6726_v54 = vcombine.low %v1889_v30, %v1893_v31 }
 0x23a   : > { %4879 = vmatpush1.bf16.msra.mxu0 %v6638_v3  ;;  %v2021_v32 = vld [vmem:[%s7736_s1 + $0xfe8] sm:$0xff] }
 0x23b   : > { %4920 = vmatpush1.bf16.msra.mxu1 %v6766_v4  ;;  %4880 = vmatprep.subr.bf16.mxu0 %v6631_v5  ;;  %v6855_v40 = vcombine.high %v2017_v14, %v2021_v32  ;;  %v1881_v42 = vld [vmem:[%s7736_s1 + $0xb88] sm:$0xff]  ;;  %v6854_v58 = vcombine.low %v2017_v14, %v2021_v32 }
 0x23c   : > { %4921 = vmatprep.subr.bf16.mxu1 %v6759_v6  ;;  %v1885_v49 = vld [vmem:[%s7736_s1 + $0xba8] sm:$0xff] }
 0x23d   : > { %v2009_v50 = vld [vmem:[%s7736_s1 + $0xf88] sm:$0xff]  ;;  %v6719_v62 = vcombine.high %v1881_v42, %v1885_v49  ;;  %v6718_v4 = vcombine.low %v1881_v42, %v1885_v49 }
 0x23e   : > { %4881 = vmatpush1.bf16.msra.mxu0 %v6630_v37  ;;  %v2013_v51 = vld [vmem:[%s7736_s1 + $0xfa8] sm:$0xff] }
 0x23f   : > { %4922 = vmatpush1.bf16.msra.mxu1 %v6758_v38  ;;  %4882 = vmatprep.subr.bf16.mxu0 %v6623_v57  ;;  %v6847_v63 = vcombine.high %v2009_v50, %v2013_v51  ;;  %v1873_v0 = vld [vmem:[%s7736_s1 + $0xb48] sm:$0xff]  ;;  %v6846_v5 = vcombine.low %v2009_v50, %v2013_v51 }
 0x240   : > { %4923 = vmatprep.subr.bf16.mxu1 %v6751_v41  ;;  %v1877_v1 = vld [vmem:[%s7736_s1 + $0xb68] sm:$0xff] }
 0x241   : > { %v2001_v2 = vld [vmem:[%s7736_s1 + $0xf48] sm:$0xff]  ;;  %v6711_v6 = vcombine.high %v1873_v0, %v1877_v1  ;;  %v6710_v38 = vcombine.low %v1873_v0, %v1877_v1  ;;  %v1570_v1 = vld [vmem:[%s7736_s1 + $0x1d0] sm:$0xff] }
 0x242   : > { %4883 = vmatpush1.bf16.msra.mxu0 %v6622_v13  ;;  %v2005_v3 = vld [vmem:[%s7736_s1 + $0xf68] sm:$0xff] }
 0x243   : > { %4924 = vmatpush1.bf16.msra.mxu1 %v6750_v15  ;;  %4884 = vmatprep.subr.bf16.mxu0 %v6615_v16  ;;  %v6839_v7 = vcombine.high %v2001_v2, %v2005_v3  ;;  %v1865_v8 = vld [vmem:[%s7736_s1 + $0xb08] sm:$0xff]  ;;  %v6838_v57 = vcombine.low %v2001_v2, %v2005_v3  ;;  %v1574_v2 = vld [vmem:[%s7736_s1 + $0x1f0] sm:$0xff] }
 0x244   : > { %4925 = vmatprep.subr.bf16.mxu1 %v6743_v17  ;;  %v1869_v9 = vld [vmem:[%s7736_s1 + $0xb28] sm:$0xff]  ;;  %v1698_v3 = vld [vmem:[%s7736_s1 + $0x5d0] sm:$0xff] }
 0x245   : > { %v1993_v10 = vld [vmem:[%s7736_s1 + $0xf08] sm:$0xff]  ;;  %v6703_v41 = vcombine.high %v1865_v8, %v1869_v9  ;;  %v6702_v15 = vcombine.low %v1865_v8, %v1869_v9 }
 0x246   : > { %4885 = vmatpush1.bf16.msra.mxu0 %v6614_v21  ;;  %v1997_v37 = vld [vmem:[%s7736_s1 + $0xf28] sm:$0xff] }
 0x247   : > { %4926 = vmatpush1.bf16.msra.mxu1 %v6742_v27  ;;  %4886 = vmatprep.subr.bf16.mxu0 %v6607_v28  ;;  %v6831_v43 = vcombine.high %v1993_v10, %v1997_v37  ;;  %v1857_v44 = vld [vmem:[%s7736_s1 + $0xac8] sm:$0xff]  ;;  %v6830_v16 = vcombine.low %v1993_v10, %v1997_v37  ;;  %v1562_v10 = vld [vmem:[%s7736_s1 + $0x190] sm:$0xff] }
 0x248   : > { %4927 = vmatprep.subr.bf16.mxu1 %v6735_v29  ;;  %v1861_v11 = vld [vmem:[%s7736_s1 + $0xae8] sm:$0xff]  ;;  %v1566_v37 = vld [vmem:[%s7736_s1 + $0x1b0] sm:$0xff] }
 0x249   : > { %v1985_v12 = vld [vmem:[%s7736_s1 + $0xec8] sm:$0xff]  ;;  %v6695_v17 = vcombine.high %v1857_v44, %v1861_v11  ;;  %v6694_v27 = vcombine.low %v1857_v44, %v1861_v11 }
 0x24a   : > { %4887 = vmatpush1.bf16.msra.mxu0 %v6606_v33  ;;  %v1989_v13 = vld [vmem:[%s7736_s1 + $0xee8] sm:$0xff] }
 0x24b   : > { %4928 = vmatpush1.bf16.msra.mxu1 %v6734_v36  ;;  %4888 = vmatprep.subr.bf16.mxu0 %v6727_v39  ;;  %v6823_v18 = vcombine.high %v1985_v12, %v1989_v13  ;;  %v1849_v19 = vld [vmem:[%s7736_s1 + $0xa88] sm:$0xff]  ;;  %v6822_v28 = vcombine.low %v1985_v12, %v1989_v13  ;;  %v6401_v12 = vcombine.high %v1562_v10, %v1566_v37  ;;  %v1554_v13 = vld [vmem:[%s7736_s1 + $0x150] sm:$0xff] }
 0x24c   : > { %4929 = vmatprep.subr.bf16.mxu1 %v6855_v40  ;;  %v1853_v23 = vld [vmem:[%s7736_s1 + $0xaa8] sm:$0xff] }
 0x24d   : > { %v1977_v20 = vld [vmem:[%s7736_s1 + $0xe88] sm:$0xff]  ;;  %v6687_v29 = vcombine.high %v1849_v19, %v1853_v23  ;;  %v6686_v36 = vcombine.low %v1849_v19, %v1853_v23  ;;  %v1686_v19 = vld [vmem:[%s7736_s1 + $0x570] sm:$0xff] }
 0x24e   : > { %4889 = vmatpush2.bf16.msra.mxu0 %v6726_v54  ;;  %v1981_v21 = vld [vmem:[%s7736_s1 + $0xea8] sm:$0xff] }
 0x24f   : > { %4930 = vmatpush2.bf16.msra.mxu1 %v6854_v58  ;;  %4890 = vmatprep.subr.bf16.mxu0 %v6719_v62  ;;  %v6815_v30 = vcombine.high %v1977_v20, %v1981_v21  ;;  %v1841_v31 = vld [vmem:[%s7736_s1 + $0xa48] sm:$0xff]  ;;  %v6814_v39 = vcombine.low %v1977_v20, %v1981_v21  ;;  %v6400_v20 = vcombine.low %v1562_v10, %v1566_v37  ;;  %v1658_v10 = vld [vmem:[%s7736_s1 + $0x490] sm:$0xff] }
 0x250   : > { %4931 = vmatprep.subr.bf16.mxu1 %v6847_v63  ;;  %v1845_v14 = vld [vmem:[%s7736_s1 + $0xa68] sm:$0xff]  ;;  %v1662_v37 = vld [vmem:[%s7736_s1 + $0x4b0] sm:$0xff] }
 0x251   : > { %v1969_v32 = vld [vmem:[%s7736_s1 + $0xe48] sm:$0xff]  ;;  %v6679_v40 = vcombine.high %v1841_v31, %v1845_v14  ;;  %v6678_v58 = vcombine.low %v1841_v31, %v1845_v14  ;;  %v1546_v14 = vld [vmem:[%s7736_s1 + $0x110] sm:$0xff] }
 0x252   : > { %4891 = vmatpush2.bf16.msra.mxu0 %v6718_v4  ;;  %v1973_v33 = vld [vmem:[%s7736_s1 + $0xe68] sm:$0xff]  ;;  %v1702_v4 = vld [vmem:[%s7736_s1 + $0x5f0] sm:$0xff] }
 0x253   : > { %4932 = vmatpush2.bf16.msra.mxu1 %v6846_v5  ;;  %4892 = vmatprep.subr.bf16.mxu0 %v6711_v6  ;;  %v6807_v42 = vcombine.high %v1969_v32, %v1973_v33  ;;  %v1833_v49 = vld [vmem:[%s7736_s1 + $0xa08] sm:$0xff]  ;;  %v6806_v62 = vcombine.low %v1969_v32, %v1973_v33  ;;  %v6537_v9 = vcombine.high %v1698_v3, %v1702_v4  ;;  %v1550_v32 = vld [vmem:[%s7736_s1 + $0x130] sm:$0xff] }
 0x254   : > { %4933 = vmatprep.subr.bf16.mxu1 %v6839_v7  ;;  %v1837_v50 = vld [vmem:[%s7736_s1 + $0xa28] sm:$0xff]  ;;  %v6409_v7 = vcombine.high %v1570_v1, %v1574_v2  ;;  %v6536_v44 = vcombine.low %v1698_v3, %v1702_v4  ;;  %v6384_v3 = vcombine.low %v1546_v14, %v1550_v32 }
 0x255   : > { %v1961_v51 = vld [vmem:[%s7736_s1 + $0xe08] sm:$0xff]  ;;  %v6671_v63 = vcombine.high %v1833_v49, %v1837_v50  ;;  %v6670_v5 = vcombine.low %v1833_v49, %v1837_v50 }
 0x256   : > { %4893 = vmatpush2.bf16.msra.mxu0 %v6710_v38  ;;  %v1965_v54 = vld [vmem:[%s7736_s1 + $0xe28] sm:$0xff]  ;;  %v6408_v38 = vcombine.low %v1570_v1, %v1574_v2  ;;  %v1666_v1 = vld [vmem:[%s7736_s1 + $0x4d0] sm:$0xff] }
 0x257   : > { %4934 = vmatpush2.bf16.msra.mxu1 %v6838_v57  ;;  %4894 = vmatprep.subr.bf16.mxu0 %v6703_v41  ;;  %v6799_v0 = vcombine.high %v1961_v51, %v1965_v54  ;;  %v6798_v6 = vcombine.low %v1961_v51, %v1965_v54  ;;  %v8248_v8 = vld [vmem:[%s441_s14] sm:$0xff]  ;;  %v1690_v41 = vld [vmem:[%s7736_s1 + $0x590] sm:$0xff]  ;;  %v6385_v54 = vcombine.high %v1546_v14, %v1550_v32 }
 0x258   : > { %4935 = vmatprep.subr.bf16.mxu1 %v6831_v43  ;;  %v2029_v57 = vrot.slane %v8248_v8, %v647_v53  ;;  %v1694_v43 = vld [vmem:[%s7736_s1 + $0x5b0] sm:$0xff]  ;;  %v2033_v11 = vrot.slane %v8248_v8, %v651_v25 }
 0x259   : > { %v6528_v21 = vcombine.low %v1690_v41, %v1694_v43  ;;  %v1670_v2 = vld [vmem:[%s7736_s1 + $0x4f0] sm:$0xff] }
 0x25a   : > { %4895 = vmatpush2.bf16.msra.mxu0 %v6702_v15  ;;  %v1558_v15 = vld [vmem:[%s7736_s1 + $0x170] sm:$0xff] }
 0x25b   : > { %4936 = vmatpush2.bf16.msra.mxu1 %v6830_v16  ;;  %4896 = vmatprep.subr.bf16.mxu0 %v6695_v17  ;;  %v6529_v17 = vcombine.high %v1690_v41, %v1694_v43  ;;  %v6392_v49 = vcombine.low %v1554_v13, %v1558_v15  ;;  %v6497_v43 = vcombine.high %v1658_v10, %v1662_v37  ;;  %v1762_v14 = vld [vmem:[%s7736_s1 + $0x7d0] sm:$0xff] }
 0x25c   : > { %4937 = vmatprep.subr.bf16.mxu1 %v6823_v18  ;;  %v1682_v18 = vld [vmem:[%s7736_s1 + $0x550] sm:$0xff] }
 0x25d   : > { %v6521_v31 = vcombine.high %v1682_v18, %v1686_v19  ;;  %v6520_v51 = vcombine.low %v1682_v18, %v1686_v19  ;;  %v1514_v19 = vld [vmem:[%s7736_s1 + $0x10] sm:$0xff] }
 0x25e   : > { %4897 = vmatpush2.bf16.msra.mxu0 %v6694_v27  ;;  %v6393_v27 = vcombine.high %v1554_v13, %v1558_v15  ;;  %v1654_v13 = vld [vmem:[%s7736_s1 + $0x470] sm:$0xff] }
 0x25f   : > { %4938 = vmatpush2.bf16.msra.mxu1 %v6822_v28  ;;  %4898 = vmatprep.subr.bf16.mxu0 %v6687_v29  ;;  %v1766_v32 = vld [vmem:[%s7736_s1 + $0x7f0] sm:$0xff] }
 0x260   : > { %4939 = vmatprep.subr.bf16.mxu1 %v6815_v30 }
 0x262   : > { %4899 = vmatpush2.bf16.msra.mxu0 %v6686_v36  ;;  %v1674_v36 = vld [vmem:[%s7736_s1 + $0x510] sm:$0xff] }
 0x263   : > { %4940 = vmatpush2.bf16.msra.mxu1 %v6814_v39  ;;  %4900 = vmatprep.subr.bf16.mxu0 %v6679_v40  ;;  %v1678_v39 = vld [vmem:[%s7736_s1 + $0x530] sm:$0xff] }
 0x264   : > { %4941 = vmatprep.subr.bf16.mxu1 %v6807_v42  ;;  %v6512_v4 = vcombine.low %v1674_v36, %v1678_v39 }
 0x266   : > { %4901 = vmatpush2.bf16.msra.mxu0 %v6678_v58 }
 0x267   : > { %4942 = vmatpush2.bf16.msra.mxu1 %v6806_v62  ;;  %4902 = vmatprep.subr.bf16.mxu0 %v6671_v63  ;;  %v6513_v62 = vcombine.high %v1674_v36, %v1678_v39  ;;  %v1538_v63 = vld [vmem:[%s7736_s1 + $0xd0] sm:$0xff] }
 0x268   : > { %4943 = vmatprep.subr.bf16.mxu1 %v6799_v0  ;;  %v1542_v0 = vld [vmem:[%s7736_s1 + $0xf0] sm:$0xff] }
 0x26a   : > { %4903 = vmatpush2.bf16.msra.mxu0 %v6670_v5  ;;  %v6377_v5 = vcombine.high %v1538_v63, %v1542_v0 }
 0x26b   : > { %4944 = vmatpush2.bf16.msra.mxu1 %v6798_v6  ;;  %4954 = vmatprep.subr.bf16.mxu0 %v6409_v7  ;;  %v6505_v6 = vcombine.high %v1666_v1, %v1670_v2  ;;  %v1530_v7 = vld [vmem:[%s7736_s1 + $0x90] sm:$0xff] }
 0x26c   : > { %4995 = vmatprep.subr.bf16.mxu1 %v6537_v9  ;;  %v1534_v9 = vld [vmem:[%s7736_s1 + $0xb0] sm:$0xff] }
 0x26d   : > { %4905 = vmatmul.mubr.bf16.vlgmr.msra.gmra.mxu0 %v8108_v46  ;;  %v4660_v16 = vpop.f32.mrf.mxu0  ;;  %v4701_v23 = vpop.f32.mrf.mxu1  ;;  %v6369_v41 = vcombine.high %v1530_v7, %v1534_v9  ;;  %v6368_v15 = vcombine.low %v1530_v7, %v1534_v9 }
 0x26e   : > { %4946 = vmatmul.mubr.bf16.vlgmr.msra.gmra.mxu1 %v8102_v34  ;;  %v4661_v53 = vadd.f32 %v4660_v16, %v2029_v57  ;;  %4955 = vmatpush1.bf16.msra.mxu0 %v6408_v38  ;;  %v6376_v38 = vcombine.low %v1538_v63, %v1542_v0  ;;  %v6504_v57 = vcombine.low %v1666_v1, %v1670_v2  ;;  %v1618_v1 = vld [vmem:[%s7736_s1 + $0x350] sm:$0xff] }
 0x26f   : > { %4986 = vmatprep.mubr.bf16.mxu0 %v8008_v56  ;;  %4996 = vmatpush1.bf16.msra.mxu1 %v6536_v44  ;;  %v4662_v25 = vpop.f32.mrf.mxu0  ;;  %v4703_v30 = vpop.f32.mrf.mxu1  ;;  %v1522_v44 = vld [vmem:[%s7736_s1 + $0x50] sm:$0xff]  ;;  %v6496_v16 = vcombine.low %v1658_v10, %v1662_v37 }
 0x270   : > { %v8267_v28 = vadd.f32 %v4701_v23, %v4661_v53  ;;  %5027 = vmatprep.mubr.bf16.mxu1 %v8012_v60  ;;  %v4663_v29 = vadd.f32 %v4662_v25, %v2033_v11  ;;  %4956 = vmatprep.subr.bf16.mxu0 %v6401_v12  ;;  %v1526_v11 = vld [vmem:[%s7736_s1 + $0x70] sm:$0xff] }
 0x271   : > { %4997 = vmatprep.subr.bf16.mxu1 %v6529_v17  ;;  %v4664_v33 = vpop.f32.mrf.mxu0  ;;  %v4705_v42 = vpop.f32.mrf.mxu1  ;;  %v1650_v12 = vld [vmem:[%s7736_s1 + $0x450] sm:$0xff]  ;;  %v6361_v17 = vcombine.high %v1522_v44, %v1526_v11  ;;  %v6360_v25 = vcombine.low %v1522_v44, %v1526_v11 }
 0x272   : > { %v8274_v40 = vadd.f32 %v4703_v30, %v4663_v29  ;;  %4957 = vmatpush1.bf16.msra.mxu0 %v6400_v20  ;;  %v6489_v18 = vcombine.high %v1650_v12, %v1654_v13  ;;  %v1518_v53 = vld [vmem:[%s7736_s1 + $0x30] sm:$0xff]  ;;  %v6601_v42 = vcombine.high %v1762_v14, %v1766_v32 }
 0x273   : > { %4998 = vmatpush1.bf16.msra.mxu1 %v6528_v21  ;;  %v4665_v50 = vpop.f32.mrf.mxu0  ;;  %4958 = vmatprep.subr.bf16.mxu0 %v6393_v27  ;;  %v4706_v58 = vpop.f32.mrf.mxu1  ;;  %v1642_v23 = vld [vmem:[%s7736_s1 + $0x410] sm:$0xff]  ;;  %v6488_v21 = vcombine.low %v1650_v12, %v1654_v13  ;;  %v6353_v27 = vcombine.high %v1514_v19, %v1518_v53  ;;  %v6352_v33 = vcombine.low %v1514_v19, %v1518_v53 }
 0x274   : > { %4999 = vmatprep.subr.bf16.mxu1 %v6521_v31  ;;  %v1646_v20 = vld [vmem:[%s7736_s1 + $0x430] sm:$0xff] }
 0x275   : > { %v6481_v29 = vcombine.high %v1642_v23, %v1646_v20  ;;  %v1634_v30 = vld [vmem:[%s7736_s1 + $0x3d0] sm:$0xff]  ;;  %v6480_v36 = vcombine.low %v1642_v23, %v1646_v20 }
 0x276   : > { %4959 = vmatpush1.bf16.msra.mxu0 %v6392_v49  ;;  %v1638_v31 = vld [vmem:[%s7736_s1 + $0x3f0] sm:$0xff] }
 0x277   : > { %5000 = vmatpush1.bf16.msra.mxu1 %v6520_v51  ;;  %4960 = vmatprep.subr.bf16.mxu0 %v6385_v54  ;;  %v6473_v39 = vcombine.high %v1634_v30, %v1638_v31  ;;  %v1626_v49 = vld [vmem:[%s7736_s1 + $0x390] sm:$0xff]  ;;  %v6472_v58 = vcombine.low %v1634_v30, %v1638_v31 }
 0x278   : > { %5001 = vmatprep.subr.bf16.mxu1 %v6513_v62  ;;  %v1630_v50 = vld [vmem:[%s7736_s1 + $0x3b0] sm:$0xff]  ;;  %v6600_v62 = vcombine.low %v1762_v14, %v1766_v32 }
 0x279   : > { %v1754_v51 = vld [vmem:[%s7736_s1 + $0x790] sm:$0xff]  ;;  %v6465_v63 = vcombine.high %v1626_v49, %v1630_v50 }
 0x27a   : > { %4961 = vmatpush1.bf16.msra.mxu0 %v6384_v3  ;;  %v1758_v54 = vld [vmem:[%s7736_s1 + $0x7b0] sm:$0xff] }
 0x27b   : > { %5002 = vmatpush1.bf16.msra.mxu1 %v6512_v4  ;;  %4962 = vmatprep.subr.bf16.mxu0 %v6377_v5  ;;  %v6593_v0 = vcombine.high %v1754_v51, %v1758_v54  ;;  %v1622_v2 = vld [vmem:[%s7736_s1 + $0x370] sm:$0xff]  ;;  %v6464_v5 = vcombine.low %v1626_v49, %v1630_v50 }
 0x27c   : > { %5003 = vmatprep.subr.bf16.mxu1 %v6505_v6  ;;  %v1746_v3 = vld [vmem:[%s7736_s1 + $0x750] sm:$0xff]  ;;  %v6592_v6 = vcombine.low %v1754_v51, %v1758_v54  ;;  %v6457_v7 = vcombine.high %v1618_v1, %v1622_v2 }
 0x27d   : > { %v1750_v4 = vld [vmem:[%s7736_s1 + $0x770] sm:$0xff] }
 0x27e   : > { %4963 = vmatpush1.bf16.msra.mxu0 %v6376_v38  ;;  %v6585_v9 = vcombine.high %v1746_v3, %v1750_v4  ;;  %v1610_v10 = vld [vmem:[%s7736_s1 + $0x310] sm:$0xff] }
 0x27f   : > { %5004 = vmatpush1.bf16.msra.mxu1 %v6504_v57  ;;  %4964 = vmatprep.subr.bf16.mxu0 %v6369_v41  ;;  %v1614_v37 = vld [vmem:[%s7736_s1 + $0x330] sm:$0xff]  ;;  %v6456_v41 = vcombine.low %v1618_v1, %v1622_v2 }
 0x280   : > { %5005 = vmatprep.subr.bf16.mxu1 %v6497_v43  ;;  %v1738_v38 = vld [vmem:[%s7736_s1 + $0x710] sm:$0xff]  ;;  %v6584_v43 = vcombine.low %v1746_v3, %v1750_v4  ;;  %v6449_v44 = vcombine.high %v1610_v10, %v1614_v37 }
 0x281   : > { %v1742_v57 = vld [vmem:[%s7736_s1 + $0x730] sm:$0xff] }
 0x282   : > { %4965 = vmatpush1.bf16.msra.mxu0 %v6368_v15  ;;  %v6577_v11 = vcombine.high %v1738_v38, %v1742_v57  ;;  %v1602_v12 = vld [vmem:[%s7736_s1 + $0x2d0] sm:$0xff] }
 0x283   : > { %5006 = vmatpush1.bf16.msra.mxu1 %v6496_v16  ;;  %4966 = vmatprep.subr.bf16.mxu0 %v6361_v17  ;;  %v1606_v13 = vld [vmem:[%s7736_s1 + $0x2f0] sm:$0xff]  ;;  %v6448_v17 = vcombine.low %v1610_v10, %v1614_v37 }
 0x284   : > { %5007 = vmatprep.subr.bf16.mxu1 %v6489_v18  ;;  %v1730_v15 = vld [vmem:[%s7736_s1 + $0x6d0] sm:$0xff]  ;;  %v6576_v18 = vcombine.low %v1738_v38, %v1742_v57  ;;  %v6441_v19 = vcombine.high %v1602_v12, %v1606_v13 }
 0x285   : > { %v1734_v16 = vld [vmem:[%s7736_s1 + $0x6f0] sm:$0xff] }
 0x286   : > { %4967 = vmatpush1.bf16.msra.mxu0 %v6360_v25  ;;  %v6569_v53 = vcombine.high %v1730_v15, %v1734_v16  ;;  %v1594_v23 = vld [vmem:[%s7736_s1 + $0x290] sm:$0xff] }
 0x287   : > { %5008 = vmatpush1.bf16.msra.mxu1 %v6488_v21  ;;  %4968 = vmatprep.subr.bf16.mxu0 %v6353_v27  ;;  %v1598_v20 = vld [vmem:[%s7736_s1 + $0x2b0] sm:$0xff]  ;;  %v6440_v27 = vcombine.low %v1602_v12, %v1606_v13 }
 0x288   : > { %5009 = vmatprep.subr.bf16.mxu1 %v6481_v29  ;;  %v1722_v25 = vld [vmem:[%s7736_s1 + $0x690] sm:$0xff]  ;;  %v6568_v29 = vcombine.low %v1730_v15, %v1734_v16  ;;  %v6433_v30 = vcombine.high %v1594_v23, %v1598_v20 }
 0x289   : > { %v1726_v21 = vld [vmem:[%s7736_s1 + $0x6b0] sm:$0xff] }
 0x28a   : > { %4969 = vmatpush1.bf16.msra.mxu0 %v6352_v33  ;;  %v6561_v31 = vcombine.high %v1722_v25, %v1726_v21  ;;  %v1586_v14 = vld [vmem:[%s7736_s1 + $0x250] sm:$0xff] }
 0x28b   : > { %5010 = vmatpush1.bf16.msra.mxu1 %v6480_v36  ;;  %4970 = vmatprep.subr.bf16.mxu0 %v6473_v39  ;;  %v1590_v32 = vld [vmem:[%s7736_s1 + $0x270] sm:$0xff]  ;;  %v6432_v39 = vcombine.low %v1594_v23, %v1598_v20 }
 0x28c   : > { %5011 = vmatprep.subr.bf16.mxu1 %v6601_v42  ;;  %v1714_v33 = vld [vmem:[%s7736_s1 + $0x650] sm:$0xff]  ;;  %v6560_v42 = vcombine.low %v1722_v25, %v1726_v21  ;;  %v6425_v49 = vcombine.high %v1586_v14, %v1590_v32 }
 0x28d   : > { %v1718_v36 = vld [vmem:[%s7736_s1 + $0x670] sm:$0xff] }
 0x28e   : > { %4971 = vmatpush2.bf16.msra.mxu0 %v6472_v58  ;;  %v6553_v50 = vcombine.high %v1714_v33, %v1718_v36  ;;  %v1578_v51 = vld [vmem:[%s7736_s1 + $0x210] sm:$0xff] }
 0x28f   : > { %5012 = vmatpush2.bf16.msra.mxu1 %v6600_v62  ;;  %4972 = vmatprep.subr.bf16.mxu0 %v6465_v63  ;;  %v1582_v54 = vld [vmem:[%s7736_s1 + $0x230] sm:$0xff]  ;;  %v6424_v63 = vcombine.low %v1586_v14, %v1590_v32 }
 0x290   : > { %5013 = vmatprep.subr.bf16.mxu1 %v6593_v0  ;;  %v1706_v58 = vld [vmem:[%s7736_s1 + $0x610] sm:$0xff]  ;;  %v6552_v0 = vcombine.low %v1714_v33, %v1718_v36  ;;  %v6417_v1 = vcombine.high %v1578_v51, %v1582_v54 }
 0x291   : > { %v1710_v62 = vld [vmem:[%s7736_s1 + $0x630] sm:$0xff] }
 0x292   : > { %4973 = vmatpush2.bf16.msra.mxu0 %v6464_v5  ;;  %v6545_v2 = vcombine.high %v1706_v58, %v1710_v62  ;;  %v1826_v3 = vld [vmem:[%s7736_s1 + $0x9d0] sm:$0xff] }
 0x293   : > { %5014 = vmatpush2.bf16.msra.mxu1 %v6592_v6  ;;  %4974 = vmatprep.subr.bf16.mxu0 %v6457_v7  ;;  %v1830_v4 = vld [vmem:[%s7736_s1 + $0x9f0] sm:$0xff]  ;;  %v6416_v7 = vcombine.low %v1578_v51, %v1582_v54 }
 0x294   : > { %5015 = vmatprep.subr.bf16.mxu1 %v6585_v9  ;;  %v1954_v5 = vld [vmem:[%s7736_s1 + $0xdd0] sm:$0xff]  ;;  %v6544_v9 = vcombine.low %v1706_v58, %v1710_v62  ;;  %v6665_v10 = vcombine.high %v1826_v3, %v1830_v4 }
 0x295   : > { %v1958_v6 = vld [vmem:[%s7736_s1 + $0xdf0] sm:$0xff] }
 0x296   : > { %4975 = vmatpush2.bf16.msra.mxu0 %v6456_v41  ;;  %v6793_v37 = vcombine.high %v1954_v5, %v1958_v6  ;;  %v1818_v38 = vld [vmem:[%s7736_s1 + $0x990] sm:$0xff]  ;;  %v6664_v41 = vcombine.low %v1826_v3, %v1830_v4 }
 0x297   : > { %5016 = vmatpush2.bf16.msra.mxu1 %v6584_v43  ;;  %4976 = vmatprep.subr.bf16.mxu0 %v6449_v44  ;;  %v1822_v57 = vld [vmem:[%s7736_s1 + $0x9b0] sm:$0xff] }
 0x298   : > { %5017 = vmatprep.subr.bf16.mxu1 %v6577_v11  ;;  %v1946_v43 = vld [vmem:[%s7736_s1 + $0xd90] sm:$0xff]  ;;  %v6792_v11 = vcombine.low %v1954_v5, %v1958_v6  ;;  %v6657_v12 = vcombine.high %v1818_v38, %v1822_v57  ;;  %v6656_v20 = vcombine.low %v1818_v38, %v1822_v57 }
 0x299   : > { %v1950_v44 = vld [vmem:[%s7736_s1 + $0xdb0] sm:$0xff] }
 0x29a   : > { %4977 = vmatpush2.bf16.msra.mxu0 %v6448_v17  ;;  %v1810_v13 = vld [vmem:[%s7736_s1 + $0x950] sm:$0xff]  ;;  %v6785_v17 = vcombine.high %v1946_v43, %v1950_v44  ;;  %v6784_v21 = vcombine.low %v1946_v43, %v1950_v44 }
 0x29b   : > { %5018 = vmatpush2.bf16.msra.mxu1 %v6576_v18  ;;  %4978 = vmatprep.subr.bf16.mxu0 %v6441_v19  ;;  %v1814_v15 = vld [vmem:[%s7736_s1 + $0x970] sm:$0xff] }
 0x29c   : > { %5019 = vmatprep.subr.bf16.mxu1 %v6569_v53  ;;  %v1938_v18 = vld [vmem:[%s7736_s1 + $0xd50] sm:$0xff] }
 0x29d   : > { %v1942_v19 = vld [vmem:[%s7736_s1 + $0xd70] sm:$0xff] }
 0x29e   : > { %4979 = vmatpush2.bf16.msra.mxu0 %v6440_v27  ;;  %v6649_v27 = vcombine.high %v1810_v13, %v1814_v15  ;;  %v1802_v14 = vld [vmem:[%s7736_s1 + $0x910] sm:$0xff]  ;;  %v6776_v51 = vcombine.low %v1938_v18, %v1942_v19 }
 0x29f   : > { %5020 = vmatpush2.bf16.msra.mxu1 %v6568_v29  ;;  %4980 = vmatprep.subr.bf16.mxu0 %v6433_v30  ;;  %v1806_v32 = vld [vmem:[%s7736_s1 + $0x930] sm:$0xff] }
 0x2a0   : > { %5021 = vmatprep.subr.bf16.mxu1 %v6561_v31  ;;  %v1930_v36 = vld [vmem:[%s7736_s1 + $0xd10] sm:$0xff]  ;;  %v6641_v54 = vcombine.high %v1802_v14, %v1806_v32  ;;  %v6640_v3 = vcombine.low %v1802_v14, %v1806_v32 }
 0x2a1   : > { %v1778_v44 = vld [vmem:[%s7736_s1 + $0x850] sm:$0xff] }
 0x2a2   : > { %4981 = vmatpush2.bf16.msra.mxu0 %v6432_v39  ;;  %v1934_v39 = vld [vmem:[%s7736_s1 + $0xd30] sm:$0xff] }
 0x2a3   : > { %5022 = vmatpush2.bf16.msra.mxu1 %v6560_v42  ;;  %4982 = vmatprep.subr.bf16.mxu0 %v6425_v49  ;;  %v6769_v62 = vcombine.high %v1930_v36, %v1934_v39  ;;  %v6768_v4 = vcombine.low %v1930_v36, %v1934_v39  ;;  %v2018_v14 = vld [vmem:[%s7736_s1 + $0xfd0] sm:$0xff] }
 0x2a4   : > { %5023 = vmatprep.subr.bf16.mxu1 %v6553_v50  ;;  %v6648_v50 = vcombine.low %v1810_v13, %v1814_v15  ;;  %v1910_v13 = vld [vmem:[%s7736_s1 + $0xc70] sm:$0xff] }
 0x2a5   : > { %v2022_v32 = vld [vmem:[%s7736_s1 + $0xff0] sm:$0xff] }
 0x2a6   : > { %4983 = vmatpush2.bf16.msra.mxu0 %v6424_v63  ;;  %v1794_v63 = vld [vmem:[%s7736_s1 + $0x8d0] sm:$0xff] }
 0x2a7   : > { %5024 = vmatpush2.bf16.msra.mxu1 %v6552_v0  ;;  %4984 = vmatprep.subr.bf16.mxu0 %v6417_v1  ;;  %v1798_v0 = vld [vmem:[%s7736_s1 + $0x8f0] sm:$0xff] }
 0x2a8   : > { %5025 = vmatprep.subr.bf16.mxu1 %v6545_v2  ;;  %v1922_v1 = vld [vmem:[%s7736_s1 + $0xcd0] sm:$0xff]  ;;  %v6633_v5 = vcombine.high %v1794_v63, %v1798_v0  ;;  %v6632_v38 = vcombine.low %v1794_v63, %v1798_v0 }
 0x2a9   : > { %v1926_v2 = vld [vmem:[%s7736_s1 + $0xcf0] sm:$0xff] }
 0x2aa   : > { %4985 = vmatpush2.bf16.msra.mxu0 %v6416_v7  ;;  %v6761_v6 = vcombine.high %v1922_v1, %v1926_v2  ;;  %v1786_v7 = vld [vmem:[%s7736_s1 + $0x890] sm:$0xff]  ;;  %v6760_v57 = vcombine.low %v1922_v1, %v1926_v2 }
 0x2ab   : > { %5026 = vmatpush2.bf16.msra.mxu1 %v6544_v9  ;;  %5036 = vmatprep.subr.bf16.mxu0 %v6665_v10  ;;  %v1790_v9 = vld [vmem:[%s7736_s1 + $0x8b0] sm:$0xff] }
 0x2ac   : > { %5077 = vmatprep.subr.bf16.mxu1 %v6793_v37  ;;  %v1914_v10 = vld [vmem:[%s7736_s1 + $0xc90] sm:$0xff]  ;;  %v6624_v15 = vcombine.low %v1786_v7, %v1790_v9 }
 0x2ad   : > { %4987 = vmatmul.mubr.bf16.vlgmr.msra.gmra.mxu0 %v8010_v59  ;;  %v4742_v16 = vpop.f32.mrf.mxu0  ;;  %v4783_v23 = vpop.f32.mrf.mxu1  ;;  %v1918_v37 = vld [vmem:[%s7736_s1 + $0xcb0] sm:$0xff] }
 0x2ae   : > { %5028 = vmatmul.mubr.bf16.vlgmr.msra.gmra.mxu1 %v8006_v55  ;;  %v4743_v53 = vadd.f32 %v4742_v16, %v8267_v28  ;;  %5037 = vmatpush1.bf16.msra.mxu0 %v6664_v41  ;;  %v6777_v28 = vcombine.high %v1938_v18, %v1942_v19  ;;  %v6625_v41 = vcombine.high %v1786_v7, %v1790_v9  ;;  %v1770_v19 = vld [vmem:[%s7736_s1 + $0x810] sm:$0xff] }
 0x2af   : > { %5068 = vmatprep.mubr.bf16.mxu0 %v8104_v35  ;;  %5078 = vmatpush1.bf16.msra.mxu1 %v6792_v11  ;;  %v4744_v25 = vpop.f32.mrf.mxu0  ;;  %v4785_v31 = vpop.f32.mrf.mxu1  ;;  %v6753_v43 = vcombine.high %v1914_v10, %v1918_v37  ;;  %v1782_v11 = vld [vmem:[%s7736_s1 + $0x870] sm:$0xff]  ;;  %v6752_v16 = vcombine.low %v1914_v10, %v1918_v37 }
 0x2b0   : > { %v8340_v29 = vadd.f32 %v4783_v23, %v4743_v53  ;;  %5109 = vmatprep.mubr.bf16.mxu1 %v8110_v47  ;;  %v4745_v30 = vadd.f32 %v4744_v25, %v8274_v40  ;;  %5038 = vmatprep.subr.bf16.mxu0 %v6657_v12  ;;  %v1906_v12 = vld [vmem:[%s7736_s1 + $0xc50] sm:$0xff]  ;;  %v6616_v25 = vcombine.low %v1778_v44, %v1782_v11 }
 0x2b1   : > { %5079 = vmatprep.subr.bf16.mxu1 %v6785_v17  ;;  %v4746_v33 = vpop.f32.mrf.mxu0  ;;  %v4787_v49 = vpop.f32.mrf.mxu1  ;;  %v6617_v17 = vcombine.high %v1778_v44, %v1782_v11  ;;  %v6745_v18 = vcombine.high %v1906_v12, %v1910_v13  ;;  %v1774_v53 = vld [vmem:[%s7736_s1 + $0x830] sm:$0xff] }
 0x2b2   : > { %v8348_v42 = vadd.f32 %v4785_v31, %v4745_v30  ;;  %5039 = vmatpush1.bf16.msra.mxu0 %v6656_v20  ;;  %v1898_v23 = vld [vmem:[%s7736_s1 + $0xc10] sm:$0xff]  ;;  %v6608_v33 = vcombine.low %v1770_v19, %v1774_v53  ;;  %v6857_v49 = vcombine.high %v2018_v14, %v2022_v32 }
 0x2b3   : > { %5080 = vmatpush1.bf16.msra.mxu1 %v6784_v21  ;;  %v4747_v40 = vpop.f32.mrf.mxu0  ;;  %5040 = vmatprep.subr.bf16.mxu0 %v6649_v27  ;;  %v4788_v58 = vpop.f32.mrf.mxu1  ;;  %v1902_v20 = vld [vmem:[%s7736_s1 + $0xc30] sm:$0xff]  ;;  %v6744_v21 = vcombine.low %v1906_v12, %v1910_v13  ;;  %v6609_v27 = vcombine.high %v1770_v19, %v1774_v53 }
 0x2b4   : > { %5081 = vmatprep.subr.bf16.mxu1 %v6777_v28  ;;  %v6737_v30 = vcombine.high %v1898_v23, %v1902_v20  ;;  %v1890_v31 = vld [vmem:[%s7736_s1 + $0xbd0] sm:$0xff]  ;;  %v6736_v36 = vcombine.low %v1898_v23, %v1902_v20 }
 0x2b5   : > { %v1894_v28 = vld [vmem:[%s7736_s1 + $0xbf0] sm:$0xff] }
 0x2b6   : > { %5041 = vmatpush1.bf16.msra.mxu0 %v6648_v50  ;;  %v6729_v39 = vcombine.high %v1890_v31, %v1894_v28  ;;  %v1882_v50 = vld [vmem:[%s7736_s1 + $0xb90] sm:$0xff]  ;;  %v6728_v58 = vcombine.low %v1890_v31, %v1894_v28 }
 0x2b7   : > { %5082 = vmatpush1.bf16.msra.mxu1 %v6776_v51  ;;  %5042 = vmatprep.subr.bf16.mxu0 %v6641_v54  ;;  %v1886_v40 = vld [vmem:[%s7736_s1 + $0xbb0] sm:$0xff] }
 0x2b8   : > { %5083 = vmatprep.subr.bf16.mxu1 %v6769_v62  ;;  %v2010_v51 = vld [vmem:[%s7736_s1 + $0xf90] sm:$0xff]  ;;  %v6856_v62 = vcombine.low %v2018_v14, %v2022_v32  ;;  %v6721_v63 = vcombine.high %v1882_v50, %v1886_v40 }
 0x2b9   : > { %v2014_v54 = vld [vmem:[%s7736_s1 + $0xfb0] sm:$0xff] }
 0x2ba   : > { %5043 = vmatpush1.bf16.msra.mxu0 %v6640_v3  ;;  %v6849_v0 = vcombine.high %v2010_v51, %v2014_v54  ;;  %v1874_v1 = vld [vmem:[%s7736_s1 + $0xb50] sm:$0xff] }
 0x2bb   : > { %5084 = vmatpush1.bf16.msra.mxu1 %v6768_v4  ;;  %5044 = vmatprep.subr.bf16.mxu0 %v6633_v5  ;;  %v1878_v2 = vld [vmem:[%s7736_s1 + $0xb70] sm:$0xff]  ;;  %v6720_v5 = vcombine.low %v1882_v50, %v1886_v40 }
 0x2bc   : > { %5085 = vmatprep.subr.bf16.mxu1 %v6761_v6  ;;  %v2002_v3 = vld [vmem:[%s7736_s1 + $0xf50] sm:$0xff]  ;;  %v6848_v6 = vcombine.low %v2010_v51, %v2014_v54  ;;  %v6713_v7 = vcombine.high %v1874_v1, %v1878_v2 }
 0x2bd   : > { %v2006_v4 = vld [vmem:[%s7736_s1 + $0xf70] sm:$0xff] }
 0x2be   : > { %5045 = vmatpush1.bf16.msra.mxu0 %v6632_v38  ;;  %v6841_v9 = vcombine.high %v2002_v3, %v2006_v4  ;;  %v1866_v10 = vld [vmem:[%s7736_s1 + $0xb10] sm:$0xff] }
 0x2bf   : > { %5086 = vmatpush1.bf16.msra.mxu1 %v6760_v57  ;;  %5046 = vmatprep.subr.bf16.mxu0 %v6625_v41  ;;  %v1870_v37 = vld [vmem:[%s7736_s1 + $0xb30] sm:$0xff]  ;;  %v6712_v41 = vcombine.low %v1874_v1, %v1878_v2 }
 0x2c0   : > { %5087 = vmatprep.subr.bf16.mxu1 %v6753_v43  ;;  %v1994_v38 = vld [vmem:[%s7736_s1 + $0xf10] sm:$0xff]  ;;  %v6840_v43 = vcombine.low %v2002_v3, %v2006_v4  ;;  %v6705_v44 = vcombine.high %v1866_v10, %v1870_v37  ;;  %v1571_v3 = vld [vmem:[%s7736_s1 + $0x1d8] sm:$0xff] }
 0x2c1   : > { %v1998_v57 = vld [vmem:[%s7736_s1 + $0xf30] sm:$0xff]  ;;  %v1575_v4 = vld [vmem:[%s7736_s1 + $0x1f8] sm:$0xff] }
 0x2c2   : > { %5047 = vmatpush1.bf16.msra.mxu0 %v6624_v15  ;;  %v6833_v11 = vcombine.high %v1994_v38, %v1998_v57  ;;  %v1858_v12 = vld [vmem:[%s7736_s1 + $0xad0] sm:$0xff] }
 0x2c3   : > { %5088 = vmatpush1.bf16.msra.mxu1 %v6752_v16  ;;  %5048 = vmatprep.subr.bf16.mxu0 %v6617_v17  ;;  %v1862_v13 = vld [vmem:[%s7736_s1 + $0xaf0] sm:$0xff]  ;;  %v6704_v17 = vcombine.low %v1866_v10, %v1870_v37  ;;  %v6411_v10 = vcombine.high %v1571_v3, %v1575_v4 }
 0x2c4   : > { %5089 = vmatprep.subr.bf16.mxu1 %v6745_v18  ;;  %v1986_v15 = vld [vmem:[%s7736_s1 + $0xed0] sm:$0xff]  ;;  %v6832_v18 = vcombine.low %v1994_v38, %v1998_v57  ;;  %v6697_v19 = vcombine.high %v1858_v12, %v1862_v13  ;;  %v1563_v38 = vld [vmem:[%s7736_s1 + $0x198] sm:$0xff] }
 0x2c5   : > { %v1990_v16 = vld [vmem:[%s7736_s1 + $0xef0] sm:$0xff]  ;;  %v1567_v57 = vld [vmem:[%s7736_s1 + $0x1b8] sm:$0xff] }
 0x2c6   : > { %5049 = vmatpush1.bf16.msra.mxu0 %v6616_v25  ;;  %v6825_v53 = vcombine.high %v1986_v15, %v1990_v16  ;;  %v1850_v23 = vld [vmem:[%s7736_s1 + $0xa90] sm:$0xff] }
 0x2c7   : > { %5090 = vmatpush1.bf16.msra.mxu1 %v6744_v21  ;;  %5050 = vmatprep.subr.bf16.mxu0 %v6609_v27  ;;  %v1854_v20 = vld [vmem:[%s7736_s1 + $0xab0] sm:$0xff]  ;;  %v6696_v27 = vcombine.low %v1858_v12, %v1862_v13  ;;  %v2041_v13 = vrot.slane %v8248_v8, %v659_v26 }
 0x2c8   : > { %5091 = vmatprep.subr.bf16.mxu1 %v6737_v30  ;;  %v1978_v25 = vld [vmem:[%s7736_s1 + $0xe90] sm:$0xff]  ;;  %v6824_v30 = vcombine.low %v1986_v15, %v1990_v16  ;;  %v6689_v31 = vcombine.high %v1850_v23, %v1854_v20  ;;  %v6403_v15 = vcombine.high %v1563_v38, %v1567_v57  ;;  %v1555_v16 = vld [vmem:[%s7736_s1 + $0x158] sm:$0xff] }
 0x2c9   : > { %v1982_v21 = vld [vmem:[%s7736_s1 + $0xeb0] sm:$0xff] }
 0x2ca   : > { %5051 = vmatpush1.bf16.msra.mxu0 %v6608_v33  ;;  %v6817_v28 = vcombine.high %v1978_v25, %v1982_v21  ;;  %v1842_v14 = vld [vmem:[%s7736_s1 + $0xa50] sm:$0xff] }
 0x2cb   : > { %5092 = vmatpush1.bf16.msra.mxu1 %v6736_v36  ;;  %5052 = vmatprep.subr.bf16.mxu0 %v6729_v39  ;;  %v1846_v32 = vld [vmem:[%s7736_s1 + $0xa70] sm:$0xff]  ;;  %v6688_v39 = vcombine.low %v1850_v23, %v1854_v20 }
 0x2cc   : > { %5093 = vmatprep.subr.bf16.mxu1 %v6857_v49  ;;  %v1970_v33 = vld [vmem:[%s7736_s1 + $0xe50] sm:$0xff]  ;;  %v6816_v49 = vcombine.low %v1978_v25, %v1982_v21  ;;  %v6681_v50 = vcombine.high %v1842_v14, %v1846_v32  ;;  %v6402_v25 = vcombine.low %v1563_v38, %v1567_v57 }
 0x2cd   : > { %v1974_v36 = vld [vmem:[%s7736_s1 + $0xe70] sm:$0xff] }
 0x2ce   : > { %5053 = vmatpush2.bf16.msra.mxu0 %v6728_v58  ;;  %v6809_v40 = vcombine.high %v1970_v33, %v1974_v36  ;;  %v1834_v51 = vld [vmem:[%s7736_s1 + $0xa10] sm:$0xff] }
 0x2cf   : > { %5094 = vmatpush2.bf16.msra.mxu1 %v6856_v62  ;;  %5054 = vmatprep.subr.bf16.mxu0 %v6721_v63  ;;  %v1838_v54 = vld [vmem:[%s7736_s1 + $0xa30] sm:$0xff]  ;;  %v6680_v63 = vcombine.low %v1842_v14, %v1846_v32  ;;  %v1547_v14 = vld [vmem:[%s7736_s1 + $0x118] sm:$0xff] }
 0x2d0   : > { %5095 = vmatprep.subr.bf16.mxu1 %v6849_v0  ;;  %v1962_v58 = vld [vmem:[%s7736_s1 + $0xe10] sm:$0xff]  ;;  %v6808_v0 = vcombine.low %v1970_v33, %v1974_v36  ;;  %v6673_v1 = vcombine.high %v1834_v51, %v1838_v54  ;;  %v1551_v32 = vld [vmem:[%s7736_s1 + $0x138] sm:$0xff] }
 0x2d1   : > { %v1966_v62 = vld [vmem:[%s7736_s1 + $0xe30] sm:$0xff]  ;;  %v1679_v36 = vld [vmem:[%s7736_s1 + $0x538] sm:$0xff] }
 0x2d2   : > { %5055 = vmatpush2.bf16.msra.mxu0 %v6720_v5  ;;  %v6801_v2 = vcombine.high %v1962_v58, %v1966_v62  ;;  %v1699_v5 = vld [vmem:[%s7736_s1 + $0x5d8] sm:$0xff] }
 0x2d3   : > { %5096 = vmatpush2.bf16.msra.mxu1 %v6848_v6  ;;  %5056 = vmatprep.subr.bf16.mxu0 %v6713_v7  ;;  %v1703_v6 = vld [vmem:[%s7736_s1 + $0x5f8] sm:$0xff]  ;;  %v6672_v7 = vcombine.low %v1834_v51, %v1838_v54  ;;  %v6387_v51 = vcombine.high %v1547_v14, %v1551_v32 }
 0x2d4   : > { %5097 = vmatprep.subr.bf16.mxu1 %v6841_v9  ;;  %v6800_v9 = vcombine.low %v1962_v58, %v1966_v62  ;;  %v6539_v37 = vcombine.high %v1699_v5, %v1703_v6  ;;  %v6538_v12 = vcombine.low %v1699_v5, %v1703_v6  ;;  %v1539_v62 = vld [vmem:[%s7736_s1 + $0xd8] sm:$0xff] }
 0x2d5   : > { %v1531_v6 = vld [vmem:[%s7736_s1 + $0x98] sm:$0xff] }
 0x2d6   : > { %5057 = vmatpush2.bf16.msra.mxu0 %v6712_v41  ;;  %v2037_v41 = vrot.slane %v8248_v8, %v655_v24  ;;  %v1683_v24 = vld [vmem:[%s7736_s1 + $0x558] sm:$0xff] }
 0x2d7   : > { %5098 = vmatpush2.bf16.msra.mxu1 %v6840_v43  ;;  %5058 = vmatprep.subr.bf16.mxu0 %v6705_v44  ;;  %v6410_v43 = vcombine.low %v1571_v3, %v1575_v4  ;;  %v1691_v44 = vld [vmem:[%s7736_s1 + $0x598] sm:$0xff] }
 0x2d8   : > { %5099 = vmatprep.subr.bf16.mxu1 %v6833_v11  ;;  %v1695_v11 = vld [vmem:[%s7736_s1 + $0x5b8] sm:$0xff] }
 0x2d9   : > { %v6530_v8 = vcombine.low %v1691_v44, %v1695_v11 }
 0x2da   : > { %5059 = vmatpush2.bf16.msra.mxu0 %v6704_v17  ;;  %v1559_v17 = vld [vmem:[%s7736_s1 + $0x178] sm:$0xff] }
 0x2db   : > { %5100 = vmatpush2.bf16.msra.mxu1 %v6832_v18  ;;  %5060 = vmatprep.subr.bf16.mxu0 %v6697_v19  ;;  %v6531_v19 = vcombine.high %v1691_v44, %v1695_v11  ;;  %v6395_v21 = vcombine.high %v1555_v16, %v1559_v17  ;;  %v1527_v44 = vld [vmem:[%s7736_s1 + $0x78] sm:$0xff] }
 0x2dc   : > { %5101 = vmatprep.subr.bf16.mxu1 %v6825_v53  ;;  %v1687_v53 = vld [vmem:[%s7736_s1 + $0x578] sm:$0xff] }
 0x2dd   : > { %v1651_v11 = vld [vmem:[%s7736_s1 + $0x458] sm:$0xff] }
 0x2de   : > { %5061 = vmatpush2.bf16.msra.mxu0 %v6696_v27 }
 0x2df   : > { %5102 = vmatpush2.bf16.msra.mxu1 %v6824_v30  ;;  %5062 = vmatprep.subr.bf16.mxu0 %v6689_v31 }
 0x2e0   : > { %5103 = vmatprep.subr.bf16.mxu1 %v6817_v28  ;;  %v6523_v28 = vcombine.high %v1683_v24, %v1687_v53 }
 0x2e2   : > { %5063 = vmatpush2.bf16.msra.mxu0 %v6688_v39 }
 0x2e3   : > { %5104 = vmatpush2.bf16.msra.mxu1 %v6816_v49  ;;  %5064 = vmatprep.subr.bf16.mxu0 %v6681_v50  ;;  %v6394_v50 = vcombine.low %v1555_v16, %v1559_v17 }
 0x2e4   : > { %5105 = vmatprep.subr.bf16.mxu1 %v6809_v40  ;;  %v6522_v40 = vcombine.low %v1683_v24, %v1687_v53  ;;  %v1643_v24 = vld [vmem:[%s7736_s1 + $0x418] sm:$0xff] }
 0x2e5   : > { %v1647_v53 = vld [vmem:[%s7736_s1 + $0x438] sm:$0xff] }
 0x2e6   : > { %5065 = vmatpush2.bf16.msra.mxu0 %v6680_v63  ;;  %v1543_v63 = vld [vmem:[%s7736_s1 + $0xf8] sm:$0xff] }
 0x2e7   : > { %5106 = vmatpush2.bf16.msra.mxu1 %v6808_v0  ;;  %5066 = vmatprep.subr.bf16.mxu0 %v6673_v1  ;;  %v1667_v0 = vld [vmem:[%s7736_s1 + $0x4d8] sm:$0xff]  ;;  %v6379_v4 = vcombine.high %v1539_v62, %v1543_v63 }
 0x2e8   : > { %5107 = vmatprep.subr.bf16.mxu1 %v6801_v2  ;;  %v1671_v1 = vld [vmem:[%s7736_s1 + $0x4f8] sm:$0xff]  ;;  %v6386_v2 = vcombine.low %v1547_v14, %v1551_v32  ;;  %v6482_v14 = vcombine.low %v1643_v24, %v1647_v53 }
 0x2e9   : > { %v6507_v5 = vcombine.high %v1667_v0, %v1671_v1  ;;  %v6506_v38 = vcombine.low %v1667_v0, %v1671_v1  ;;  %v1751_v0 = vld [vmem:[%s7736_s1 + $0x778] sm:$0xff] }
 0x2ea   : > { %5067 = vmatpush2.bf16.msra.mxu0 %v6672_v7  ;;  %v1535_v7 = vld [vmem:[%s7736_s1 + $0xb8] sm:$0xff] }
 0x2eb   : > { %5108 = vmatpush2.bf16.msra.mxu1 %v6800_v9  ;;  %5118 = vmatprep.subr.bf16.mxu0 %v6411_v10  ;;  %v1659_v9 = vld [vmem:[%s7736_s1 + $0x498] sm:$0xff]  ;;  %v6371_v57 = vcombine.high %v1531_v6, %v1535_v7 }
 0x2ec   : > { %5159 = vmatprep.subr.bf16.mxu1 %v6539_v37  ;;  %v1663_v10 = vld [vmem:[%s7736_s1 + $0x4b8] sm:$0xff]  ;;  %v6378_v37 = vcombine.low %v1539_v62, %v1543_v63 }
 0x2ed   : > { %v4824_v18 = vpop.f32.mrf.mxu0  ;;  %5069 = vmatmul.mubr.bf16.vlgmr.msra.gmra.mxu0 %v8108_v46  ;;  %v4865_v20 = vpop.f32.mrf.mxu1  ;;  %v1623_v62 = vld [vmem:[%s7736_s1 + $0x378] sm:$0xff] }
 0x2ee   : > { %v4825_v23 = vadd.f32 %v4824_v18, %v2037_v41  ;;  %5110 = vmatmul.mubr.bf16.vlgmr.msra.gmra.mxu1 %v8102_v34  ;;  %5119 = vmatpush1.bf16.msra.mxu0 %v6410_v43  ;;  %v6499_v41 = vcombine.high %v1659_v9, %v1663_v10  ;;  %v1523_v43 = vld [vmem:[%s7736_s1 + $0x58] sm:$0xff] }
 0x2ef   : > { %5150 = vmatprep.mubr.bf16.mxu0 %v8008_v56  ;;  %5160 = vmatpush1.bf16.msra.mxu1 %v6538_v12  ;;  %v4826_v26 = vpop.f32.mrf.mxu0  ;;  %v4867_v31 = vpop.f32.mrf.mxu1  ;;  %v1675_v56 = vld [vmem:[%s7736_s1 + $0x518] sm:$0xff]  ;;  %v6363_v16 = vcombine.high %v1523_v43, %v1527_v44 }
 0x2f0   : > { %v8419_v27 = vadd.f32 %v4865_v20, %v4825_v23  ;;  %5191 = vmatprep.mubr.bf16.mxu1 %v8012_v60  ;;  %v4827_v30 = vadd.f32 %v4826_v26, %v2041_v13  ;;  %5120 = vmatprep.subr.bf16.mxu0 %v6403_v15  ;;  %v6515_v58 = vcombine.high %v1675_v56, %v1679_v36  ;;  %v1655_v12 = vld [vmem:[%s7736_s1 + $0x478] sm:$0xff] }
 0x2f1   : > { %v4828_v33 = vpop.f32.mrf.mxu0  ;;  %5161 = vmatprep.subr.bf16.mxu1 %v6531_v19  ;;  %v4869_v49 = vpop.f32.mrf.mxu1  ;;  %v6514_v3 = vcombine.low %v1675_v56, %v1679_v36  ;;  %v6370_v13 = vcombine.low %v1531_v6, %v1535_v7  ;;  %v6498_v15 = vcombine.low %v1659_v9, %v1663_v10  ;;  %v6491_v17 = vcombine.high %v1651_v11, %v1655_v12  ;;  %v1515_v18 = vld [vmem:[%s7736_s1 + $0x18] sm:$0xff] }
 0x2f2   : > { %v8426_v39 = vadd.f32 %v4867_v31, %v4827_v30  ;;  %5121 = vmatpush1.bf16.msra.mxu0 %v6402_v25  ;;  %v1519_v19 = vld [vmem:[%s7736_s1 + $0x38] sm:$0xff]  ;;  %v6362_v23 = vcombine.low %v1523_v43, %v1527_v44  ;;  %v6490_v20 = vcombine.low %v1651_v11, %v1655_v12  ;;  %v6483_v26 = vcombine.high %v1643_v24, %v1647_v53 }
 0x2f3   : > { %5162 = vmatpush1.bf16.msra.mxu1 %v6530_v8  ;;  %v4829_v60 = vpop.f32.mrf.mxu0  ;;  %5122 = vmatprep.subr.bf16.mxu0 %v6395_v21  ;;  %v4870_v54 = vpop.f32.mrf.mxu1  ;;  %v6355_v25 = vcombine.high %v1515_v18, %v1519_v19  ;;  %v1635_v8 = vld [vmem:[%s7736_s1 + $0x3d8] sm:$0xff] }
 0x2f4   : > { %5163 = vmatprep.subr.bf16.mxu1 %v6523_v28  ;;  %v1639_v21 = vld [vmem:[%s7736_s1 + $0x3f8] sm:$0xff]  ;;  %v6354_v28 = vcombine.low %v1515_v18, %v1519_v19 }
 0x2f5   : > { %v1763_v30 = vld [vmem:[%s7736_s1 + $0x7d8] sm:$0xff]  ;;  %v6475_v32 = vcombine.high %v1635_v8, %v1639_v21  ;;  %v6474_v60 = vcombine.low %v1635_v8, %v1639_v21 }
 0x2f6   : > { %5123 = vmatpush1.bf16.msra.mxu0 %v6394_v50  ;;  %v1767_v31 = vld [vmem:[%s7736_s1 + $0x7f8] sm:$0xff] }
 0x2f7   : > { %5164 = vmatpush1.bf16.msra.mxu1 %v6522_v40  ;;  %5124 = vmatprep.subr.bf16.mxu0 %v6387_v51  ;;  %v6603_v33 = vcombine.high %v1763_v30, %v1767_v31  ;;  %v1627_v56 = vld [vmem:[%s7736_s1 + $0x398] sm:$0xff]  ;;  %v6602_v40 = vcombine.low %v1763_v30, %v1767_v31 }
 0x2f8   : > { %5165 = vmatprep.subr.bf16.mxu1 %v6515_v58  ;;  %v1631_v36 = vld [vmem:[%s7736_s1 + $0x3b8] sm:$0xff] }
 0x2f9   : > { %v1755_v49 = vld [vmem:[%s7736_s1 + $0x798] sm:$0xff]  ;;  %v6467_v51 = vcombine.high %v1627_v56, %v1631_v36  ;;  %v6466_v1 = vcombine.low %v1627_v56, %v1631_v36 }
 0x2fa   : > { %5125 = vmatpush1.bf16.msra.mxu0 %v6386_v2  ;;  %v1759_v50 = vld [vmem:[%s7736_s1 + $0x7b8] sm:$0xff] }
 0x2fb   : > { %5166 = vmatpush1.bf16.msra.mxu1 %v6514_v3  ;;  %5126 = vmatprep.subr.bf16.mxu0 %v6379_v4  ;;  %v6595_v54 = vcombine.high %v1755_v49, %v1759_v50  ;;  %v1619_v58 = vld [vmem:[%s7736_s1 + $0x358] sm:$0xff]  ;;  %v6594_v2 = vcombine.low %v1755_v49, %v1759_v50 }
 0x2fc   : > { %5167 = vmatprep.subr.bf16.mxu1 %v6507_v5  ;;  %v1747_v63 = vld [vmem:[%s7736_s1 + $0x758] sm:$0xff]  ;;  %v6459_v3 = vcombine.high %v1619_v58, %v1623_v62  ;;  %v6458_v10 = vcombine.low %v1619_v58, %v1623_v62 }
 0x2fd   : > { %v6587_v4 = vcombine.high %v1747_v63, %v1751_v0  ;;  %v1611_v5 = vld [vmem:[%s7736_s1 + $0x318] sm:$0xff] }
 0x2fe   : > { %5127 = vmatpush1.bf16.msra.mxu0 %v6378_v37  ;;  %v1615_v6 = vld [vmem:[%s7736_s1 + $0x338] sm:$0xff]  ;;  %v6586_v37 = vcombine.low %v1747_v63, %v1751_v0 }
 0x2ff   : > { %5168 = vmatpush1.bf16.msra.mxu1 %v6506_v38  ;;  %5128 = vmatprep.subr.bf16.mxu0 %v6371_v57  ;;  %v1739_v7 = vld [vmem:[%s7736_s1 + $0x718] sm:$0xff]  ;;  %v6451_v38 = vcombine.high %v1611_v5, %v1615_v6  ;;  %v6450_v12 = vcombine.low %v1611_v5, %v1615_v6 }
 0x300   : > { %5169 = vmatprep.subr.bf16.mxu1 %v6499_v41  ;;  %v1743_v9 = vld [vmem:[%s7736_s1 + $0x738] sm:$0xff] }
 0x301   : > { %v6579_v57 = vcombine.high %v1739_v7, %v1743_v9  ;;  %v1603_v41 = vld [vmem:[%s7736_s1 + $0x2d8] sm:$0xff] }
 0x302   : > { %5129 = vmatpush1.bf16.msra.mxu0 %v6370_v13  ;;  %v1607_v43 = vld [vmem:[%s7736_s1 + $0x2f8] sm:$0xff]  ;;  %v6578_v13 = vcombine.low %v1739_v7, %v1743_v9 }
 0x303   : > { %5170 = vmatpush1.bf16.msra.mxu1 %v6498_v15  ;;  %5130 = vmatprep.subr.bf16.mxu0 %v6363_v16  ;;  %v1731_v44 = vld [vmem:[%s7736_s1 + $0x6d8] sm:$0xff]  ;;  %v6443_v15 = vcombine.high %v1603_v41, %v1607_v43  ;;  %v6442_v53 = vcombine.low %v1603_v41, %v1607_v43 }
 0x304   : > { %5171 = vmatprep.subr.bf16.mxu1 %v6491_v17  ;;  %v1735_v11 = vld [vmem:[%s7736_s1 + $0x6f8] sm:$0xff] }
 0x305   : > { %v6571_v16 = vcombine.high %v1731_v44, %v1735_v11  ;;  %v1595_v17 = vld [vmem:[%s7736_s1 + $0x298] sm:$0xff] }
 0x306   : > { %5131 = vmatpush1.bf16.msra.mxu0 %v6362_v23  ;;  %v1599_v18 = vld [vmem:[%s7736_s1 + $0x2b8] sm:$0xff]  ;;  %v6570_v23 = vcombine.low %v1731_v44, %v1735_v11 }
 0x307   : > { %5172 = vmatpush1.bf16.msra.mxu1 %v6490_v20  ;;  %5132 = vmatprep.subr.bf16.mxu0 %v6355_v25  ;;  %v1723_v19 = vld [vmem:[%s7736_s1 + $0x698] sm:$0xff]  ;;  %v6435_v20 = vcombine.high %v1595_v17, %v1599_v18  ;;  %v6434_v31 = vcombine.low %v1595_v17, %v1599_v18 }
 0x308   : > { %5173 = vmatprep.subr.bf16.mxu1 %v6483_v26  ;;  %v1727_v24 = vld [vmem:[%s7736_s1 + $0x6b8] sm:$0xff] }
 0x309   : > { %v6563_v25 = vcombine.high %v1723_v19, %v1727_v24  ;;  %v1587_v26 = vld [vmem:[%s7736_s1 + $0x258] sm:$0xff] }
 0x30a   : > { %5133 = vmatpush1.bf16.msra.mxu0 %v6354_v28  ;;  %v1591_v8 = vld [vmem:[%s7736_s1 + $0x278] sm:$0xff]  ;;  %v6562_v28 = vcombine.low %v1723_v19, %v1727_v24 }
 0x30b   : > { %5174 = vmatpush1.bf16.msra.mxu1 %v6482_v14  ;;  %5134 = vmatprep.subr.bf16.mxu0 %v6475_v32  ;;  %v1715_v21 = vld [vmem:[%s7736_s1 + $0x658] sm:$0xff]  ;;  %v6427_v14 = vcombine.high %v1587_v26, %v1591_v8  ;;  %v6426_v50 = vcombine.low %v1587_v26, %v1591_v8 }
 0x30c   : > { %5175 = vmatprep.subr.bf16.mxu1 %v6603_v33  ;;  %v1719_v30 = vld [vmem:[%s7736_s1 + $0x678] sm:$0xff] }
 0x30d   : > { %v6555_v32 = vcombine.high %v1715_v21, %v1719_v30  ;;  %v1579_v33 = vld [vmem:[%s7736_s1 + $0x218] sm:$0xff] }
 0x30e   : > { %5135 = vmatpush2.bf16.msra.mxu0 %v6474_v60  ;;  %v1583_v56 = vld [vmem:[%s7736_s1 + $0x238] sm:$0xff]  ;;  %v6554_v60 = vcombine.low %v1715_v21, %v1719_v30 }
 0x30f   : > { %5176 = vmatpush2.bf16.msra.mxu1 %v6602_v40  ;;  %5136 = vmatprep.subr.bf16.mxu0 %v6467_v51  ;;  %v1707_v36 = vld [vmem:[%s7736_s1 + $0x618] sm:$0xff]  ;;  %v6419_v40 = vcombine.high %v1579_v33, %v1583_v56  ;;  %v6418_v0 = vcombine.low %v1579_v33, %v1583_v56 }
 0x310   : > { %5177 = vmatprep.subr.bf16.mxu1 %v6595_v54  ;;  %v1711_v49 = vld [vmem:[%s7736_s1 + $0x638] sm:$0xff] }
 0x311   : > { %v6547_v51 = vcombine.high %v1707_v36, %v1711_v49  ;;  %v1827_v54 = vld [vmem:[%s7736_s1 + $0x9d8] sm:$0xff] }
 0x312   : > { %5137 = vmatpush2.bf16.msra.mxu0 %v6466_v1  ;;  %v1831_v58 = vld [vmem:[%s7736_s1 + $0x9f8] sm:$0xff]  ;;  %v6546_v1 = vcombine.low %v1707_v36, %v1711_v49 }
 0x313   : > { %5178 = vmatpush2.bf16.msra.mxu1 %v6594_v2  ;;  %5138 = vmatprep.subr.bf16.mxu0 %v6459_v3  ;;  %v1955_v62 = vld [vmem:[%s7736_s1 + $0xdd8] sm:$0xff]  ;;  %v6667_v2 = vcombine.high %v1827_v54, %v1831_v58  ;;  %v6666_v6 = vcombine.low %v1827_v54, %v1831_v58 }
 0x314   : > { %5179 = vmatprep.subr.bf16.mxu1 %v6587_v4  ;;  %v1959_v63 = vld [vmem:[%s7736_s1 + $0xdf8] sm:$0xff] }
 0x315   : > { %v6795_v3 = vcombine.high %v1955_v62, %v1959_v63  ;;  %v1819_v4 = vld [vmem:[%s7736_s1 + $0x998] sm:$0xff] }
 0x316   : > { %5139 = vmatpush2.bf16.msra.mxu0 %v6458_v10  ;;  %v1823_v5 = vld [vmem:[%s7736_s1 + $0x9b8] sm:$0xff]  ;;  %v6794_v10 = vcombine.low %v1955_v62, %v1959_v63 }
 0x317   : > { %5180 = vmatpush2.bf16.msra.mxu1 %v6586_v37  ;;  %5140 = vmatprep.subr.bf16.mxu0 %v6451_v38  ;;  %v1947_v7 = vld [vmem:[%s7736_s1 + $0xd98] sm:$0xff]  ;;  %v6659_v37 = vcombine.high %v1819_v4, %v1823_v5 }
 0x318   : > { %5181 = vmatprep.subr.bf16.mxu1 %v6579_v57  ;;  %v1951_v9 = vld [vmem:[%s7736_s1 + $0xdb8] sm:$0xff] }
 0x319   : > { %v1811_v38 = vld [vmem:[%s7736_s1 + $0x958] sm:$0xff]  ;;  %v6787_v43 = vcombine.high %v1947_v7, %v1951_v9 }
 0x31a   : > { %5141 = vmatpush2.bf16.msra.mxu0 %v6450_v12  ;;  %v1815_v57 = vld [vmem:[%s7736_s1 + $0x978] sm:$0xff] }
 0x31b   : > { %5182 = vmatpush2.bf16.msra.mxu1 %v6578_v13  ;;  %5142 = vmatprep.subr.bf16.mxu0 %v6443_v15  ;;  %v1939_v44 = vld [vmem:[%s7736_s1 + $0xd58] sm:$0xff]  ;;  %v6658_v15 = vcombine.low %v1819_v4, %v1823_v5  ;;  %v6651_v17 = vcombine.high %v1811_v38, %v1815_v57 }
 0x31c   : > { %5183 = vmatprep.subr.bf16.mxu1 %v6571_v16  ;;  %v1943_v11 = vld [vmem:[%s7736_s1 + $0xd78] sm:$0xff] }
 0x31d   : > { %v6779_v19 = vcombine.high %v1939_v44, %v1943_v11  ;;  %v1807_v24 = vld [vmem:[%s7736_s1 + $0x938] sm:$0xff] }
 0x31e   : > { %5143 = vmatpush2.bf16.msra.mxu0 %v6442_v53 }
 0x31f   : > { %5184 = vmatpush2.bf16.msra.mxu1 %v6570_v23  ;;  %5144 = vmatprep.subr.bf16.mxu0 %v6435_v20  ;;  %v1935_v23 = vld [vmem:[%s7736_s1 + $0xd38] sm:$0xff] }
 0x320   : > { %5185 = vmatprep.subr.bf16.mxu1 %v6563_v25  ;;  %v6650_v25 = vcombine.low %v1811_v38, %v1815_v57  ;;  %v1903_v38 = vld [vmem:[%s7736_s1 + $0xc38] sm:$0xff] }
 0x322   : > { %5145 = vmatpush2.bf16.msra.mxu0 %v6434_v31  ;;  %v1795_v31 = vld [vmem:[%s7736_s1 + $0x8d8] sm:$0xff] }
 0x323   : > { %5186 = vmatpush2.bf16.msra.mxu1 %v6562_v28  ;;  %5146 = vmatprep.subr.bf16.mxu0 %v6427_v14  ;;  %v1799_v28 = vld [vmem:[%s7736_s1 + $0x8f8] sm:$0xff] }
 0x324   : > { %5187 = vmatprep.subr.bf16.mxu1 %v6555_v32  ;;  %v1923_v14 = vld [vmem:[%s7736_s1 + $0xcd8] sm:$0xff]  ;;  %v6635_v36 = vcombine.high %v1795_v31, %v1799_v28  ;;  %v6634_v54 = vcombine.low %v1795_v31, %v1799_v28 }
 0x325   : > { %v1927_v32 = vld [vmem:[%s7736_s1 + $0xcf8] sm:$0xff] }
 0x326   : > { %5147 = vmatpush2.bf16.msra.mxu0 %v6426_v50  ;;  %v6763_v49 = vcombine.high %v1923_v14, %v1927_v32  ;;  %v1787_v50 = vld [vmem:[%s7736_s1 + $0x898] sm:$0xff]  ;;  %v6762_v58 = vcombine.low %v1923_v14, %v1927_v32 }
 0x327   : > { %5188 = vmatpush2.bf16.msra.mxu1 %v6554_v60  ;;  %5148 = vmatprep.subr.bf16.mxu0 %v6419_v40  ;;  %v1791_v60 = vld [vmem:[%s7736_s1 + $0x8b8] sm:$0xff] }
 0x328   : > { %5189 = vmatprep.subr.bf16.mxu1 %v6547_v51  ;;  %v1915_v40 = vld [vmem:[%s7736_s1 + $0xc98] sm:$0xff]  ;;  %v6627_v62 = vcombine.high %v1787_v50, %v1791_v60  ;;  %v6626_v4 = vcombine.low %v1787_v50, %v1791_v60 }
 0x329   : > { %v1919_v51 = vld [vmem:[%s7736_s1 + $0xcb8] sm:$0xff] }
 0x32a   : > { %5149 = vmatpush2.bf16.msra.mxu0 %v6418_v0  ;;  %v6755_v63 = vcombine.high %v1915_v40, %v1919_v51  ;;  %v1779_v0 = vld [vmem:[%s7736_s1 + $0x858] sm:$0xff]  ;;  %v6754_v5 = vcombine.low %v1915_v40, %v1919_v51 }
 0x32b   : > { %5190 = vmatpush2.bf16.msra.mxu1 %v6546_v1  ;;  %5200 = vmatprep.subr.bf16.mxu0 %v6667_v2  ;;  %v1783_v1 = vld [vmem:[%s7736_s1 + $0x878] sm:$0xff] }
 0x32c   : > { %5241 = vmatprep.subr.bf16.mxu1 %v6795_v3  ;;  %v1907_v2 = vld [vmem:[%s7736_s1 + $0xc58] sm:$0xff]  ;;  %v6618_v57 = vcombine.low %v1779_v0, %v1783_v1 }
 0x32d   : > { %v4906_v41 = vpop.f32.mrf.mxu0  ;;  %5151 = vmatmul.mubr.bf16.vlgmr.msra.gmra.mxu0 %v8010_v59  ;;  %v6786_v59 = vcombine.low %v1947_v7, %v1951_v9  ;;  %v1911_v3 = vld [vmem:[%s7736_s1 + $0xc78] sm:$0xff] }
 0x32e   : > { %v4907_v12 = vadd.f32 %v4906_v41, %v8419_v27  ;;  %v4947_v13 = vpop.f32.mrf.mxu1  ;;  %5192 = vmatmul.mubr.bf16.vlgmr.msra.gmra.mxu1 %v8006_v55  ;;  %5201 = vmatpush1.bf16.msra.mxu0 %v6666_v6  ;;  %v1803_v55 = vld [vmem:[%s7736_s1 + $0x918] sm:$0xff]  ;;  %v6619_v6 = vcombine.high %v1779_v0, %v1783_v1  ;;  %v6747_v7 = vcombine.high %v1907_v2, %v1911_v3 }
 0x32f   : > { %5232 = vmatprep.mubr.bf16.mxu0 %v8104_v35  ;;  %5242 = vmatpush1.bf16.msra.mxu1 %v6794_v10  ;;  %v8492_v16 = vpop.f32.mrf.mxu0  ;;  %v1931_v35 = vld [vmem:[%s7736_s1 + $0xd18] sm:$0xff]  ;;  %v6643_v8 = vcombine.high %v1803_v55, %v1807_v24  ;;  %v6642_v33 = vcombine.low %v1803_v55, %v1807_v24  ;;  %v6746_v41 = vcombine.low %v1907_v2, %v1911_v3 }
 0x330   : > { %v8494_v18 = vadd.f32 %v4947_v13, %v4907_v12  ;;  %5273 = vmatprep.mubr.bf16.mxu1 %v8110_v47  ;;  %v8497_v27 = vpop.f32.mrf.mxu1  ;;  %5202 = vmatprep.subr.bf16.mxu0 %v6659_v37  ;;  %v6778_v47 = vcombine.low %v1939_v44, %v1943_v11  ;;  %v6771_v30 = vcombine.high %v1931_v35, %v1935_v23  ;;  %v1771_v9 = vld [vmem:[%s7736_s1 + $0x818] sm:$0xff] }
 0x331   : > { %v4910_v53 = vpop.f32.mrf.mxu0  ;;  %5243 = vmatprep.subr.bf16.mxu1 %v6787_v43  ;;  %v6770_v56 = vcombine.low %v1931_v35, %v1935_v23  ;;  %v1775_v10 = vld [vmem:[%s7736_s1 + $0x838] sm:$0xff] }
 0x332   : > { %v4951_v20 = vpop.f32.mrf.mxu1  ;;  %5203 = vmatpush1.bf16.msra.mxu0 %v6658_v15  ;;  %v1899_v37 = vld [vmem:[%s7736_s1 + $0xc18] sm:$0xff]  ;;  %v6611_v43 = vcombine.high %v1771_v9, %v1775_v10 }
 0x333   : > { %5244 = vmatpush1.bf16.msra.mxu1 %v6786_v59  ;;  %v4911_v26 = vpop.f32.mrf.mxu0  ;;  %5204 = vmatprep.subr.bf16.mxu0 %v6651_v17  ;;  %v6739_v44 = vcombine.high %v1899_v37, %v1903_v38  ;;  %v1891_v11 = vld [vmem:[%s7736_s1 + $0xbd8] sm:$0xff]  ;;  %v6610_v59 = vcombine.low %v1771_v9, %v1775_v10  ;;  %v6738_v17 = vcombine.low %v1899_v37, %v1903_v38 }
 0x334   : > { %v4952_v21 = vpop.f32.mrf.mxu1  ;;  %5245 = vmatprep.subr.bf16.mxu1 %v6779_v19  ;;  %v1895_v12 = vld [vmem:[%s7736_s1 + $0xbf8] sm:$0xff] }
 0x335   : > { %v2019_v13 = vld [vmem:[%s7736_s1 + $0xfd8] sm:$0xff]  ;;  %v6731_v19 = vcombine.high %v1891_v11, %v1895_v12  ;;  %v6730_v20 = vcombine.low %v1891_v11, %v1895_v12 }
 0x336   : > { %5205 = vmatpush1.bf16.msra.mxu0 %v6650_v25  ;;  %v2023_v15 = vld [vmem:[%s7736_s1 + $0xff8] sm:$0xff] }
 0x337   : > { %5246 = vmatpush1.bf16.msra.mxu1 %v6778_v47  ;;  %5206 = vmatprep.subr.bf16.mxu0 %v6643_v8  ;;  %v6859_v55 = vcombine.high %v2019_v13, %v2023_v15  ;;  %v1883_v24 = vld [vmem:[%s7736_s1 + $0xb98] sm:$0xff]  ;;  %v6858_v25 = vcombine.low %v2019_v13, %v2023_v15 }
 0x338   : > { %5247 = vmatprep.subr.bf16.mxu1 %v6771_v30  ;;  %v1887_v53 = vld [vmem:[%s7736_s1 + $0xbb8] sm:$0xff] }
 0x339   : > { %v2011_v35 = vld [vmem:[%s7736_s1 + $0xf98] sm:$0xff]  ;;  %v6723_v26 = vcombine.high %v1883_v24, %v1887_v53  ;;  %v6722_v28 = vcombine.low %v1883_v24, %v1887_v53  ;;  %v4909_v53 = vadd.f32 %v8492_v16, %v8426_v39  ;;  %v7126_v39 = vld [vmem:[%s7744_s27 + $0x78] sm:$0xff]  }
 0x33a   : > { %5207 = vmatpush1.bf16.msra.mxu0 %v6642_v33  ;;  %v2015_v23 = vld [vmem:[%s7736_s1 + $0xfb8] sm:$0xff]  ;;  %v7127_v16 = vld [vmem:[%s7744_s27 + $0xf8] sm:$0xff]  }
 0x33b   : > { %5248 = vmatpush1.bf16.msra.mxu1 %v6770_v56  ;;  %5208 = vmatprep.subr.bf16.mxu0 %v6635_v36  ;;  %v6851_v47 = vcombine.high %v2011_v35, %v2015_v23  ;;  %v1875_v8 = vld [vmem:[%s7736_s1 + $0xb58] sm:$0xff]  ;;  %v6850_v14 = vcombine.low %v2011_v35, %v2015_v23 }
 0x33c   : > { %5249 = vmatprep.subr.bf16.mxu1 %v6763_v49  ;;  %v1879_v21 = vld [vmem:[%s7736_s1 + $0xb78] sm:$0xff] }
 0x33d   : > { %v2003_v30 = vld [vmem:[%s7736_s1 + $0xf58] sm:$0xff]  ;;  %v6715_v32 = vcombine.high %v1875_v8, %v1879_v21  ;;  %v6714_v60 = vcombine.low %v1875_v8, %v1879_v21  ;;  %v5283_v21 = vmax.f32 %v8348_v42, 0.0 }
 0x33e   : > { %5209 = vmatpush1.bf16.msra.mxu0 %v6634_v54  ;;  %v2007_v31 = vld [vmem:[%s7736_s1 + $0xf78] sm:$0xff] }
 0x33f   : > { %5250 = vmatpush1.bf16.msra.mxu1 %v6762_v58  ;;  %5210 = vmatprep.subr.bf16.mxu0 %v6627_v62  ;;  %v6843_v33 = vcombine.high %v2003_v30, %v2007_v31  ;;  %v1867_v56 = vld [vmem:[%s7736_s1 + $0xb18] sm:$0xff]  ;;  %v6842_v40 = vcombine.low %v2003_v30, %v2007_v31  ;;  %v7128_v31 = vld [vmem:[%s7744_s27 + $0x38] sm:$0xff]  }
 0x340   : > { %5251 = vmatprep.subr.bf16.mxu1 %v6755_v63  ;;  %v1871_v36 = vld [vmem:[%s7736_s1 + $0xb38] sm:$0xff] }
 0x341   : > { %v1995_v49 = vld [vmem:[%s7736_s1 + $0xf18] sm:$0xff]  ;;  %v6707_v51 = vcombine.high %v1867_v56, %v1871_v36  ;;  %v6706_v1 = vcombine.low %v1867_v56, %v1871_v36  ;;  %v7132_v36 = vld [vmem:[%s7744_s27 + $0x30] sm:$0xff]  }
 0x342   : > { %5211 = vmatpush1.bf16.msra.mxu0 %v6626_v4  ;;  %v1999_v50 = vld [vmem:[%s7736_s1 + $0xf38] sm:$0xff] }
 0x343   : > { %5252 = vmatpush1.bf16.msra.mxu1 %v6754_v5  ;;  %5212 = vmatprep.subr.bf16.mxu0 %v6619_v6  ;;  %v6835_v54 = vcombine.high %v1995_v49, %v1999_v50  ;;  %v1859_v58 = vld [vmem:[%s7736_s1 + $0xad8] sm:$0xff]  ;;  %v6834_v2 = vcombine.low %v1995_v49, %v1999_v50  ;;  %v7133_v50 = vld [vmem:[%s7744_s27 + $0xb0] sm:$0xff]  }
 0x344   : > { %5253 = vmatprep.subr.bf16.mxu1 %v6747_v7  ;;  %v1863_v62 = vld [vmem:[%s7736_s1 + $0xaf8] sm:$0xff] }
 0x345   : > { %v1987_v63 = vld [vmem:[%s7736_s1 + $0xed8] sm:$0xff]  ;;  %v6699_v3 = vcombine.high %v1859_v58, %v1863_v62  ;;  %v6698_v10 = vcombine.low %v1859_v58, %v1863_v62 }
 0x346   : > { %5213 = vmatpush1.bf16.msra.mxu0 %v6618_v57  ;;  %v1991_v0 = vld [vmem:[%s7736_s1 + $0xef8] sm:$0xff] }
 0x347   : > { %5254 = vmatpush1.bf16.msra.mxu1 %v6746_v41  ;;  %5214 = vmatprep.subr.bf16.mxu0 %v6611_v43  ;;  %v6827_v4 = vcombine.high %v1987_v63, %v1991_v0  ;;  %v1851_v5 = vld [vmem:[%s7736_s1 + $0xa98] sm:$0xff]  ;;  %v6826_v37 = vcombine.low %v1987_v63, %v1991_v0  ;;  %v7138_v63 = vld [vmem:[%s7744_s27 + $0x60] sm:$0xff]  }
 0x348   : > { %5255 = vmatprep.subr.bf16.mxu1 %v6739_v44  ;;  %v1855_v6 = vld [vmem:[%s7736_s1 + $0xab8] sm:$0xff] }
 0x349   : > { %v1979_v7 = vld [vmem:[%s7736_s1 + $0xe98] sm:$0xff]  ;;  %v6691_v38 = vcombine.high %v1851_v5, %v1855_v6  ;;  %v6690_v12 = vcombine.low %v1851_v5, %v1855_v6  ;;  %v7143_v5 = vld [vmem:[%s7744_s27 + $0xd8] sm:$0xff]  }
 0x34a   : > { %5215 = vmatpush1.bf16.msra.mxu0 %v6610_v59  ;;  %v1983_v9 = vld [vmem:[%s7736_s1 + $0xeb8] sm:$0xff]  ;;  %v7144_v6 = vld [vmem:[%s7744_s27 + $0x18] sm:$0xff]  }
 0x34b   : > { %5256 = vmatpush1.bf16.msra.mxu1 %v6738_v17  ;;  %5216 = vmatprep.subr.bf16.mxu0 %v6731_v19  ;;  %v6819_v57 = vcombine.high %v1979_v7, %v1983_v9  ;;  %v1843_v41 = vld [vmem:[%s7736_s1 + $0xa58] sm:$0xff]  ;;  %v6818_v13 = vcombine.low %v1979_v7, %v1983_v9  ;;  %v7145_v7 = vld [vmem:[%s7744_s27 + $0x98] sm:$0xff]   ;;  %v7146_v9 = vld [vmem:[%s7744_s27 + $0x50] sm:$0xff]  }
 0x34c   : > { %5257 = vmatprep.subr.bf16.mxu1 %v6859_v55  ;;  %v1847_v43 = vld [vmem:[%s7736_s1 + $0xa78] sm:$0xff] }
 0x34d   : > { %v1971_v44 = vld [vmem:[%s7736_s1 + $0xe58] sm:$0xff]  ;;  %v6683_v15 = vcombine.high %v1843_v41, %v1847_v43  ;;  %v6682_v35 = vcombine.low %v1843_v41, %v1847_v43 }
 0x34e   : > { %5217 = vmatpush2.bf16.msra.mxu0 %v6730_v20  ;;  %v1975_v11 = vld [vmem:[%s7736_s1 + $0xe78] sm:$0xff] }
 0x34f   : > { %5258 = vmatpush2.bf16.msra.mxu1 %v6858_v25  ;;  %5218 = vmatprep.subr.bf16.mxu0 %v6723_v26  ;;  %v6811_v59 = vcombine.high %v1971_v44, %v1975_v11  ;;  %v1835_v17 = vld [vmem:[%s7736_s1 + $0xa18] sm:$0xff]  ;;  %v6810_v23 = vcombine.low %v1971_v44, %v1975_v11  ;;  %v4950_v26 = vadd.f32 %v8497_v27, %v4909_v53  ;;  %v7129_v27 = vld [vmem:[%s7744_s27 + $0xb8] sm:$0xff]   ;;  %v7154_v11 = vld [vmem:[%s7744_s27 + $0x40] sm:$0xff]  }
 0x350   : > { %5259 = vmatprep.subr.bf16.mxu1 %v6851_v47  ;;  %v1839_v19 = vld [vmem:[%s7736_s1 + $0xa38] sm:$0xff] }
 0x351   : > { %v1963_v55 = vld [vmem:[%s7736_s1 + $0xe18] sm:$0xff]  ;;  %v6675_v20 = vcombine.high %v1835_v17, %v1839_v19  ;;  %v6674_v47 = vcombine.low %v1835_v17, %v1839_v19  ;;  %v5285_v30 = vmax.f32 %v4950_v26, 0.0  ;;  %v7158_v17 = vld [vmem:[%s7744_s27 + $0x178] sm:$0xff]   ;;  %v5284_v19 = vmax.f32 %v8494_v18, 0.0  ;;  %v7161_v18 = vld [vmem:[%s7744_s27 + $0x130] sm:$0xff]  }
 0x352   : > { %5219 = vmatpush2.bf16.msra.mxu0 %v6722_v28  ;;  %v1967_v24 = vld [vmem:[%s7736_s1 + $0xe38] sm:$0xff]  ;;  %v7130_v28 = vld [vmem:[%s7744_s27 + $0x70] sm:$0xff]  }
 0x353   : > { %5260 = vmatpush2.bf16.msra.mxu1 %v6850_v14  ;;  %5220 = vmatprep.subr.bf16.mxu0 %v6715_v32  ;;  %v6803_v25 = vcombine.high %v1963_v55, %v1967_v24  ;;  %v6802_v8 = vcombine.low %v1963_v55, %v1967_v24  ;;  %v5291_v14 = vpack.c.bf16 %v5283_v21, %v5283_v21  ;;  %v7137_v62 = vld [vmem:[%s7744_s27 + $0xa8] sm:$0xff]   ;;  %v7174_v55 = vld [vmem:[%s7744_s27 + $0x1f8] sm:$0xff]   ;;  %v7177_v26 = vld [vmem:[%s7744_s27 + $0x1b0] sm:$0xff]  }
 0x354   : > { %5261 = vmatprep.subr.bf16.mxu1 %v6843_v33  ;;  %v7131_v33 = vld [vmem:[%s7744_s27 + $0xf0] sm:$0xff]   ;;  %v5293_v56 = vpack.c.bf16 %v5285_v30, %v5285_v30  ;;  %v7151_v41 = vld [vmem:[%s7744_s27 + $0xc8] sm:$0xff]   ;;  %v7159_v24 = vld [vmem:[%s7744_s27 + $0x138] sm:$0xff]  }
 0x355   : > { %v7152_v43 = vld [vmem:[%s7744_s27 + $0x8] sm:$0xff]   ;;  %v7180_v21 = vld [vmem:[%s7744_s27 + $0x1e0] sm:$0xff]  }
 0x356   : > { %5221 = vmatpush2.bf16.msra.mxu0 %v6714_v60  ;;  %v7134_v60 = vld [vmem:[%s7744_s27 + $0x68] sm:$0xff]   ;;  %v7165_v30 = vld [vmem:[%s7744_s27 + $0x120] sm:$0xff]  }
 0x357   : > { %5262 = vmatpush2.bf16.msra.mxu1 %v6842_v40  ;;  %5222 = vmatprep.subr.bf16.mxu0 %v6707_v51  ;;  %v7135_v40 = vld [vmem:[%s7744_s27 + $0xe8] sm:$0xff]  }
 0x358   : > { %5263 = vmatprep.subr.bf16.mxu1 %v6835_v54  ;;  %v7136_v54 = vld [vmem:[%s7744_s27 + $0x28] sm:$0xff]  }
 0x359   : > { %v7153_v44 = vld [vmem:[%s7744_s27 + $0x88] sm:$0xff]  }
 0x35a   : > { %5223 = vmatpush2.bf16.msra.mxu0 %v6706_v1  ;;  %v7139_v1 = vld [vmem:[%s7744_s27 + $0xe0] sm:$0xff]  }
 0x35b   : > { %5264 = vmatpush2.bf16.msra.mxu1 %v6834_v2  ;;  %5224 = vmatprep.subr.bf16.mxu0 %v6699_v3  ;;  %v7140_v2 = vld [vmem:[%s7744_s27 + $0x20] sm:$0xff]  }
 0x35c   : > { %5265 = vmatprep.subr.bf16.mxu1 %v6827_v4  ;;  %v7141_v3 = vld [vmem:[%s7744_s27 + $0xa0] sm:$0xff]   ;;  %v7142_v4 = vld [vmem:[%s7744_s27 + $0x58] sm:$0xff]  }
 0x35e   : > { %5225 = vmatpush2.bf16.msra.mxu0 %v6698_v10  ;;  %v7147_v10 = vld [vmem:[%s7744_s27 + $0xd0] sm:$0xff]  }
 0x35f   : > { %5266 = vmatpush2.bf16.msra.mxu1 %v6826_v37  ;;  %5226 = vmatprep.subr.bf16.mxu0 %v6691_v38  ;;  %v7148_v37 = vld [vmem:[%s7744_s27 + $0x10] sm:$0xff]  }
 0x360   : > { %5267 = vmatprep.subr.bf16.mxu1 %v6819_v57  ;;  %v7149_v38 = vld [vmem:[%s7744_s27 + $0x90] sm:$0xff]   ;;  %v7150_v57 = vld [vmem:[%s7744_s27 + $0x48] sm:$0xff]  }
 0x362   : > { %5227 = vmatpush2.bf16.msra.mxu0 %v6690_v12  ;;  %v7155_v12 = vld [vmem:[%s7744_s27 + $0xc0] sm:$0xff]  }
 0x363   : > { %5268 = vmatpush2.bf16.msra.mxu1 %v6818_v13  ;;  %5228 = vmatprep.subr.bf16.mxu0 %v6683_v15  ;;  %v7156_v13 = vld [vmem:[%s7744_s27] sm:$0xff]   ;;  %v5282_v15 = vmax.f32 %v8340_v29, 0.0  ;;  %v7175_v29 = vld [vmem:[%s7744_s27 + $0x1b8] sm:$0xff]  }
 0x364   : > { %5269 = vmatprep.subr.bf16.mxu1 %v6811_v59  ;;  %v7157_v59 = vld [vmem:[%s7744_s27 + $0x80] sm:$0xff]  }
 0x365   : > { %v5290_v53 = vpack.c.bf16 %v5282_v15, %v5282_v15 }
 0x366   : > { %5229 = vmatpush2.bf16.msra.mxu0 %v6682_v35  ;;  %v7160_v35 = vld [vmem:[%s7744_s27 + $0x170] sm:$0xff]  }
 0x367   : > { %5270 = vmatpush2.bf16.msra.mxu1 %v6810_v23  ;;  %5230 = vmatprep.subr.bf16.mxu0 %v6675_v20  ;;  %v5292_v23 = vpack.c.bf16 %v5284_v19, %v5284_v19  ;;  %v7176_v20 = vld [vmem:[%s7744_s27 + $0x1f0] sm:$0xff]  }
 0x368   : > { %5271 = vmatprep.subr.bf16.mxu1 %v6803_v25  ;;  %v7162_v25 = vld [vmem:[%s7744_s27 + $0x168] sm:$0xff]  }
 0x36a   : > { %5231 = vmatpush2.bf16.msra.mxu0 %v6674_v47  ;;  %v7178_v47 = vld [vmem:[%s7744_s27 + $0x1e8] sm:$0xff]  }
 0x36b   : > { %5272 = vmatpush2.bf16.msra.mxu1 %v6802_v8  ;;  %6934 = vmatprep.subr.bf16.mxu0 %v7126_v39  ;;  %v7163_v8 = vld [vmem:[%s7744_s27 + $0x128] sm:$0xff]   ;;  %v7164_v39 = vld [vmem:[%s7744_s27 + $0x160] sm:$0xff]  }
 0x36c   : > { %6956 = vmatprep.subr.bf16.mxu1 %v7127_v16  ;;  %v7179_v16 = vld [vmem:[%s7744_s27 + $0x1a8] sm:$0xff]  }
 0x36d   : > { %v8560_v32 = vpop.f32.mrf.mxu0  ;;  %5233 = vmatmul.mubr.bf16.vlgmr.msra.gmra.mxu0 %v8108_v46 }
 0x36e   : > { %v8564_v42 = vpop.f32.mrf.mxu1  ;;  %5274 = vmatmul.mubr.bf16.vlgmr.msra.gmra.mxu1 %v8102_v34  ;;  %6935 = vmatpush3.bf16.msra.mxu0 %v7128_v31  ;;  %v7166_v31 = vld [vmem:[%s7744_s27 + $0x158] sm:$0xff]  }
 0x36f   : > { %5849 = vmatprep.mubr.bf16.mxu0 %v5291_v14  ;;  %6957 = vmatpush3.bf16.msra.mxu1 %v7129_v27  ;;  %v8568_v49 = vpop.f32.mrf.mxu0  ;;  %v7181_v27 = vld [vmem:[%s7744_s27 + $0x1a0] sm:$0xff]   ;;  %v7167_v14 = vld [vmem:[%s7744_s27 + $0x118] sm:$0xff]  }
 0x370   : > { %5889 = vmatprep.mubr.bf16.mxu1 %v5293_v56  ;;  %v8572_v46 = vpop.f32.mrf.mxu1  ;;  %6936 = vmatprep.subr.bf16.mxu0 %v7130_v28  ;;  %v7182_v28 = vld [vmem:[%s7744_s27 + $0x1d8] sm:$0xff]  }
 0x371   : > { %v4992_v51 = vpop.f32.mrf.mxu0  ;;  %6958 = vmatprep.subr.bf16.mxu1 %v7131_v33  ;;  %v7168_v33 = vld [vmem:[%s7744_s27 + $0x150] sm:$0xff]   ;;  %v7183_v56 = vld [vmem:[%s7744_s27 + $0x198] sm:$0xff]  }
 0x372   : > { %v5033_v34 = vpop.f32.mrf.mxu1  ;;  %6937 = vmatpush3.bf16.msra.mxu0 %v7132_v36  ;;  %v7169_v36 = vld [vmem:[%s7744_s27 + $0x110] sm:$0xff]  }
 0x373   : > { %6959 = vmatpush3.bf16.msra.mxu1 %v7133_v50  ;;  %v4993_v58 = vpop.f32.mrf.mxu0  ;;  %6938 = vmatprep.subr.bf16.mxu0 %v7134_v60  ;;  %v7170_v50 = vld [vmem:[%s7744_s27 + $0x148] sm:$0xff]   ;;  %v7190_v51 = vld [vmem:[%s441_s14] sm:$0xff] }
 0x374   : > { %v5034_v0 = vpop.f32.mrf.mxu1  ;;  %6960 = vmatprep.subr.bf16.mxu1 %v7135_v40  ;;  %v7171_v60 = vld [vmem:[%s7744_s27 + $0x108] sm:$0xff]   ;;  %v7172_v40 = vld [vmem:[%s7744_s27 + $0x140] sm:$0xff]   ;;  %v2045_v34 = vrot.slane %v7190_v51, %v663_v45 }
 0x375   : > { %v7173_v58 = vld [vmem:[%s7744_s27 + $0x100] sm:$0xff]  }
 0x376   : > { %6939 = vmatpush3.bf16.msra.mxu0 %v7136_v54  ;;  %v2049_v54 = vrot.slane %v7190_v51, %v667_v52 }
 0x377   : > { %6961 = vmatpush3.bf16.msra.mxu1 %v7137_v62  ;;  %6940 = vmatprep.subr.bf16.mxu0 %v7138_v63  ;;  %v4989_v62 = vadd.f32 %v8560_v32, %v2045_v34 }
 0x378   : > { %6962 = vmatprep.subr.bf16.mxu1 %v7139_v1  ;;  %v4991_v63 = vadd.f32 %v8568_v49, %v2049_v54 }
 0x379   : > { %v5030_v0 = vadd.f32 %v8564_v42, %v4989_v62 }
 0x37a   : > { %6941 = vmatpush3.bf16.msra.mxu0 %v7140_v2  ;;  %v7184_v2 = vld [vmem:[%s7744_s27 + $0x1d0] sm:$0xff]  }
 0x37b   : > { %6963 = vmatpush3.bf16.msra.mxu1 %v7141_v3  ;;  %6942 = vmatprep.subr.bf16.mxu0 %v7142_v4  ;;  %v5032_v3 = vadd.f32 %v8572_v46, %v4991_v63 }
 0x37c   : > { %6964 = vmatprep.subr.bf16.mxu1 %v7143_v5  ;;  %v7185_v5 = vld [vmem:[%s7744_s27 + $0x190] sm:$0xff]  }
 0x37e   : > { %6943 = vmatpush3.bf16.msra.mxu0 %v7144_v6 }
 0x37f   : > { %6965 = vmatpush3.bf16.msra.mxu1 %v7145_v7  ;;  %6944 = vmatprep.subr.bf16.mxu0 %v7146_v9  ;;  %v7186_v9 = vld [vmem:[%s7744_s27 + $0x1c8] sm:$0xff]  }
 0x380   : > { %6966 = vmatprep.subr.bf16.mxu1 %v7147_v10 }
 0x382   : > { %6945 = vmatpush3.bf16.msra.mxu0 %v7148_v37  ;;  %v7187_v37 = vld [vmem:[%s7744_s27 + $0x188] sm:$0xff]  }
 0x383   : > { %6967 = vmatpush3.bf16.msra.mxu1 %v7149_v38  ;;  %6946 = vmatprep.subr.bf16.mxu0 %v7150_v57 }
 0x384   : > { %6968 = vmatprep.subr.bf16.mxu1 %v7151_v41 }
 0x386   : > { %6947 = vmatpush3.bf16.msra.mxu0 %v7152_v43  ;;  %v7188_v43 = vld [vmem:[%s7744_s27 + $0x1c0] sm:$0xff]  }
 0x387   : > { %6969 = vmatpush3.bf16.msra.mxu1 %v7153_v44  ;;  %6948 = vmatprep.subr.bf16.mxu0 %v7154_v11  ;;  %v7189_v11 = vld [vmem:[%s7744_s27 + $0x180] sm:$0xff]  }
 0x388   : > { %6970 = vmatprep.subr.bf16.mxu1 %v7155_v12 }
 0x38a   : > { %6949 = vmatpush3.bf16.msra.mxu0 %v7156_v13 }
 0x38b   : > { %6971 = vmatpush3.bf16.msra.mxu1 %v7157_v59  ;;  %6978 = vmatprep.subr.bf16.mxu0 %v7158_v17 }
 0x38c   : > { %7000 = vmatprep.subr.bf16.mxu1 %v7174_v55 }
 0x38d   : > { %5850 = vmatmul.mubr.bf16.vlgmr.msra.gmra.mxu0 %v5290_v53 }
 0x38e   : > { %5890 = vmatmul.mubr.bf16.vlgmr.msra.gmra.mxu1 %v5292_v23  ;;  %6979 = vmatpush3.bf16.msra.mxu0 %v7159_v24 }
 0x38f   : > { %6980 = vmatprep.subr.bf16.mxu0 %v7160_v35  ;;  %7001 = vmatpush3.bf16.msra.mxu1 %v7175_v29  ;;  %v2053_v35 = vrot.slane %v7190_v51, %v671_v48  ;;  %v2057_v29 = vrot.slane %v7190_v51, %v675_v61 }
 0x390   : > { %7002 = vmatprep.subr.bf16.mxu1 %v7176_v20 }
 0x392   : > { %6981 = vmatpush3.bf16.msra.mxu0 %v7161_v18 }
 0x393   : > { %6982 = vmatprep.subr.bf16.mxu0 %v7162_v25  ;;  %7003 = vmatpush3.bf16.msra.mxu1 %v7177_v26 }
 0x394   : > { %7004 = vmatprep.subr.bf16.mxu1 %v7178_v47 }
 0x396   : > { %6983 = vmatpush3.bf16.msra.mxu0 %v7163_v8 }
 0x397   : > { %6984 = vmatprep.subr.bf16.mxu0 %v7164_v39  ;;  %7005 = vmatpush3.bf16.msra.mxu1 %v7179_v16 }
 0x398   : > { %7006 = vmatprep.subr.bf16.mxu1 %v7180_v21 }
 0x39a   : > { %6985 = vmatpush3.bf16.msra.mxu0 %v7165_v30 }
 0x39b   : > { %6986 = vmatprep.subr.bf16.mxu0 %v7166_v31  ;;  %7007 = vmatpush3.bf16.msra.mxu1 %v7181_v27 }
 0x39c   : > { %7008 = vmatprep.subr.bf16.mxu1 %v7182_v28 }
 0x39e   : > { %6987 = vmatpush3.bf16.msra.mxu0 %v7167_v14 }
 0x39f   : > { %6988 = vmatprep.subr.bf16.mxu0 %v7168_v33  ;;  %7009 = vmatpush3.bf16.msra.mxu1 %v7183_v56 }
 0x3a0   : > { %7010 = vmatprep.subr.bf16.mxu1 %v7184_v2 }
 0x3a2   : > { %6989 = vmatpush3.bf16.msra.mxu0 %v7169_v36 }
 0x3a3   : > { %6990 = vmatprep.subr.bf16.mxu0 %v7170_v50  ;;  %7011 = vmatpush3.bf16.msra.mxu1 %v7185_v5 }
 0x3a4   : > { %7012 = vmatprep.subr.bf16.mxu1 %v7186_v9 }
 0x3a6   : > { %6991 = vmatpush3.bf16.msra.mxu0 %v7171_v60  ;;  %v6860_v60 = vld [vmem:[%s458_s15] ss:$0 sm:$0xff] }
 0x3a7   : > { %6992 = vmatprep.subr.bf16.mxu0 %v7172_v40  ;;  %7013 = vmatpush3.bf16.msra.mxu1 %v7187_v37 }
 0x3a8   : > { %7014 = vmatprep.subr.bf16.mxu1 %v7188_v43 }
 0x3aa   : > { %6993 = vmatpush3.bf16.msra.mxu0 %v7173_v58 }
 0x3ab   : > { %7015 = vmatpush3.bf16.msra.mxu1 %v7189_v11 }
 0x3ad   : > { %v5070_v1 = vpop.f32.mrf.mxu0 }
 0x3ae   : > { %v5071_v45 = vadd.f32 %v5070_v1, %v5030_v0  ;;  %v5111_v4 = vpop.f32.mrf.mxu1 }
 0x3af   : > { %v5072_v52 = vpop.f32.mrf.mxu0 }
 0x3b0   : > { %v5112_v6 = vadd.f32 %v5111_v4, %v5071_v45  ;;  %v5073_v7 = vadd.f32 %v5072_v52, %v5032_v3  ;;  %v5113_v32 = vpop.f32.mrf.mxu1 }
 0x3b1   : > { %v5074_v49 = vpop.f32.mrf.mxu0 }
 0x3b2   : > { %v5114_v10 = vadd.f32 %v5113_v32, %v5073_v7  ;;  %v5115_v42 = vpop.f32.mrf.mxu1  ;;  %v5286_v38 = vmax.f32 %v5112_v6, 0.0 }
 0x3b3   : > { %v5075_v57 = vpop.f32.mrf.mxu0 }
 0x3b4   : > { %v5287_v46 = vmax.f32 %v5114_v10, 0.0  ;;  %v5116_v41 = vpop.f32.mrf.mxu1  ;;  %v5294_v12 = vpack.c.bf16 %v5286_v38, %v5286_v38 }
 0x3b6   : > { %v5295_v44 = vpack.c.bf16 %v5287_v46, %v5287_v46 }
 0x3b8   : > { %5929 = vmatprep.mubr.bf16.mxu0 %v5295_v44 }
 0x3b9   : > { %5930 = vmatmul.mubr.bf16.vlgmr.msra.gmra.mxu0 %v5294_v12 }
 0x3ed   : > { %v5152_v13 = vpop.f32.mrf.mxu0 }
 0x3ee   : > { %v5193_v15 = vpop.f32.mrf.mxu1  ;;  %v5153_v23 = vadd.f32 %v5152_v13, %v2053_v35 }
 0x3ef   : > { %v5154_v59 = vpop.f32.mrf.mxu0 }
 0x3f0   : > { %v5195_v17 = vpop.f32.mrf.mxu1  ;;  %v5155_v20 = vadd.f32 %v5154_v59, %v2057_v29  ;;  %v5194_v18 = vadd.f32 %v5193_v15, %v5153_v23 }
 0x3f1   : > { %v5156_v19 = vpop.f32.mrf.mxu0 }
 0x3f2   : > { %v5197_v55 = vpop.f32.mrf.mxu1  ;;  %v5196_v26 = vadd.f32 %v5195_v17, %v5155_v20 }
 0x3f3   : > { %v5157_v24 = vpop.f32.mrf.mxu0 }
 0x3f4   : > { %v5198_v53 = vpop.f32.mrf.mxu1 }
 0x42d   : > { %v5234_v25 = vpop.f32.mrf.mxu0 }
 0x42e   : > { %v5235_v47 = vadd.f32 %v5234_v25, %v5194_v18  ;;  %v5275_v8 = vpop.f32.mrf.mxu1 }
 0x42f   : > { %v5236_v39 = vpop.f32.mrf.mxu0 }
 0x430   : > { %v5276_v16 = vadd.f32 %v5275_v8, %v5235_v47  ;;  %v5237_v21 = vadd.f32 %v5236_v39, %v5196_v26  ;;  %v5277_v30 = vpop.f32.mrf.mxu1 }
 0x431   : > { %v5238_v31 = vpop.f32.mrf.mxu0 }
 0x432   : > { %v5278_v27 = vadd.f32 %v5277_v30, %v5237_v21  ;;  %v5279_v28 = vpop.f32.mrf.mxu1  ;;  %v5288_v14 = vmax.f32 %v5276_v16, 0.0 }
 0x433   : > { %v5239_v48 = vpop.f32.mrf.mxu0 }
 0x434   : > { %v5289_v33 = vmax.f32 %v5278_v27, 0.0  ;;  %v5280_v22 = vpop.f32.mrf.mxu1  ;;  %v5296_v56 = vpack.c.bf16 %v5288_v14, %v5288_v14 }
 0x436   : > { %v5297_v61 = vpack.c.bf16 %v5289_v33, %v5289_v33 }
 0x438   : > { %5969 = vmatprep.mubr.bf16.mxu1 %v5297_v61 }
 0x439   : > { %5970 = vmatmul.mubr.bf16.vlgmr.msra.gmra.mxu1 %v5296_v56 }
 0x44d   : > { %v6950_v36 = vpop.f32.mrf.mxu0 }
 0x44e   : > { %v6972_v50 = vpop.f32.mrf.mxu1 }
 0x44f   : > { %v6951_v40 = vpop.f32.mrf.mxu0 }
 0x450   : > { %v6952_v51 = vadd.f32 %v6951_v40, %v6950_v36  ;;  %v6973_v34 = vpop.f32.mrf.mxu1 }
 0x451   : > { %v6974_v54 = vadd.f32 %v6973_v34, %v6972_v50  ;;  %v6953_v58 = vpop.f32.mrf.mxu0 }
 0x452   : > { %v5852_v62 = vadd.f32 %v6952_v51, %v6860_v60  ;;  %v6975_v63 = vpop.f32.mrf.mxu1 }
 0x453   : > { %v6954_v0 = vpop.f32.mrf.mxu0 }
 0x454   : > { %v5892_v1 = vadd.f32 %v6974_v54, %v5852_v62  ;;  %v6976_v2 = vpop.f32.mrf.mxu1 }
 0x479   : > { %v6994_v3 = vpop.f32.mrf.mxu0 }
 0x47b   : > { %v6995_v45 = vpop.f32.mrf.mxu0 }
 0x47c   : > { %v6996_v4 = vadd.f32 %v6995_v45, %v6994_v3 }
 0x47d   : > { %v6997_v5 = vpop.f32.mrf.mxu0 }
 0x47e   : > { %v5932_v52 = vadd.f32 %v6996_v4, %v5892_v1 }
 0x47f   : > { %v6998_v6 = vpop.f32.mrf.mxu0 }
 0x4f9   : > { %v7016_v7 = vpop.f32.mrf.mxu1 }
 0x4fb   : > { %v7017_v32 = vpop.f32.mrf.mxu1 }
 0x4fc   : > { %v7018_v49 = vadd.f32 %v7017_v32, %v7016_v7 }
 0x4fd   : > { %v7019_v9 = vpop.f32.mrf.mxu1 }
 0x4fe   : > { %v5972_v10 = vadd.f32 %v7018_v49, %v5932_v52 }
 0x4ff   : > { %v7020_v42 = vpop.f32.mrf.mxu1 }
 0x500   : > { %5977 = vst [vmem:[%s512_s30] sm:$0xff] %v5972_v10 }
 0x501   : > { %7398 = shalt.err (!%p7395_p5)
}
 0x502   : > { %s7399_s7 = scalar_lea.hbm %s8651_s18, 128  ;;  %s7403_s12 = scalar_lea.hbm %s8739_s2, 256 }
 0x503   : > { %p7400_p2 = scmp.ne.s32.totalorder %s8651_s18, %s7399_s7  ;;  %p7404_p8 = scmp.lt.s32.totalorder %s8651_s18, %s8739_s2 }
 0x504   : > { %p7405_p9 = scmp.lt.s32.totalorder %s7403_s12, %s7399_s7 }
 0x505   : > { %p7401_p4 = pnand %p7400_p2, %p8740_p3 }
 0x506   : > { %p7406_p7 = por %p7405_p9, %p7404_p8 }
 0x507   : > { %p7402_p1 = pneg %p7401_p4 }
 0x509   : > { %p7407_p13 = pnand %p7406_p7, %p7402_p1 }
 0x50b   : > { %7410 = shalt.err (!%p7407_p13)
}
 0x50c   : > { %7038 = dma.vmem_to_hbm [thread:$0]  (%p8740_p3), %s5994_s9, 128, %s8651_s18, %s5979_s22  }
 0x50d PF: > { %s6005_s27 = sand.u32 1, %s7457_s24   ;;  %p8741_p0 = scmp.ne.s32.totalorder %s8724_s20, 0 }
 0x50e   : > { %p8742_p6 = scmp.ge.s32.totalorder %s7477_s29, 2  ;;  %s6006_s15 = scalar_lea.sflag [#allocation4], %s6005_s27 }
 0x510   : > { %p7064_p10 = pnand %p8742_p6, %p8741_p0 }
 0x512   : > { %p7065_p12 = pneg %p7064_p10 }
 0x514   : > { %7452 = dma.done.wait (%p7065_p12), %s6006_s15, 128  }
 0x515   : > { %7454 = vsyncadd (%p7065_p12), %s6006_s15, 4294967168  ;;  %s30_s29 = sadd.s32 1, %s7477_s29   ;;  %s8743_s23 = sld [smem:[#allocation22_spill]] }
 0x516   : > { %p27_p11 = scmp.ge.s32.totalorder %s30_s29, 4   ;;  %s8744_s17 = sld [smem:[#allocation21_spill]] }
 0x517   : > { %s8745_s24 = smov %s7461_s25  ;;  %s8746_s25 = smov %s7465_s26 }
 0x518   : > { %s8748_s27 = smov %s7473_s28  ;;  %29 = sbr.rel (!%p27_p11) target bundleno = 17 (0x11), region = 158 }
 0x51b   : > { %s8747_s26 = smov %s8743_s23 }
 0x51c   : > { %s8749_s28 = smov %s8744_s17 }
 0x51d   :  { %6011 = vsyncpa [#allocation3], 1 }
 0x51e   :  { %6013 = vsyncpa [#allocation3 + $0x1], 1 }
 0x51f   :  { %6014 = vsyncpa [#allocation6], 1 }
 0x520   :  { %6016 = vsyncpa [#allocation6 + $0x1], 1 }
 0x521   :  { %6017 = vsyncpa [#allocation9], 1 }
 0x522   :  { %6019 = vsyncpa [#allocation9 + $0x1], 1 }
 0x523   :  { %6020 = vsyncpa [#allocation12], 1 }
 0x524   :  { %6022 = vsyncpa [#allocation12 + $0x1], 1 }
 0x525   :  { %6023 = vsyncpa [#allocation4], 1 }
 0x526   :  { %6025 = vsyncpa [#allocation4 + $0x1], 1 }

</bundles_post_ra>
